<compile_context>
chip_gen: v7x
topology: tpu7x:2x2x1
jax: 0.10.0
libtpu: 0.0.40
codegen_flags: <defaults>
</compile_context>

<pallas_src>
import math
from functools import partial

import numpy as np

import jax
import jax.numpy as jnp
from jax import lax
from jax.experimental import pallas as pl
from jax.experimental.pallas import tpu as pltpu


# (out_channels, kernel, stride) — matches DQNBase CNN feature stack.
CONV_DEFS = ((32, 8, 4), (64, 4, 2), (64, 3, 1), (1024, 3, 1))

_LANE = 128
_HEAD_HIDDEN = 512


def _round_up(x, m):
    return (x + m - 1) // m * m


def _nbytes(*arrays):
    return sum(int(a.size) * a.dtype.itemsize for a in arrays)


def _vmem_limit(op_bytes):
    # double-buffer everything + generous headroom; stays well under v7x 64 MiB.
    return int(min(max(2 * op_bytes + (4 << 20), 8 << 20), 32 << 20))


# -----------------------------------------------------------------------------
# Pallas kernel 1: GEMM + bias (+ ReLU).  bf16 x bf16 -> f32 accumulate.
# Used for the first three conv layers (as im2col GEMMs).
# -----------------------------------------------------------------------------
def _gemm_bias_kernel(x_ref, w_ref, b_ref, o_ref, *, relu):
    acc = jnp.dot(x_ref[...], w_ref[...], preferred_element_type=jnp.float32)
    y = acc + b_ref[...]                      # bias + activation in f32
    if relu:
        y = jnp.maximum(y, 0.0)
    o_ref[...] = y.astype(o_ref.dtype)


def pallas_linear(x, w, b, *, relu=False, out_dtype=jnp.float32, tm=512):
    """y = act(x @ w + b).  x:(M,K) bf16, w:(K,N) bf16, b:(1,N) f32, N % 128 == 0."""
    M, K = x.shape
    Kw, N = w.shape
    assert K == Kw and N % _LANE == 0 and b.shape == (1, N)

    if M <= tm:
        TM, Mp = M, M                         # single block == full array
    else:
        TM = tm                               # multiple of 8 -> >=2 M-programs
        Mp = _round_up(M, TM)
        if Mp != M:
            x = jnp.pad(x, ((0, Mp - M), (0, 0)))

    out_itemsize = jnp.dtype(out_dtype).itemsize
    tile_bytes = (TM * K * x.dtype.itemsize + K * N * w.dtype.itemsize
                  + N * 4 + TM * N * out_itemsize)
    cost = pl.CostEstimate(
        flops=2 * Mp * K * N,
        transcendentals=0,
        bytes_accessed=int(Mp * K * x.dtype.itemsize + K * N * w.dtype.itemsize
                           + N * 4 + Mp * N * out_itemsize))

    out = pl.pallas_call(
        partial(_gemm_bias_kernel, relu=relu),
        out_shape=jax.ShapeDtypeStruct((Mp, N), out_dtype),
        grid=(Mp // TM,),
        in_specs=[
            pl.BlockSpec((TM, K), lambda i: (i, 0)),
            pl.BlockSpec((K, N), lambda i: (0, 0)),   # weight stays resident
            pl.BlockSpec((1, N), lambda i: (0, 0)),
        ],
        out_specs=pl.BlockSpec((TM, N), lambda i: (i, 0)),
        compiler_params=pltpu.CompilerParams(
            dimension_semantics=("parallel",),        # shards M across v7x TCs
            vmem_limit_bytes=_vmem_limit(tile_bytes)),
        cost_estimate=cost,
    )(x, w, b)
    return out[:M] if Mp != M else out


# -----------------------------------------------------------------------------
# Pallas kernel 2: fused conv4 + head1 + head2 + dueling combine + softmax.
# All intermediates stay in VMEM/vregs; output is lane-dense (B, A*128) f32.
# -----------------------------------------------------------------------------
def _fused_head_kernel(p4_ref, w4_ref, b4_ref, w1_ref, b1_ref,
                       w2a_ref, b2a_ref, w2v_ref, b2v_ref, o_ref, *,
                       num_actions, num_atoms, blk, hid):
    # conv4 (final spatial is 1x1 -> plain GEMM) + bias + ReLU
    feat = jnp.dot(p4_ref[...], w4_ref[...], preferred_element_type=jnp.float32)
    feat = jnp.maximum(feat + b4_ref[...], 0.0).astype(jnp.bfloat16)

    # head hidden layer: fused [adv1 | val1] GEMM + bias + ReLU
    h1 = jnp.dot(feat, w1_ref[...], preferred_element_type=jnp.float32)
    h1 = jnp.maximum(h1 + b1_ref[...], 0.0).astype(jnp.bfloat16)

    # head output layers: advantage (per-action 128-lane atom blocks) + value.
    # h1 split at lane-aligned column `hid` (512) -> no relayout.
    adv = jnp.dot(h1[:, :hid], w2a_ref[...],
                  preferred_element_type=jnp.float32) + b2a_ref[...]
    val = jnp.dot(h1[:, hid:], w2v_ref[...],
                  preferred_element_type=jnp.float32) + b2v_ref[...]

    # dueling combine + per-(batch, action) softmax over atoms.
    valid = lax.broadcasted_iota(jnp.int32, (1, blk), 1) < num_atoms
    mean_adv = adv[:, 0:blk]
    for a in range(1, num_actions):
        mean_adv = mean_adv + adv[:, a * blk:(a + 1) * blk]
    mean_adv = mean_adv * (1.0 / num_actions)

    for a in range(num_actions):
        logits = val + adv[:, a * blk:(a + 1) * blk] - mean_adv
        logits = jnp.where(valid, logits, -jnp.inf)   # padded atom lanes -> prob 0
        m = jnp.max(logits, axis=-1, keepdims=True)
        e = jnp.exp(logits - m)
        inv = pl.reciprocal(jnp.sum(e, axis=-1, keepdims=True), approx=False)
        o_ref[:, a * blk:(a + 1) * blk] = (e * inv).astype(o_ref.dtype)


def pallas_fused_head(p4, pp, num_actions, num_atoms):
    B, K4 = p4.shape
    w4, b4, w1, b1 = pp["w4"], pp["b4"], pp["w1"], pp["b1"]
    w2a, b2a, w2v, b2v = pp["w2a"], pp["b2a"], pp["w2v"], pp["b2v"]
    hid = w2a.shape[0]
    blk = w2v.shape[1]
    assert w4.shape[0] == K4 and w1.shape[0] == w4.shape[1]
    assert w1.shape[1] == 2 * hid and w2a.shape[1] == num_actions * blk
    assert num_atoms <= blk and blk % _LANE == 0 and hid % _LANE == 0

    op_bytes = _nbytes(p4, w4, b4, w1, b1, w2a, b2a, w2v, b2v) \
        + B * num_actions * blk * 4
    cost = pl.CostEstimate(
        flops=2 * B * (K4 * w4.shape[1] + w4.shape[1] * w1.shape[1]
                       + hid * num_actions * blk + hid * blk),
        transcendentals=B * num_actions * blk,
        bytes_accessed=int(op_bytes))

    out = pl.pallas_call(
        partial(_fused_head_kernel, num_actions=num_actions,
                num_atoms=num_atoms, blk=blk, hid=hid),
        out_shape=jax.ShapeDtypeStruct((B, num_actions * blk), jnp.float32),
        in_specs=[pl.BlockSpec(memory_space=pltpu.MemorySpace.VMEM)] * 9,
        out_specs=pl.BlockSpec(memory_space=pltpu.MemorySpace.VMEM),
        compiler_params=pltpu.CompilerParams(
            vmem_limit_bytes=_vmem_limit(op_bytes)),
        cost_estimate=cost,
    )(p4, w4, b4, w1, b1, w2a, b2a, w2v, b2v)
    # lane-dense in-kernel stores; slice the real atoms in the wrapper.
    return out.reshape(B, num_actions, blk)[:, :, :num_atoms]


# -----------------------------------------------------------------------------
# im2col (plain-XLA glue), NHWC with channels innermost (lane-contiguous).
# TODO(synk): fold im2col into the conv kernel via a (kh*kw) "arbitrary" grid
# axis + f32 VMEM accumulator to avoid materializing the patch matrix in HBM.
# -----------------------------------------------------------------------------
def _im2col_nhwc(x, kh, kw, stride):
    """x: (B,H,W,C) -> (B*Ho*Wo, kh*kw*C) patches (ordering kh, kw, C)."""
    B, H, W, C = x.shape
    Ho = (H - kh) // stride + 1
    Wo = (W - kw) // stride + 1
    taps = []
    for dy in range(kh):
        for dx in range(kw):
            taps.append(lax.slice(
                x, (0, dy, dx, 0),
                (B, dy + (Ho - 1) * stride + 1, dx + (Wo - 1) * stride + 1, C),
                (1, stride, stride, 1)))          # (B, Ho, Wo, C)
    p = jnp.concatenate(taps, axis=-1)            # (B, Ho, Wo, kh*kw*C)
    return p.reshape(B * Ho * Wo, kh * kw * C), Ho, Wo


# -----------------------------------------------------------------------------
# Parameters (PyTorch-layout init) + packing for the Pallas forward.
# -----------------------------------------------------------------------------
def _feature_size(in_shape):
    c, h, w = in_shape
    for (cout, k, s) in CONV_DEFS:
        h = (h - k) // s + 1
        w = (w - k) // s + 1
        c = cout
    return c * h * w


def init_params(key, in_shape, num_actions, num_atoms):
    """PyTorch-layout parameters (conv OIHW, linear (in,out)), f32."""
    keys = jax.random.split(key, len(CONV_DEFS) + 4)
    ki = 0
    convs = []
    cin = in_shape[0]
    for (cout, k, s) in CONV_DEFS:
        fan_in = cin * k * k
        w = jax.random.normal(keys[ki], (cout, cin, k, k), jnp.float32) * math.sqrt(2.0 / fan_in)
        ki += 1
        convs.append((w, jnp.zeros((cout,), jnp.float32), s))
        cin = cout
    feat = _feature_size(in_shape)

    def lin(k_, nin, nout):
        w = jax.random.normal(k_, (nin, nout), jnp.float32) * math.sqrt(2.0 / nin)
        return (w, jnp.zeros((nout,), jnp.float32))

    params = {"convs": convs}
    params["adv1"] = lin(keys[ki], feat, _HEAD_HIDDEN); ki += 1
    params["adv2"] = lin(keys[ki], _HEAD_HIDDEN, num_actions * num_atoms); ki += 1
    params["val1"] = lin(keys[ki], feat, _HEAD_HIDDEN); ki += 1
    params["val2"] = lin(keys[ki], _HEAD_HIDDEN, num_atoms); ki += 1
    return params


def prepare_params(params, num_actions, num_atoms):
    """Pack for the Pallas forward.

    Conv weights become (k*k*real_Cin, Cout_pad128) bf16 GEMM weights: there is
    NO input-channel padding (the wrapper slices activations back to the real
    channel count before each im2col), and output channels are zero-padded to a
    multiple of 128 only so every GEMM writes lane-dense N.  Those padded
    output lanes are sliced away before they are ever read, so the padding is
    numerically exact by construction (zero weights + zero bias).
    """
    conv_packed = []
    for (w, b, _s) in params["convs"]:
        O, C, kh, kw = w.shape
        cout_pad = _round_up(O, _LANE)
        wt = jnp.transpose(w, (2, 3, 1, 0))                 # (kh, kw, Cin, O)
        wt = jnp.pad(wt, ((0, 0), (0, 0), (0, 0), (0, cout_pad - O)))
        wt = wt.reshape(kh * kw * C, cout_pad).astype(jnp.bfloat16)
        bt = jnp.pad(b, (0, cout_pad - O)).reshape(1, cout_pad).astype(jnp.float32)
        conv_packed.append((wt, bt))

    # conv4 feeds the fused head kernel; convs 1..3 stay standalone GEMMs.
    *convs123, (w4, b4) = conv_packed

    # head hidden: advantage/value hidden layers fused into one (1024, 1024) GEMM.
    a1w, a1b = params["adv1"]; v1w, v1b = params["val1"]
    hid = a1w.shape[1]
    assert hid % _LANE == 0
    w1 = jnp.concatenate([a1w, v1w], axis=1).astype(jnp.bfloat16)
    b1 = jnp.concatenate([a1b, v1b]).reshape(1, -1).astype(jnp.float32)

    # head out: SEPARATE adv / value GEMM weights (no block-diagonal zeros).
    # Each action's atoms (and the value atoms) occupy their own 128-lane block
    # so the in-kernel dueling/softmax epilogue slices are lane-aligned.
    a2w, a2b = params["adv2"]; v2w, v2b = params["val2"]
    blk = _round_up(num_atoms, _LANE)
    assert num_atoms <= blk and blk % _LANE == 0
    w2a = jnp.zeros((hid, num_actions * blk), jnp.float32)
    b2a = jnp.zeros((num_actions * blk,), jnp.float32)
    for a in range(num_actions):
        w2a = w2a.at[:, a * blk: a * blk + num_atoms].set(
            a2w[:, a * num_atoms:(a + 1) * num_atoms])
        b2a = b2a.at[a * blk: a * blk + num_atoms].set(
            a2b[a * num_atoms:(a + 1) * num_atoms])
    w2v = jnp.zeros((hid, blk), jnp.float32).at[:, :num_atoms].set(v2w)
    b2v = jnp.zeros((blk,), jnp.float32).at[:num_atoms].set(v2b)

    return {"convs": convs123, "w4": w4, "b4": b4,
            "w1": w1, "b1": b1,
            "w2a": w2a.astype(jnp.bfloat16), "b2a": b2a.reshape(1, -1),
            "w2v": w2v.astype(jnp.bfloat16), "b2v": b2v.reshape(1, -1)}


# -----------------------------------------------------------------------------
# Forward
# -----------------------------------------------------------------------------
@partial(jax.jit, static_argnames=("num_actions", "num_atoms"))
def categorical_dueling_dqn_forward(x, pp, *, num_actions, num_atoms):
    """x: (B, C, H, W) f32 (PyTorch NCHW).  Returns (B, num_actions, num_atoms)."""
    B = x.shape[0]
    h = jnp.transpose(x, (0, 2, 3, 1)).astype(jnp.bfloat16)     # NHWC, bf16 once
    for (wt, bt), (cout, k, s) in zip(pp["convs"], CONV_DEFS[:3]):
        patches, Ho, Wo = _im2col_nhwc(h, k, k, s)               # K = k*k*real_Cin
        y = pallas_linear(patches, wt, bt, relu=True, out_dtype=jnp.bfloat16)
        # drop lane-padding channels before the next im2col (real channels only)
        h = y.reshape(B, Ho, Wo, wt.shape[1])[..., :cout]
    # conv4 im2col; final spatial must be 1x1 so the flatten matches torch's
    # NCHW .view(B, -1) and the feature dim (1024) carries no padding.
    k4, s4 = CONV_DEFS[3][1], CONV_DEFS[3][2]
    patches4, Ho, Wo = _im2col_nhwc(h, k4, k4, s4)
    assert Ho == 1 and Wo == 1
    # conv4 + head1 + head2 + dueling combine + softmax in ONE pallas_call.
    return pallas_fused_head(patches4, pp, num_actions, num_atoms)


# -----------------------------------------------------------------------------
# Pure-JAX reference with the same bf16-compute / f32-accumulate recipe.
# -----------------------------------------------------------------------------
def ref_forward(x, params, num_actions, num_atoms, compute_dtype=jnp.bfloat16):
    cd = compute_dtype
    h = x.astype(cd)
    for (w, b, s) in params["convs"]:
        h = lax.conv_general_dilated(h, w.astype(cd), (s, s), "VALID",
                                     dimension_numbers=("NCHW", "OIHW", "NCHW"),
                                     preferred_element_type=jnp.float32)
        h = jnp.maximum(h + b[None, :, None, None], 0.0).astype(cd)
    B = h.shape[0]
    feat = h.reshape(B, -1)

    def lin(v, w, b, relu):
        y = jnp.dot(v.astype(cd), w.astype(cd),
                    preferred_element_type=jnp.float32) + b
        return jnp.maximum(y, 0.0) if relu else y

    a = lin(lin(feat, *params["adv1"], True).astype(cd), *params["adv2"], False)
    v = lin(lin(feat, *params["val1"], True).astype(cd), *params["val2"], False)
    adv = a.reshape(B, num_actions, num_atoms)
    val = v.reshape(B, 1, num_atoms)
    logits = val + adv - adv.mean(axis=1, keepdims=True)
    return jax.nn.softmax(logits, axis=-1)


# -----------------------------------------------------------------------------
if __name__ == "__main__":
    # Smallest spatial the k8/s4 -> k4/s2 -> k3 -> k3 stack admits is 52x52.
    B, C, H, W = 2, 4, 52, 52
    num_actions, num_atoms = 6, 51   # Vmin/Vmax only affect the unused support buffer

    key = jax.random.PRNGKey(0)
    kx, kp = jax.random.split(key)
    x = jax.random.normal(kx, (B, C, H, W), jnp.float32)
    params = init_params(kp, (C, H, W), num_actions, num_atoms)
    pp = prepare_params(params, num_actions, num_atoms)

    out = categorical_dueling_dqn_forward(x, pp, num_actions=num_actions,
                                          num_atoms=num_atoms)
    out = jax.block_until_ready(out)

    ref = ref_forward(x, params, num_actions, num_atoms)
    assert out.shape == (B, num_actions, num_atoms)
    np.testing.assert_allclose(np.asarray(out), np.asarray(ref), atol=3e-3, rtol=3e-2)
    # exact (non-approx) reciprocal -> each distribution sums to 1 tightly
    np.testing.assert_allclose(np.asarray(out).sum(-1), 1.0, atol=1e-5)

    print("KERNEL_OK")
</pallas_src>

<mosaic_0001>
module attributes {stable_mosaic.version = 11 : i64} {
  func.func @_gemm_bias_kernel(%arg0: i32, %arg1: memref<288x256xbf16, #tpu.memory_space<vmem>>, %arg2: memref<256x128xbf16, #tpu.memory_space<vmem>>, %arg3: memref<1x128xf32, #tpu.memory_space<vmem>>, %arg4: memref<288x128xbf16, #tpu.memory_space<vmem>>) attributes {dimension_semantics = [#tpu.dimension_semantics<parallel>], iteration_bounds = array<i64: 1>, scalar_prefetch = 0 : i64, scratch_operands = 0 : i64, tpu.core_type = #tpu.core_type<tc>, window_params = [{transform_indices = @transform_0, window_bounds = array<i64: 288, 256>}, {pipeline_mode = #tpu.pipeline_mode<synchronous>, transform_indices = @transform_1, window_bounds = array<i64: 256, 128>}, {pipeline_mode = #tpu.pipeline_mode<synchronous>, transform_indices = @transform_2, window_bounds = array<i64: 1, 128>}, {transform_indices = @transform_3, window_bounds = array<i64: 288, 128>}]} {
    %c0 = arith.constant 0 : index
    %c0_0 = arith.constant 0 : index
    %0 = vector.load %arg1[%c0, %c0_0] : memref<288x256xbf16, #tpu.memory_space<vmem>>, vector<288x256xbf16>
    %c0_1 = arith.constant 0 : index
    %c0_2 = arith.constant 0 : index
    %1 = vector.load %arg2[%c0_1, %c0_2] : memref<256x128xbf16, #tpu.memory_space<vmem>>, vector<256x128xbf16>
    %cst = arith.constant dense<0.000000e+00> : vector<288x128xf32>
    %2 = tpu.matmul %0, %1, %cst {dimension_numbers = #tpu.dot_dimension_numbers<[1], [0], [0], [1], [0, 0, 1, 1], [], []>} : vector<288x256xbf16>, vector<256x128xbf16>, vector<288x128xf32> -> vector<288x128xf32>
    %c0_3 = arith.constant 0 : index
    %c0_4 = arith.constant 0 : index
    %3 = vector.load %arg3[%c0_3, %c0_4] : memref<1x128xf32, #tpu.memory_space<vmem>>, vector<1x128xf32>
    %4 = vector.broadcast %3 : vector<1x128xf32> to vector<288x128xf32>
    %5 = arith.addf %2, %4 : vector<288x128xf32>
    %cst_5 = arith.constant 0.000000e+00 : f32
    %6 = vector.broadcast %cst_5 : f32 to vector<288x128xf32>
    %7 = arith.maximumf %5, %6 : vector<288x128xf32>
    %8 = arith.truncf %7 : vector<288x128xf32> to vector<288x128xbf16>
    %c0_6 = arith.constant 0 : index
    %c0_7 = arith.constant 0 : index
    %9 = vector.load %arg4[%c0_6, %c0_7] : memref<288x128xbf16, #tpu.memory_space<vmem>>, vector<288x128xbf16>
    tpu.vector_store %arg4[%c0_6, %c0_7], %8 {strides = array<i32>} : memref<288x128xbf16, #tpu.memory_space<vmem>>, vector<288x128xbf16>,
    return
  }
  func.func @transform_0(%arg0: i32) -> (i32, i32) {
    %c0_i32 = arith.constant 0 : i32
    %c0_i32_0 = arith.constant 0 : i32
    return %arg0, %c0_i32 : i32, i32
  }
  func.func @transform_1(%arg0: i32) -> (i32, i32) {
    %c0_i32 = arith.constant 0 : i32
    %c0_i32_0 = arith.constant 0 : i32
    %c0_i32_1 = arith.constant 0 : i32
    return %c0_i32, %c0_i32_0 : i32, i32
  }
  func.func @transform_2(%arg0: i32) -> (i32, i32) {
    %c0_i32 = arith.constant 0 : i32
    %c0_i32_0 = arith.constant 0 : i32
    %c0_i32_1 = arith.constant 0 : i32
    return %c0_i32, %c0_i32_0 : i32, i32
  }
  func.func @transform_3(%arg0: i32) -> (i32, i32) {
    %c0_i32 = arith.constant 0 : i32
    %c0_i32_0 = arith.constant 0 : i32
    return %arg0, %c0_i32 : i32, i32
  }
}

module attributes {stable_mosaic.version = 11 : i64} {
  func.func @_gemm_bias_kernel(%arg0: i32, %arg1: memref<50x512xbf16, #tpu.memory_space<vmem>>, %arg2: memref<512x128xbf16, #tpu.memory_space<vmem>>, %arg3: memref<1x128xf32, #tpu.memory_space<vmem>>, %arg4: memref<50x128xbf16, #tpu.memory_space<vmem>>) attributes {dimension_semantics = [#tpu.dimension_semantics<parallel>], iteration_bounds = array<i64: 1>, scalar_prefetch = 0 : i64, scratch_operands = 0 : i64, tpu.core_type = #tpu.core_type<tc>, window_params = [{transform_indices = @transform_0, window_bounds = array<i64: 50, 512>}, {pipeline_mode = #tpu.pipeline_mode<synchronous>, transform_indices = @transform_1, window_bounds = array<i64: 512, 128>}, {pipeline_mode = #tpu.pipeline_mode<synchronous>, transform_indices = @transform_2, window_bounds = array<i64: 1, 128>}, {transform_indices = @transform_3, window_bounds = array<i64: 50, 128>}]} {
    %c0 = arith.constant 0 : index
    %c0_0 = arith.constant 0 : index
    %0 = vector.load %arg1[%c0, %c0_0] : memref<50x512xbf16, #tpu.memory_space<vmem>>, vector<50x512xbf16>
    %c0_1 = arith.constant 0 : index
    %c0_2 = arith.constant 0 : index
    %1 = vector.load %arg2[%c0_1, %c0_2] : memref<512x128xbf16, #tpu.memory_space<vmem>>, vector<512x128xbf16>
    %cst = arith.constant dense<0.000000e+00> : vector<50x128xf32>
    %2 = tpu.matmul %0, %1, %cst {dimension_numbers = #tpu.dot_dimension_numbers<[1], [0], [0], [1], [0, 0, 1, 1], [], []>} : vector<50x512xbf16>, vector<512x128xbf16>, vector<50x128xf32> -> vector<50x128xf32>
    %c0_3 = arith.constant 0 : index
    %c0_4 = arith.constant 0 : index
    %3 = vector.load %arg3[%c0_3, %c0_4] : memref<1x128xf32, #tpu.memory_space<vmem>>, vector<1x128xf32>
    %4 = vector.broadcast %3 : vector<1x128xf32> to vector<50x128xf32>
    %5 = arith.addf %2, %4 : vector<50x128xf32>
    %cst_5 = arith.constant 0.000000e+00 : f32
    %6 = vector.broadcast %cst_5 : f32 to vector<50x128xf32>
    %7 = arith.maximumf %5, %6 : vector<50x128xf32>
    %8 = arith.truncf %7 : vector<50x128xf32> to vector<50x128xbf16>
    %c0_6 = arith.constant 0 : index
    %c0_7 = arith.constant 0 : index
    %9 = vector.load %arg4[%c0_6, %c0_7] : memref<50x128xbf16, #tpu.memory_space<vmem>>, vector<50x128xbf16>
    tpu.vector_store %arg4[%c0_6, %c0_7], %8 {strides = array<i32>} : memref<50x128xbf16, #tpu.memory_space<vmem>>, vector<50x128xbf16>,
    return
  }
  func.func @transform_0(%arg0: i32) -> (i32, i32) {
    %c0_i32 = arith.constant 0 : i32
    %c0_i32_0 = arith.constant 0 : i32
    return %arg0, %c0_i32 : i32, i32
  }
  func.func @transform_1(%arg0: i32) -> (i32, i32) {
    %c0_i32 = arith.constant 0 : i32
    %c0_i32_0 = arith.constant 0 : i32
    %c0_i32_1 = arith.constant 0 : i32
    return %c0_i32, %c0_i32_0 : i32, i32
  }
  func.func @transform_2(%arg0: i32) -> (i32, i32) {
    %c0_i32 = arith.constant 0 : i32
    %c0_i32_0 = arith.constant 0 : i32
    %c0_i32_1 = arith.constant 0 : i32
    return %c0_i32, %c0_i32_0 : i32, i32
  }
  func.func @transform_3(%arg0: i32) -> (i32, i32) {
    %c0_i32 = arith.constant 0 : i32
    %c0_i32_0 = arith.constant 0 : i32
    return %arg0, %c0_i32 : i32, i32
  }
}

module attributes {stable_mosaic.version = 11 : i64} {
  func.func @_gemm_bias_kernel(%arg0: i32, %arg1: memref<18x576xbf16, #tpu.memory_space<vmem>>, %arg2: memref<576x128xbf16, #tpu.memory_space<vmem>>, %arg3: memref<1x128xf32, #tpu.memory_space<vmem>>, %arg4: memref<18x128xbf16, #tpu.memory_space<vmem>>) attributes {dimension_semantics = [#tpu.dimension_semantics<parallel>], iteration_bounds = array<i64: 1>, scalar_prefetch = 0 : i64, scratch_operands = 0 : i64, tpu.core_type = #tpu.core_type<tc>, window_params = [{transform_indices = @transform_0, window_bounds = array<i64: 18, 576>}, {pipeline_mode = #tpu.pipeline_mode<synchronous>, transform_indices = @transform_1, window_bounds = array<i64: 576, 128>}, {pipeline_mode = #tpu.pipeline_mode<synchronous>, transform_indices = @transform_2, window_bounds = array<i64: 1, 128>}, {transform_indices = @transform_3, window_bounds = array<i64: 18, 128>}]} {
    %c0 = arith.constant 0 : index
    %c0_0 = arith.constant 0 : index
    %0 = vector.load %arg1[%c0, %c0_0] : memref<18x576xbf16, #tpu.memory_space<vmem>>, vector<18x576xbf16>
    %c0_1 = arith.constant 0 : index
    %c0_2 = arith.constant 0 : index
    %1 = vector.load %arg2[%c0_1, %c0_2] : memref<576x128xbf16, #tpu.memory_space<vmem>>, vector<576x128xbf16>
    %cst = arith.constant dense<0.000000e+00> : vector<18x128xf32>
    %2 = tpu.matmul %0, %1, %cst {dimension_numbers = #tpu.dot_dimension_numbers<[1], [0], [0], [1], [0, 0, 1, 1], [], []>} : vector<18x576xbf16>, vector<576x128xbf16>, vector<18x128xf32> -> vector<18x128xf32>
    %c0_3 = arith.constant 0 : index
    %c0_4 = arith.constant 0 : index
    %3 = vector.load %arg3[%c0_3, %c0_4] : memref<1x128xf32, #tpu.memory_space<vmem>>, vector<1x128xf32>
    %4 = vector.broadcast %3 : vector<1x128xf32> to vector<18x128xf32>
    %5 = arith.addf %2, %4 : vector<18x128xf32>
    %cst_5 = arith.constant 0.000000e+00 : f32
    %6 = vector.broadcast %cst_5 : f32 to vector<18x128xf32>
    %7 = arith.maximumf %5, %6 : vector<18x128xf32>
    %8 = arith.truncf %7 : vector<18x128xf32> to vector<18x128xbf16>
    %c0_6 = arith.constant 0 : index
    %c0_7 = arith.constant 0 : index
    %9 = vector.load %arg4[%c0_6, %c0_7] : memref<18x128xbf16, #tpu.memory_space<vmem>>, vector<18x128xbf16>
    tpu.vector_store %arg4[%c0_6, %c0_7], %8 {strides = array<i32>} : memref<18x128xbf16, #tpu.memory_space<vmem>>, vector<18x128xbf16>,
    return
  }
  func.func @transform_0(%arg0: i32) -> (i32, i32) {
    %c0_i32 = arith.constant 0 : i32
    %c0_i32_0 = arith.constant 0 : i32
    return %arg0, %c0_i32 : i32, i32
  }
  func.func @transform_1(%arg0: i32) -> (i32, i32) {
    %c0_i32 = arith.constant 0 : i32
    %c0_i32_0 = arith.constant 0 : i32
    %c0_i32_1 = arith.constant 0 : i32
    return %c0_i32, %c0_i32_0 : i32, i32
  }
  func.func @transform_2(%arg0: i32) -> (i32, i32) {
    %c0_i32 = arith.constant 0 : i32
    %c0_i32_0 = arith.constant 0 : i32
    %c0_i32_1 = arith.constant 0 : i32
    return %c0_i32, %c0_i32_0 : i32, i32
  }
  func.func @transform_3(%arg0: i32) -> (i32, i32) {
    %c0_i32 = arith.constant 0 : i32
    %c0_i32_0 = arith.constant 0 : i32
    return %arg0, %c0_i32 : i32, i32
  }
}

module attributes {stable_mosaic.version = 11 : i64} {
  func.func @_fused_head_kernel(%arg0: memref<2x576xbf16, #tpu.memory_space<vmem>>, %arg1: memref<576x1024xbf16, #tpu.memory_space<vmem>>, %arg2: memref<1x1024xf32, #tpu.memory_space<vmem>>, %arg3: memref<1024x1024xbf16, #tpu.memory_space<vmem>>, %arg4: memref<1x1024xf32, #tpu.memory_space<vmem>>, %arg5: memref<512x768xbf16, #tpu.memory_space<vmem>>, %arg6: memref<1x768xf32, #tpu.memory_space<vmem>>, %arg7: memref<512x128xbf16, #tpu.memory_space<vmem>>, %arg8: memref<1x128xf32, #tpu.memory_space<vmem>>, %arg9: memref<2x768xf32, #tpu.memory_space<vmem>>) attributes {dimension_semantics = [], scalar_prefetch = 0 : i64, scratch_operands = 0 : i64, tpu.core_type = #tpu.core_type<tc>} {
    %c0 = arith.constant 0 : index
    %c0_0 = arith.constant 0 : index
    %0 = vector.load %arg0[%c0, %c0_0] : memref<2x576xbf16, #tpu.memory_space<vmem>>, vector<2x576xbf16>
    %c0_1 = arith.constant 0 : index
    %c0_2 = arith.constant 0 : index
    %1 = vector.load %arg1[%c0_1, %c0_2] : memref<576x1024xbf16, #tpu.memory_space<vmem>>, vector<576x1024xbf16>
    %cst = arith.constant dense<0.000000e+00> : vector<2x1024xf32>
    %2 = tpu.matmul %0, %1, %cst {dimension_numbers = #tpu.dot_dimension_numbers<[1], [0], [0], [1], [0, 0, 1, 1], [], []>} : vector<2x576xbf16>, vector<576x1024xbf16>, vector<2x1024xf32> -> vector<2x1024xf32>
    %c0_3 = arith.constant 0 : index
    %c0_4 = arith.constant 0 : index
    %3 = vector.load %arg2[%c0_3, %c0_4] : memref<1x1024xf32, #tpu.memory_space<vmem>>, vector<1x1024xf32>
    %4 = vector.broadcast %3 : vector<1x1024xf32> to vector<2x1024xf32>
    %5 = arith.addf %2, %4 : vector<2x1024xf32>
    %cst_5 = arith.constant 0.000000e+00 : f32
    %6 = vector.broadcast %cst_5 : f32 to vector<2x1024xf32>
    %7 = arith.maximumf %5, %6 : vector<2x1024xf32>
    %8 = arith.truncf %7 : vector<2x1024xf32> to vector<2x1024xbf16>
    %c0_6 = arith.constant 0 : index
    %c0_7 = arith.constant 0 : index
    %9 = vector.load %arg3[%c0_6, %c0_7] : memref<1024x1024xbf16, #tpu.memory_space<vmem>>, vector<1024x1024xbf16>
    %cst_8 = arith.constant dense<0.000000e+00> : vector<2x1024xf32>
    %10 = tpu.matmul %8, %9, %cst_8 {dimension_numbers = #tpu.dot_dimension_numbers<[1], [0], [0], [1], [0, 0, 1, 1], [], []>} : vector<2x1024xbf16>, vector<1024x1024xbf16>, vector<2x1024xf32> -> vector<2x1024xf32>
    %c0_9 = arith.constant 0 : index
    %c0_10 = arith.constant 0 : index
    %11 = vector.load %arg4[%c0_9, %c0_10] : memref<1x1024xf32, #tpu.memory_space<vmem>>, vector<1x1024xf32>
    %12 = vector.broadcast %11 : vector<1x1024xf32> to vector<2x1024xf32>
    %13 = arith.addf %10, %12 : vector<2x1024xf32>
    %cst_11 = arith.constant 0.000000e+00 : f32
    %14 = vector.broadcast %cst_11 : f32 to vector<2x1024xf32>
    %15 = arith.maximumf %13, %14 : vector<2x1024xf32>
    %16 = arith.truncf %15 : vector<2x1024xf32> to vector<2x1024xbf16>
    %17 = vector.extract_strided_slice %16 {offsets = [0, 0], sizes = [2, 512], strides = [1, 1]} : vector<2x1024xbf16> to vector<2x512xbf16>
    %c0_12 = arith.constant 0 : index
    %c0_13 = arith.constant 0 : index
    %18 = vector.load %arg5[%c0_12, %c0_13] : memref<512x768xbf16, #tpu.memory_space<vmem>>, vector<512x768xbf16>
    %cst_14 = arith.constant dense<0.000000e+00> : vector<2x768xf32>
    %19 = tpu.matmul %17, %18, %cst_14 {dimension_numbers = #tpu.dot_dimension_numbers<[1], [0], [0], [1], [0, 0, 1, 1], [], []>} : vector<2x512xbf16>, vector<512x768xbf16>, vector<2x768xf32> -> vector<2x768xf32>
    %c0_15 = arith.constant 0 : index
    %c0_16 = arith.constant 0 : index
    %20 = vector.load %arg6[%c0_15, %c0_16] : memref<1x768xf32, #tpu.memory_space<vmem>>, vector<1x768xf32>
    %21 = vector.broadcast %20 : vector<1x768xf32> to vector<2x768xf32>
    %22 = arith.addf %19, %21 : vector<2x768xf32>
    %23 = vector.extract_strided_slice %16 {offsets = [0, 512], sizes = [2, 512], strides = [1, 1]} : vector<2x1024xbf16> to vector<2x512xbf16>
    %c0_17 = arith.constant 0 : index
    %c0_18 = arith.constant 0 : index
    %24 = vector.load %arg7[%c0_17, %c0_18] : memref<512x128xbf16, #tpu.memory_space<vmem>>, vector<512x128xbf16>
    %cst_19 = arith.constant dense<0.000000e+00> : vector<2x128xf32>
    %25 = tpu.matmul %23, %24, %cst_19 {dimension_numbers = #tpu.dot_dimension_numbers<[1], [0], [0], [1], [0, 0, 1, 1], [], []>} : vector<2x512xbf16>, vector<512x128xbf16>, vector<2x128xf32> -> vector<2x128xf32>
    %c0_20 = arith.constant 0 : index
    %c0_21 = arith.constant 0 : index
    %26 = vector.load %arg8[%c0_20, %c0_21] : memref<1x128xf32, #tpu.memory_space<vmem>>, vector<1x128xf32>
    %27 = vector.broadcast %26 : vector<1x128xf32> to vector<2x128xf32>
    %28 = arith.addf %25, %27 : vector<2x128xf32>
    %29 = tpu.iota {dimensions = array<i32: 1>} : vector<1x128xi32>
    %c51_i32 = arith.constant 51 : i32
    %30 = vector.broadcast %c51_i32 : i32 to vector<1x128xi32>
    %31 = arith.cmpi slt, %29, %30 : vector<1x128xi32>
    %32 = vector.extract_strided_slice %22 {offsets = [0, 0], sizes = [2, 128], strides = [1, 1]} : vector<2x768xf32> to vector<2x128xf32>
    %33 = vector.extract_strided_slice %22 {offsets = [0, 128], sizes = [2, 128], strides = [1, 1]} : vector<2x768xf32> to vector<2x128xf32>
    %34 = arith.addf %32, %33 : vector<2x128xf32>
    %35 = vector.extract_strided_slice %22 {offsets = [0, 256], sizes = [2, 128], strides = [1, 1]} : vector<2x768xf32> to vector<2x128xf32>
    %36 = arith.addf %34, %35 : vector<2x128xf32>
    %37 = vector.extract_strided_slice %22 {offsets = [0, 384], sizes = [2, 128], strides = [1, 1]} : vector<2x768xf32> to vector<2x128xf32>
    %38 = arith.addf %36, %37 : vector<2x128xf32>
    %39 = vector.extract_strided_slice %22 {offsets = [0, 512], sizes = [2, 128], strides = [1, 1]} : vector<2x768xf32> to vector<2x128xf32>
    %40 = arith.addf %38, %39 : vector<2x128xf32>
    %41 = vector.extract_strided_slice %22 {offsets = [0, 640], sizes = [2, 128], strides = [1, 1]} : vector<2x768xf32> to vector<2x128xf32>
    %42 = arith.addf %40, %41 : vector<2x128xf32>
    %cst_22 = arith.constant 0.166666672 : f32
    %43 = vector.broadcast %cst_22 : f32 to vector<2x128xf32>
    %44 = arith.mulf %42, %43 : vector<2x128xf32>
    %45 = vector.extract_strided_slice %22 {offsets = [0, 0], sizes = [2, 128], strides = [1, 1]} : vector<2x768xf32> to vector<2x128xf32>
    %46 = arith.addf %28, %45 : vector<2x128xf32>
    %47 = arith.subf %46, %44 : vector<2x128xf32>
    %cst_23 = arith.constant 0xFF800000 : f32
    %48 = vector.shape_cast %31 : vector<1x128xi1> to vector<1x128xi1>
    %49 = vector.broadcast %48 : vector<1x128xi1> to vector<2x128xi1>
    %50 = vector.broadcast %cst_23 : f32 to vector<2x128xf32>
    %51 = arith.select %49, %47, %50 : vector<2x128xi1>, vector<2x128xf32>
    %cst_24 = arith.constant dense<0xFF800000> : vector<2xf32>
    %52 = vector.multi_reduction <maximumf>, %51, %cst_24 [1] : vector<2x128xf32> to vector<2xf32>
    %53 = vector.shape_cast %52 : vector<2xf32> to vector<2x1xf32>
    %54 = vector.broadcast %53 : vector<2x1xf32> to vector<2x128xf32>
    %55 = arith.subf %51, %54 : vector<2x128xf32>
    %56 = math.exp %55 : vector<2x128xf32>
    %cst_25 = arith.constant dense<0.000000e+00> : vector<2xf32>
    %57 = vector.multi_reduction <add>, %56, %cst_25 [1] : vector<2x128xf32> to vector<2xf32>
    %58 = vector.shape_cast %57 : vector<2xf32> to vector<2x1xf32>
    %59 = tpu.reciprocal %58 : vector<2x1xf32> -> vector<2x1xf32>
    %60 = vector.broadcast %59 : vector<2x1xf32> to vector<2x128xf32>
    %61 = arith.mulf %56, %60 : vector<2x128xf32>
    %c0_26 = arith.constant 0 : index
    %c0_27 = arith.constant 0 : index
    %62 = vector.load %arg9[%c0_26, %c0_27] : memref<2x768xf32, #tpu.memory_space<vmem>>, vector<2x128xf32>
    tpu.vector_store %arg9[%c0_26, %c0_27], %61 {strides = array<i32>} : memref<2x768xf32, #tpu.memory_space<vmem>>, vector<2x128xf32>,
    %63 = vector.extract_strided_slice %22 {offsets = [0, 128], sizes = [2, 128], strides = [1, 1]} : vector<2x768xf32> to vector<2x128xf32>
    %64 = arith.addf %28, %63 : vector<2x128xf32>
    %65 = arith.subf %64, %44 : vector<2x128xf32>
    %cst_28 = arith.constant 0xFF800000 : f32
    %66 = vector.shape_cast %31 : vector<1x128xi1> to vector<1x128xi1>
    %67 = vector.broadcast %66 : vector<1x128xi1> to vector<2x128xi1>
    %68 = vector.broadcast %cst_28 : f32 to vector<2x128xf32>
    %69 = arith.select %67, %65, %68 : vector<2x128xi1>, vector<2x128xf32>
    %cst_29 = arith.constant dense<0xFF800000> : vector<2xf32>
    %70 = vector.multi_reduction <maximumf>, %69, %cst_29 [1] : vector<2x128xf32> to vector<2xf32>
    %71 = vector.shape_cast %70 : vector<2xf32> to vector<2x1xf32>
    %72 = vector.broadcast %71 : vector<2x1xf32> to vector<2x128xf32>
    %73 = arith.subf %69, %72 : vector<2x128xf32>
    %74 = math.exp %73 : vector<2x128xf32>
    %cst_30 = arith.constant dense<0.000000e+00> : vector<2xf32>
    %75 = vector.multi_reduction <add>, %74, %cst_30 [1] : vector<2x128xf32> to vector<2xf32>
    %76 = vector.shape_cast %75 : vector<2xf32> to vector<2x1xf32>
    %77 = tpu.reciprocal %76 : vector<2x1xf32> -> vector<2x1xf32>
    %78 = vector.broadcast %77 : vector<2x1xf32> to vector<2x128xf32>
    %79 = arith.mulf %74, %78 : vector<2x128xf32>
    %c0_31 = arith.constant 0 : index
    %c128 = arith.constant 128 : index
    %80 = vector.load %arg9[%c0_31, %c128] : memref<2x768xf32, #tpu.memory_space<vmem>>, vector<2x128xf32>
    tpu.vector_store %arg9[%c0_31, %c128], %79 {strides = array<i32>} : memref<2x768xf32, #tpu.memory_space<vmem>>, vector<2x128xf32>,
    %81 = vector.extract_strided_slice %22 {offsets = [0, 256], sizes = [2, 128], strides = [1, 1]} : vector<2x768xf32> to vector<2x128xf32>
    %82 = arith.addf %28, %81 : vector<2x128xf32>
    %83 = arith.subf %82, %44 : vector<2x128xf32>
    %cst_32 = arith.constant 0xFF800000 : f32
    %84 = vector.shape_cast %31 : vector<1x128xi1> to vector<1x128xi1>
    %85 = vector.broadcast %84 : vector<1x128xi1> to vector<2x128xi1>
    %86 = vector.broadcast %cst_32 : f32 to vector<2x128xf32>
    %87 = arith.select %85, %83, %86 : vector<2x128xi1>, vector<2x128xf32>
    %cst_33 = arith.constant dense<0xFF800000> : vector<2xf32>
    %88 = vector.multi_reduction <maximumf>, %87, %cst_33 [1] : vector<2x128xf32> to vector<2xf32>
    %89 = vector.shape_cast %88 : vector<2xf32> to vector<2x1xf32>
    %90 = vector.broadcast %89 : vector<2x1xf32> to vector<2x128xf32>
    %91 = arith.subf %87, %90 : vector<2x128xf32>
    %92 = math.exp %91 : vector<2x128xf32>
    %cst_34 = arith.constant dense<0.000000e+00> : vector<2xf32>
    %93 = vector.multi_reduction <add>, %92, %cst_34 [1] : vector<2x128xf32> to vector<2xf32>
    %94 = vector.shape_cast %93 : vector<2xf32> to vector<2x1xf32>
    %95 = tpu.reciprocal %94 : vector<2x1xf32> -> vector<2x1xf32>
    %96 = vector.broadcast %95 : vector<2x1xf32> to vector<2x128xf32>
    %97 = arith.mulf %92, %96 : vector<2x128xf32>
    %c0_35 = arith.constant 0 : index
    %c256 = arith.constant 256 : index
    %98 = vector.load %arg9[%c0_35, %c256] : memref<2x768xf32, #tpu.memory_space<vmem>>, vector<2x128xf32>
    tpu.vector_store %arg9[%c0_35, %c256], %97 {strides = array<i32>} : memref<2x768xf32, #tpu.memory_space<vmem>>, vector<2x128xf32>,
    %99 = vector.extract_strided_slice %22 {offsets = [0, 384], sizes = [2, 128], strides = [1, 1]} : vector<2x768xf32> to vector<2x128xf32>
    %100 = arith.addf %28, %99 : vector<2x128xf32>
    %101 = arith.subf %100, %44 : vector<2x128xf32>
    %cst_36 = arith.constant 0xFF800000 : f32
    %102 = vector.shape_cast %31 : vector<1x128xi1> to vector<1x128xi1>
    %103 = vector.broadcast %102 : vector<1x128xi1> to vector<2x128xi1>
    %104 = vector.broadcast %cst_36 : f32 to vector<2x128xf32>
    %105 = arith.select %103, %101, %104 : vector<2x128xi1>, vector<2x128xf32>
    %cst_37 = arith.constant dense<0xFF800000> : vector<2xf32>
    %106 = vector.multi_reduction <maximumf>, %105, %cst_37 [1] : vector<2x128xf32> to vector<2xf32>
    %107 = vector.shape_cast %106 : vector<2xf32> to vector<2x1xf32>
    %108 = vector.broadcast %107 : vector<2x1xf32> to vector<2x128xf32>
    %109 = arith.subf %105, %108 : vector<2x128xf32>
    %110 = math.exp %109 : vector<2x128xf32>
    %cst_38 = arith.constant dense<0.000000e+00> : vector<2xf32>
    %111 = vector.multi_reduction <add>, %110, %cst_38 [1] : vector<2x128xf32> to vector<2xf32>
    %112 = vector.shape_cast %111 : vector<2xf32> to vector<2x1xf32>
    %113 = tpu.reciprocal %112 : vector<2x1xf32> -> vector<2x1xf32>
    %114 = vector.broadcast %113 : vector<2x1xf32> to vector<2x128xf32>
    %115 = arith.mulf %110, %114 : vector<2x128xf32>
    %c0_39 = arith.constant 0 : index
    %c384 = arith.constant 384 : index
    %116 = vector.load %arg9[%c0_39, %c384] : memref<2x768xf32, #tpu.memory_space<vmem>>, vector<2x128xf32>
    tpu.vector_store %arg9[%c0_39, %c384], %115 {strides = array<i32>} : memref<2x768xf32, #tpu.memory_space<vmem>>, vector<2x128xf32>,
    %117 = vector.extract_strided_slice %22 {offsets = [0, 512], sizes = [2, 128], strides = [1, 1]} : vector<2x768xf32> to vector<2x128xf32>
    %118 = arith.addf %28, %117 : vector<2x128xf32>
    %119 = arith.subf %118, %44 : vector<2x128xf32>
    %cst_40 = arith.constant 0xFF800000 : f32
    %120 = vector.shape_cast %31 : vector<1x128xi1> to vector<1x128xi1>
    %121 = vector.broadcast %120 : vector<1x128xi1> to vector<2x128xi1>
    %122 = vector.broadcast %cst_40 : f32 to vector<2x128xf32>
    %123 = arith.select %121, %119, %122 : vector<2x128xi1>, vector<2x128xf32>
    %cst_41 = arith.constant dense<0xFF800000> : vector<2xf32>
    %124 = vector.multi_reduction <maximumf>, %123, %cst_41 [1] : vector<2x128xf32> to vector<2xf32>
    %125 = vector.shape_cast %124 : vector<2xf32> to vector<2x1xf32>
    %126 = vector.broadcast %125 : vector<2x1xf32> to vector<2x128xf32>
    %127 = arith.subf %123, %126 : vector<2x128xf32>
    %128 = math.exp %127 : vector<2x128xf32>
    %cst_42 = arith.constant dense<0.000000e+00> : vector<2xf32>
    %129 = vector.multi_reduction <add>, %128, %cst_42 [1] : vector<2x128xf32> to vector<2xf32>
    %130 = vector.shape_cast %129 : vector<2xf32> to vector<2x1xf32>
    %131 = tpu.reciprocal %130 : vector<2x1xf32> -> vector<2x1xf32>
    %132 = vector.broadcast %131 : vector<2x1xf32> to vector<2x128xf32>
    %133 = arith.mulf %128, %132 : vector<2x128xf32>
    %c0_43 = arith.constant 0 : index
    %c512 = arith.constant 512 : index
    %134 = vector.load %arg9[%c0_43, %c512] : memref<2x768xf32, #tpu.memory_space<vmem>>, vector<2x128xf32>
    tpu.vector_store %arg9[%c0_43, %c512], %133 {strides = array<i32>} : memref<2x768xf32, #tpu.memory_space<vmem>>, vector<2x128xf32>,
    %135 = vector.extract_strided_slice %22 {offsets = [0, 640], sizes = [2, 128], strides = [1, 1]} : vector<2x768xf32> to vector<2x128xf32>
    %136 = arith.addf %28, %135 : vector<2x128xf32>
    %137 = arith.subf %136, %44 : vector<2x128xf32>
    %cst_44 = arith.constant 0xFF800000 : f32
    %138 = vector.shape_cast %31 : vector<1x128xi1> to vector<1x128xi1>
    %139 = vector.broadcast %138 : vector<1x128xi1> to vector<2x128xi1>
    %140 = vector.broadcast %cst_44 : f32 to vector<2x128xf32>
    %141 = arith.select %139, %137, %140 : vector<2x128xi1>, vector<2x128xf32>
    %cst_45 = arith.constant dense<0xFF800000> : vector<2xf32>
    %142 = vector.multi_reduction <maximumf>, %141, %cst_45 [1] : vector<2x128xf32> to vector<2xf32>
    %143 = vector.shape_cast %142 : vector<2xf32> to vector<2x1xf32>
    %144 = vector.broadcast %143 : vector<2x1xf32> to vector<2x128xf32>
    %145 = arith.subf %141, %144 : vector<2x128xf32>
    %146 = math.exp %145 : vector<2x128xf32>
    %cst_46 = arith.constant dense<0.000000e+00> : vector<2xf32>
    %147 = vector.multi_reduction <add>, %146, %cst_46 [1] : vector<2x128xf32> to vector<2xf32>
    %148 = vector.shape_cast %147 : vector<2xf32> to vector<2x1xf32>
    %149 = tpu.reciprocal %148 : vector<2x1xf32> -> vector<2x1xf32>
    %150 = vector.broadcast %149 : vector<2x1xf32> to vector<2x128xf32>
    %151 = arith.mulf %146, %150 : vector<2x128xf32>
    %c0_47 = arith.constant 0 : index
    %c640 = arith.constant 640 : index
    %152 = vector.load %arg9[%c0_47, %c640] : memref<2x768xf32, #tpu.memory_space<vmem>>, vector<2x128xf32>
    tpu.vector_store %arg9[%c0_47, %c640], %151 {strides = array<i32>} : memref<2x768xf32, #tpu.memory_space<vmem>>, vector<2x128xf32>,
    return
  }
}

</mosaic_0001>

<bundles_post_ra>
// kernel: categorical_dueling_dqn_forward.4
= control target key start
LH: loop header
LB: loop body
LE: loop exit
PB: predicated region body
PF: predicated region fallthrough
CT: control target
= control target key end

     0   :  { %v1098_v0 = vmov 0   ;;  %s1402_s1 = inlined_call_operand.vmem [shape: bf16[256,128], index: 1, kind: input, shape index: {}]   ;;  %s1403_s0 = inlined_call_operand.vmem [shape: bf16[288,256], index: 0, kind: input, shape index: {}]   ;;  %s1404_s2 = inlined_call_operand.vmem [shape: f32[1,128], index: 2, kind: input, shape index: {}]   ;;  %s1405_s3 = inlined_call_operand.vmem [shape: bf16[288,128], index: 3, kind: output, shape index: {}]  }
   0x1   :  { %366 = vmatprep.subr.bf16.mxu0 %v1098_v0  ;;  %995 = vmatprep.subr.bf16.mxu1 %v1098_v0  ;;  %v1028_v1 = vld [vmem:[%s1402_s1] sm:$0xff]   ;;  %v1029_v2 = vld [vmem:[%s1402_s1 + $0x8] sm:$0xff]   ;;  %v1030_v3 = vld [vmem:[%s1402_s1 + $0x10] sm:$0xff]  }
   0x2   :  { %367 = vmatpush1.bf16.msra.mxu0 %v1028_v1  ;;  %1011 = vmatpush1.bf16.msra.mxu1 %v1028_v1  ;;  %v1031_v4 = vld [vmem:[%s1402_s1 + $0x18] sm:$0xff]   ;;  %v1032_v5 = vld [vmem:[%s1402_s1 + $0x20] sm:$0xff]   ;;  %v1033_v7 = vld [vmem:[%s1402_s1 + $0x28] sm:$0xff]  }
   0x3   :  { %368 = vmatprep.subr.bf16.mxu0 %v1098_v0  ;;  %996 = vmatprep.subr.bf16.mxu1 %v1098_v0  ;;  %v1046_v6 = vld [vmem:[%s1403_s0 + $0x4] ss:$8 sps:$4 sm:$0xff]   ;;  %v1049_v8 = vld [vmem:[%s1403_s0 + $0x94] ss:$8 sps:$4 sm:$0xff]   ;;  %v1044_v19 = vld [vmem:[%s1403_s0] ss:$8 sps:$4 sm:$0xff]  }
   0x4   :  { %398 = vmatprep.mubr.bf16.mxu0 %v1046_v6  ;;  %470 = vmatprep.mubr.bf16.mxu1 %v1049_v8  ;;  %v1034_v9 = vld [vmem:[%s1402_s1 + $0x30] sm:$0xff]   ;;  %v1035_v10 = vld [vmem:[%s1402_s1 + $0x38] sm:$0xff]   ;;  %v1036_v11 = vld [vmem:[%s1402_s1 + $0x40] sm:$0xff]  }
   0x5   :  { %v1037_v12 = vld [vmem:[%s1402_s1 + $0x48] sm:$0xff]   ;;  %v1038_v13 = vld [vmem:[%s1402_s1 + $0x50] sm:$0xff]   ;;  %v1039_v14 = vld [vmem:[%s1402_s1 + $0x58] sm:$0xff]  }
   0x6   :  { %369 = vmatpush1.bf16.msra.mxu0 %v1029_v2  ;;  %1012 = vmatpush1.bf16.msra.mxu1 %v1029_v2  ;;  %v1040_v15 = vld [vmem:[%s1402_s1 + $0x60] sm:$0xff]   ;;  %v1041_v16 = vld [vmem:[%s1402_s1 + $0x68] sm:$0xff]   ;;  %v1042_v17 = vld [vmem:[%s1402_s1 + $0x70] sm:$0xff]  }
   0x7   :  { %370 = vmatprep.subr.bf16.mxu0 %v1098_v0  ;;  %997 = vmatprep.subr.bf16.mxu1 %v1098_v0  ;;  %v1043_v18 = vld [vmem:[%s1402_s1 + $0x78] sm:$0xff]   ;;  %v1052_v22 = vld [vmem:[%s1403_s0 + $0xa4] ss:$8 sps:$4 sm:$0xff]   ;;  %v1055_v24 = vld [vmem:[%s1403_s0 + $0xa0] ss:$8 sps:$4 sm:$0xff]  }
   0x8   :  { %v1047_v20 = vld [vmem:[%s1403_s0 + $0x90] ss:$8 sps:$4 sm:$0xff]   ;;  %v1050_v21 = vld [vmem:[%s1403_s0 + $0x14] ss:$8 sps:$4 sm:$0xff]   ;;  %v1056_v25 = vld [vmem:[%s1403_s0 + $0x24] ss:$8 sps:$4 sm:$0xff]  }
   0x9   :  { %v1054_v23 = vld [vmem:[%s1403_s0 + $0x10] ss:$8 sps:$4 sm:$0xff]   ;;  %v1058_v26 = vld [vmem:[%s1403_s0 + $0xb4] ss:$8 sps:$4 sm:$0xff]   ;;  %v1060_v27 = vld [vmem:[%s1403_s0 + $0x20] ss:$8 sps:$4 sm:$0xff]  }
   0xa   :  { %371 = vmatpush1.bf16.msra.mxu0 %v1030_v3  ;;  %1013 = vmatpush1.bf16.msra.mxu1 %v1030_v3  ;;  %v1061_v28 = vld [vmem:[%s1403_s0 + $0xb0] ss:$8 sps:$4 sm:$0xff]   ;;  %v1062_v29 = vld [vmem:[%s1403_s0 + $0x34] ss:$8 sps:$4 sm:$0xff]   ;;  %v1064_v30 = vld [vmem:[%s1403_s0 + $0xc4] ss:$8 sps:$4 sm:$0xff]  }
   0xb   :  { %372 = vmatprep.subr.bf16.mxu0 %v1098_v0  ;;  %998 = vmatprep.subr.bf16.mxu1 %v1098_v0  ;;  %v1066_v31 = vld [vmem:[%s1403_s0 + $0x30] ss:$8 sps:$4 sm:$0xff]   ;;  %v1067_v32 = vld [vmem:[%s1403_s0 + $0xc0] ss:$8 sps:$4 sm:$0xff]   ;;  %v1068_v33 = vld [vmem:[%s1403_s0 + $0x44] ss:$8 sps:$4 sm:$0xff]  }
   0xc   :  { %v1070_v34 = vld [vmem:[%s1403_s0 + $0xd4] ss:$8 sps:$4 sm:$0xff]   ;;  %v1072_v35 = vld [vmem:[%s1403_s0 + $0x40] ss:$8 sps:$4 sm:$0xff]   ;;  %v1073_v36 = vld [vmem:[%s1403_s0 + $0xd0] ss:$8 sps:$4 sm:$0xff]  }
   0xd   :  { %v1074_v37 = vld [vmem:[%s1403_s0 + $0x54] ss:$8 sps:$4 sm:$0xff]   ;;  %v1076_v38 = vld [vmem:[%s1403_s0 + $0xe4] ss:$8 sps:$4 sm:$0xff]   ;;  %v1078_v39 = vld [vmem:[%s1403_s0 + $0x50] ss:$8 sps:$4 sm:$0xff]  }
   0xe   :  { %373 = vmatpush1.bf16.msra.mxu0 %v1031_v4  ;;  %1014 = vmatpush1.bf16.msra.mxu1 %v1031_v4  ;;  %v1079_v40 = vld [vmem:[%s1403_s0 + $0xe0] ss:$8 sps:$4 sm:$0xff]   ;;  %v1080_v41 = vld [vmem:[%s1403_s0 + $0x64] ss:$8 sps:$4 sm:$0xff]   ;;  %v1082_v42 = vld [vmem:[%s1403_s0 + $0xf4] ss:$8 sps:$4 sm:$0xff]  }
   0xf   :  { %374 = vmatprep.subr.bf16.mxu0 %v1098_v0  ;;  %999 = vmatprep.subr.bf16.mxu1 %v1098_v0  ;;  %v1084_v43 = vld [vmem:[%s1403_s0 + $0x60] ss:$8 sps:$4 sm:$0xff]   ;;  %v1085_v44 = vld [vmem:[%s1403_s0 + $0xf0] ss:$8 sps:$4 sm:$0xff]   ;;  %v1086_v45 = vld [vmem:[%s1403_s0 + $0x74] ss:$8 sps:$4 sm:$0xff]  }
  0x10   :  { %v1088_v46 = vld [vmem:[%s1403_s0 + $0x104] ss:$8 sps:$4 sm:$0xff]   ;;  %v1090_v47 = vld [vmem:[%s1403_s0 + $0x70] ss:$8 sps:$4 sm:$0xff]   ;;  %v1091_v48 = vld [vmem:[%s1403_s0 + $0x100] ss:$8 sps:$4 sm:$0xff]  }
  0x11   :  { %v1092_v49 = vld [vmem:[%s1403_s0 + $0x84] ss:$8 sps:$4 sm:$0xff]   ;;  %v1094_v50 = vld [vmem:[%s1403_s0 + $0x114] ss:$8 sps:$4 sm:$0xff]   ;;  %v1096_v51 = vld [vmem:[%s1403_s0 + $0x80] ss:$8 sps:$4 sm:$0xff]  }
  0x12   :  { %375 = vmatpush1.bf16.msra.mxu0 %v1032_v5  ;;  %1015 = vmatpush1.bf16.msra.mxu1 %v1032_v5  ;;  %v1097_v52 = vld [vmem:[%s1403_s0 + $0x110] ss:$8 sps:$4 sm:$0xff]   ;;  %v1310_v53 = vld [vmem:[%s1404_s2] ss:$0 sm:$0xff] }
  0x13   :  { %376 = vmatprep.subr.bf16.mxu0 %v1098_v0  ;;  %1000 = vmatprep.subr.bf16.mxu1 %v1098_v0 }
  0x16   :  { %377 = vmatpush1.bf16.msra.mxu0 %v1033_v7  ;;  %1016 = vmatpush1.bf16.msra.mxu1 %v1033_v7 }
  0x17   :  { %378 = vmatprep.subr.bf16.mxu0 %v1098_v0  ;;  %1001 = vmatprep.subr.bf16.mxu1 %v1098_v0 }
  0x1a   :  { %379 = vmatpush1.bf16.msra.mxu0 %v1034_v9  ;;  %1017 = vmatpush1.bf16.msra.mxu1 %v1034_v9 }
  0x1b   :  { %380 = vmatprep.subr.bf16.mxu0 %v1098_v0  ;;  %1002 = vmatprep.subr.bf16.mxu1 %v1098_v0 }
  0x1e   :  { %381 = vmatpush1.bf16.msra.mxu0 %v1035_v10  ;;  %1018 = vmatpush1.bf16.msra.mxu1 %v1035_v10 }
  0x1f   :  { %382 = vmatprep.subr.bf16.mxu0 %v1098_v0  ;;  %1003 = vmatprep.subr.bf16.mxu1 %v1098_v0 }
  0x22   :  { %383 = vmatpush1.bf16.msra.mxu0 %v1036_v11  ;;  %1019 = vmatpush1.bf16.msra.mxu1 %v1036_v11 }
  0x23   :  { %384 = vmatprep.subr.bf16.mxu0 %v1098_v0  ;;  %1004 = vmatprep.subr.bf16.mxu1 %v1098_v0 }
  0x26   :  { %385 = vmatpush1.bf16.msra.mxu0 %v1037_v12  ;;  %1020 = vmatpush1.bf16.msra.mxu1 %v1037_v12 }
  0x27   :  { %386 = vmatprep.subr.bf16.mxu0 %v1098_v0  ;;  %1005 = vmatprep.subr.bf16.mxu1 %v1098_v0 }
  0x2a   :  { %387 = vmatpush1.bf16.msra.mxu0 %v1038_v13  ;;  %1021 = vmatpush1.bf16.msra.mxu1 %v1038_v13 }
  0x2b   :  { %388 = vmatprep.subr.bf16.mxu0 %v1098_v0  ;;  %1006 = vmatprep.subr.bf16.mxu1 %v1098_v0 }
  0x2e   :  { %389 = vmatpush1.bf16.msra.mxu0 %v1039_v14  ;;  %1022 = vmatpush1.bf16.msra.mxu1 %v1039_v14 }
  0x2f   :  { %390 = vmatprep.subr.bf16.mxu0 %v1098_v0  ;;  %1007 = vmatprep.subr.bf16.mxu1 %v1098_v0 }
  0x32   :  { %391 = vmatpush1.bf16.msra.mxu0 %v1040_v15  ;;  %1023 = vmatpush1.bf16.msra.mxu1 %v1040_v15 }
  0x33   :  { %392 = vmatprep.subr.bf16.mxu0 %v1098_v0  ;;  %1008 = vmatprep.subr.bf16.mxu1 %v1098_v0 }
  0x36   :  { %393 = vmatpush1.bf16.msra.mxu0 %v1041_v16  ;;  %1024 = vmatpush1.bf16.msra.mxu1 %v1041_v16 }
  0x37   :  { %394 = vmatprep.subr.bf16.mxu0 %v1098_v0  ;;  %1009 = vmatprep.subr.bf16.mxu1 %v1098_v0 }
  0x3a   :  { %395 = vmatpush1.bf16.msra.mxu0 %v1042_v17  ;;  %1025 = vmatpush1.bf16.msra.mxu1 %v1042_v17 }
  0x3b   :  { %396 = vmatprep.subr.bf16.mxu0 %v1098_v0  ;;  %1010 = vmatprep.subr.bf16.mxu1 %v1098_v0 }
  0x3e   :  { %397 = vmatpush1.bf16.msra.mxu0 %v1043_v18  ;;  %1026 = vmatpush1.bf16.msra.mxu1 %v1043_v18 }
  0x41   :  { %399 = vmatmul.mubr.bf16.vlgmr.msra.gmra.mrb[0].mxu0 %v1044_v19  ;;  %471 = vmatmul.mubr.bf16.vlgmr.msra.gmra.mrb[0].mxu1 %v1047_v20 }
  0x42   :  { %406 = vmatprep.mubr.bf16.mxu0 %v1050_v21  ;;  %478 = vmatprep.mubr.bf16.mxu1 %v1052_v22 }
  0x49   :  { %407 = vmatmul.mubr.bf16.gmra.mrb[4].mxu0 %v1054_v23  ;;  %479 = vmatmul.mubr.bf16.gmra.mrb[4].mxu1 %v1055_v24 }
  0x4a   :  { %414 = vmatprep.mubr.bf16.mxu0 %v1056_v25  ;;  %486 = vmatprep.mubr.bf16.mxu1 %v1058_v26 }
  0x51   :  { %415 = vmatmul.mubr.bf16.gmra.mrb[8].mxu0 %v1060_v27  ;;  %487 = vmatmul.mubr.bf16.gmra.mrb[8].mxu1 %v1061_v28 }
  0x52   :  { %422 = vmatprep.mubr.bf16.mxu0 %v1062_v29  ;;  %494 = vmatprep.mubr.bf16.mxu1 %v1064_v30 }
  0x59   :  { %423 = vmatmul.mubr.bf16.gmra.mrb[12].mxu0 %v1066_v31  ;;  %495 = vmatmul.mubr.bf16.gmra.mrb[12].mxu1 %v1067_v32 }
  0x5a   :  { %430 = vmatprep.mubr.bf16.mxu0 %v1068_v33  ;;  %502 = vmatprep.mubr.bf16.mxu1 %v1070_v34 }
  0x61   :  { %431 = vmatmul.mubr.bf16.gmra.mrb[16].mxu0 %v1072_v35  ;;  %503 = vmatmul.mubr.bf16.gmra.mrb[16].mxu1 %v1073_v36 }
  0x62   :  { %438 = vmatprep.mubr.bf16.mxu0 %v1074_v37  ;;  %510 = vmatprep.mubr.bf16.mxu1 %v1076_v38 }
  0x69   :  { %439 = vmatmul.mubr.bf16.gmra.mrb[20].mxu0 %v1078_v39  ;;  %511 = vmatmul.mubr.bf16.gmra.mrb[20].mxu1 %v1079_v40 }
  0x6a   :  { %446 = vmatprep.mubr.bf16.mxu0 %v1080_v41  ;;  %518 = vmatprep.mubr.bf16.mxu1 %v1082_v42 }
  0x71   :  { %447 = vmatmul.mubr.bf16.gmra.mrb[24].mxu0 %v1084_v43  ;;  %519 = vmatmul.mubr.bf16.gmra.mrb[24].mxu1 %v1085_v44 }
  0x72   :  { %454 = vmatprep.mubr.bf16.mxu0 %v1086_v45  ;;  %526 = vmatprep.mubr.bf16.mxu1 %v1088_v46 }
  0x79   :  { %455 = vmatmul.mubr.bf16.gmra.mrb[28].mxu0 %v1090_v47  ;;  %527 = vmatmul.mubr.bf16.gmra.mrb[28].mxu1 %v1091_v48 }
  0x7a   :  { %462 = vmatprep.mubr.bf16.mxu0 %v1092_v49  ;;  %534 = vmatprep.mubr.bf16.mxu1 %v1094_v50 }
  0x81   :  { %463 = vmatmul.mubr.bf16.gmra.mrb[32].mxu0 %v1096_v51  ;;  %535 = vmatmul.mubr.bf16.gmra.mrb[32].mxu1 %v1097_v52 }
 0x114   :  { %v400_v54 = vpop.f32.mrb[0].mxu0  ;;  %v472_v55 = vpop.f32.mrb[0].mxu1 }
 0x115   :  { %v401_v56 = vadd.f32 %v1310_v53, %v400_v54  ;;  %v473_v57 = vadd.f32 %v1310_v53, %v472_v55  ;;  %v402_v58 = vpop.f32.mrb[1].mxu0  ;;  %v474_v59 = vpop.f32.mrb[1].mxu1 }
 0x116   :  { %v403_v60 = vpop.f32.mrb[2].mxu0  ;;  %v475_v61 = vpop.f32.mrb[2].mxu1 }
 0x117   :  { %v404_v62 = vadd.f32 %v1310_v53, %v403_v60  ;;  %v476_v63 = vadd.f32 %v1310_v53, %v475_v61  ;;  %v405_v0 = vpop.f32.mrb[3].mxu0  ;;  %v477_v1 = vpop.f32.mrb[3].mxu1  ;;  %v543_v2 = vmax.f32 %v401_v56, 0.0  ;;  %v561_v3 = vmax.f32 %v473_v57, 0.0 }
 0x119   :  { %v544_v4 = vmax.f32 %v404_v62, 0.0  ;;  %v562_v5 = vmax.f32 %v476_v63, 0.0 }
 0x11b   :  { %v891_v6 = vpack.c.bf16 %v544_v4, %v543_v2  ;;  %v936_v7 = vpack.c.bf16 %v562_v5, %v561_v3 }
 0x11c   :  { %v408_v8 = vpop.f32.mrb[4].mxu0  ;;  %v480_v9 = vpop.f32.mrb[4].mxu1 }
 0x11d   :  { %892 = vst [vmem:[%s1405_s3] sm:$0xff] %v891_v6   ;;  %986 = vst [vmem:[%s1405_s3 + $0x48] sm:$0xff] %v936_v7   ;;  %v409_v10 = vadd.f32 %v1310_v53, %v408_v8  ;;  %v481_v11 = vadd.f32 %v1310_v53, %v480_v9  ;;  %v410_v12 = vpop.f32.mrb[5].mxu0  ;;  %v482_v13 = vpop.f32.mrb[5].mxu1 }
 0x11e   :  { %v411_v14 = vpop.f32.mrb[6].mxu0  ;;  %v483_v15 = vpop.f32.mrb[6].mxu1 }
 0x11f   :  { %v412_v16 = vadd.f32 %v1310_v53, %v411_v14  ;;  %v484_v17 = vadd.f32 %v1310_v53, %v483_v15  ;;  %v413_v18 = vpop.f32.mrb[7].mxu0  ;;  %v485_v19 = vpop.f32.mrb[7].mxu1  ;;  %v545_v20 = vmax.f32 %v409_v10, 0.0  ;;  %v563_v21 = vmax.f32 %v481_v11, 0.0 }
 0x121   :  { %v546_v22 = vmax.f32 %v412_v16, 0.0  ;;  %v564_v23 = vmax.f32 %v484_v17, 0.0 }
 0x123   :  { %v896_v24 = vpack.c.bf16 %v546_v22, %v545_v20  ;;  %v941_v25 = vpack.c.bf16 %v564_v23, %v563_v21 }
 0x124   :  { %v416_v26 = vpop.f32.mrb[8].mxu0  ;;  %v488_v27 = vpop.f32.mrb[8].mxu1 }
 0x125   :  { %978 = vst [vmem:[%s1405_s3 + $0x8] sm:$0xff] %v896_v24   ;;  %987 = vst [vmem:[%s1405_s3 + $0x50] sm:$0xff] %v941_v25   ;;  %v417_v28 = vadd.f32 %v1310_v53, %v416_v26  ;;  %v489_v29 = vadd.f32 %v1310_v53, %v488_v27  ;;  %v418_v30 = vpop.f32.mrb[9].mxu0  ;;  %v490_v31 = vpop.f32.mrb[9].mxu1 }
 0x126   :  { %v419_v32 = vpop.f32.mrb[10].mxu0  ;;  %v491_v33 = vpop.f32.mrb[10].mxu1 }
 0x127   :  { %v420_v34 = vadd.f32 %v1310_v53, %v419_v32  ;;  %v492_v35 = vadd.f32 %v1310_v53, %v491_v33  ;;  %v421_v36 = vpop.f32.mrb[11].mxu0  ;;  %v493_v37 = vpop.f32.mrb[11].mxu1  ;;  %v547_v38 = vmax.f32 %v417_v28, 0.0  ;;  %v565_v39 = vmax.f32 %v489_v29, 0.0 }
 0x129   :  { %v548_v40 = vmax.f32 %v420_v34, 0.0  ;;  %v566_v41 = vmax.f32 %v492_v35, 0.0 }
 0x12b   :  { %v901_v42 = vpack.c.bf16 %v548_v40, %v547_v38  ;;  %v946_v43 = vpack.c.bf16 %v566_v41, %v565_v39 }
 0x12c   :  { %v424_v44 = vpop.f32.mrb[12].mxu0  ;;  %v496_v45 = vpop.f32.mrb[12].mxu1 }
 0x12d   :  { %979 = vst [vmem:[%s1405_s3 + $0x10] sm:$0xff] %v901_v42   ;;  %988 = vst [vmem:[%s1405_s3 + $0x58] sm:$0xff] %v946_v43   ;;  %v425_v46 = vadd.f32 %v1310_v53, %v424_v44  ;;  %v497_v47 = vadd.f32 %v1310_v53, %v496_v45  ;;  %v426_v48 = vpop.f32.mrb[13].mxu0  ;;  %v498_v49 = vpop.f32.mrb[13].mxu1 }
 0x12e   :  { %v427_v50 = vpop.f32.mrb[14].mxu0  ;;  %v499_v51 = vpop.f32.mrb[14].mxu1 }
 0x12f   :  { %v428_v52 = vadd.f32 %v1310_v53, %v427_v50  ;;  %v500_v54 = vadd.f32 %v1310_v53, %v499_v51  ;;  %v429_v55 = vpop.f32.mrb[15].mxu0  ;;  %v501_v56 = vpop.f32.mrb[15].mxu1  ;;  %v549_v57 = vmax.f32 %v425_v46, 0.0  ;;  %v567_v58 = vmax.f32 %v497_v47, 0.0 }
 0x131   :  { %v550_v59 = vmax.f32 %v428_v52, 0.0  ;;  %v568_v60 = vmax.f32 %v500_v54, 0.0 }
 0x133   :  { %v906_v61 = vpack.c.bf16 %v550_v59, %v549_v57  ;;  %v951_v62 = vpack.c.bf16 %v568_v60, %v567_v58 }
 0x134   :  { %v432_v63 = vpop.f32.mrb[16].mxu0  ;;  %v504_v0 = vpop.f32.mrb[16].mxu1 }
 0x135   :  { %980 = vst [vmem:[%s1405_s3 + $0x18] sm:$0xff] %v906_v61   ;;  %989 = vst [vmem:[%s1405_s3 + $0x60] sm:$0xff] %v951_v62   ;;  %v433_v1 = vadd.f32 %v1310_v53, %v432_v63  ;;  %v505_v2 = vadd.f32 %v1310_v53, %v504_v0  ;;  %v434_v3 = vpop.f32.mrb[17].mxu0  ;;  %v506_v4 = vpop.f32.mrb[17].mxu1 }
 0x136   :  { %v435_v5 = vpop.f32.mrb[18].mxu0  ;;  %v507_v6 = vpop.f32.mrb[18].mxu1 }
 0x137   :  { %v436_v7 = vadd.f32 %v1310_v53, %v435_v5  ;;  %v508_v8 = vadd.f32 %v1310_v53, %v507_v6  ;;  %v437_v9 = vpop.f32.mrb[19].mxu0  ;;  %v509_v10 = vpop.f32.mrb[19].mxu1  ;;  %v551_v11 = vmax.f32 %v433_v1, 0.0  ;;  %v569_v12 = vmax.f32 %v505_v2, 0.0 }
 0x139   :  { %v552_v13 = vmax.f32 %v436_v7, 0.0  ;;  %v570_v14 = vmax.f32 %v508_v8, 0.0 }
 0x13b   :  { %v911_v15 = vpack.c.bf16 %v552_v13, %v551_v11  ;;  %v956_v16 = vpack.c.bf16 %v570_v14, %v569_v12 }
 0x13c   :  { %v440_v17 = vpop.f32.mrb[20].mxu0  ;;  %v512_v18 = vpop.f32.mrb[20].mxu1 }
 0x13d   :  { %981 = vst [vmem:[%s1405_s3 + $0x20] sm:$0xff] %v911_v15   ;;  %990 = vst [vmem:[%s1405_s3 + $0x68] sm:$0xff] %v956_v16   ;;  %v441_v19 = vadd.f32 %v1310_v53, %v440_v17  ;;  %v513_v20 = vadd.f32 %v1310_v53, %v512_v18  ;;  %v442_v21 = vpop.f32.mrb[21].mxu0  ;;  %v514_v22 = vpop.f32.mrb[21].mxu1 }
 0x13e   :  { %v443_v23 = vpop.f32.mrb[22].mxu0  ;;  %v515_v24 = vpop.f32.mrb[22].mxu1 }
 0x13f   :  { %v444_v25 = vadd.f32 %v1310_v53, %v443_v23  ;;  %v516_v26 = vadd.f32 %v1310_v53, %v515_v24  ;;  %v445_v27 = vpop.f32.mrb[23].mxu0  ;;  %v517_v28 = vpop.f32.mrb[23].mxu1  ;;  %v553_v29 = vmax.f32 %v441_v19, 0.0  ;;  %v571_v30 = vmax.f32 %v513_v20, 0.0 }
 0x141   :  { %v554_v31 = vmax.f32 %v444_v25, 0.0  ;;  %v572_v32 = vmax.f32 %v516_v26, 0.0 }
 0x143   :  { %v916_v33 = vpack.c.bf16 %v554_v31, %v553_v29  ;;  %v961_v34 = vpack.c.bf16 %v572_v32, %v571_v30 }
 0x144   :  { %v448_v35 = vpop.f32.mrb[24].mxu0  ;;  %v520_v36 = vpop.f32.mrb[24].mxu1 }
 0x145   :  { %982 = vst [vmem:[%s1405_s3 + $0x28] sm:$0xff] %v916_v33   ;;  %991 = vst [vmem:[%s1405_s3 + $0x70] sm:$0xff] %v961_v34   ;;  %v449_v37 = vadd.f32 %v1310_v53, %v448_v35  ;;  %v521_v38 = vadd.f32 %v1310_v53, %v520_v36  ;;  %v450_v39 = vpop.f32.mrb[25].mxu0  ;;  %v522_v40 = vpop.f32.mrb[25].mxu1 }
 0x146   :  { %v451_v41 = vpop.f32.mrb[26].mxu0  ;;  %v523_v42 = vpop.f32.mrb[26].mxu1 }
 0x147   :  { %v452_v43 = vadd.f32 %v1310_v53, %v451_v41  ;;  %v524_v44 = vadd.f32 %v1310_v53, %v523_v42  ;;  %v453_v45 = vpop.f32.mrb[27].mxu0  ;;  %v525_v46 = vpop.f32.mrb[27].mxu1  ;;  %v555_v47 = vmax.f32 %v449_v37, 0.0  ;;  %v573_v48 = vmax.f32 %v521_v38, 0.0 }
 0x149   :  { %v556_v49 = vmax.f32 %v452_v43, 0.0  ;;  %v574_v50 = vmax.f32 %v524_v44, 0.0 }
 0x14b   :  { %v921_v51 = vpack.c.bf16 %v556_v49, %v555_v47  ;;  %v966_v52 = vpack.c.bf16 %v574_v50, %v573_v48 }
 0x14c   :  { %v456_v54 = vpop.f32.mrb[28].mxu0  ;;  %v528_v55 = vpop.f32.mrb[28].mxu1 }
 0x14d   :  { %983 = vst [vmem:[%s1405_s3 + $0x30] sm:$0xff] %v921_v51   ;;  %992 = vst [vmem:[%s1405_s3 + $0x78] sm:$0xff] %v966_v52   ;;  %v457_v56 = vadd.f32 %v1310_v53, %v456_v54  ;;  %v529_v57 = vadd.f32 %v1310_v53, %v528_v55  ;;  %v458_v58 = vpop.f32.mrb[29].mxu0  ;;  %v530_v59 = vpop.f32.mrb[29].mxu1 }
 0x14e   :  { %v459_v60 = vpop.f32.mrb[30].mxu0  ;;  %v531_v61 = vpop.f32.mrb[30].mxu1 }
 0x14f   :  { %v460_v62 = vadd.f32 %v1310_v53, %v459_v60  ;;  %v532_v63 = vadd.f32 %v1310_v53, %v531_v61  ;;  %v461_v0 = vpop.f32.mrb[31].mxu0  ;;  %v533_v1 = vpop.f32.mrb[31].mxu1  ;;  %v557_v2 = vmax.f32 %v457_v56, 0.0  ;;  %v575_v3 = vmax.f32 %v529_v57, 0.0 }
 0x151   :  { %v558_v4 = vmax.f32 %v460_v62, 0.0  ;;  %v576_v5 = vmax.f32 %v532_v63, 0.0 }
 0x153   :  { %v926_v6 = vpack.c.bf16 %v558_v4, %v557_v2  ;;  %v971_v7 = vpack.c.bf16 %v576_v5, %v575_v3 }
 0x154   :  { %v464_v8 = vpop.f32.mrb[32].mxu0  ;;  %v536_v9 = vpop.f32.mrb[32].mxu1 }
 0x155   :  { %984 = vst [vmem:[%s1405_s3 + $0x38] sm:$0xff] %v926_v6   ;;  %993 = vst [vmem:[%s1405_s3 + $0x80] sm:$0xff] %v971_v7   ;;  %v465_v10 = vadd.f32 %v1310_v53, %v464_v8  ;;  %v537_v11 = vadd.f32 %v1310_v53, %v536_v9  ;;  %v466_v12 = vpop.f32.mrb[33].mxu0  ;;  %v538_v13 = vpop.f32.mrb[33].mxu1 }
 0x156   :  { %v467_v14 = vpop.f32.mrb[34].mxu0  ;;  %v539_v15 = vpop.f32.mrb[34].mxu1 }
 0x157   :  { %v468_v16 = vadd.f32 %v1310_v53, %v467_v14  ;;  %v540_v17 = vadd.f32 %v1310_v53, %v539_v15  ;;  %v469_v18 = vpop.f32.mrb[35].mxu0  ;;  %v541_v19 = vpop.f32.mrb[35].mxu1  ;;  %v559_v20 = vmax.f32 %v465_v10, 0.0  ;;  %v577_v21 = vmax.f32 %v537_v11, 0.0 }
 0x159   :  { %v560_v22 = vmax.f32 %v468_v16, 0.0  ;;  %v578_v23 = vmax.f32 %v540_v17, 0.0 }
 0x15b   :  { %v931_v24 = vpack.c.bf16 %v560_v22, %v559_v20  ;;  %v976_v25 = vpack.c.bf16 %v578_v23, %v577_v21 }
 0x15d   :  { %985 = vst [vmem:[%s1405_s3 + $0x40] sm:$0xff] %v931_v24   ;;  %994 = vst [vmem:[%s1405_s3 + $0x88] sm:$0xff] %v976_v25  }

// kernel: categorical_dueling_dqn_forward.5
= control target key start
LH: loop header
LB: loop body
LE: loop exit
PB: predicated region body
PF: predicated region fallthrough
CT: control target
= control target key end

     0   :  { %s937_s1 = inlined_call_operand.vmem [shape: bf16[512,128], index: 1, kind: input, shape index: {}]   ;;  %s938_s0 = inlined_call_operand.vmem [shape: bf16[50,512], index: 0, kind: input, shape index: {}]   ;;  %s939_s2 = inlined_call_operand.vmem [shape: f32[1,128], index: 2, kind: input, shape index: {}]   ;;  %s940_s3 = inlined_call_operand.vmem [shape: bf16[50,128], index: 3, kind: output, shape index: {}]  }
   0x1   :  { %v701_v0 = vld [vmem:[%s937_s1 + $0x40] sm:$0xff]   ;;  %v705_v4 = vld [vmem:[%s937_s1 + $0x48] sm:$0xff]   ;;  %v709_v8 = vld [vmem:[%s937_s1 + $0x50] sm:$0xff]  }
   0x2   :  { %v702_v1 = vld [vmem:[%s937_s1 + $0xc0] sm:$0xff]   ;;  %621 = vmatprep.subr.bf16.mxu0 %v701_v0  ;;  %v706_v5 = vld [vmem:[%s937_s1 + $0xc8] sm:$0xff]   ;;  %v710_v9 = vld [vmem:[%s937_s1 + $0xd0] sm:$0xff]  }
   0x3   :  { %v703_v2 = vld [vmem:[%s937_s1] sm:$0xff]   ;;  %661 = vmatprep.subr.bf16.mxu1 %v702_v1  ;;  %v707_v6 = vld [vmem:[%s937_s1 + $0x8] sm:$0xff]   ;;  %v711_v10 = vld [vmem:[%s937_s1 + $0x10] sm:$0xff]  }
   0x4   :  { %v704_v3 = vld [vmem:[%s937_s1 + $0x80] sm:$0xff]   ;;  %622 = vmatpush3.bf16.msra.mxu0 %v703_v2  ;;  %v708_v7 = vld [vmem:[%s937_s1 + $0x88] sm:$0xff]   ;;  %v712_v11 = vld [vmem:[%s937_s1 + $0x90] sm:$0xff]  }
   0x5   :  { %662 = vmatpush3.bf16.msra.mxu1 %v704_v3  ;;  %623 = vmatprep.subr.bf16.mxu0 %v705_v4  ;;  %v713_v12 = vld [vmem:[%s937_s1 + $0x58] sm:$0xff]   ;;  %v717_v16 = vld [vmem:[%s937_s1 + $0x60] sm:$0xff]   ;;  %v721_v20 = vld [vmem:[%s937_s1 + $0x68] sm:$0xff]  }
   0x6   :  { %663 = vmatprep.subr.bf16.mxu1 %v706_v5  ;;  %v714_v13 = vld [vmem:[%s937_s1 + $0xd8] sm:$0xff]   ;;  %v718_v17 = vld [vmem:[%s937_s1 + $0xe0] sm:$0xff]   ;;  %v722_v21 = vld [vmem:[%s937_s1 + $0xe8] sm:$0xff]  }
   0x7   :  { %v715_v14 = vld [vmem:[%s937_s1 + $0x18] sm:$0xff]   ;;  %v719_v18 = vld [vmem:[%s937_s1 + $0x20] sm:$0xff]   ;;  %v723_v22 = vld [vmem:[%s937_s1 + $0x28] sm:$0xff]  }
   0x8   :  { %624 = vmatpush3.bf16.msra.mxu0 %v707_v6  ;;  %v716_v15 = vld [vmem:[%s937_s1 + $0x98] sm:$0xff]   ;;  %v720_v19 = vld [vmem:[%s937_s1 + $0xa0] sm:$0xff]   ;;  %v724_v23 = vld [vmem:[%s937_s1 + $0xa8] sm:$0xff]  }
   0x9   :  { %664 = vmatpush3.bf16.msra.mxu1 %v708_v7  ;;  %625 = vmatprep.subr.bf16.mxu0 %v709_v8  ;;  %v725_v24 = vld [vmem:[%s937_s1 + $0x70] sm:$0xff]   ;;  %v729_v28 = vld [vmem:[%s937_s1 + $0x78] sm:$0xff]   ;;  %v27_v42 = vld [vmem:[%s938_s0 + $0x60] sm:$0x11] }
   0xa   :  { %665 = vmatprep.subr.bf16.mxu1 %v710_v9  ;;  %v726_v25 = vld [vmem:[%s937_s1 + $0xf0] sm:$0xff]   ;;  %v730_v29 = vld [vmem:[%s937_s1 + $0xf8] sm:$0xff]   ;;  %v28_v43 = vld [vmem:[%s938_s0 + $0x68] sm:$0x11]  ;;  %v555_v46 = vcombine.high %v27_v42, %v27_v42  ;;  %v554_v48 = vcombine.low %v27_v42, %v27_v42 }
   0xb   :  { %v727_v26 = vld [vmem:[%s937_s1 + $0x30] sm:$0xff]   ;;  %v731_v30 = vld [vmem:[%s937_s1 + $0x38] sm:$0xff]   ;;  %v557_v47 = vcombine.high %v28_v43, %v28_v43  ;;  %v556_v49 = vcombine.low %v28_v43, %v28_v43  ;;  %v916_v52 = vld [vmem:[%s939_s2] ss:$0 sm:$0xff] }
   0xc   :  { %626 = vmatpush3.bf16.msra.mxu0 %v711_v10  ;;  %v728_v27 = vld [vmem:[%s937_s1 + $0xb0] sm:$0xff]   ;;  %v732_v31 = vld [vmem:[%s937_s1 + $0xb8] sm:$0xff]  }
   0xd   :  { %666 = vmatpush3.bf16.msra.mxu1 %v712_v11  ;;  %627 = vmatprep.subr.bf16.mxu0 %v713_v12  ;;  %v733_v32 = vld [vmem:[%s938_s0] ss:$16 sps:$4 sm:$0xff]   ;;  %v735_v33 = vld [vmem:[%s938_s0 + $0x4] ss:$16 sps:$4 sm:$0xff]   ;;  %v736_v34 = vld [vmem:[%s938_s0 + $0x8] ss:$16 sps:$4 sm:$0xff]  }
   0xe   :  { %667 = vmatprep.subr.bf16.mxu1 %v714_v13  ;;  %v738_v35 = vld [vmem:[%s938_s0 + $0xc] ss:$16 sps:$4 sm:$0xff]   ;;  %398 = vmatprep.mubr.bf16.mxu0 %v735_v33  ;;  %v739_v36 = vld [vmem:[%s938_s0 + $0x24] ss:$16 sps:$4 sm:$0xff]   ;;  %v743_v38 = vld [vmem:[%s938_s0 + $0x20] ss:$16 sps:$4 sm:$0xff]  }
   0xf   :  { %462 = vmatprep.mubr.bf16.mxu1 %v738_v35  ;;  %v741_v37 = vld [vmem:[%s938_s0 + $0x2c] ss:$16 sps:$4 sm:$0xff]   ;;  %v744_v39 = vld [vmem:[%s938_s0 + $0x28] ss:$16 sps:$4 sm:$0xff]   ;;  %v745_v40 = vld [vmem:[%s938_s0 + $0x44] ss:$16 sps:$4 sm:$0xff]  }
  0x10   :  { %628 = vmatpush3.bf16.msra.mxu0 %v715_v14  ;;  %v747_v41 = vld [vmem:[%s938_s0 + $0x4c] ss:$16 sps:$4 sm:$0xff]   ;;  %v749_v44 = vld [vmem:[%s938_s0 + $0x40] ss:$16 sps:$4 sm:$0xff]   ;;  %v750_v45 = vld [vmem:[%s938_s0 + $0x48] ss:$16 sps:$4 sm:$0xff]  }
  0x11   :  { %668 = vmatpush3.bf16.msra.mxu1 %v716_v15  ;;  %629 = vmatprep.subr.bf16.mxu0 %v717_v16 }
  0x12   :  { %669 = vmatprep.subr.bf16.mxu1 %v718_v17 }
  0x14   :  { %630 = vmatpush3.bf16.msra.mxu0 %v719_v18 }
  0x15   :  { %670 = vmatpush3.bf16.msra.mxu1 %v720_v19  ;;  %631 = vmatprep.subr.bf16.mxu0 %v721_v20 }
  0x16   :  { %671 = vmatprep.subr.bf16.mxu1 %v722_v21 }
  0x18   :  { %632 = vmatpush3.bf16.msra.mxu0 %v723_v22 }
  0x19   :  { %672 = vmatpush3.bf16.msra.mxu1 %v724_v23  ;;  %633 = vmatprep.subr.bf16.mxu0 %v725_v24 }
  0x1a   :  { %673 = vmatprep.subr.bf16.mxu1 %v726_v25 }
  0x1c   :  { %634 = vmatpush3.bf16.msra.mxu0 %v727_v26 }
  0x1d   :  { %674 = vmatpush3.bf16.msra.mxu1 %v728_v27  ;;  %635 = vmatprep.subr.bf16.mxu0 %v729_v28 }
  0x1e   :  { %675 = vmatprep.subr.bf16.mxu1 %v730_v29 }
  0x20   :  { %636 = vmatpush3.bf16.msra.mxu0 %v731_v30 }
  0x21   :  { %676 = vmatpush3.bf16.msra.mxu1 %v732_v31 }
  0x23   :  { %399 = vmatmul.mubr.bf16.vlgmr.msra.gmra.mrb[0].mxu0 %v733_v32 }
  0x24   :  { %463 = vmatmul.mubr.bf16.vlgmr.msra.gmra.mrb[0].mxu1 %v736_v34  ;;  %406 = vmatprep.mubr.bf16.mxu0 %v739_v36 }
  0x25   :  { %470 = vmatprep.mubr.bf16.mxu1 %v741_v37 }
  0x2b   :  { %407 = vmatmul.mubr.bf16.gmra.mrb[4].mxu0 %v743_v38 }
  0x2c   :  { %471 = vmatmul.mubr.bf16.gmra.mrb[4].mxu1 %v744_v39  ;;  %414 = vmatprep.mubr.bf16.mxu0 %v745_v40 }
  0x2d   :  { %478 = vmatprep.mubr.bf16.mxu1 %v747_v41 }
  0x33   :  { %415 = vmatmul.mubr.bf16.gmra.mrb[8].mxu0 %v749_v44 }
  0x34   :  { %479 = vmatmul.mubr.bf16.gmra.mrb[8].mxu1 %v750_v45  ;;  %422 = vmatprep.mubr.bf16.mxu0 %v555_v46 }
  0x35   :  { %486 = vmatprep.mubr.bf16.mxu1 %v557_v47 }
  0x3b   :  { %423 = vmatmul.mubr.bf16.gmra.mrb[12].mxu0 %v554_v48 }
  0x3c   :  { %487 = vmatmul.mubr.bf16.gmra.mrb[12].mxu1 %v556_v49 }
  0xf6   :  { %v637_v50 = vpop.f32.mrb[0].mxu0 }
  0xf7   :  { %v677_v51 = vpop.f32.mrb[0].mxu1  ;;  %v638_v53 = vpop.f32.mrb[1].mxu0 }
  0xf8   :  { %v639_v54 = vadd.f32 %v638_v53, %v637_v50  ;;  %v678_v55 = vpop.f32.mrb[1].mxu1  ;;  %v640_v56 = vpop.f32.mrb[2].mxu0 }
  0xf9   :  { %v679_v57 = vadd.f32 %v678_v55, %v677_v51  ;;  %v680_v58 = vpop.f32.mrb[2].mxu1  ;;  %v641_v59 = vpop.f32.mrb[3].mxu0 }
  0xfa   :  { %v401_v60 = vadd.f32 %v639_v54, %v916_v52  ;;  %v642_v61 = vadd.f32 %v641_v59, %v640_v56  ;;  %v681_v62 = vpop.f32.mrb[3].mxu1 }
  0xfb   :  { %v682_v63 = vadd.f32 %v681_v62, %v680_v58 }
  0xfc   :  { %v465_v0 = vadd.f32 %v679_v57, %v401_v60  ;;  %v404_v1 = vadd.f32 %v642_v61, %v916_v52 }
  0xfe   :  { %v468_v2 = vadd.f32 %v682_v63, %v404_v1  ;;  %v643_v3 = vpop.f32.mrb[4].mxu0  ;;  %v494_v6 = vmax.f32 %v465_v0, 0.0 }
  0xff   :  { %v683_v4 = vpop.f32.mrb[4].mxu1  ;;  %v644_v5 = vpop.f32.mrb[5].mxu0 }
 0x100   :  { %v495_v7 = vmax.f32 %v468_v2, 0.0  ;;  %v645_v8 = vadd.f32 %v644_v5, %v643_v3  ;;  %v684_v9 = vpop.f32.mrb[5].mxu1  ;;  %v646_v10 = vpop.f32.mrb[6].mxu0 }
 0x101   :  { %v685_v11 = vadd.f32 %v684_v9, %v683_v4  ;;  %v686_v12 = vpop.f32.mrb[6].mxu1  ;;  %v647_v13 = vpop.f32.mrb[7].mxu0 }
 0x102   :  { %v607_v14 = vpack.c.bf16 %v495_v7, %v494_v6  ;;  %v409_v15 = vadd.f32 %v645_v8, %v916_v52  ;;  %v648_v16 = vadd.f32 %v647_v13, %v646_v10  ;;  %v687_v17 = vpop.f32.mrb[7].mxu1 }
 0x103   :  { %v688_v18 = vadd.f32 %v687_v17, %v686_v12 }
 0x104   :  { %608 = vst [vmem:[%s940_s3] sm:$0xff] %v607_v14   ;;  %v473_v19 = vadd.f32 %v685_v11, %v409_v15  ;;  %v412_v20 = vadd.f32 %v648_v16, %v916_v52 }
 0x106   :  { %v476_v21 = vadd.f32 %v688_v18, %v412_v20  ;;  %v649_v22 = vpop.f32.mrb[8].mxu0  ;;  %v496_v25 = vmax.f32 %v473_v19, 0.0 }
 0x107   :  { %v689_v23 = vpop.f32.mrb[8].mxu1  ;;  %v650_v24 = vpop.f32.mrb[9].mxu0 }
 0x108   :  { %v497_v26 = vmax.f32 %v476_v21, 0.0  ;;  %v651_v27 = vadd.f32 %v650_v24, %v649_v22  ;;  %v690_v28 = vpop.f32.mrb[9].mxu1  ;;  %v652_v29 = vpop.f32.mrb[10].mxu0 }
 0x109   :  { %v691_v30 = vadd.f32 %v690_v28, %v689_v23  ;;  %v692_v31 = vpop.f32.mrb[10].mxu1  ;;  %v653_v32 = vpop.f32.mrb[11].mxu0 }
 0x10a   :  { %v612_v33 = vpack.c.bf16 %v497_v26, %v496_v25  ;;  %v417_v34 = vadd.f32 %v651_v27, %v916_v52  ;;  %v654_v35 = vadd.f32 %v653_v32, %v652_v29  ;;  %v693_v36 = vpop.f32.mrb[11].mxu1 }
 0x10b   :  { %v694_v37 = vadd.f32 %v693_v36, %v692_v31 }
 0x10c   :  { %619 = vst [vmem:[%s940_s3 + $0x8] sm:$0xff] %v612_v33   ;;  %v481_v38 = vadd.f32 %v691_v30, %v417_v34  ;;  %v420_v39 = vadd.f32 %v654_v35, %v916_v52 }
 0x10e   :  { %v484_v40 = vadd.f32 %v694_v37, %v420_v39  ;;  %v655_v41 = vpop.f32.mrb[12].mxu0  ;;  %v498_v44 = vmax.f32 %v481_v38, 0.0 }
 0x10f   :  { %v695_v42 = vpop.f32.mrb[12].mxu1  ;;  %v656_v43 = vpop.f32.mrb[13].mxu0 }
 0x110   :  { %v499_v45 = vmax.f32 %v484_v40, 0.0  ;;  %v657_v46 = vadd.f32 %v656_v43, %v655_v41  ;;  %v696_v47 = vpop.f32.mrb[13].mxu1  ;;  %v658_v48 = vpop.f32.mrb[14].mxu0 }
 0x111   :  { %v697_v49 = vadd.f32 %v696_v47, %v695_v42  ;;  %v698_v50 = vpop.f32.mrb[14].mxu1  ;;  %v659_v51 = vpop.f32.mrb[15].mxu0 }
 0x112   :  { %v617_v53 = vpack.c.bf16 %v499_v45, %v498_v44  ;;  %v425_v54 = vadd.f32 %v657_v46, %v916_v52  ;;  %v699_v55 = vpop.f32.mrb[15].mxu1 }
 0x114   :  { %620 = vst [vmem:[%s940_s3 + $0x10] sm:$0xff] %v617_v53   ;;  %v489_v56 = vadd.f32 %v697_v49, %v425_v54 }
 0x116   :  { %v500_v57 = vmax.f32 %v489_v56, 0.0 }
 0x118   :  { %v603_v58 = vpack.c.bf16 %v500_v57, %v500_v57 }
 0x11a   :  { %536 = vst [vmem:[%s940_s3 + $0x18] sm:$0x1] %v603_v58 }

// kernel: categorical_dueling_dqn_forward.6
= control target key start
LH: loop header
LB: loop body
LE: loop exit
PB: predicated region body
PF: predicated region fallthrough
CT: control target
= control target key end

     0   :  { %vm361_vm0 = vcmask 523264   ;;  %s878_s1 = inlined_call_operand.vmem [shape: bf16[576,128], index: 1, kind: input, shape index: {}]   ;;  %s879_s0 = inlined_call_operand.vmem [shape: bf16[18,576], index: 0, kind: input, shape index: {}]   ;;  %s880_s2 = inlined_call_operand.vmem [shape: f32[1,128], index: 2, kind: input, shape index: {}]   ;;  %s881_s3 = inlined_call_operand.vmem [shape: bf16[18,128], index: 3, kind: output, shape index: {}]  }
   0x1   :  { %v669_v0 = vld [vmem:[%s878_s1 + $0x40] sm:$0xff]   ;;  %v673_v4 = vld [vmem:[%s878_s1 + $0x48] sm:$0xff]   ;;  %v677_v8 = vld [vmem:[%s878_s1 + $0x50] sm:$0xff]  }
   0x2   :  { %v670_v1 = vld [vmem:[%s878_s1] sm:$0xff]   ;;  %595 = vmatprep.subr.bf16.mxu0 %v669_v0  ;;  %v674_v5 = vld [vmem:[%s878_s1 + $0x8] sm:$0xff]   ;;  %v678_v9 = vld [vmem:[%s878_s1 + $0x10] sm:$0xff]  }
   0x3   :  { %v671_v2 = vld [vmem:[%s878_s1 + $0xc0] sm:$0xff]   ;;  %596 = vmatpush3.bf16.msra.mxu0 %v670_v1  ;;  %v675_v6 = vld [vmem:[%s878_s1 + $0xc8] sm:$0xff]   ;;  %v679_v10 = vld [vmem:[%s878_s1 + $0xd0] sm:$0xff]  }
   0x4   :  { %v672_v3 = vld [vmem:[%s878_s1 + $0x80] sm:$0xff]   ;;  %623 = vmatprep.subr.bf16.mxu1 %v671_v2  ;;  %597 = vmatprep.subr.bf16.mxu0 %v673_v4  ;;  %v676_v7 = vld [vmem:[%s878_s1 + $0x88] sm:$0xff]   ;;  %v680_v11 = vld [vmem:[%s878_s1 + $0x90] sm:$0xff]  }
   0x5   :  { %624 = vmatpush3.bf16.msra.mxu1 %v672_v3  ;;  %v681_v12 = vld [vmem:[%s878_s1 + $0x58] sm:$0xff]   ;;  %v685_v16 = vld [vmem:[%s878_s1 + $0x60] sm:$0xff]   ;;  %v689_v20 = vld [vmem:[%s878_s1 + $0x68] sm:$0xff]  }
   0x6   :  { %625 = vmatprep.subr.bf16.mxu1 %v675_v6  ;;  %v682_v13 = vld [vmem:[%s878_s1 + $0x18] sm:$0xff]   ;;  %v686_v17 = vld [vmem:[%s878_s1 + $0x20] sm:$0xff]   ;;  %v690_v21 = vld [vmem:[%s878_s1 + $0x28] sm:$0xff]  }
   0x7   :  { %598 = vmatpush3.bf16.msra.mxu0 %v674_v5  ;;  %v683_v14 = vld [vmem:[%s878_s1 + $0xd8] sm:$0xff]   ;;  %v687_v18 = vld [vmem:[%s878_s1 + $0xe0] sm:$0xff]   ;;  %v691_v22 = vld [vmem:[%s878_s1 + $0xe8] sm:$0xff]  }
   0x8   :  { %599 = vmatprep.subr.bf16.mxu0 %v677_v8  ;;  %v684_v15 = vld [vmem:[%s878_s1 + $0x98] sm:$0xff]   ;;  %v688_v19 = vld [vmem:[%s878_s1 + $0xa0] sm:$0xff]   ;;  %v692_v23 = vld [vmem:[%s878_s1 + $0xa8] sm:$0xff]  }
   0x9   :  { %626 = vmatpush3.bf16.msra.mxu1 %v676_v7  ;;  %v693_v24 = vld [vmem:[%s878_s1 + $0x70] sm:$0xff]   ;;  %v697_v28 = vld [vmem:[%s878_s1 + $0x78] sm:$0xff]   ;;  %v704_v34 = vld [vmem:[%s878_s1 + $0x100] sm:$0xff]  }
   0xa   :  { %627 = vmatprep.subr.bf16.mxu1 %v679_v10  ;;  %v694_v25 = vld [vmem:[%s878_s1 + $0x30] sm:$0xff]   ;;  %v698_v29 = vld [vmem:[%s878_s1 + $0x38] sm:$0xff]   ;;  %v707_v36 = vld [vmem:[%s879_s0 + $0xc] ss:$20 sps:$4 sm:$0xff]  }
   0xb   :  { %600 = vmatpush3.bf16.msra.mxu0 %v678_v9  ;;  %v695_v26 = vld [vmem:[%s878_s1 + $0xf0] sm:$0xff]   ;;  %v699_v30 = vld [vmem:[%s878_s1 + $0xf8] sm:$0xff]   ;;  %v708_v37 = vld [vmem:[%s878_s1 + $0x108] sm:$0xff]   ;;  %448 = vmatprep.mubr.bf16.mxu1 %v707_v36 }
   0xc   :  { %601 = vmatprep.subr.bf16.mxu0 %v681_v12  ;;  %v696_v27 = vld [vmem:[%s878_s1 + $0xb0] sm:$0xff]   ;;  %v702_v32 = vld [vmem:[%s879_s0 + $0x4] ss:$20 sps:$4 sm:$0xff]   ;;  %v705_v35 = vld [vmem:[%s879_s0 + $0x8] ss:$20 sps:$4 sm:$0xff]  }
   0xd   :  { %628 = vmatpush3.bf16.msra.mxu1 %v680_v11  ;;  %v700_v31 = vld [vmem:[%s879_s0] ss:$20 sps:$4 sm:$0xff]   ;;  %v703_v33 = vld [vmem:[%s878_s1 + $0xb8] sm:$0xff]   ;;  %400 = vmatprep.mubr.bf16.mxu0 %v702_v32  ;;  %v21_v38 = vld [vmem:[%s879_s0 + $0x28] sm:$0x11] }
   0xe   :  { %629 = vmatprep.subr.bf16.mxu1 %v683_v14  ;;  %v542_v39 = vcombine.high %v21_v38, %v21_v38  ;;  %v711_v40 = vld [vmem:[%s878_s1 + $0x110] sm:$0xff]   ;;  %v541_v42 = vcombine.low %v21_v38, %v21_v38  ;;  %v714_v46 = vld [vmem:[%s878_s1 + $0x118] sm:$0xff]   ;;  %v535_v49 = vld [vmem:[%s880_s2] ss:$0 sm:$0xff] }
   0xf   :  { %602 = vmatpush3.bf16.msra.mxu0 %v682_v13  ;;  %v22_v41 = vld [vmem:[%s879_s0 + $0x30] sm:$0x11]  ;;  %v716_v47 = vld [vmem:[%s879_s0 + $0x38] ss:$0 sps:$4 sm:$0x11]  }
  0x10   :  { %603 = vmatprep.subr.bf16.mxu0 %v685_v16  ;;  %v544_v43 = vcombine.high %v22_v41, %v22_v41  ;;  %v715_v44 = vld [vmem:[%s879_s0 + $0x10] ss:$20 sps:$4 sm:$0xff]   ;;  %v543_v45 = vcombine.low %v22_v41, %v22_v41 }
  0x11   :  { %630 = vmatpush3.bf16.msra.mxu1 %v684_v15 }
  0x12   :  { %631 = vmatprep.subr.bf16.mxu1 %v687_v18 }
  0x13   :  { %604 = vmatpush3.bf16.msra.mxu0 %v686_v17 }
  0x14   :  { %605 = vmatprep.subr.bf16.mxu0 %v689_v20 }
  0x15   :  { %632 = vmatpush3.bf16.msra.mxu1 %v688_v19 }
  0x16   :  { %633 = vmatprep.subr.bf16.mxu1 %v691_v22 }
  0x17   :  { %606 = vmatpush3.bf16.msra.mxu0 %v690_v21 }
  0x18   :  { %607 = vmatprep.subr.bf16.mxu0 %v693_v24 }
  0x19   :  { %634 = vmatpush3.bf16.msra.mxu1 %v692_v23 }
  0x1a   :  { %635 = vmatprep.subr.bf16.mxu1 %v695_v26 }
  0x1b   :  { %608 = vmatpush3.bf16.msra.mxu0 %v694_v25 }
  0x1c   :  { %609 = vmatprep.subr.bf16.mxu0 %v697_v28 }
  0x1d   :  { %636 = vmatpush3.bf16.msra.mxu1 %v696_v27 }
  0x1e   :  { %637 = vmatprep.subr.bf16.mxu1 %v699_v30 }
  0x1f   :  { %610 = vmatpush3.bf16.msra.mxu0 %v698_v29 }
  0x20   :  { %657 = vmatprep.subr.bf16.mxu0 %v704_v34 }
  0x21   :  { %638 = vmatpush3.bf16.msra.mxu1 %v703_v33 }
  0x22   :  { %401 = vmatmul.mubr.bf16.vlgmr.msra.gmra.mrb[0].mxu0 %v700_v31 }
  0x23   :  { %658 = vmatpush3.bf16.msra.mxu0 %v704_v34  ;;  %408 = vmatprep.mubr.bf16.mxu0 %v542_v39 }
  0x24   :  { %449 = vmatmul.mubr.bf16.vlgmr.msra.gmra.mrb[0].mxu1 %v705_v35  ;;  %659 = vmatprep.subr.bf16.mxu0 %v708_v37 }
  0x25   :  { %456 = vmatprep.mubr.bf16.mxu1 %v544_v43 }
  0x27   :  { %660 = vmatpush3.bf16.msra.mxu0 %v708_v37 }
  0x28   :  { %661 = vmatprep.subr.bf16.mxu0 %v711_v40 }
  0x2a   :  { %409 = vmatmul.mubr.bf16.gmra.mrb[4].mxu0 %v541_v42 }
  0x2b   :  { %665 = vmatprep.mubr.msk.bf16.mxu0 %vm361_vm0, %v715_v44  ;;  %662 = vmatpush3.bf16.msra.mxu0 %v711_v40 }
  0x2c   :  { %457 = vmatmul.mubr.bf16.gmra.mrb[4].mxu1 %v543_v45  ;;  %663 = vmatprep.subr.bf16.mxu0 %v714_v46 }
  0x2f   :  { %664 = vmatpush3.bf16.msra.mxu0 %v714_v46 }
  0x32   :  { %666 = vmatmul.mubr.msk.bf16.vlgmr.msra.gmra.mrb[8].mxu0 %vm361_vm0, %v716_v47 }
  0xf5   :  { %v611_v48 = vpop.f32.mrb[0].mxu0 }
  0xf6   :  { %v612_v50 = vpop.f32.mrb[1].mxu0 }
  0xf7   :  { %v613_v51 = vadd.f32 %v612_v50, %v611_v48  ;;  %v614_v52 = vpop.f32.mrb[2].mxu0  ;;  %v639_v53 = vpop.f32.mrb[0].mxu1 }
  0xf8   :  { %v615_v54 = vpop.f32.mrb[3].mxu0  ;;  %v640_v57 = vpop.f32.mrb[1].mxu1 }
  0xf9   :  { %v403_v55 = vadd.f32 %v613_v51, %v535_v49  ;;  %v616_v56 = vadd.f32 %v615_v54, %v614_v52  ;;  %v641_v58 = vadd.f32 %v640_v57, %v639_v53  ;;  %v642_v59 = vpop.f32.mrb[2].mxu1 }
  0xfa   :  { %v643_v61 = vpop.f32.mrb[3].mxu1 }
  0xfb   :  { %v406_v60 = vadd.f32 %v616_v56, %v535_v49  ;;  %v644_v62 = vadd.f32 %v643_v61, %v642_v59  ;;  %v451_v63 = vadd.f32 %v641_v58, %v403_v55 }
  0xfd   :  { %v617_v0 = vpop.f32.mrb[4].mxu0  ;;  %v454_v2 = vadd.f32 %v644_v62, %v406_v60 }
  0xfe   :  { %v618_v1 = vpop.f32.mrb[5].mxu0 }
  0xff   :  { %v619_v3 = vadd.f32 %v618_v1, %v617_v0  ;;  %v620_v4 = vpop.f32.mrb[6].mxu0  ;;  %v645_v5 = vpop.f32.mrb[4].mxu1 }
 0x100   :  { %v621_v6 = vpop.f32.mrb[7].mxu0  ;;  %v646_v8 = vpop.f32.mrb[5].mxu1 }
 0x101   :  { %v411_v7 = vadd.f32 %v619_v3, %v535_v49  ;;  %v647_v9 = vadd.f32 %v646_v8, %v645_v5  ;;  %v648_v10 = vpop.f32.mrb[6].mxu1 }
 0x102   :  { %v649_v11 = vpop.f32.mrb[7].mxu1 }
 0x103   :  { %v459_v12 = vadd.f32 %v647_v9, %v411_v7 }
 0x105   :  { %v667_v13 = vpop.f32.mrb[8].mxu0 }
 0x106   :  { %v507_v14 = vadd.f32 %v667_v13, %v459_v12  ;;  %v498_v15 = vpop.f32.mrb[9].mxu0 }
 0x107   :  { %v499_v16 = vadd.f32 %v498_v15, %v451_v63  ;;  %v668_v17 = vpop.f32.mrb[10].mxu0 }
 0x108   :  { %v514_v18 = vmax.f32 %v507_v14, 0.0  ;;  %v501_v19 = vpop.f32.mrb[11].mxu0 }
 0x109   :  { %v502_v20 = vadd.f32 %v501_v19, %v454_v2  ;;  %v512_v22 = vmax.f32 %v499_v16, 0.0 }
 0x10a   :  { %v589_v21 = vpack.c.bf16 %v514_v18, %v514_v18 }
 0x10b   :  { %v513_v23 = vmax.f32 %v502_v20, 0.0 }
 0x10c   :  { %530 = vst [vmem:[%s881_s3 + $0x8] sm:$0x1] %v589_v21 }
 0x10d   :  { %v593_v24 = vpack.c.bf16 %v513_v23, %v512_v22 }
 0x10f   :  { %594 = vst [vmem:[%s881_s3] sm:$0xff] %v593_v24  }

// kernel: categorical_dueling_dqn_forward.7
= control target key start
LH: loop header
LB: loop body
LE: loop exit
PB: predicated region body
PF: predicated region fallthrough
CT: control target
= control target key end

     0   :  { %v324_v0 = vlaneseq  ;;  %v9557_v4 = vmov 0   ;;  %v9558_v5 = vmov 1966171168   ;;  %vm1848_vm0 = vcmask 523264   ;;  %s12966_s1 = inlined_call_operand.vmem [shape: bf16[576,1024], index: 1, kind: input, shape index: {}]   ;;  %s12967_s0 = inlined_call_operand.vmem [shape: bf16[2,576], index: 0, kind: input, shape index: {}]   ;;  %s12968_s3 = inlined_call_operand.vmem [shape: bf16[1024,1024], index: 3, kind: input, shape index: {}]   ;;  %s12969_s2 = inlined_call_operand.vmem [shape: f32[1,1024], index: 2, kind: input, shape index: {}]   ;;  %s12970_s5 = inlined_call_operand.vmem [shape: bf16[512,768], index: 5, kind: input, shape index: {}]   ;;  %s12971_s4 = inlined_call_operand.vmem [shape: f32[1,1024], index: 4, kind: input, shape index: {}]   ;;  %s12972_s7 = inlined_call_operand.vmem [shape: bf16[512,128], index: 7, kind: input, shape index: {}]   ;;  %s12973_s6 = inlined_call_operand.vmem [shape: f32[1,768], index: 6, kind: input, shape index: {}]   ;;  %s12974_s8 = inlined_call_operand.vmem [shape: f32[1,128], index: 8, kind: input, shape index: {}]   ;;  %s12975_s9 = inlined_call_operand.vmem [shape: f32[2,768], index: 9, kind: output, shape index: {}]  }
   0x1   :  { %v34_v1 = vld [vmem:[%s12966_s1] sm:$0xff]  ;;  %1966 = vmatprep.mubr.bf16.mxu1 %v9557_v4  ;;  %v367_v6 = vunpack.c.l.s4 %v9558_v5  ;;  %v35_v42 = vld [vmem:[%s12966_s1 + $0x8] sm:$0xff]  ;;  %vm7933_vm2 = vcmask 1041408  }
   0x2   :  { %v38_v2 = vld [vmem:[%s12966_s1 + $0x20] sm:$0xff]  ;;  %v9638_v18 = vshrl.u32 %v324_v0, 7  ;;  %v39_v43 = vld [vmem:[%s12966_s1 + $0x28] sm:$0xff] }
   0x3   :  { %v290_v3 = vld [vmem:[%s12966_s1 + $0x800] sm:$0xff]  ;;  %v8026_v7 = vcombine.high %v34_v1, %v38_v2  ;;  %v8025_v9 = vcombine.low %v34_v1, %v38_v2  ;;  %v368_v23 = vunpack.c.0.s8 %v367_v6  ;;  %v8028_v49 = vcombine.high %v35_v42, %v39_v43  ;;  %v43_v53 = vld [vmem:[%s12966_s1 + $0x48] sm:$0xff] }
   0x4   :  { %v294_v8 = vld [vmem:[%s12966_s1 + $0x820] sm:$0xff]  ;;  %v47_v54 = vld [vmem:[%s12966_s1 + $0x68] sm:$0xff]  ;;  %v8027_v57 = vcombine.low %v35_v42, %v39_v43 }
   0x5   :  { %v42_v10 = vld [vmem:[%s12966_s1 + $0x40] sm:$0xff]  ;;  %v8282_v12 = vcombine.high %v290_v3, %v294_v8  ;;  %v8281_v13 = vcombine.low %v290_v3, %v294_v8  ;;  %1852 = vmatprep.subr.bf16.mxu0 %v8026_v7  ;;  %v9659_v31 = vsub.s32 %v368_v23, %v9638_v18  ;;  %v8036_v59 = vcombine.high %v43_v53, %v47_v54  ;;  %v51_v62 = vld [vmem:[%s12966_s1 + $0x88] sm:$0xff] }
   0x6   :  { %v46_v11 = vld [vmem:[%s12966_s1 + $0x60] sm:$0xff]  ;;  %1853 = vmatpush1.bf16.msra.mxu0 %v8025_v9  ;;  %v55_v63 = vld [vmem:[%s12966_s1 + $0xa8] sm:$0xff]  ;;  %v8035_v2 = vcombine.low %v43_v53, %v47_v54 }
   0x7   :  { %v8034_v14 = vcombine.high %v42_v10, %v46_v11  ;;  %v298_v15 = vld [vmem:[%s12966_s1 + $0x840] sm:$0xff]  ;;  %1934 = vmatprep.subr.bf16.mxu1 %v8282_v12  ;;  %v8033_v24 = vcombine.low %v42_v10, %v46_v11  ;;  %v8044_v5 = vcombine.high %v51_v62, %v55_v63  ;;  %v59_v8 = vld [vmem:[%s12966_s1 + $0xc8] sm:$0xff]  ;;  %v8043_v11 = vcombine.low %v51_v62, %v55_v63 }
   0x8   :  { %v302_v16 = vld [vmem:[%s12966_s1 + $0x860] sm:$0xff]  ;;  %1935 = vmatpush1.bf16.msra.mxu1 %v8281_v13  ;;  %v63_v9 = vld [vmem:[%s12966_s1 + $0xe8] sm:$0xff] }
   0x9   :  { %v50_v17 = vld [vmem:[%s12966_s1 + $0x80] sm:$0xff]  ;;  %v8290_v19 = vcombine.high %v298_v15, %v302_v16  ;;  %1854 = vmatprep.subr.bf16.mxu0 %v8034_v14  ;;  %v8289_v25 = vcombine.low %v298_v15, %v302_v16  ;;  %v8052_v13 = vcombine.high %v59_v8, %v63_v9  ;;  %v67_v16 = vld [vmem:[%s12966_s1 + $0x108] sm:$0xff] }
   0xa   :  { %v54_v20 = vld [vmem:[%s12966_s1 + $0xa0] sm:$0xff]  ;;  %1855 = vmatpush1.bf16.msra.mxu0 %v8033_v24  ;;  %v91_v43 = vld [vmem:[%s12966_s1 + $0x1c8] sm:$0xff] }
   0xb   :  { %v306_v21 = vld [vmem:[%s12966_s1 + $0x880] sm:$0xff]  ;;  %v8042_v26 = vcombine.high %v50_v17, %v54_v20  ;;  %1936 = vmatprep.subr.bf16.mxu1 %v8290_v19  ;;  %v8041_v34 = vcombine.low %v50_v17, %v54_v20  ;;  %v71_v17 = vld [vmem:[%s12966_s1 + $0x128] sm:$0xff]  ;;  %v8051_v20 = vcombine.low %v59_v8, %v63_v9 }
   0xc   :  { %v310_v22 = vld [vmem:[%s12966_s1 + $0x8a0] sm:$0xff]  ;;  %1937 = vmatpush1.bf16.msra.mxu1 %v8289_v25  ;;  %v75_v25 = vld [vmem:[%s12966_s1 + $0x148] sm:$0xff] }
   0xd   :  { %v8298_v27 = vcombine.high %v306_v21, %v310_v22  ;;  %v58_v28 = vld [vmem:[%s12966_s1 + $0xc0] sm:$0xff]  ;;  %1856 = vmatprep.subr.bf16.mxu0 %v8042_v26  ;;  %v8297_v37 = vcombine.low %v306_v21, %v310_v22  ;;  %v8060_v22 = vcombine.high %v67_v16, %v71_v17  ;;  %v79_v26 = vld [vmem:[%s12966_s1 + $0x168] sm:$0xff] }
   0xe   :  { %v62_v29 = vld [vmem:[%s12966_s1 + $0xe0] sm:$0xff]  ;;  %1857 = vmatpush1.bf16.msra.mxu0 %v8041_v34  ;;  %v83_v34 = vld [vmem:[%s12966_s1 + $0x188] sm:$0xff] }
   0xf   :  { %v33_v30 = vld [vmem:[%s12967_s0] sm:$0x1f]  ;;  %v8050_v38 = vcombine.high %v58_v28, %v62_v29  ;;  %1938 = vmatprep.subr.bf16.mxu1 %v8298_v27  ;;  %v8049_v44 = vcombine.low %v58_v28, %v62_v29  ;;  %v8059_v28 = vcombine.low %v67_v16, %v71_v17  ;;  %v103_v53 = vld [vmem:[%s12966_s1 + $0x228] sm:$0xff] }
  0x10   :  { %v314_v32 = vld [vmem:[%s12966_s1 + $0x8c0] sm:$0xff]  ;;  %v365_v35 = vcombine.high %v33_v30, %v33_v30  ;;  %v9668_v36 = vrot.slane %v33_v30, %v9659_v31  ;;  %1939 = vmatpush1.bf16.msra.mxu1 %v8297_v37  ;;  %v8068_v30 = vcombine.high %v75_v25, %v79_v26  ;;  %v111_v62 = vld [vmem:[%s12966_s1 + $0x268] sm:$0xff] }
  0x11   :  { %v318_v33 = vld [vmem:[%s12966_s1 + $0x8e0] sm:$0xff]  ;;  %1858 = vmatprep.subr.bf16.mxu0 %v8050_v38  ;;  %v8067_v38 = vcombine.low %v75_v25, %v79_v26  ;;  %v119_v8 = vld [vmem:[%s12966_s1 + $0x2a8] sm:$0xff] }
  0x12   :  { %v8306_v39 = vcombine.high %v314_v32, %v318_v33  ;;  %v66_v40 = vld [vmem:[%s12966_s1 + $0x100] sm:$0xff]  ;;  %v379_v45 = vrot.slane %v365_v35, %v9659_v31  ;;  %v380_v46 = vcombine.high %v9668_v36, %v9668_v36  ;;  %v8305_v47 = vcombine.low %v314_v32, %v318_v33  ;;  %1859 = vmatpush1.bf16.msra.mxu0 %v8049_v44  ;;  %v87_v35 = vld [vmem:[%s12966_s1 + $0x1a8] sm:$0xff] }
  0x13   :  { %v70_v41 = vld [vmem:[%s12966_s1 + $0x120] sm:$0xff]  ;;  %v95_v44 = vld [vmem:[%s12966_s1 + $0x1e8] sm:$0xff] }
  0x14   :  { %v8058_v48 = vcombine.high %v66_v40, %v70_v41  ;;  %1940 = vmatprep.subr.bf16.mxu1 %v8306_v39  ;;  %v74_v50 = vld [vmem:[%s12966_s1 + $0x140] sm:$0xff]  ;;  %v9692_v52 = vrot.slane %v380_v46, %v9659_v31  ;;  %v9701_v55 = vrot.slane %v379_v45, %v9659_v31  ;;  %v8057_v56 = vcombine.low %v66_v40, %v70_v41  ;;  %v127_v16 = vld [vmem:[%s12966_s1 + $0x2e8] sm:$0xff] }
  0x15   :  { %v78_v51 = vld [vmem:[%s12966_s1 + $0x160] sm:$0xff]  ;;  %1941 = vmatpush1.bf16.msra.mxu1 %v8305_v47  ;;  %v8076_v40 = vcombine.high %v83_v34, %v87_v35  ;;  %v8075_v46 = vcombine.low %v83_v34, %v87_v35  ;;  %v135_v25 = vld [vmem:[%s12966_s1 + $0x328] sm:$0xff] }
  0x16   :  { %1884 = vmatprep.mubr.bf16.mxu0 %v9692_v52  ;;  %1860 = vmatprep.subr.bf16.mxu0 %v8058_v48  ;;  %v8066_v58 = vcombine.high %v74_v50, %v78_v51  ;;  %v82_v60 = vld [vmem:[%s12966_s1 + $0x180] sm:$0xff]  ;;  %v8065_v1 = vcombine.low %v74_v50, %v78_v51  ;;  %v8084_v48 = vcombine.high %v91_v43, %v95_v44  ;;  %v99_v51 = vld [vmem:[%s12966_s1 + $0x208] sm:$0xff] }
  0x17   :  { %1975 = vmatprep.subr.bf16.mxu1 %v8028_v49  ;;  %v86_v61 = vld [vmem:[%s12966_s1 + $0x1a0] sm:$0xff]  ;;  %1861 = vmatpush1.bf16.msra.mxu0 %v8057_v56  ;;  %v8083_v56 = vcombine.low %v91_v43, %v95_v44  ;;  %v139_v34 = vld [vmem:[%s12966_s1 + $0x348] sm:$0xff] }
  0x18   :  { %8313 = vmatmul.mubr.msk.bf16.vlgmr.msra.gmra.mrb[0].mxu1 %vm1848_vm0, %v9701_v55  ;;  %1862 = vmatprep.subr.bf16.mxu0 %v8066_v58  ;;  %v8074_v3 = vcombine.high %v82_v60, %v86_v61  ;;  %v90_v6 = vld [vmem:[%s12966_s1 + $0x1c0] sm:$0xff]  ;;  %v8073_v10 = vcombine.low %v82_v60, %v86_v61  ;;  %v8092_v58 = vcombine.high %v99_v51, %v103_v53  ;;  %v107_v61 = vld [vmem:[%s12966_s1 + $0x248] sm:$0xff] }
  0x19   :  { %1976 = vmatpush1.bf16.msra.mxu1 %v8027_v57  ;;  %v94_v7 = vld [vmem:[%s12966_s1 + $0x1e0] sm:$0xff]  ;;  %2007 = vmatprep.mubr.bf16.mxu1 %v9692_v52  ;;  %v143_v35 = vld [vmem:[%s12966_s1 + $0x368] sm:$0xff] }
  0x1a   :  { %1977 = vmatprep.subr.bf16.mxu1 %v8036_v59  ;;  %v8082_v12 = vcombine.high %v90_v6, %v94_v7  ;;  %v98_v14 = vld [vmem:[%s12966_s1 + $0x200] sm:$0xff]  ;;  %v8081_v19 = vcombine.low %v90_v6, %v94_v7  ;;  %v115_v7 = vld [vmem:[%s12966_s1 + $0x288] sm:$0xff] }
  0x1b   :  { %1863 = vmatpush1.bf16.msra.mxu0 %v8065_v1  ;;  %v102_v15 = vld [vmem:[%s12966_s1 + $0x220] sm:$0xff]  ;;  %v8091_v1 = vcombine.low %v99_v51, %v103_v53  ;;  %v151_v43 = vld [vmem:[%s12966_s1 + $0x3a8] sm:$0xff] }
  0x1c   :  { %1864 = vmatprep.subr.bf16.mxu0 %v8074_v3  ;;  %v8090_v21 = vcombine.high %v98_v14, %v102_v15  ;;  %v106_v23 = vld [vmem:[%s12966_s1 + $0x240] sm:$0xff]  ;;  %v8089_v27 = vcombine.low %v98_v14, %v102_v15  ;;  %v8100_v3 = vcombine.high %v107_v61, %v111_v62  ;;  %v123_v15 = vld [vmem:[%s12966_s1 + $0x2c8] sm:$0xff] }
  0x1d   :  { %1978 = vmatpush1.bf16.msra.mxu1 %v8035_v2  ;;  %v110_v24 = vld [vmem:[%s12966_s1 + $0x260] sm:$0xff]  ;;  %v159_v51 = vld [vmem:[%s12966_s1 + $0x3e8] sm:$0xff] }
  0x1e   :  { %1979 = vmatprep.subr.bf16.mxu1 %v8044_v5  ;;  %v8098_v29 = vcombine.high %v106_v23, %v110_v24  ;;  %v114_v32 = vld [vmem:[%s12966_s1 + $0x280] sm:$0xff]  ;;  %v8097_v37 = vcombine.low %v106_v23, %v110_v24  ;;  %v131_v24 = vld [vmem:[%s12966_s1 + $0x308] sm:$0xff] }
  0x1f   :  { %1865 = vmatpush1.bf16.msra.mxu0 %v8073_v10  ;;  %v118_v33 = vld [vmem:[%s12966_s1 + $0x2a0] sm:$0xff]  ;;  %v8099_v10 = vcombine.low %v107_v61, %v111_v62  ;;  %v167_v61 = vld [vmem:[%s12966_s1 + $0x428] sm:$0xff] }
  0x20   :  { %1866 = vmatprep.subr.bf16.mxu0 %v8082_v12  ;;  %v8106_v39 = vcombine.high %v114_v32, %v118_v33  ;;  %v122_v41 = vld [vmem:[%s12966_s1 + $0x2c0] sm:$0xff]  ;;  %v8105_v45 = vcombine.low %v114_v32, %v118_v33  ;;  %v8108_v12 = vcombine.high %v115_v7, %v119_v8  ;;  %v9847_v33 = vrot.slane %v9668_v36, %v9659_v31 }
  0x21   :  { %1980 = vmatpush1.bf16.msra.mxu1 %v8043_v11  ;;  %v126_v42 = vld [vmem:[%s12966_s1 + $0x2e0] sm:$0xff]  ;;  %v8132_v31 = vcombine.high %v139_v34, %v143_v35 }
  0x22   :  { %1981 = vmatprep.subr.bf16.mxu1 %v8052_v13  ;;  %v8114_v47 = vcombine.high %v122_v41, %v126_v42  ;;  %v130_v49 = vld [vmem:[%s12966_s1 + $0x300] sm:$0xff]  ;;  %v8113_v54 = vcombine.low %v122_v41, %v126_v42  ;;  %v147_v42 = vld [vmem:[%s12966_s1 + $0x388] sm:$0xff] }
  0x23   :  { %1867 = vmatpush1.bf16.msra.mxu0 %v8081_v19  ;;  %v134_v50 = vld [vmem:[%s12966_s1 + $0x320] sm:$0xff]  ;;  %v8107_v19 = vcombine.low %v115_v7, %v119_v8  ;;  %v175_v7 = vld [vmem:[%s12966_s1 + $0x468] sm:$0xff] }
  0x24   :  { %1868 = vmatprep.subr.bf16.mxu0 %v8090_v21  ;;  %v8122_v57 = vcombine.high %v130_v49, %v134_v50  ;;  %v138_v59 = vld [vmem:[%s12966_s1 + $0x340] sm:$0xff]  ;;  %v8121_v63 = vcombine.low %v130_v49, %v134_v50  ;;  %v8116_v21 = vcombine.high %v123_v15, %v127_v16  ;;  %v155_v50 = vld [vmem:[%s12966_s1 + $0x3c8] sm:$0xff] }
  0x25   :  { %1982 = vmatpush1.bf16.msra.mxu1 %v8051_v20  ;;  %v142_v60 = vld [vmem:[%s12966_s1 + $0x360] sm:$0xff] }
  0x26   :  { %1983 = vmatprep.subr.bf16.mxu1 %v8060_v22  ;;  %v8130_v2 = vcombine.high %v138_v59, %v142_v60  ;;  %v146_v5 = vld [vmem:[%s12966_s1 + $0x380] sm:$0xff]  ;;  %v8129_v9 = vcombine.low %v138_v59, %v142_v60  ;;  %v163_v60 = vld [vmem:[%s12966_s1 + $0x408] sm:$0xff] }
  0x27   :  { %1869 = vmatpush1.bf16.msra.mxu0 %v8089_v27  ;;  %v150_v6 = vld [vmem:[%s12966_s1 + $0x3a0] sm:$0xff]  ;;  %v8115_v27 = vcombine.low %v123_v15, %v127_v16  ;;  %v183_v15 = vld [vmem:[%s12966_s1 + $0x4a8] sm:$0xff] }
  0x28   :  { %1870 = vmatprep.subr.bf16.mxu0 %v8098_v29  ;;  %v8138_v11 = vcombine.high %v146_v5, %v150_v6  ;;  %v154_v13 = vld [vmem:[%s12966_s1 + $0x3c0] sm:$0xff]  ;;  %v8137_v17 = vcombine.low %v146_v5, %v150_v6  ;;  %v8124_v29 = vcombine.high %v131_v24, %v135_v25  ;;  %v171_v6 = vld [vmem:[%s12966_s1 + $0x448] sm:$0xff] }
  0x29   :  { %1984 = vmatpush1.bf16.msra.mxu1 %v8059_v28  ;;  %v158_v14 = vld [vmem:[%s12966_s1 + $0x3e0] sm:$0xff] }
  0x2a   :  { %1985 = vmatprep.subr.bf16.mxu1 %v8068_v30  ;;  %v8146_v20 = vcombine.high %v154_v13, %v158_v14  ;;  %v162_v22 = vld [vmem:[%s12966_s1 + $0x400] sm:$0xff]  ;;  %v8145_v26 = vcombine.low %v154_v13, %v158_v14  ;;  %v179_v14 = vld [vmem:[%s12966_s1 + $0x488] sm:$0xff] }
  0x2b   :  { %1871 = vmatpush1.bf16.msra.mxu0 %v8097_v37  ;;  %v166_v23 = vld [vmem:[%s12966_s1 + $0x420] sm:$0xff] }
  0x2c   :  { %1872 = vmatprep.subr.bf16.mxu0 %v8106_v39  ;;  %v8154_v28 = vcombine.high %v162_v22, %v166_v23  ;;  %v170_v30 = vld [vmem:[%s12966_s1 + $0x440] sm:$0xff]  ;;  %v8153_v37 = vcombine.low %v162_v22, %v166_v23  ;;  %v8123_v39 = vcombine.low %v131_v24, %v135_v25  ;;  %v187_v23 = vld [vmem:[%s12966_s1 + $0x4c8] sm:$0xff] }
  0x2d   :  { %1986 = vmatpush1.bf16.msra.mxu1 %v8067_v38  ;;  %v174_v32 = vld [vmem:[%s12966_s1 + $0x460] sm:$0xff]  ;;  %v9857_v38 = vcombine.high %v9692_v52, %v9692_v52  ;;  %v191_v24 = vld [vmem:[%s12966_s1 + $0x4e8] sm:$0xff] }
  0x2e   :  { %1987 = vmatprep.subr.bf16.mxu1 %v8076_v40  ;;  %v8162_v40 = vcombine.high %v170_v30, %v174_v32  ;;  %v178_v36 = vld [vmem:[%s12966_s1 + $0x480] sm:$0xff]  ;;  %v8161_v44 = vcombine.low %v170_v30, %v174_v32  ;;  %v195_v32 = vld [vmem:[%s12966_s1 + $0x508] sm:$0xff] }
  0x2f   :  { %1873 = vmatpush1.bf16.msra.mxu0 %v8105_v45  ;;  %v182_v41 = vld [vmem:[%s12966_s1 + $0x4a0] sm:$0xff]  ;;  %v8131_v45 = vcombine.low %v139_v34, %v143_v35  ;;  %v199_v34 = vld [vmem:[%s12966_s1 + $0x528] sm:$0xff] }
  0x30   :  { %1874 = vmatprep.subr.bf16.mxu0 %v8114_v47  ;;  %v8140_v47 = vcombine.high %v147_v42, %v151_v43  ;;  %v190_v49 = vld [vmem:[%s12966_s1 + $0x4e0] sm:$0xff]  ;;  %v8169_v53 = vcombine.low %v178_v36, %v182_v41 }
  0x31   :  { %1988 = vmatpush1.bf16.msra.mxu1 %v8075_v46  ;;  %v8170_v46 = vcombine.high %v178_v36, %v182_v41  ;;  %v198_v59 = vld [vmem:[%s12966_s1 + $0x520] sm:$0xff]  ;;  %v203_v41 = vld [vmem:[%s12966_s1 + $0x548] sm:$0xff] }
  0x32   :  { %1989 = vmatprep.subr.bf16.mxu1 %v8084_v48  ;;  %v186_v48 = vld [vmem:[%s12966_s1 + $0x4c0] sm:$0xff] }
  0x33   :  { %1875 = vmatpush1.bf16.msra.mxu0 %v8113_v54  ;;  %v8139_v54 = vcombine.low %v147_v42, %v151_v43  ;;  %v8177_v62 = vcombine.low %v186_v48, %v190_v49  ;;  %v206_v5 = vld [vmem:[%s12966_s1 + $0x560] sm:$0xff]  ;;  %v207_v42 = vld [vmem:[%s12966_s1 + $0x568] sm:$0xff] }
  0x34   :  { %1876 = vmatprep.subr.bf16.mxu0 %v8122_v57  ;;  %v8148_v57 = vcombine.high %v155_v50, %v159_v51  ;;  %v214_v13 = vld [vmem:[%s12966_s1 + $0x5a0] sm:$0xff] }
  0x35   :  { %1990 = vmatpush1.bf16.msra.mxu1 %v8083_v56  ;;  %v8178_v56 = vcombine.high %v186_v48, %v190_v49  ;;  %v222_v22 = vld [vmem:[%s12966_s1 + $0x5e0] sm:$0xff]  ;;  %v211_v49 = vld [vmem:[%s12966_s1 + $0x588] sm:$0xff] }
  0x36   :  { %1991 = vmatprep.subr.bf16.mxu1 %v8092_v58  ;;  %v194_v58 = vld [vmem:[%s12966_s1 + $0x500] sm:$0xff] }
  0x37   :  { %1877 = vmatpush1.bf16.msra.mxu0 %v8121_v63  ;;  %v8147_v63 = vcombine.low %v155_v50, %v159_v51  ;;  %v8185_v8 = vcombine.low %v194_v58, %v198_v59  ;;  %v230_v30 = vld [vmem:[%s12966_s1 + $0x620] sm:$0xff]  ;;  %v215_v50 = vld [vmem:[%s12966_s1 + $0x5a8] sm:$0xff] }
  0x38   :  { %1878 = vmatprep.subr.bf16.mxu0 %v8130_v2  ;;  %v8156_v2 = vcombine.high %v163_v60, %v167_v61  ;;  %v238_v36 = vld [vmem:[%s12966_s1 + $0x660] sm:$0xff] }
  0x39   :  { %1992 = vmatpush1.bf16.msra.mxu1 %v8091_v1  ;;  %v8186_v1 = vcombine.high %v194_v58, %v198_v59  ;;  %v246_v48 = vld [vmem:[%s12966_s1 + $0x6a0] sm:$0xff]  ;;  %v219_v59 = vld [vmem:[%s12966_s1 + $0x5c8] sm:$0xff] }
  0x3a   :  { %1993 = vmatprep.subr.bf16.mxu1 %v8100_v3  ;;  %v202_v3 = vld [vmem:[%s12966_s1 + $0x540] sm:$0xff] }
  0x3b   :  { %1879 = vmatpush1.bf16.msra.mxu0 %v8129_v9  ;;  %v8155_v9 = vcombine.low %v163_v60, %v167_v61  ;;  %v8193_v16 = vcombine.low %v202_v3, %v206_v5  ;;  %v254_v58 = vld [vmem:[%s12966_s1 + $0x6e0] sm:$0xff]  ;;  %v223_v60 = vld [vmem:[%s12966_s1 + $0x5e8] sm:$0xff] }
  0x3c   :  { %1880 = vmatprep.subr.bf16.mxu0 %v8138_v11  ;;  %v8164_v11 = vcombine.high %v171_v6, %v175_v7 }
  0x3d   :  { %1994 = vmatpush1.bf16.msra.mxu1 %v8099_v10  ;;  %v8194_v10 = vcombine.high %v202_v3, %v206_v5  ;;  %v262_v3 = vld [vmem:[%s12966_s1 + $0x720] sm:$0xff]  ;;  %v227_v5 = vld [vmem:[%s12966_s1 + $0x608] sm:$0xff] }
  0x3e   :  { %1995 = vmatprep.subr.bf16.mxu1 %v8108_v12  ;;  %v210_v12 = vld [vmem:[%s12966_s1 + $0x580] sm:$0xff] }
  0x3f   :  { %1881 = vmatpush1.bf16.msra.mxu0 %v8137_v17  ;;  %v8163_v17 = vcombine.low %v171_v6, %v175_v7  ;;  %v8201_v25 = vcombine.low %v210_v12, %v214_v13  ;;  %v231_v6 = vld [vmem:[%s12966_s1 + $0x628] sm:$0xff] }
  0x40   :  { %1882 = vmatprep.subr.bf16.mxu0 %v8146_v20  ;;  %v8172_v20 = vcombine.high %v179_v14, %v183_v15 }
  0x41   :  { %1996 = vmatpush1.bf16.msra.mxu1 %v8107_v19  ;;  %v8202_v19 = vcombine.high %v210_v12, %v214_v13  ;;  %v270_v12 = vld [vmem:[%s12966_s1 + $0x760] sm:$0xff]  ;;  %v235_v13 = vld [vmem:[%s12966_s1 + $0x648] sm:$0xff] }
  0x42   :  { %1997 = vmatprep.subr.bf16.mxu1 %v8116_v21  ;;  %v218_v21 = vld [vmem:[%s12966_s1 + $0x5c0] sm:$0xff] }
  0x43   :  { %1883 = vmatpush1.bf16.msra.mxu0 %v8145_v26  ;;  %v8171_v26 = vcombine.low %v179_v14, %v183_v15  ;;  %v8209_v35 = vcombine.low %v218_v21, %v222_v22  ;;  %v239_v14 = vld [vmem:[%s12966_s1 + $0x668] sm:$0xff] }
  0x44   :  { %1893 = vmatprep.subr.bf16.mxu0 %v8154_v28  ;;  %v8180_v28 = vcombine.high %v187_v23, %v191_v24 }
  0x45   :  { %1998 = vmatpush1.bf16.msra.mxu1 %v8115_v27  ;;  %v8210_v27 = vcombine.high %v218_v21, %v222_v22  ;;  %v278_v21 = vld [vmem:[%s12966_s1 + $0x7a0] sm:$0xff]  ;;  %v243_v22 = vld [vmem:[%s12966_s1 + $0x688] sm:$0xff] }
  0x46   :  { %1999 = vmatprep.subr.bf16.mxu1 %v8124_v29  ;;  %1885 = vmatmul.mubr.bf16.vlgmr.msra.gmra.mrb[0].mxu0 %v9847_v33  ;;  %v226_v29 = vld [vmem:[%s12966_s1 + $0x600] sm:$0xff] }
  0x47   :  { %1894 = vmatpush1.bf16.msra.mxu0 %v8153_v37  ;;  %1925 = vmatprep.mubr.bf16.mxu0 %v9857_v38  ;;  %v8179_v37 = vcombine.low %v187_v23, %v191_v24  ;;  %v8217_v43 = vcombine.low %v226_v29, %v230_v30  ;;  %v247_v23 = vld [vmem:[%s12966_s1 + $0x6a8] sm:$0xff] }
  0x48   :  { %1895 = vmatprep.subr.bf16.mxu0 %v8162_v40  ;;  %v8188_v40 = vcombine.high %v195_v32, %v199_v34 }
  0x49   :  { %2000 = vmatpush1.bf16.msra.mxu1 %v8123_v39  ;;  %v8218_v39 = vcombine.high %v226_v29, %v230_v30  ;;  %v286_v29 = vld [vmem:[%s12966_s1 + $0x7e0] sm:$0xff]  ;;  %v251_v30 = vld [vmem:[%s12966_s1 + $0x6c8] sm:$0xff] }
  0x4a   :  { %2001 = vmatprep.subr.bf16.mxu1 %v8132_v31  ;;  %v234_v31 = vld [vmem:[%s12966_s1 + $0x640] sm:$0xff] }
  0x4b   :  { %1896 = vmatpush1.bf16.msra.mxu0 %v8161_v44  ;;  %v8187_v44 = vcombine.low %v195_v32, %v199_v34  ;;  %v8225_v51 = vcombine.low %v234_v31, %v238_v36  ;;  %v255_v32 = vld [vmem:[%s12966_s1 + $0x6e8] sm:$0xff] }
  0x4c   :  { %1897 = vmatprep.subr.bf16.mxu0 %v8170_v46  ;;  %v8196_v46 = vcombine.high %v203_v41, %v207_v42 }
  0x4d   :  { %2002 = vmatpush1.bf16.msra.mxu1 %v8131_v45  ;;  %v8226_v45 = vcombine.high %v234_v31, %v238_v36  ;;  %v40_v31 = vld [vmem:[%s12966_s1 + $0x30] sm:$0xff]  ;;  %v259_v36 = vld [vmem:[%s12966_s1 + $0x708] sm:$0xff] }
  0x4e   :  { %2003 = vmatprep.subr.bf16.mxu1 %v8140_v47  ;;  %v242_v47 = vld [vmem:[%s12966_s1 + $0x680] sm:$0xff] }
  0x4f   :  { %1898 = vmatpush1.bf16.msra.mxu0 %v8169_v53  ;;  %v8195_v53 = vcombine.low %v203_v41, %v207_v42  ;;  %v8233_v61 = vcombine.low %v242_v47, %v246_v48  ;;  %v263_v41 = vld [vmem:[%s12966_s1 + $0x728] sm:$0xff] }
  0x50   :  { %1899 = vmatprep.subr.bf16.mxu0 %v8178_v56  ;;  %v8204_v56 = vcombine.high %v211_v49, %v215_v50 }
  0x51   :  { %2004 = vmatpush1.bf16.msra.mxu1 %v8139_v54  ;;  %v8234_v54 = vcombine.high %v242_v47, %v246_v48  ;;  %v48_v47 = vld [vmem:[%s12966_s1 + $0x70] sm:$0xff]  ;;  %v10051_v48 = vcombine.high %v9847_v33, %v9847_v33 }
  0x52   :  { %2005 = vmatprep.subr.bf16.mxu1 %v8148_v57  ;;  %v250_v57 = vld [vmem:[%s12966_s1 + $0x6c0] sm:$0xff] }
  0x53   :  { %1900 = vmatpush1.bf16.msra.mxu0 %v8177_v62  ;;  %v8203_v62 = vcombine.low %v211_v49, %v215_v50  ;;  %v8241_v7 = vcombine.low %v250_v57, %v254_v58  ;;  %v267_v49 = vld [vmem:[%s12966_s1 + $0x748] sm:$0xff] }
  0x54   :  { %1901 = vmatprep.subr.bf16.mxu0 %v8186_v1  ;;  %v8212_v1 = vcombine.high %v219_v59, %v223_v60  ;;  %v271_v50 = vld [vmem:[%s12966_s1 + $0x768] sm:$0xff] }
  0x55   :  { %2006 = vmatpush1.bf16.msra.mxu1 %v8147_v63  ;;  %v8242_v63 = vcombine.high %v250_v57, %v254_v58  ;;  %v52_v57 = vld [vmem:[%s12966_s1 + $0x90] sm:$0xff] }
  0x56   :  { %2016 = vmatprep.subr.bf16.mxu1 %v8156_v2  ;;  %v258_v2 = vld [vmem:[%s12966_s1 + $0x700] sm:$0xff]  ;;  %v56_v58 = vld [vmem:[%s12966_s1 + $0xb0] sm:$0xff] }
  0x57   :  { %1902 = vmatpush1.bf16.msra.mxu0 %v8185_v8  ;;  %v8211_v8 = vcombine.low %v219_v59, %v223_v60  ;;  %v8249_v15 = vcombine.low %v258_v2, %v262_v3  ;;  %v275_v59 = vld [vmem:[%s12966_s1 + $0x788] sm:$0xff] }
  0x58   :  { %2008 = vmatmul.mubr.bf16.vlgmr.msra.gmra.mrb[4].mxu1 %v9847_v33  ;;  %1903 = vmatprep.subr.bf16.mxu0 %v8194_v10  ;;  %v8220_v10 = vcombine.high %v227_v5, %v231_v6  ;;  %v279_v60 = vld [vmem:[%s12966_s1 + $0x7a8] sm:$0xff] }
  0x59   :  { %2017 = vmatpush1.bf16.msra.mxu1 %v8155_v9  ;;  %2048 = vmatprep.mubr.bf16.mxu1 %v9857_v38  ;;  %v8250_v9 = vcombine.high %v258_v2, %v262_v3  ;;  %v60_v2 = vld [vmem:[%s12966_s1 + $0xd0] sm:$0xff] }
  0x5a   :  { %2018 = vmatprep.subr.bf16.mxu1 %v8164_v11  ;;  %v266_v11 = vld [vmem:[%s12966_s1 + $0x740] sm:$0xff]  ;;  %v64_v3 = vld [vmem:[%s12966_s1 + $0xf0] sm:$0xff] }
  0x5b   :  { %1904 = vmatpush1.bf16.msra.mxu0 %v8193_v16  ;;  %v8219_v16 = vcombine.low %v227_v5, %v231_v6  ;;  %v8257_v24 = vcombine.low %v266_v11, %v270_v12  ;;  %v283_v5 = vld [vmem:[%s12966_s1 + $0x7c8] sm:$0xff] }
  0x5c   :  { %1905 = vmatprep.subr.bf16.mxu0 %v8202_v19  ;;  %v8228_v19 = vcombine.high %v235_v13, %v239_v14  ;;  %v287_v6 = vld [vmem:[%s12966_s1 + $0x7e8] sm:$0xff] }
  0x5d   :  { %2019 = vmatpush1.bf16.msra.mxu1 %v8163_v17  ;;  %v8258_v17 = vcombine.high %v266_v11, %v270_v12  ;;  %v68_v11 = vld [vmem:[%s12966_s1 + $0x110] sm:$0xff] }
  0x5e   :  { %2020 = vmatprep.subr.bf16.mxu1 %v8172_v20  ;;  %v274_v20 = vld [vmem:[%s12966_s1 + $0x780] sm:$0xff]  ;;  %v72_v12 = vld [vmem:[%s12966_s1 + $0x130] sm:$0xff] }
  0x5f   :  { %1906 = vmatpush1.bf16.msra.mxu0 %v8201_v25  ;;  %v8227_v25 = vcombine.low %v235_v13, %v239_v14  ;;  %v8265_v34 = vcombine.low %v274_v20, %v278_v21  ;;  %v291_v13 = vld [vmem:[%s12966_s1 + $0x808] sm:$0xff] }
  0x60   :  { %1907 = vmatprep.subr.bf16.mxu0 %v8210_v27  ;;  %v8236_v27 = vcombine.high %v243_v22, %v247_v23  ;;  %v295_v14 = vld [vmem:[%s12966_s1 + $0x828] sm:$0xff] }
  0x61   :  { %2021 = vmatpush1.bf16.msra.mxu1 %v8171_v26  ;;  %v8266_v26 = vcombine.high %v274_v20, %v278_v21  ;;  %v76_v20 = vld [vmem:[%s12966_s1 + $0x150] sm:$0xff] }
  0x62   :  { %2022 = vmatprep.subr.bf16.mxu1 %v8180_v28  ;;  %v282_v28 = vld [vmem:[%s12966_s1 + $0x7c0] sm:$0xff]  ;;  %v80_v21 = vld [vmem:[%s12966_s1 + $0x170] sm:$0xff] }
  0x63   :  { %1908 = vmatpush1.bf16.msra.mxu0 %v8209_v35  ;;  %v8235_v35 = vcombine.low %v243_v22, %v247_v23  ;;  %v8273_v42 = vcombine.low %v282_v28, %v286_v29  ;;  %v299_v22 = vld [vmem:[%s12966_s1 + $0x848] sm:$0xff] }
  0x64   :  { %1909 = vmatprep.subr.bf16.mxu0 %v8218_v39  ;;  %v8244_v39 = vcombine.high %v251_v30, %v255_v32  ;;  %v303_v23 = vld [vmem:[%s12966_s1 + $0x868] sm:$0xff] }
  0x65   :  { %2023 = vmatpush1.bf16.msra.mxu1 %v8179_v37  ;;  %v8274_v37 = vcombine.high %v282_v28, %v286_v29  ;;  %v84_v28 = vld [vmem:[%s12966_s1 + $0x190] sm:$0xff] }
  0x66   :  { %2024 = vmatprep.subr.bf16.mxu1 %v8188_v40  ;;  %v36_v40 = vld [vmem:[%s12966_s1 + $0x10] sm:$0xff] }
  0x67   :  { %1910 = vmatpush1.bf16.msra.mxu0 %v8217_v43  ;;  %v8243_v43 = vcombine.low %v251_v30, %v255_v32  ;;  %v88_v29 = vld [vmem:[%s12966_s1 + $0x1b0] sm:$0xff]  ;;  %v307_v30 = vld [vmem:[%s12966_s1 + $0x888] sm:$0xff] }
  0x68   :  { %1911 = vmatprep.subr.bf16.mxu0 %v8226_v45  ;;  %v8252_v45 = vcombine.high %v259_v36, %v263_v41  ;;  %v311_v32 = vld [vmem:[%s12966_s1 + $0x8a8] sm:$0xff] }
  0x69   :  { %2025 = vmatpush1.bf16.msra.mxu1 %v8187_v44  ;;  %v8030_v44 = vcombine.high %v36_v40, %v40_v31 }
  0x6a   :  { %2026 = vmatprep.subr.bf16.mxu1 %v8196_v46  ;;  %v44_v46 = vld [vmem:[%s12966_s1 + $0x50] sm:$0xff] }
  0x6b   :  { %1912 = vmatpush1.bf16.msra.mxu0 %v8225_v51  ;;  %v8029_v51 = vcombine.low %v36_v40, %v40_v31  ;;  %v92_v40 = vld [vmem:[%s12966_s1 + $0x1d0] sm:$0xff] }
  0x6c   :  { %1913 = vmatprep.subr.bf16.mxu0 %v8234_v54  ;;  %v8038_v54 = vcombine.high %v44_v46, %v48_v47  ;;  %v96_v31 = vld [vmem:[%s12966_s1 + $0x1f0] sm:$0xff] }
  0x6d   :  { %2027 = vmatpush1.bf16.msra.mxu1 %v8195_v53  ;;  %v8251_v53 = vcombine.low %v259_v36, %v263_v41  ;;  %v315_v36 = vld [vmem:[%s12966_s1 + $0x8c8] sm:$0xff] }
  0x6e   :  { %2028 = vmatprep.subr.bf16.mxu1 %v8204_v56  ;;  %v8260_v56 = vcombine.high %v267_v49, %v271_v50  ;;  %v319_v41 = vld [vmem:[%s12966_s1 + $0x8e8] sm:$0xff] }
  0x6f   :  { %1914 = vmatpush1.bf16.msra.mxu0 %v8233_v61  ;;  %v8037_v61 = vcombine.low %v44_v46, %v48_v47  ;;  %v100_v46 = vld [vmem:[%s12966_s1 + $0x210] sm:$0xff] }
  0x70   :  { %1915 = vmatprep.subr.bf16.mxu0 %v8242_v63  ;;  %v8046_v63 = vcombine.high %v52_v57, %v56_v58  ;;  %v104_v47 = vld [vmem:[%s12966_s1 + $0x230] sm:$0xff] }
  0x71   :  { %2029 = vmatpush1.bf16.msra.mxu1 %v8203_v62  ;;  %v8259_v62 = vcombine.low %v267_v49, %v271_v50  ;;  %v292_v49 = vld [vmem:[%s12966_s1 + $0x810] sm:$0xff] }
  0x72   :  { %2030 = vmatprep.subr.bf16.mxu1 %v8212_v1  ;;  %v8268_v1 = vcombine.high %v275_v59, %v279_v60  ;;  %v296_v50 = vld [vmem:[%s12966_s1 + $0x830] sm:$0xff] }
  0x73   :  { %1916 = vmatpush1.bf16.msra.mxu0 %v8241_v7  ;;  %v8045_v7 = vcombine.low %v52_v57, %v56_v58  ;;  %v108_v57 = vld [vmem:[%s12966_s1 + $0x250] sm:$0xff] }
  0x74   :  { %1917 = vmatprep.subr.bf16.mxu0 %v8250_v9  ;;  %v8054_v9 = vcombine.high %v60_v2, %v64_v3  ;;  %v112_v58 = vld [vmem:[%s12966_s1 + $0x270] sm:$0xff] }
  0x75   :  { %2031 = vmatpush1.bf16.msra.mxu1 %v8211_v8  ;;  %v8267_v8 = vcombine.low %v275_v59, %v279_v60  ;;  %v300_v59 = vld [vmem:[%s12966_s1 + $0x850] sm:$0xff] }
  0x76   :  { %2032 = vmatprep.subr.bf16.mxu1 %v8220_v10  ;;  %v8276_v10 = vcombine.high %v283_v5, %v287_v6  ;;  %v304_v60 = vld [vmem:[%s12966_s1 + $0x870] sm:$0xff] }
  0x77   :  { %1918 = vmatpush1.bf16.msra.mxu0 %v8249_v15  ;;  %v8053_v15 = vcombine.low %v60_v2, %v64_v3  ;;  %v116_v2 = vld [vmem:[%s12966_s1 + $0x290] sm:$0xff] }
  0x78   :  { %1919 = vmatprep.subr.bf16.mxu0 %v8258_v17  ;;  %v8062_v17 = vcombine.high %v68_v11, %v72_v12  ;;  %v120_v3 = vld [vmem:[%s12966_s1 + $0x2b0] sm:$0xff] }
  0x79   :  { %2033 = vmatpush1.bf16.msra.mxu1 %v8219_v16  ;;  %v8275_v16 = vcombine.low %v283_v5, %v287_v6  ;;  %v308_v5 = vld [vmem:[%s12966_s1 + $0x890] sm:$0xff] }
  0x7a   :  { %2034 = vmatprep.subr.bf16.mxu1 %v8228_v19  ;;  %v8284_v19 = vcombine.high %v291_v13, %v295_v14  ;;  %v312_v6 = vld [vmem:[%s12966_s1 + $0x8b0] sm:$0xff] }
  0x7b   :  { %1920 = vmatpush1.bf16.msra.mxu0 %v8257_v24  ;;  %v8061_v24 = vcombine.low %v68_v11, %v72_v12  ;;  %v124_v11 = vld [vmem:[%s12966_s1 + $0x2d0] sm:$0xff] }
  0x7c   :  { %1921 = vmatprep.subr.bf16.mxu0 %v8266_v26  ;;  %v8070_v26 = vcombine.high %v76_v20, %v80_v21  ;;  %v128_v12 = vld [vmem:[%s12966_s1 + $0x2f0] sm:$0xff] }
  0x7d   :  { %2035 = vmatpush1.bf16.msra.mxu1 %v8227_v25  ;;  %v8283_v25 = vcombine.low %v291_v13, %v295_v14  ;;  %v316_v13 = vld [vmem:[%s12966_s1 + $0x8d0] sm:$0xff] }
  0x7e   :  { %2036 = vmatprep.subr.bf16.mxu1 %v8236_v27  ;;  %v8292_v27 = vcombine.high %v299_v22, %v303_v23  ;;  %v320_v14 = vld [vmem:[%s12966_s1 + $0x8f0] sm:$0xff] }
  0x7f   :  { %1922 = vmatpush1.bf16.msra.mxu0 %v8265_v34  ;;  %v8069_v34 = vcombine.low %v76_v20, %v80_v21  ;;  %v132_v20 = vld [vmem:[%s12966_s1 + $0x310] sm:$0xff] }
  0x80   :  { %1923 = vmatprep.subr.bf16.mxu0 %v8274_v37  ;;  %v8078_v37 = vcombine.high %v84_v28, %v88_v29  ;;  %v136_v21 = vld [vmem:[%s12966_s1 + $0x330] sm:$0xff] }
  0x81   :  { %2037 = vmatpush1.bf16.msra.mxu1 %v8235_v35  ;;  %v8291_v35 = vcombine.low %v299_v22, %v303_v23  ;;  %v37_v22 = vld [vmem:[%s12966_s1 + $0x18] sm:$0xff] }
  0x82   :  { %2038 = vmatprep.subr.bf16.mxu1 %v8244_v39  ;;  %v8300_v39 = vcombine.high %v307_v30, %v311_v32  ;;  %v41_v23 = vld [vmem:[%s12966_s1 + $0x38] sm:$0xff] }
  0x83   :  { %1924 = vmatpush1.bf16.msra.mxu0 %v8273_v42  ;;  %v8077_v42 = vcombine.low %v84_v28, %v88_v29  ;;  %v140_v28 = vld [vmem:[%s12966_s1 + $0x350] sm:$0xff] }
  0x84   :  { %2098 = vmatprep.subr.bf16.mxu0 %v8030_v44  ;;  %v8086_v44 = vcombine.high %v92_v40, %v96_v31  ;;  %v144_v29 = vld [vmem:[%s12966_s1 + $0x370] sm:$0xff] }
  0x85   :  { %2039 = vmatpush1.bf16.msra.mxu1 %v8243_v43  ;;  %v8299_v43 = vcombine.low %v307_v30, %v311_v32  ;;  %v45_v30 = vld [vmem:[%s12966_s1 + $0x58] sm:$0xff] }
  0x86   :  { %2040 = vmatprep.subr.bf16.mxu1 %v8252_v45  ;;  %1926 = vmatmul.mubr.bf16.vlgmr.msra.gmra.mrb[0].mxu0 %v10051_v48  ;;  %v8308_v45 = vcombine.high %v315_v36, %v319_v41  ;;  %v49_v32 = vld [vmem:[%s12966_s1 + $0x78] sm:$0xff] }
  0x87   :  { %2099 = vmatpush1.bf16.msra.mxu0 %v8029_v51  ;;  %2130 = vmatprep.mubr.bf16.mxu0 %v9692_v52  ;;  %v8085_v51 = vcombine.low %v92_v40, %v96_v31  ;;  %v148_v40 = vld [vmem:[%s12966_s1 + $0x390] sm:$0xff] }
  0x88   :  { %2100 = vmatprep.subr.bf16.mxu0 %v8038_v54  ;;  %v8094_v54 = vcombine.high %v100_v46, %v104_v47  ;;  %v152_v31 = vld [vmem:[%s12966_s1 + $0x3b0] sm:$0xff] }
  0x89   :  { %2041 = vmatpush1.bf16.msra.mxu1 %v8251_v53  ;;  %v8307_v53 = vcombine.low %v315_v36, %v319_v41  ;;  %v53_v36 = vld [vmem:[%s12966_s1 + $0x98] sm:$0xff] }
  0x8a   :  { %2042 = vmatprep.subr.bf16.mxu1 %v8260_v56  ;;  %v8286_v56 = vcombine.high %v292_v49, %v296_v50  ;;  %v57_v41 = vld [vmem:[%s12966_s1 + $0xb8] sm:$0xff] }
  0x8b   :  { %2101 = vmatpush1.bf16.msra.mxu0 %v8037_v61  ;;  %v8093_v61 = vcombine.low %v100_v46, %v104_v47  ;;  %v156_v46 = vld [vmem:[%s12966_s1 + $0x3d0] sm:$0xff] }
  0x8c   :  { %2102 = vmatprep.subr.bf16.mxu0 %v8046_v63  ;;  %v8102_v63 = vcombine.high %v108_v57, %v112_v58  ;;  %v160_v47 = vld [vmem:[%s12966_s1 + $0x3f0] sm:$0xff] }
  0x8d   :  { %2043 = vmatpush1.bf16.msra.mxu1 %v8259_v62  ;;  %v8285_v62 = vcombine.low %v292_v49, %v296_v50  ;;  %v61_v49 = vld [vmem:[%s12966_s1 + $0xd8] sm:$0xff] }
  0x8e   :  { %2044 = vmatprep.subr.bf16.mxu1 %v8268_v1  ;;  %v8294_v1 = vcombine.high %v300_v59, %v304_v60  ;;  %v65_v50 = vld [vmem:[%s12966_s1 + $0xf8] sm:$0xff] }
  0x8f   :  { %2103 = vmatpush1.bf16.msra.mxu0 %v8045_v7  ;;  %v8101_v7 = vcombine.low %v108_v57, %v112_v58  ;;  %v168_v57 = vld [vmem:[%s12966_s1 + $0x430] sm:$0xff]  ;;  %v69_v58 = vld [vmem:[%s12966_s1 + $0x118] sm:$0xff] }
  0x90   :  { %2104 = vmatprep.subr.bf16.mxu0 %v8054_v9  ;;  %v8110_v9 = vcombine.high %v116_v2, %v120_v3 }
  0x91   :  { %2045 = vmatpush1.bf16.msra.mxu1 %v8267_v8  ;;  %v8293_v8 = vcombine.low %v300_v59, %v304_v60  ;;  %v73_v59 = vld [vmem:[%s12966_s1 + $0x138] sm:$0xff]  ;;  %v8149_v60 = vcombine.low %v156_v46, %v160_v47 }
  0x92   :  { %2046 = vmatprep.subr.bf16.mxu1 %v8276_v10  ;;  %v8302_v10 = vcombine.high %v308_v5, %v312_v6 }
  0x93   :  { %2105 = vmatpush1.bf16.msra.mxu0 %v8053_v15  ;;  %v8109_v15 = vcombine.low %v116_v2, %v120_v3  ;;  %v176_v2 = vld [vmem:[%s12966_s1 + $0x470] sm:$0xff]  ;;  %v77_v3 = vld [vmem:[%s12966_s1 + $0x158] sm:$0xff] }
  0x94   :  { %2106 = vmatprep.subr.bf16.mxu0 %v8062_v17  ;;  %v8118_v17 = vcombine.high %v124_v11, %v128_v12 }
  0x95   :  { %2047 = vmatpush1.bf16.msra.mxu1 %v8275_v16  ;;  %v8301_v16 = vcombine.low %v308_v5, %v312_v6  ;;  %v81_v5 = vld [vmem:[%s12966_s1 + $0x178] sm:$0xff] }
  0x96   :  { %2057 = vmatprep.subr.bf16.mxu1 %v8284_v19  ;;  %v8310_v19 = vcombine.high %v316_v13, %v320_v14 }
  0x97   :  { %2107 = vmatpush1.bf16.msra.mxu0 %v8061_v24  ;;  %v8117_v24 = vcombine.low %v124_v11, %v128_v12  ;;  %v184_v11 = vld [vmem:[%s12966_s1 + $0x4b0] sm:$0xff]  ;;  %v85_v12 = vld [vmem:[%s12966_s1 + $0x198] sm:$0xff] }
  0x98   :  { %2049 = vmatmul.mubr.bf16.vlgmr.msra.gmra.mrb[4].mxu1 %v10051_v48  ;;  %2108 = vmatprep.subr.bf16.mxu0 %v8070_v26  ;;  %v8126_v26 = vcombine.high %v132_v20, %v136_v21 }
  0x99   :  { %2058 = vmatpush1.bf16.msra.mxu1 %v8283_v25  ;;  %2089 = vmatprep.mubr.bf16.mxu1 %v9557_v4  ;;  %v8309_v25 = vcombine.low %v316_v13, %v320_v14  ;;  %v89_v13 = vld [vmem:[%s12966_s1 + $0x1b8] sm:$0xff] }
  0x9a   :  { %2059 = vmatprep.subr.bf16.mxu1 %v8292_v27  ;;  %v8032_v27 = vcombine.high %v37_v22, %v41_v23 }
  0x9b   :  { %2109 = vmatpush1.bf16.msra.mxu0 %v8069_v34  ;;  %v8125_v34 = vcombine.low %v132_v20, %v136_v21  ;;  %v192_v20 = vld [vmem:[%s12966_s1 + $0x4f0] sm:$0xff]  ;;  %v93_v21 = vld [vmem:[%s12966_s1 + $0x1d8] sm:$0xff] }
  0x9c   :  { %2110 = vmatprep.subr.bf16.mxu0 %v8078_v37  ;;  %v8134_v37 = vcombine.high %v140_v28, %v144_v29 }
  0x9d   :  { %2060 = vmatpush1.bf16.msra.mxu1 %v8291_v35  ;;  %v8031_v35 = vcombine.low %v37_v22, %v41_v23  ;;  %v97_v22 = vld [vmem:[%s12966_s1 + $0x1f8] sm:$0xff] }
  0x9e   :  { %2061 = vmatprep.subr.bf16.mxu1 %v8300_v39  ;;  %v8040_v39 = vcombine.high %v45_v30, %v49_v32 }
  0x9f   :  { %2111 = vmatpush1.bf16.msra.mxu0 %v8077_v42  ;;  %v8133_v42 = vcombine.low %v140_v28, %v144_v29  ;;  %v200_v28 = vld [vmem:[%s12966_s1 + $0x530] sm:$0xff]  ;;  %v101_v29 = vld [vmem:[%s12966_s1 + $0x218] sm:$0xff] }
  0xa0   :  { %2112 = vmatprep.subr.bf16.mxu0 %v8086_v44  ;;  %v8142_v44 = vcombine.high %v148_v40, %v152_v31 }
  0xa1   :  { %2062 = vmatpush1.bf16.msra.mxu1 %v8299_v43  ;;  %v8039_v43 = vcombine.low %v45_v30, %v49_v32  ;;  %v105_v30 = vld [vmem:[%s12966_s1 + $0x238] sm:$0xff] }
  0xa2   :  { %2063 = vmatprep.subr.bf16.mxu1 %v8308_v45  ;;  %v8048_v45 = vcombine.high %v53_v36, %v57_v41 }
  0xa3   :  { %2113 = vmatpush1.bf16.msra.mxu0 %v8085_v51  ;;  %v8141_v51 = vcombine.low %v148_v40, %v152_v31  ;;  %v208_v40 = vld [vmem:[%s12966_s1 + $0x570] sm:$0xff]  ;;  %v109_v31 = vld [vmem:[%s12966_s1 + $0x258] sm:$0xff] }
  0xa4   :  { %2114 = vmatprep.subr.bf16.mxu0 %v8094_v54  ;;  %v8150_v54 = vcombine.high %v156_v46, %v160_v47  ;;  %v216_v46 = vld [vmem:[%s12966_s1 + $0x5b0] sm:$0xff]  ;;  %v117_v47 = vld [vmem:[%s12966_s1 + $0x298] sm:$0xff] }
  0xa5   :  { %2064 = vmatpush1.bf16.msra.mxu1 %v8307_v53  ;;  %v8047_v53 = vcombine.low %v53_v36, %v57_v41  ;;  %v113_v36 = vld [vmem:[%s12966_s1 + $0x278] sm:$0xff] }
  0xa6   :  { %2180 = vmatprep.subr.bf16.mxu1 %v8286_v56  ;;  %v8056_v56 = vcombine.high %v61_v49, %v65_v50 }
  0xa7   :  { %2115 = vmatpush1.bf16.msra.mxu0 %v8093_v61  ;;  %v8055_v61 = vcombine.low %v61_v49, %v65_v50  ;;  %v121_v49 = vld [vmem:[%s12966_s1 + $0x2b8] sm:$0xff] }
  0xa8   :  { %8314 = vmatmul.mubr.msk.bf16.vlgmr.msra.gmra.mrb[4].mxu1 %vm1848_vm0, %v9701_v55  ;;  %2116 = vmatprep.subr.bf16.mxu0 %v8102_v63  ;;  %v8064_v63 = vcombine.high %v69_v58, %v73_v59 }
  0xa9   :  { %2181 = vmatpush1.bf16.msra.mxu1 %v8285_v62  ;;  %2212 = vmatprep.mubr.bf16.mxu1 %v9557_v4 }
  0xaa   :  { %2182 = vmatprep.subr.bf16.mxu1 %v8294_v1  ;;  %v172_v1 = vld [vmem:[%s12966_s1 + $0x450] sm:$0xff] }
  0xab   :  { %2117 = vmatpush1.bf16.msra.mxu0 %v8101_v7  ;;  %v8063_v7 = vcombine.low %v69_v58, %v73_v59  ;;  %v8165_v14 = vcombine.low %v172_v1, %v176_v2  ;;  %v129_v58 = vld [vmem:[%s12966_s1 + $0x2f8] sm:$0xff] }
  0xac   :  { %2118 = vmatprep.subr.bf16.mxu0 %v8110_v9  ;;  %v8072_v9 = vcombine.high %v77_v3, %v81_v5 }
  0xad   :  { %2183 = vmatpush1.bf16.msra.mxu1 %v8293_v8  ;;  %v8166_v8 = vcombine.high %v172_v1, %v176_v2  ;;  %v232_v1 = vld [vmem:[%s12966_s1 + $0x630] sm:$0xff]  ;;  %v133_v2 = vld [vmem:[%s12966_s1 + $0x318] sm:$0xff] }
  0xae   :  { %2184 = vmatprep.subr.bf16.mxu1 %v8302_v10  ;;  %v180_v10 = vld [vmem:[%s12966_s1 + $0x490] sm:$0xff] }
  0xaf   :  { %2119 = vmatpush1.bf16.msra.mxu0 %v8109_v15  ;;  %v8071_v15 = vcombine.low %v77_v3, %v81_v5  ;;  %v8173_v23 = vcombine.low %v180_v10, %v184_v11  ;;  %v137_v3 = vld [vmem:[%s12966_s1 + $0x338] sm:$0xff] }
  0xb0   :  { %2120 = vmatprep.subr.bf16.mxu0 %v8118_v17  ;;  %v8080_v17 = vcombine.high %v85_v12, %v89_v13 }
  0xb1   :  { %2185 = vmatpush1.bf16.msra.mxu1 %v8301_v16  ;;  %v8174_v16 = vcombine.high %v180_v10, %v184_v11  ;;  %v240_v10 = vld [vmem:[%s12966_s1 + $0x670] sm:$0xff]  ;;  %v141_v11 = vld [vmem:[%s12966_s1 + $0x358] sm:$0xff] }
  0xb2   :  { %2186 = vmatprep.subr.bf16.mxu1 %v8310_v19  ;;  %v188_v19 = vld [vmem:[%s12966_s1 + $0x4d0] sm:$0xff] }
  0xb3   :  { %2121 = vmatpush1.bf16.msra.mxu0 %v8117_v24  ;;  %v8079_v24 = vcombine.low %v85_v12, %v89_v13  ;;  %v8181_v32 = vcombine.low %v188_v19, %v192_v20  ;;  %v145_v12 = vld [vmem:[%s12966_s1 + $0x378] sm:$0xff] }
  0xb4   :  { %2122 = vmatprep.subr.bf16.mxu0 %v8126_v26  ;;  %v8088_v26 = vcombine.high %v93_v21, %v97_v22 }
  0xb5   :  { %2187 = vmatpush1.bf16.msra.mxu1 %v8309_v25  ;;  %v8182_v25 = vcombine.high %v188_v19, %v192_v20  ;;  %v248_v19 = vld [vmem:[%s12966_s1 + $0x6b0] sm:$0xff]  ;;  %v149_v20 = vld [vmem:[%s12966_s1 + $0x398] sm:$0xff] }
  0xb6   :  { %2221 = vmatprep.subr.bf16.mxu1 %v8032_v27  ;;  %v196_v27 = vld [vmem:[%s12966_s1 + $0x510] sm:$0xff] }
  0xb7   :  { %2123 = vmatpush1.bf16.msra.mxu0 %v8125_v34  ;;  %v8087_v34 = vcombine.low %v93_v21, %v97_v22  ;;  %v8189_v41 = vcombine.low %v196_v27, %v200_v28  ;;  %v153_v21 = vld [vmem:[%s12966_s1 + $0x3b8] sm:$0xff] }
  0xb8   :  { %8315 = vmatmul.mubr.msk.bf16.vlgmr.msra.gmra.mrb[8].mxu1 %vm1848_vm0, %v9701_v55  ;;  %2124 = vmatprep.subr.bf16.mxu0 %v8134_v37  ;;  %v8096_v37 = vcombine.high %v101_v29, %v105_v30 }
  0xb9   :  { %2222 = vmatpush1.bf16.msra.mxu1 %v8031_v35  ;;  %2253 = vmatprep.mubr.bf16.mxu1 %v9692_v52  ;;  %v164_v52 = vld [vmem:[%s12966_s1 + $0x410] sm:$0xff]  ;;  %v8190_v35 = vcombine.high %v196_v27, %v200_v28 }
  0xba   :  { %2223 = vmatprep.subr.bf16.mxu1 %v8040_v39  ;;  %v8158_v62 = vcombine.high %v164_v52, %v168_v57  ;;  %v8157_v6 = vcombine.low %v164_v52, %v168_v57  ;;  %v204_v39 = vld [vmem:[%s12966_s1 + $0x550] sm:$0xff]  ;;  %v125_v57 = vld [vmem:[%s12966_s1 + $0x2d8] sm:$0xff] }
  0xbb   :  { %2125 = vmatpush1.bf16.msra.mxu0 %v8133_v42  ;;  %v8095_v42 = vcombine.low %v101_v29, %v105_v30  ;;  %v8197_v50 = vcombine.low %v204_v39, %v208_v40  ;;  %v224_v52 = vld [vmem:[%s12966_s1 + $0x5f0] sm:$0xff]  ;;  %v157_v29 = vld [vmem:[%s12966_s1 + $0x3d8] sm:$0xff] }
  0xbc   :  { %2126 = vmatprep.subr.bf16.mxu0 %v8142_v44  ;;  %v8104_v44 = vcombine.high %v109_v31, %v113_v36  ;;  %v256_v27 = vld [vmem:[%s12966_s1 + $0x6f0] sm:$0xff]  ;;  %v161_v30 = vld [vmem:[%s12966_s1 + $0x3f8] sm:$0xff] }
  0xbd   :  { %2224 = vmatpush1.bf16.msra.mxu1 %v8039_v43  ;;  %v8198_v43 = vcombine.high %v204_v39, %v208_v40 }
  0xbe   :  { %2225 = vmatprep.subr.bf16.mxu1 %v8048_v45  ;;  %v212_v45 = vld [vmem:[%s12966_s1 + $0x590] sm:$0xff] }
  0xbf   :  { %2127 = vmatpush1.bf16.msra.mxu0 %v8141_v51  ;;  %v8103_v51 = vcombine.low %v109_v31, %v113_v36  ;;  %v8205_v59 = vcombine.low %v212_v45, %v216_v46  ;;  %v8152_v31 = vcombine.high %v157_v29, %v161_v30  ;;  %v260_v36 = vld [vmem:[%s12966_s1 + $0x710] sm:$0xff] }
  0xc0   :  { %2128 = vmatprep.subr.bf16.mxu0 %v8150_v54  ;;  %v8112_v54 = vcombine.high %v117_v47, %v121_v49 }
  0xc1   :  { %2226 = vmatpush1.bf16.msra.mxu1 %v8047_v53  ;;  %v8206_v53 = vcombine.high %v212_v45, %v216_v46  ;;  %v8151_v45 = vcombine.low %v157_v29, %v161_v30  ;;  %v2380_v29 = vld [vmem:[%s12968_s3 + $0xa0] sm:$0xff]  ;;  %v213_v30 = vld [vmem:[%s12966_s1 + $0x598] sm:$0xff] }
  0xc2   :  { %2227 = vmatprep.subr.bf16.mxu1 %v8056_v56  ;;  %v220_v56 = vld [vmem:[%s12966_s1 + $0x5d0] sm:$0xff] }
  0xc3   :  { %2129 = vmatpush1.bf16.msra.mxu0 %v8149_v60  ;;  %v8111_v60 = vcombine.low %v117_v47, %v121_v49  ;;  %v8213_v5 = vcombine.low %v220_v56, %v224_v52  ;;  %v268_v49 = vld [vmem:[%s12966_s1 + $0x750] sm:$0xff] }
  0xc4   :  { %2139 = vmatprep.subr.bf16.mxu0 %v8158_v62  ;;  %v8120_v62 = vcombine.high %v125_v57, %v129_v58 }
  0xc5   :  { %2228 = vmatpush1.bf16.msra.mxu1 %v8055_v61  ;;  %v8214_v61 = vcombine.high %v220_v56, %v224_v52 }
  0xc6   :  { %2229 = vmatprep.subr.bf16.mxu1 %v8064_v63  ;;  %2131 = vmatmul.mubr.bf16.vlgmr.msra.gmra.mrb[4].mxu0 %v9847_v33  ;;  %v228_v63 = vld [vmem:[%s12966_s1 + $0x610] sm:$0xff] }
  0xc7   :  { %2140 = vmatpush1.bf16.msra.mxu0 %v8157_v6  ;;  %2171 = vmatprep.mubr.bf16.mxu0 %v9857_v38  ;;  %v8119_v6 = vcombine.low %v125_v57, %v129_v58  ;;  %v8221_v13 = vcombine.low %v228_v63, %v232_v1  ;;  %v276_v58 = vld [vmem:[%s12966_s1 + $0x790] sm:$0xff] }
  0xc8   :  { %2141 = vmatprep.subr.bf16.mxu0 %v8166_v8  ;;  %v8128_v8 = vcombine.high %v133_v2, %v137_v3 }
  0xc9   :  { %2230 = vmatpush1.bf16.msra.mxu1 %v8063_v7  ;;  %v8222_v7 = vcombine.high %v228_v63, %v232_v1 }
  0xca   :  { %2231 = vmatprep.subr.bf16.mxu1 %v8072_v9  ;;  %v236_v9 = vld [vmem:[%s12966_s1 + $0x650] sm:$0xff] }
  0xcb   :  { %2142 = vmatpush1.bf16.msra.mxu0 %v8165_v14  ;;  %v8127_v14 = vcombine.low %v133_v2, %v137_v3  ;;  %v8229_v22 = vcombine.low %v236_v9, %v240_v10  ;;  %v284_v3 = vld [vmem:[%s12966_s1 + $0x7d0] sm:$0xff] }
  0xcc   :  { %2143 = vmatprep.subr.bf16.mxu0 %v8174_v16  ;;  %v8136_v16 = vcombine.high %v141_v11, %v145_v12 }
  0xcd   :  { %2232 = vmatpush1.bf16.msra.mxu1 %v8071_v15  ;;  %v8230_v15 = vcombine.high %v236_v9, %v240_v10 }
  0xce   :  { %2233 = vmatprep.subr.bf16.mxu1 %v8080_v17  ;;  %v244_v17 = vld [vmem:[%s12966_s1 + $0x690] sm:$0xff] }
  0xcf   :  { %2144 = vmatpush1.bf16.msra.mxu0 %v8173_v23  ;;  %v8135_v23 = vcombine.low %v141_v11, %v145_v12  ;;  %v2364_v11 = vld [vmem:[%s12968_s3 + $0x20] sm:$0xff]  ;;  %v197_v12 = vld [vmem:[%s12966_s1 + $0x518] sm:$0xff] }
  0xd0   :  { %2145 = vmatprep.subr.bf16.mxu0 %v8182_v25  ;;  %v8144_v25 = vcombine.high %v149_v20, %v153_v21 }
  0xd1   :  { %2234 = vmatpush1.bf16.msra.mxu1 %v8079_v24  ;;  %v8238_v24 = vcombine.high %v244_v17, %v248_v19 }
  0xd2   :  { %2235 = vmatprep.subr.bf16.mxu1 %v8088_v26  ;;  %v252_v26 = vld [vmem:[%s12966_s1 + $0x6d0] sm:$0xff] }
  0xd3   :  { %2146 = vmatpush1.bf16.msra.mxu0 %v8181_v32  ;;  %v8246_v39 = vcombine.high %v252_v26, %v256_v27 }
  0xd4   :  { %2147 = vmatprep.subr.bf16.mxu0 %v8190_v35 }
  0xd5   :  { %2236 = vmatpush1.bf16.msra.mxu1 %v8087_v34  ;;  %v8237_v34 = vcombine.low %v244_v17, %v248_v19  ;;  %v2368_v19 = vld [vmem:[%s12968_s3 + $0x40] sm:$0xff] }
  0xd6   :  { %2237 = vmatprep.subr.bf16.mxu1 %v8096_v37  ;;  %v8143_v37 = vcombine.low %v149_v20, %v153_v21  ;;  %v2372_v20 = vld [vmem:[%s12968_s3 + $0x60] sm:$0xff]  ;;  %v205_v21 = vld [vmem:[%s12966_s1 + $0x558] sm:$0xff] }
  0xd7   :  { %2148 = vmatpush1.bf16.msra.mxu0 %v8189_v41  ;;  %v264_v41 = vld [vmem:[%s12966_s1 + $0x730] sm:$0xff] }
  0xd8   :  { %2149 = vmatprep.subr.bf16.mxu0 %v8198_v43  ;;  %v169_v43 = vld [vmem:[%s12966_s1 + $0x438] sm:$0xff]  ;;  %v8254_v46 = vcombine.high %v260_v36, %v264_v41 }
  0xd9   :  { %2238 = vmatpush1.bf16.msra.mxu1 %v8095_v42  ;;  %v165_v42 = vld [vmem:[%s12966_s1 + $0x418] sm:$0xff] }
  0xda   :  { %2239 = vmatprep.subr.bf16.mxu1 %v8104_v44  ;;  %v8245_v44 = vcombine.low %v252_v26, %v256_v27  ;;  %v8160_v47 = vcombine.high %v165_v42, %v169_v43  ;;  %v8159_v56 = vcombine.low %v165_v42, %v169_v43  ;;  %v2376_v27 = vld [vmem:[%s12968_s3 + $0x80] sm:$0xff]  ;;  %v225_v42 = vld [vmem:[%s12966_s1 + $0x5f8] sm:$0xff] }
  0xdb   :  { %2150 = vmatpush1.bf16.msra.mxu0 %v8197_v50  ;;  %v272_v50 = vld [vmem:[%s12966_s1 + $0x770] sm:$0xff]  ;;  %v8333_v43 = vcombine.low %v2376_v27, %v2380_v29 }
  0xdc   :  { %2151 = vmatprep.subr.bf16.mxu0 %v8206_v53  ;;  %v177_v53 = vld [vmem:[%s12966_s1 + $0x478] sm:$0xff]  ;;  %v8262_v52 = vcombine.high %v268_v49, %v272_v50 }
  0xdd   :  { %2240 = vmatpush1.bf16.msra.mxu1 %v8103_v51  ;;  %v173_v51 = vld [vmem:[%s12966_s1 + $0x458] sm:$0xff] }
  0xde   :  { %2241 = vmatprep.subr.bf16.mxu1 %v8112_v54  ;;  %v8253_v54 = vcombine.low %v260_v36, %v264_v41  ;;  %v8168_v57 = vcombine.high %v173_v51, %v177_v53  ;;  %v8167_v63 = vcombine.low %v173_v51, %v177_v53  ;;  %v2388_v36 = vld [vmem:[%s12968_s3 + $0xe0] sm:$0xff]  ;;  %v221_v41 = vld [vmem:[%s12966_s1 + $0x5d8] sm:$0xff] }
  0xdf   :  { %2152 = vmatpush1.bf16.msra.mxu0 %v8205_v59  ;;  %v280_v59 = vld [vmem:[%s12966_s1 + $0x7b0] sm:$0xff]  ;;  %v233_v51 = vld [vmem:[%s12966_s1 + $0x638] sm:$0xff] }
  0xe0   :  { %2153 = vmatprep.subr.bf16.mxu0 %v8214_v61  ;;  %v185_v61 = vld [vmem:[%s12966_s1 + $0x4b8] sm:$0xff]  ;;  %v8270_v1 = vcombine.high %v276_v58, %v280_v59 }
  0xe1   :  { %2242 = vmatpush1.bf16.msra.mxu1 %v8111_v60  ;;  %v181_v60 = vld [vmem:[%s12966_s1 + $0x498] sm:$0xff] }
  0xe2   :  { %2243 = vmatprep.subr.bf16.mxu1 %v8120_v62  ;;  %v8261_v62 = vcombine.low %v268_v49, %v272_v50  ;;  %v8176_v2 = vcombine.high %v181_v60, %v185_v61  ;;  %v2396_v49 = vld [vmem:[%s12968_s3 + $0x120] sm:$0xff]  ;;  %v229_v50 = vld [vmem:[%s12966_s1 + $0x618] sm:$0xff] }
  0xe3   :  { %2154 = vmatpush1.bf16.msra.mxu0 %v8213_v5  ;;  %v288_v5 = vld [vmem:[%s12966_s1 + $0x7f0] sm:$0xff] }
  0xe4   :  { %2155 = vmatprep.subr.bf16.mxu0 %v8222_v7  ;;  %v8269_v7 = vcombine.low %v276_v58, %v280_v59  ;;  %v8278_v9 = vcombine.high %v284_v3, %v288_v5  ;;  %v2404_v58 = vld [vmem:[%s12968_s3 + $0x160] sm:$0xff]  ;;  %v237_v59 = vld [vmem:[%s12966_s1 + $0x658] sm:$0xff] }
  0xe5   :  { %2244 = vmatpush1.bf16.msra.mxu1 %v8119_v6  ;;  %v193_v6 = vld [vmem:[%s12966_s1 + $0x4f8] sm:$0xff] }
  0xe6   :  { %2245 = vmatprep.subr.bf16.mxu1 %v8128_v8  ;;  %v8175_v8 = vcombine.low %v181_v60, %v185_v61  ;;  %v241_v60 = vld [vmem:[%s12966_s1 + $0x678] sm:$0xff] }
  0xe7   :  { %2156 = vmatpush1.bf16.msra.mxu0 %v8221_v13  ;;  %v201_v13 = vld [vmem:[%s12966_s1 + $0x538] sm:$0xff] }
  0xe8   :  { %2157 = vmatprep.subr.bf16.mxu0 %v8230_v15  ;;  %v8192_v17 = vcombine.high %v197_v12, %v201_v13 }
  0xe9   :  { %2246 = vmatpush1.bf16.msra.mxu1 %v8127_v14  ;;  %v8277_v14 = vcombine.low %v284_v3, %v288_v5  ;;  %v2412_v3 = vld [vmem:[%s12968_s3 + $0x1a0] sm:$0xff]  ;;  %v245_v5 = vld [vmem:[%s12966_s1 + $0x698] sm:$0xff] }
  0xea   :  { %2247 = vmatprep.subr.bf16.mxu1 %v8136_v16 }
  0xeb   :  { %v10377_v28 = vpop.f32.mrb[0].mxu1  ;;  %2158 = vmatpush1.bf16.msra.mxu0 %v8229_v22  ;;  %v209_v22 = vld [vmem:[%s12966_s1 + $0x578] sm:$0xff] }
  0xec   :  { %v10385_v32 = vpop.f32.mrb[1].mxu1  ;;  %2159 = vmatprep.subr.bf16.mxu0 %v8238_v24  ;;  %v8191_v24 = vcombine.low %v197_v12, %v201_v13  ;;  %v8200_v26 = vcombine.high %v205_v21, %v209_v22  ;;  %v257_v12 = vld [vmem:[%s12966_s1 + $0x6f8] sm:$0xff] }
  0xed   :  { %v1972_v35 = vpop.f32.mrb[2].mxu1  ;;  %2248 = vmatpush1.bf16.msra.mxu1 %v8135_v23 }
  0xee   :  { %v1973_v40 = vpop.f32.mrb[3].mxu1  ;;  %2249 = vmatprep.subr.bf16.mxu1 %v8144_v25  ;;  %v8326_v25 = vcombine.high %v2368_v19, %v2372_v20  ;;  %v8325_v35 = vcombine.low %v2368_v19, %v2372_v20  ;;  %v2428_v19 = vld [vmem:[%s12968_s3 + $0x220] sm:$0xff]  ;;  %v261_v20 = vld [vmem:[%s12966_s1 + $0x718] sm:$0xff] }
  0xef   :  { %2160 = vmatpush1.bf16.msra.mxu0 %v8237_v34  ;;  %v217_v34 = vld [vmem:[%s12966_s1 + $0x5b8] sm:$0xff] }
  0xf0   :  { %2161 = vmatprep.subr.bf16.mxu0 %v8246_v39  ;;  %v8334_v39 = vcombine.high %v2376_v27, %v2380_v29  ;;  %v8208_v40 = vcombine.high %v213_v30, %v217_v34  ;;  %v2436_v27 = vld [vmem:[%s12968_s3 + $0x260] sm:$0xff]  ;;  %v269_v29 = vld [vmem:[%s12966_s1 + $0x758] sm:$0xff] }
  0xf1   :  { %2250 = vmatpush1.bf16.msra.mxu1 %v8143_v37  ;;  %v8199_v37 = vcombine.low %v205_v21, %v209_v22  ;;  %v265_v21 = vld [vmem:[%s12966_s1 + $0x738] sm:$0xff] }
  0xf2   :  { %2251 = vmatprep.subr.bf16.mxu1 %v8152_v31  ;;  %v2384_v31 = vld [vmem:[%s12968_s3 + $0xc0] sm:$0xff] }
  0xf3   :  { %2162 = vmatpush1.bf16.msra.mxu0 %v8245_v44  ;;  %v8207_v44 = vcombine.low %v213_v30, %v217_v34  ;;  %v8341_v53 = vcombine.low %v2384_v31, %v2388_v36  ;;  %v273_v30 = vld [vmem:[%s12966_s1 + $0x778] sm:$0xff] }
  0xf4   :  { %2163 = vmatprep.subr.bf16.mxu0 %v8254_v46  ;;  %v8216_v46 = vcombine.high %v221_v41, %v225_v42 }
  0xf5   :  { %2252 = vmatpush1.bf16.msra.mxu1 %v8151_v45  ;;  %v8342_v45 = vcombine.high %v2384_v31, %v2388_v36  ;;  %v2444_v31 = vld [vmem:[%s12968_s3 + $0x2a0] sm:$0xff]  ;;  %v277_v36 = vld [vmem:[%s12966_s1 + $0x798] sm:$0xff] }
  0xf6   :  { %2262 = vmatprep.subr.bf16.mxu1 %v8160_v47  ;;  %v2392_v47 = vld [vmem:[%s12968_s3 + $0x100] sm:$0xff] }
  0xf7   :  { %2164 = vmatpush1.bf16.msra.mxu0 %v8253_v54  ;;  %v8215_v54 = vcombine.low %v221_v41, %v225_v42  ;;  %v8349_v61 = vcombine.low %v2392_v47, %v2396_v49  ;;  %v281_v41 = vld [vmem:[%s12966_s1 + $0x7b8] sm:$0xff] }
  0xf8   :  { %2254 = vmatmul.mubr.bf16.vlgmr.msra.gmra.mrb[12].mxu1 %v9847_v33  ;;  %2165 = vmatprep.subr.bf16.mxu0 %v8262_v52  ;;  %v189_v33 = vld [vmem:[%s12966_s1 + $0x4d8] sm:$0xff]  ;;  %v8224_v52 = vcombine.high %v229_v50, %v233_v51 }
  0xf9   :  { %2263 = vmatpush1.bf16.msra.mxu1 %v8159_v56  ;;  %2294 = vmatprep.mubr.bf16.mxu1 %v9857_v38  ;;  %v8184_v10 = vcombine.high %v189_v33, %v193_v6  ;;  %v2360_v38 = vld [vmem:[%s12968_s3] sm:$0xff]  ;;  %v8183_v15 = vcombine.low %v189_v33, %v193_v6  ;;  %v8350_v56 = vcombine.high %v2392_v47, %v2396_v49  ;;  %v249_v33 = vld [vmem:[%s12966_s1 + $0x6b8] sm:$0xff] }
  0xfa   :  { %2264 = vmatprep.subr.bf16.mxu1 %v8168_v57  ;;  %v8318_v16 = vcombine.high %v2360_v38, %v2364_v11  ;;  %v8317_v23 = vcombine.low %v2360_v38, %v2364_v11  ;;  %v2400_v57 = vld [vmem:[%s12968_s3 + $0x140] sm:$0xff]  ;;  %v253_v11 = vld [vmem:[%s12966_s1 + $0x6d8] sm:$0xff] }
  0xfb   :  { %2166 = vmatpush1.bf16.msra.mxu0 %v8261_v62  ;;  %v8223_v62 = vcombine.low %v229_v50, %v233_v51  ;;  %v8357_v6 = vcombine.low %v2400_v57, %v2404_v58  ;;  %v2420_v38 = vld [vmem:[%s12968_s3 + $0x1e0] sm:$0xff]  ;;  %v285_v49 = vld [vmem:[%s12966_s1 + $0x7d8] sm:$0xff] }
  0xfc   :  { %2167 = vmatprep.subr.bf16.mxu0 %v8270_v1  ;;  %v8232_v1 = vcombine.high %v237_v59, %v241_v60  ;;  %v2452_v47 = vld [vmem:[%s12968_s3 + $0x2e0] sm:$0xff]  ;;  %v289_v50 = vld [vmem:[%s12966_s1 + $0x7f8] sm:$0xff] }
  0xfd   :  { %2265 = vmatpush1.bf16.msra.mxu1 %v8167_v63  ;;  %v8358_v63 = vcombine.high %v2400_v57, %v2404_v58  ;;  %v2460_v57 = vld [vmem:[%s12968_s3 + $0x320] sm:$0xff]  ;;  %v293_v58 = vld [vmem:[%s12966_s1 + $0x818] sm:$0xff] }
  0xfe   :  { %2266 = vmatprep.subr.bf16.mxu1 %v8176_v2  ;;  %v2408_v2 = vld [vmem:[%s12968_s3 + $0x180] sm:$0xff] }
  0xff   :  { %2168 = vmatpush1.bf16.msra.mxu0 %v8269_v7  ;;  %v8231_v7 = vcombine.low %v237_v59, %v241_v60  ;;  %v8365_v13 = vcombine.low %v2408_v2, %v2412_v3  ;;  %v297_v59 = vld [vmem:[%s12966_s1 + $0x838] sm:$0xff] }
 0x100   :  { %2169 = vmatprep.subr.bf16.mxu0 %v8278_v9  ;;  %v8240_v9 = vcombine.high %v245_v5, %v249_v33 }
 0x101   :  { %2267 = vmatpush1.bf16.msra.mxu1 %v8175_v8  ;;  %v8366_v8 = vcombine.high %v2408_v2, %v2412_v3  ;;  %v305_v2 = vld [vmem:[%s12966_s1 + $0x878] sm:$0xff]  ;;  %v2464_v3 = vld [vmem:[%s12968_s3 + $0x340] sm:$0xff] }
 0x102   :  { %2268 = vmatprep.subr.bf16.mxu1 %v8184_v10  ;;  %v2416_v10 = vld [vmem:[%s12968_s3 + $0x1c0] sm:$0xff] }
 0x103   :  { %2170 = vmatpush1.bf16.msra.mxu0 %v8277_v14  ;;  %v8239_v14 = vcombine.low %v245_v5, %v249_v33  ;;  %v8373_v22 = vcombine.low %v2416_v10, %v2420_v38  ;;  %v2468_v5 = vld [vmem:[%s12968_s3 + $0x360] sm:$0xff] }
 0x104   :  { %5474 = vmatprep.subr.bf16.mxu0 %v8318_v16  ;;  %v8248_v16 = vcombine.high %v253_v11, %v257_v12 }
 0x105   :  { %2269 = vmatpush1.bf16.msra.mxu1 %v8183_v15  ;;  %v8374_v15 = vcombine.high %v2416_v10, %v2420_v38  ;;  %v2476_v10 = vld [vmem:[%s12968_s3 + $0x3a0] sm:$0xff]  ;;  %v309_v38 = vld [vmem:[%s12966_s1 + $0x898] sm:$0xff] }
 0x106   :  { %2270 = vmatprep.subr.bf16.mxu1 %v8192_v17  ;;  %2172 = vmatmul.mubr.bf16.vlgmr.msra.gmra.mrb[4].mxu0 %v10051_v48  ;;  %v2424_v17 = vld [vmem:[%s12968_s3 + $0x200] sm:$0xff] }
 0x107   :  { %5475 = vmatpush1.bf16.msra.mxu0 %v8317_v23  ;;  %v8247_v23 = vcombine.low %v253_v11, %v257_v12  ;;  %v8381_v34 = vcombine.low %v2424_v17, %v2428_v19  ;;  %v313_v11 = vld [vmem:[%s12966_s1 + $0x8b8] sm:$0xff]  ;;  %v8421_v12 = vcombine.low %v2464_v3, %v2468_v5 }
 0x108   :  { %5476 = vmatprep.subr.bf16.mxu0 %v8326_v25  ;;  %v8256_v25 = vcombine.high %v261_v20, %v265_v21 }
 0x109   :  { %2271 = vmatpush1.bf16.msra.mxu1 %v8191_v24  ;;  %v8382_v24 = vcombine.high %v2424_v17, %v2428_v19  ;;  %v2484_v17 = vld [vmem:[%s12968_s3 + $0x3e0] sm:$0xff] }
 0x10a   :  { %2272 = vmatprep.subr.bf16.mxu1 %v8200_v26  ;;  %v2432_v26 = vld [vmem:[%s12968_s3 + $0x240] sm:$0xff] }
 0x10b   :  { %5477 = vmatpush1.bf16.msra.mxu0 %v8325_v35  ;;  %v8255_v35 = vcombine.low %v261_v20, %v265_v21  ;;  %v8389_v42 = vcombine.low %v2432_v26, %v2436_v27  ;;  %v8303_v20 = vcombine.low %v309_v38, %v313_v11 }
 0x10c   :  { %5478 = vmatprep.subr.bf16.mxu0 %v8334_v39  ;;  %v8264_v39 = vcombine.high %v269_v29, %v273_v30 }
 0x10d   :  { %2273 = vmatpush1.bf16.msra.mxu1 %v8199_v37  ;;  %v8390_v37 = vcombine.high %v2432_v26, %v2436_v27  ;;  %v2365_v26 = vld [vmem:[%s12968_s3 + $0x28] sm:$0xff] }
 0x10e   :  { %2274 = vmatprep.subr.bf16.mxu1 %v8208_v40  ;;  %v2440_v40 = vld [vmem:[%s12968_s3 + $0x280] sm:$0xff] }
 0x10f   :  { %5479 = vmatpush1.bf16.msra.mxu0 %v8333_v43  ;;  %v8263_v43 = vcombine.low %v269_v29, %v273_v30  ;;  %v8397_v51 = vcombine.low %v2440_v40, %v2444_v31 }
 0x110   :  { %5480 = vmatprep.subr.bf16.mxu0 %v8342_v45  ;;  %v8272_v45 = vcombine.high %v277_v36, %v281_v41 }
 0x111   :  { %2275 = vmatpush1.bf16.msra.mxu1 %v8207_v44  ;;  %v8398_v44 = vcombine.high %v2440_v40, %v2444_v31  ;;  %v2377_v31 = vld [vmem:[%s12968_s3 + $0x88] sm:$0xff] }
 0x112   :  { %2276 = vmatprep.subr.bf16.mxu1 %v8216_v46  ;;  %v2448_v46 = vld [vmem:[%s12968_s3 + $0x2c0] sm:$0xff] }
 0x113   :  { %5481 = vmatpush1.bf16.msra.mxu0 %v8341_v53  ;;  %v8271_v53 = vcombine.low %v277_v36, %v281_v41  ;;  %v8405_v60 = vcombine.low %v2448_v46, %v2452_v47  ;;  %v2381_v36 = vld [vmem:[%s12968_s3 + $0xa8] sm:$0xff] }
 0x114   :  { %5482 = vmatprep.subr.bf16.mxu0 %v8350_v56  ;;  %v8280_v56 = vcombine.high %v285_v49, %v289_v50 }
 0x115   :  { %2277 = vmatpush1.bf16.msra.mxu1 %v8215_v54  ;;  %v8406_v54 = vcombine.high %v2448_v46, %v2452_v47  ;;  %v2397_v47 = vld [vmem:[%s12968_s3 + $0x128] sm:$0xff] }
 0x116   :  { %2278 = vmatprep.subr.bf16.mxu1 %v8224_v52  ;;  %v2456_v52 = vld [vmem:[%s12968_s3 + $0x300] sm:$0xff] }
 0x117   :  { %5483 = vmatpush1.bf16.msra.mxu0 %v8349_v61  ;;  %v8279_v61 = vcombine.low %v285_v49, %v289_v50  ;;  %v8413_v33 = vcombine.low %v2456_v52, %v2460_v57 }
 0x118   :  { %5484 = vmatprep.subr.bf16.mxu0 %v8358_v63  ;;  %v8288_v63 = vcombine.high %v293_v58, %v297_v59 }
 0x119   :  { %2279 = vmatpush1.bf16.msra.mxu1 %v8223_v62  ;;  %v8414_v62 = vcombine.high %v2456_v52, %v2460_v57  ;;  %v10691_v52 = vsub.s32 1, %v9638_v18 }
 0x11a   :  { %2280 = vmatprep.subr.bf16.mxu1 %v8232_v1  ;;  %v301_v1 = vld [vmem:[%s12966_s1 + $0x858] sm:$0xff] }
 0x11b   :  { %5485 = vmatpush1.bf16.msra.mxu0 %v8357_v6  ;;  %v8287_v6 = vcombine.low %v293_v58, %v297_v59 }
 0x11c   :  { %5486 = vmatprep.subr.bf16.mxu0 %v8366_v8  ;;  %v8422_v8 = vcombine.high %v2464_v3, %v2468_v5 }
 0x11d   :  { %2281 = vmatpush1.bf16.msra.mxu1 %v8231_v7  ;;  %v8296_v7 = vcombine.high %v301_v1, %v305_v2 }
 0x11e   :  { %2282 = vmatprep.subr.bf16.mxu1 %v8240_v9  ;;  %v2472_v9 = vld [vmem:[%s12968_s3 + $0x380] sm:$0xff] }
 0x11f   :  { %5487 = vmatpush1.bf16.msra.mxu0 %v8365_v13  ;;  %v8295_v13 = vcombine.low %v301_v1, %v305_v2  ;;  %v8429_v19 = vcombine.low %v2472_v9, %v2476_v10 }
 0x120   :  { %5488 = vmatprep.subr.bf16.mxu0 %v8374_v15  ;;  %v8304_v15 = vcombine.high %v309_v38, %v313_v11 }
 0x121   :  { %2283 = vmatpush1.bf16.msra.mxu1 %v8239_v14  ;;  %v8430_v14 = vcombine.high %v2472_v9, %v2476_v10 }
 0x122   :  { %2284 = vmatprep.subr.bf16.mxu1 %v8248_v16  ;;  %v2480_v16 = vld [vmem:[%s12968_s3 + $0x3c0] sm:$0xff] }
 0x123   :  { %5489 = vmatpush1.bf16.msra.mxu0 %v8373_v22  ;;  %v8438_v21 = vcombine.high %v2480_v16, %v2484_v17  ;;  %v8437_v27 = vcombine.low %v2480_v16, %v2484_v17 }
 0x124   :  { %5490 = vmatprep.subr.bf16.mxu0 %v8382_v24  ;;  %v10640_v24 = vld [vmem:[%s12968_s3 + $0x420] sm:$0xff] }
 0x125   :  { %2285 = vmatpush1.bf16.msra.mxu1 %v8247_v23  ;;  %v10635_v23 = vld [vmem:[%s12968_s3 + $0x400] sm:$0xff] }
 0x126   :  { %2286 = vmatprep.subr.bf16.mxu1 %v8256_v25  ;;  %v2361_v25 = vld [vmem:[%s12968_s3 + $0x8] sm:$0xff]  ;;  %v8446_v30 = vcombine.high %v10635_v23, %v10640_v24 }
 0x127   :  { %5491 = vmatpush1.bf16.msra.mxu0 %v8381_v34  ;;  %v8320_v34 = vcombine.high %v2361_v25, %v2365_v26 }
 0x128   :  { %5492 = vmatprep.subr.bf16.mxu0 %v8390_v37  ;;  %v2373_v37 = vld [vmem:[%s12968_s3 + $0x68] sm:$0xff] }
 0x129   :  { %2287 = vmatpush1.bf16.msra.mxu1 %v8255_v35  ;;  %v2369_v35 = vld [vmem:[%s12968_s3 + $0x48] sm:$0xff] }
 0x12a   :  { %2288 = vmatprep.subr.bf16.mxu1 %v8264_v39  ;;  %v8319_v39 = vcombine.low %v2361_v25, %v2365_v26  ;;  %v8328_v40 = vcombine.high %v2369_v35, %v2373_v37  ;;  %v8327_v41 = vcombine.low %v2369_v35, %v2373_v37  ;;  %v2437_v25 = vld [vmem:[%s12968_s3 + $0x268] sm:$0xff]  ;;  %v2512_v37 = vld [vmem:[%s12968_s3 + $0x4c0] sm:$0xff] }
 0x12b   :  { %5493 = vmatpush1.bf16.msra.mxu0 %v8389_v42  ;;  %v8336_v42 = vcombine.high %v2377_v31, %v2381_v36  ;;  %v2445_v35 = vld [vmem:[%s12968_s3 + $0x2a8] sm:$0xff] }
 0x12c   :  { %5494 = vmatprep.subr.bf16.mxu0 %v8398_v44  ;;  %v2389_v44 = vld [vmem:[%s12968_s3 + $0xe8] sm:$0xff] }
 0x12d   :  { %2289 = vmatpush1.bf16.msra.mxu1 %v8263_v43  ;;  %v2385_v43 = vld [vmem:[%s12968_s3 + $0xc8] sm:$0xff] }
 0x12e   :  { %2290 = vmatprep.subr.bf16.mxu1 %v8272_v45  ;;  %v8335_v45 = vcombine.low %v2377_v31, %v2381_v36  ;;  %v8344_v46 = vcombine.high %v2385_v43, %v2389_v44  ;;  %v8343_v49 = vcombine.low %v2385_v43, %v2389_v44  ;;  %v2453_v43 = vld [vmem:[%s12968_s3 + $0x2e8] sm:$0xff]  ;;  %v2520_v44 = vld [vmem:[%s12968_s3 + $0x500] sm:$0xff] }
 0x12f   :  { %5495 = vmatpush1.bf16.msra.mxu0 %v8397_v51  ;;  %v10677_v51 = vsub.s32 0, %v9638_v18 }
 0x130   :  { %5496 = vmatprep.subr.bf16.mxu0 %v8406_v54  ;;  %v2405_v54 = vld [vmem:[%s12968_s3 + $0x168] sm:$0xff] }
 0x131   :  { %2291 = vmatpush1.bf16.msra.mxu1 %v8271_v53  ;;  %v2401_v53 = vld [vmem:[%s12968_s3 + $0x148] sm:$0xff] }
 0x132   :  { %2292 = vmatprep.subr.bf16.mxu1 %v8280_v56  ;;  %v10688_v56 = vld [vmem:[%s12969_s2] sm:$0xff]  ;;  %v8360_v58 = vcombine.high %v2401_v53, %v2405_v54 }
 0x133   :  { %5497 = vmatpush1.bf16.msra.mxu0 %v8405_v60  ;;  %v327_v59 = vrot.slane %v10688_v56, %v10677_v51  ;;  %v2409_v60 = vld [vmem:[%s12968_s3 + $0x188] sm:$0xff] }
 0x134   :  { %5498 = vmatprep.subr.bf16.mxu0 %v8414_v62  ;;  %v331_v62 = vrot.slane %v10688_v56, %v10691_v52 }
 0x135   :  { %2293 = vmatpush1.bf16.msra.mxu1 %v8279_v61  ;;  %v2413_v61 = vld [vmem:[%s12968_s3 + $0x1a8] sm:$0xff] }
 0x136   :  { %2303 = vmatprep.subr.bf16.mxu1 %v8288_v63  ;;  %v8359_v63 = vcombine.low %v2401_v53, %v2405_v54  ;;  %v8368_v2 = vcombine.high %v2409_v60, %v2413_v61  ;;  %v8367_v38 = vcombine.low %v2409_v60, %v2413_v61  ;;  %v2461_v53 = vld [vmem:[%s12968_s3 + $0x328] sm:$0xff]  ;;  %v2528_v54 = vld [vmem:[%s12968_s3 + $0x540] sm:$0xff] }
 0x137   :  { %5499 = vmatpush1.bf16.msra.mxu0 %v8413_v33  ;;  %v2417_v33 = vld [vmem:[%s12968_s3 + $0x1c8] sm:$0xff] }
 0x138   :  { %2295 = vmatmul.mubr.bf16.vlgmr.msra.gmra.mrb[12].mxu1 %v10051_v48  ;;  %5500 = vmatprep.subr.bf16.mxu0 %v8422_v8  ;;  %v317_v48 = vld [vmem:[%s12966_s1 + $0x8d8] sm:$0xff] }
 0x139   :  { %2304 = vmatpush1.bf16.msra.mxu1 %v8287_v6  ;;  %2335 = vmatprep.mubr.bf16.mxu1 %v9557_v4  ;;  %v321_v4 = vld [vmem:[%s12966_s1 + $0x8f8] sm:$0xff]  ;;  %v2421_v6 = vld [vmem:[%s12968_s3 + $0x1e8] sm:$0xff] }
 0x13a   :  { %2305 = vmatprep.subr.bf16.mxu1 %v8296_v7  ;;  %v8312_v22 = vcombine.high %v317_v48, %v321_v4  ;;  %v8311_v29 = vcombine.low %v317_v48, %v321_v4  ;;  %v8375_v17 = vcombine.low %v2417_v33, %v2421_v6  ;;  %v8445_v4 = vcombine.low %v10635_v23, %v10640_v24  ;;  %v2504_v23 = vld [vmem:[%s12968_s3 + $0x480] sm:$0xff] }
 0x13b   :  { %5501 = vmatpush1.bf16.msra.mxu0 %v8421_v12  ;;  %v8376_v12 = vcombine.high %v2417_v33, %v2421_v6  ;;  %v2508_v24 = vld [vmem:[%s12968_s3 + $0x4a0] sm:$0xff] }
 0x13c   :  { %5502 = vmatprep.subr.bf16.mxu0 %v8430_v14  ;;  %v2425_v14 = vld [vmem:[%s12968_s3 + $0x208] sm:$0xff]  ;;  %v8461_v31 = vcombine.low %v2504_v23, %v2508_v24 }
 0x13d   :  { %2306 = vmatpush1.bf16.msra.mxu1 %v8295_v13 }
 0x13e   :  { %2307 = vmatprep.subr.bf16.mxu1 %v8304_v15  ;;  %v2429_v15 = vld [vmem:[%s12968_s3 + $0x228] sm:$0xff] }
 0x13f   :  { %5503 = vmatpush1.bf16.msra.mxu0 %v8429_v19  ;;  %v8384_v19 = vcombine.high %v2425_v14, %v2429_v15  ;;  %v8383_v26 = vcombine.low %v2425_v14, %v2429_v15 }
 0x140   :  { %5504 = vmatprep.subr.bf16.mxu0 %v8438_v21 }
 0x141   :  { %2308 = vmatpush1.bf16.msra.mxu1 %v8303_v20 }
 0x142   :  { %2309 = vmatprep.subr.bf16.mxu1 %v8312_v22  ;;  %v2433_v22 = vld [vmem:[%s12968_s3 + $0x248] sm:$0xff] }
 0x143   :  { %5505 = vmatpush1.bf16.msra.mxu0 %v8437_v27 }
 0x144   :  { %5515 = vmatprep.subr.bf16.mxu0 %v8446_v30  ;;  %v8462_v30 = vcombine.high %v2504_v23, %v2508_v24 }
 0x145   :  { %2310 = vmatpush1.bf16.msra.mxu1 %v8311_v29  ;;  %v8392_v29 = vcombine.high %v2433_v22, %v2437_v25 }
 0x146   :  { %5638 = vmatprep.subr.bf16.mxu1 %v8320_v34  ;;  %v2441_v34 = vld [vmem:[%s12968_s3 + $0x288] sm:$0xff] }
 0x147   :  { %v8400_v36 = vcombine.high %v2441_v34, %v2445_v35 }
 0x148   :  { %8316 = vmatmul.mubr.msk.bf16.vlgmr.msra.gmra.mrb[12].mxu1 %vm1848_vm0, %v9701_v55  ;;  %v2393_v55 = vld [vmem:[%s12968_s3 + $0x108] sm:$0xff] }
 0x149   :  { %5639 = vmatpush1.bf16.msra.mxu1 %v8319_v39  ;;  %v8352_v50 = vcombine.high %v2393_v55, %v2397_v47  ;;  %v8351_v57 = vcombine.low %v2393_v55, %v2397_v47  ;;  %v2516_v39 = vld [vmem:[%s12968_s3 + $0x4e0] sm:$0xff] }
 0x14a   :  { %5640 = vmatprep.subr.bf16.mxu1 %v8328_v40  ;;  %v8391_v40 = vcombine.low %v2433_v22, %v2437_v25  ;;  %v8469_v55 = vcombine.low %v2512_v37, %v2516_v39 }
 0x14d   :  { %5641 = vmatpush1.bf16.msra.mxu1 %v8327_v41  ;;  %v8470_v41 = vcombine.high %v2512_v37, %v2516_v39  ;;  %v2564_v37 = vld [vmem:[%s12968_s3 + $0x660] sm:$0xff] }
 0x14e   :  { %5642 = vmatprep.subr.bf16.mxu1 %v8336_v42  ;;  %v2449_v42 = vld [vmem:[%s12968_s3 + $0x2c8] sm:$0xff] }
 0x14f   :  { %v8408_v47 = vcombine.high %v2449_v42, %v2453_v43 }
 0x151   :  { %5643 = vmatpush1.bf16.msra.mxu1 %v8335_v45  ;;  %v2524_v45 = vld [vmem:[%s12968_s3 + $0x520] sm:$0xff] }
 0x152   :  { %5644 = vmatprep.subr.bf16.mxu1 %v8344_v46  ;;  %v8399_v46 = vcombine.low %v2441_v34, %v2445_v35  ;;  %v2493_v34 = vld [vmem:[%s12968_s3 + $0x428] sm:$0xff]  ;;  %v2560_v35 = vld [vmem:[%s12968_s3 + $0x640] sm:$0xff] }
 0x155   :  { %5645 = vmatpush1.bf16.msra.mxu1 %v8343_v49  ;;  %v8478_v49 = vcombine.high %v2520_v44, %v2524_v45 }
 0x156   :  { %5646 = vmatprep.subr.bf16.mxu1 %v8352_v50  ;;  %v2457_v50 = vld [vmem:[%s12968_s3 + $0x308] sm:$0xff] }
 0x157   :  { %v8416_v60 = vcombine.high %v2457_v50, %v2461_v53 }
 0x159   :  { %5647 = vmatpush1.bf16.msra.mxu1 %v8351_v57  ;;  %v1927_v1 = vpop.f32.mrb[0].mxu0  ;;  %v2532_v57 = vld [vmem:[%s12968_s3 + $0x560] sm:$0xff] }
 0x15a   :  { %5648 = vmatprep.subr.bf16.mxu1 %v8360_v58  ;;  %v9098_v3 = vadd.f32 %v1927_v1, %v327_v59  ;;  %v1929_v5 = vpop.f32.mrb[1].mxu0  ;;  %v8407_v58 = vcombine.low %v2449_v42, %v2453_v43  ;;  %v8477_v59 = vcombine.low %v2520_v44, %v2524_v45  ;;  %v8486_v61 = vcombine.high %v2528_v54, %v2532_v57  ;;  %v2536_v1 = vld [vmem:[%s12968_s3 + $0x580] sm:$0xff]  ;;  %v2497_v42 = vld [vmem:[%s12968_s3 + $0x448] sm:$0xff] }
 0x15b   :  { %v9100_v7 = vadd.f32 %v1929_v5, %v331_v62  ;;  %v1931_v8 = vpop.f32.mrb[2].mxu0  ;;  %v2465_v62 = vld [vmem:[%s12968_s3 + $0x348] sm:$0xff]  ;;  %v10793_v5 = vsub.s32 3, %v9638_v18  ;;  %v8485_v33 = vcombine.low %v2528_v54, %v2532_v57  ;;  %v2568_v44 = vld [vmem:[%s12968_s3 + $0x680] sm:$0xff] }
 0x15c   :  { %v9099_v9 = vadd.f32 %v9098_v3, %v10377_v28  ;;  %v1932_v10 = vpop.f32.mrb[3].mxu0  ;;  %v2496_v28 = vld [vmem:[%s12968_s3 + $0x440] sm:$0xff]  ;;  %v8415_v3 = vcombine.low %v2457_v50, %v2461_v53  ;;  %v2473_v8 = vld [vmem:[%s12968_s3 + $0x388] sm:$0xff] }
 0x15d   :  { %5649 = vmatpush1.bf16.msra.mxu1 %v8359_v63  ;;  %v9101_v11 = vadd.f32 %v9100_v7, %v10385_v32  ;;  %v2500_v32 = vld [vmem:[%s12968_s3 + $0x460] sm:$0xff]  ;;  %v2469_v63 = vld [vmem:[%s12968_s3 + $0x368] sm:$0xff] }
 0x15e   :  { %5650 = vmatprep.subr.bf16.mxu1 %v8368_v2  ;;  %v2344_v13 = vmax.f32 %v9099_v9, 0.0  ;;  %v8454_v21 = vcombine.high %v2496_v28, %v2500_v32  ;;  %v8453_v27 = vcombine.low %v2496_v28, %v2500_v32  ;;  %v2540_v2 = vld [vmem:[%s12968_s3 + $0x5a0] sm:$0xff]  ;;  %v8424_v6 = vcombine.high %v2465_v62, %v2469_v63  ;;  %v2477_v9 = vld [vmem:[%s12968_s3 + $0x3a8] sm:$0xff] }
 0x15f   :  { %v2345_v16 = vmax.f32 %v9101_v11, 0.0  ;;  %v8494_v7 = vcombine.high %v2536_v1, %v2540_v2  ;;  %v2544_v10 = vld [vmem:[%s12968_s3 + $0x5c0] sm:$0xff]  ;;  %v339_v11 = vrot.slane %v10688_v56, %v10793_v5  ;;  %v8432_v14 = vcombine.high %v2473_v8, %v2477_v9  ;;  %v2481_v28 = vld [vmem:[%s12968_s3 + $0x3c8] sm:$0xff] }
 0x160   :  { %v10727_v20 = vpack.c.bf16 %v2344_v13, %v2344_v13  ;;  %v8493_v13 = vcombine.low %v2536_v1, %v2540_v2  ;;  %v2485_v32 = vld [vmem:[%s12968_s3 + $0x3e8] sm:$0xff]  ;;  %v8431_v25 = vcombine.low %v2473_v8, %v2477_v9  ;;  %v2572_v45 = vld [vmem:[%s12968_s3 + $0x6a0] sm:$0xff] }
 0x161   :  { %5651 = vmatpush1.bf16.msra.mxu1 %v8367_v38  ;;  %v10723_v48 = vpack.c.bf16 %v2345_v16, %v2345_v16  ;;  %v2548_v38 = vld [vmem:[%s12968_s3 + $0x5e0] sm:$0xff]  ;;  %v2501_v43 = vld [vmem:[%s12968_s3 + $0x468] sm:$0xff] }
 0x162   :  { %5652 = vmatprep.subr.bf16.mxu1 %v8376_v12  ;;  %v8423_v12 = vcombine.low %v2465_v62, %v2469_v63  ;;  %v8502_v16 = vcombine.high %v2544_v10, %v2548_v38  ;;  %v8501_v24 = vcombine.low %v2544_v10, %v2548_v38  ;;  %v2505_v50 = vld [vmem:[%s12968_s3 + $0x488] sm:$0xff]  ;;  %v2576_v54 = vld [vmem:[%s12968_s3 + $0x6c0] sm:$0xff] }
 0x163   :  { %5506 = vmatprep.mubr.bf16.mxu0 %v10723_v48  ;;  %5670 = vmatprep.mubr.bf16.mxu1 %v10723_v48  ;;  %v2509_v53 = vld [vmem:[%s12968_s3 + $0x4a8] sm:$0xff]  ;;  %v2580_v57 = vld [vmem:[%s12968_s3 + $0x6e0] sm:$0xff] }
 0x164   :  { %5507 = vmatmul.mubr.bf16.vlgmr.msra.gmra.mrb[8].mxu0 %v10727_v20  ;;  %v8534_v62 = vcombine.high %v2576_v54, %v2580_v57  ;;  %v2513_v63 = vld [vmem:[%s12968_s3 + $0x4c8] sm:$0xff]  ;;  %v8533_v9 = vcombine.low %v2576_v54, %v2580_v57  ;;  %v2624_v57 = vld [vmem:[%s12968_s3 + $0x840] sm:$0xff] }
 0x165   :  { %5653 = vmatpush1.bf16.msra.mxu1 %v8375_v17  ;;  %5516 = vmatpush1.bf16.msra.mxu0 %v8445_v4  ;;  %v2552_v4 = vld [vmem:[%s12968_s3 + $0x600] sm:$0xff]  ;;  %v2517_v1 = vld [vmem:[%s12968_s3 + $0x4e8] sm:$0xff] }
 0x166   :  { %5654 = vmatprep.subr.bf16.mxu1 %v8384_v19  ;;  %5517 = vmatprep.subr.bf16.mxu0 %v8454_v21  ;;  %v2556_v19 = vld [vmem:[%s12968_s3 + $0x620] sm:$0xff]  ;;  %v8472_v10 = vcombine.high %v2513_v63, %v2517_v1  ;;  %v2557_v54 = vld [vmem:[%s12968_s3 + $0x628] sm:$0xff] }
 0x169   :  { %5655 = vmatpush1.bf16.msra.mxu1 %v8383_v26  ;;  %5518 = vmatpush1.bf16.msra.mxu0 %v8453_v27  ;;  %v8440_v26 = vcombine.high %v2481_v28, %v2485_v32 }
 0x16a   :  { %5656 = vmatprep.subr.bf16.mxu1 %v8392_v29  ;;  %5519 = vmatprep.subr.bf16.mxu0 %v8462_v30  ;;  %v8510_v29 = vcombine.high %v2552_v4, %v2556_v19  ;;  %v2489_v30 = vld [vmem:[%s12968_s3 + $0x408] sm:$0xff] }
 0x16d   :  { %5657 = vmatpush1.bf16.msra.mxu1 %v8391_v40  ;;  %5520 = vmatpush1.bf16.msra.mxu0 %v8461_v31  ;;  %v8439_v40 = vcombine.low %v2481_v28, %v2485_v32  ;;  %v8509_v31 = vcombine.low %v2552_v4, %v2556_v19  ;;  %v2529_v19 = vld [vmem:[%s12968_s3 + $0x548] sm:$0xff] }
 0x16e   :  { %5658 = vmatprep.subr.bf16.mxu1 %v8400_v36  ;;  %5521 = vmatprep.subr.bf16.mxu0 %v8470_v41  ;;  %v8448_v36 = vcombine.high %v2489_v30, %v2493_v34  ;;  %v8518_v41 = vcombine.high %v2560_v35, %v2564_v37 }
 0x171   :  { %5659 = vmatpush1.bf16.msra.mxu1 %v8399_v46  ;;  %5522 = vmatpush1.bf16.msra.mxu0 %v8469_v55  ;;  %v8447_v46 = vcombine.low %v2489_v30, %v2493_v34  ;;  %v8517_v55 = vcombine.low %v2560_v35, %v2564_v37  ;;  %v2537_v30 = vld [vmem:[%s12968_s3 + $0x588] sm:$0xff]  ;;  %v2608_v35 = vld [vmem:[%s12968_s3 + $0x7c0] sm:$0xff] }
 0x172   :  { %5660 = vmatprep.subr.bf16.mxu1 %v8408_v47  ;;  %5523 = vmatprep.subr.bf16.mxu0 %v8478_v49  ;;  %v8456_v47 = vcombine.high %v2497_v42, %v2501_v43  ;;  %v8526_v49 = vcombine.high %v2568_v44, %v2572_v45  ;;  %v2541_v34 = vld [vmem:[%s12968_s3 + $0x5a8] sm:$0xff]  ;;  %v2612_v37 = vld [vmem:[%s12968_s3 + $0x7e0] sm:$0xff] }
 0x175   :  { %5661 = vmatpush1.bf16.msra.mxu1 %v8407_v58  ;;  %5524 = vmatpush1.bf16.msra.mxu0 %v8477_v59  ;;  %v8455_v58 = vcombine.low %v2497_v42, %v2501_v43  ;;  %v8525_v59 = vcombine.low %v2568_v44, %v2572_v45  ;;  %v8566_v42 = vcombine.high %v2608_v35, %v2612_v37  ;;  %v2545_v43 = vld [vmem:[%s12968_s3 + $0x5c8] sm:$0xff]  ;;  %v2616_v45 = vld [vmem:[%s12968_s3 + $0x800] sm:$0xff] }
 0x176   :  { %5662 = vmatprep.subr.bf16.mxu1 %v8416_v60  ;;  %5525 = vmatprep.subr.bf16.mxu0 %v8486_v61  ;;  %v8464_v60 = vcombine.high %v2505_v50, %v2509_v53  ;;  %v2549_v44 = vld [vmem:[%s12968_s3 + $0x5e8] sm:$0xff] }
 0x179   :  { %5663 = vmatpush1.bf16.msra.mxu1 %v8415_v3  ;;  %5526 = vmatpush1.bf16.msra.mxu0 %v8485_v33  ;;  %v2584_v3 = vld [vmem:[%s12968_s3 + $0x700] sm:$0xff] }
 0x17a   :  { %5664 = vmatprep.subr.bf16.mxu1 %v8424_v6  ;;  %5527 = vmatprep.subr.bf16.mxu0 %v8494_v7  ;;  %v2588_v33 = vld [vmem:[%s12968_s3 + $0x720] sm:$0xff]  ;;  %v8463_v7 = vcombine.low %v2505_v50, %v2509_v53  ;;  %v2553_v53 = vld [vmem:[%s12968_s3 + $0x608] sm:$0xff] }
 0x17b   :  { %v10809_v15 = vpop.f32.mrb[4].mxu1  ;;  %v8542_v38 = vcombine.high %v2584_v3, %v2588_v33  ;;  %v8541_v28 = vcombine.low %v2584_v3, %v2588_v33  ;;  %v2561_v3 = vld [vmem:[%s12968_s3 + $0x648] sm:$0xff] }
 0x17c   :  { %v2093_v17 = vpop.f32.mrb[5].mxu1  ;;  %v2565_v33 = vld [vmem:[%s12968_s3 + $0x668] sm:$0xff] }
 0x17d   :  { %v9103_v21 = vadd.f32 %v2093_v17, %v339_v11  ;;  %v2095_v22 = vpop.f32.mrb[6].mxu1  ;;  %5665 = vmatpush1.bf16.msra.mxu1 %v8423_v12  ;;  %5528 = vmatpush1.bf16.msra.mxu0 %v8493_v13  ;;  %v2521_v11 = vld [vmem:[%s12968_s3 + $0x508] sm:$0xff]  ;;  %v2592_v13 = vld [vmem:[%s12968_s3 + $0x740] sm:$0xff]  ;;  %v10893_v17 = vsub.s32 2, %v9638_v18 }
 0x17e   :  { %v2096_v23 = vpop.f32.mrb[7].mxu1  ;;  %5666 = vmatprep.subr.bf16.mxu1 %v8432_v14  ;;  %5529 = vmatprep.subr.bf16.mxu0 %v8502_v16  ;;  %v2525_v12 = vld [vmem:[%s12968_s3 + $0x528] sm:$0xff]  ;;  %v2596_v14 = vld [vmem:[%s12968_s3 + $0x760] sm:$0xff]  ;;  %v8471_v16 = vcombine.low %v2513_v63, %v2517_v1 }
 0x17f   :  { %v2347_v27 = vmax.f32 %v9103_v21, 0.0  ;;  %v8480_v32 = vcombine.high %v2521_v11, %v2525_v12  ;;  %v8550_v4 = vcombine.high %v2592_v13, %v2596_v14  ;;  %v2533_v21 = vld [vmem:[%s12968_s3 + $0x568] sm:$0xff]  ;;  %v2600_v22 = vld [vmem:[%s12968_s3 + $0x780] sm:$0xff]  ;;  %v8479_v23 = vcombine.low %v2521_v11, %v2525_v12 }
 0x180   :  { %v2569_v11 = vld [vmem:[%s12968_s3 + $0x688] sm:$0xff] }
 0x181   :  { %v10835_v39 = vpack.c.bf16 %v2347_v27, %v2347_v27  ;;  %5667 = vmatpush1.bf16.msra.mxu1 %v8431_v25  ;;  %5530 = vmatpush1.bf16.msra.mxu0 %v8501_v24  ;;  %v2604_v25 = vld [vmem:[%s12968_s3 + $0x7a0] sm:$0xff]  ;;  %v8549_v24 = vcombine.low %v2592_v13, %v2596_v14  ;;  %v335_v27 = vrot.slane %v10688_v56, %v10893_v17  ;;  %v2573_v12 = vld [vmem:[%s12968_s3 + $0x6a8] sm:$0xff] }
 0x182   :  { %5668 = vmatprep.subr.bf16.mxu1 %v8440_v26  ;;  %5531 = vmatprep.subr.bf16.mxu0 %v8510_v29  ;;  %v8488_v26 = vcombine.high %v2529_v19, %v2533_v21  ;;  %v8558_v29 = vcombine.high %v2600_v22, %v2604_v25  ;;  %v2640_v13 = vld [vmem:[%s12968_s3 + $0x8c0] sm:$0xff] }
 0x183   :  { %5547 = vmatprep.mubr.bf16.mxu0 %v10835_v39  ;;  %v2644_v14 = vld [vmem:[%s12968_s3 + $0x8e0] sm:$0xff] }
 0x185   :  { %5669 = vmatpush1.bf16.msra.mxu1 %v8439_v40  ;;  %5532 = vmatpush1.bf16.msra.mxu0 %v8509_v31  ;;  %v8487_v40 = vcombine.low %v2529_v19, %v2533_v21  ;;  %v8557_v31 = vcombine.low %v2600_v22, %v2604_v25  ;;  %v2577_v19 = vld [vmem:[%s12968_s3 + $0x6c8] sm:$0xff]  ;;  %v2648_v22 = vld [vmem:[%s12968_s3 + $0x900] sm:$0xff] }
 0x186   :  { %5679 = vmatprep.subr.bf16.mxu1 %v8448_v36  ;;  %5533 = vmatprep.subr.bf16.mxu0 %v8518_v41  ;;  %v8496_v36 = vcombine.high %v2537_v30, %v2541_v34  ;;  %v9102_v41 = vadd.f32 %v10809_v15, %v335_v27  ;;  %v8495_v15 = vcombine.low %v2537_v30, %v2541_v34  ;;  %v2581_v21 = vld [vmem:[%s12968_s3 + $0x6e8] sm:$0xff]  ;;  %v2652_v25 = vld [vmem:[%s12968_s3 + $0x920] sm:$0xff] }
 0x187   :  { %v8606_v27 = vcombine.high %v2648_v22, %v2652_v25  ;;  %v2589_v30 = vld [vmem:[%s12968_s3 + $0x728] sm:$0xff]  ;;  %v2656_v34 = vld [vmem:[%s12968_s3 + $0x940] sm:$0xff] }
 0x188   :  { %5671 = vmatmul.mubr.bf16.vlgmr.msra.gmra.mrb[16].mxu1 %v10727_v20 }
 0x189   :  { %5680 = vmatpush1.bf16.msra.mxu1 %v8447_v46  ;;  %5711 = vmatprep.mubr.bf16.mxu1 %v10835_v39  ;;  %v2620_v46 = vld [vmem:[%s12968_s3 + $0x820] sm:$0xff] }
 0x18a   :  { %5534 = vmatpush1.bf16.msra.mxu0 %v8517_v55  ;;  %5681 = vmatprep.subr.bf16.mxu1 %v8456_v47  ;;  %v8565_v55 = vcombine.low %v2608_v35, %v2612_v37  ;;  %v8504_v47 = vcombine.high %v2545_v43, %v2549_v44  ;;  %v8574_v50 = vcombine.high %v2616_v45, %v2620_v46  ;;  %v2660_v35 = vld [vmem:[%s12968_s3 + $0x960] sm:$0xff] }
 0x18b   :  { %v10864_v61 = vpop.f32.mrb[8].mxu1  ;;  %5535 = vmatprep.subr.bf16.mxu0 %v8526_v49  ;;  %v2346_v49 = vmax.f32 %v9102_v41, 0.0  ;;  %v8535_v37 = vcombine.low %v2577_v19, %v2581_v21  ;;  %v2593_v41 = vld [vmem:[%s12968_s3 + $0x748] sm:$0xff] }
 0x18c   :  { %v10872_v2 = vpop.f32.mrb[9].mxu1 }
 0x18d   :  { %v2218_v6 = vpop.f32.mrb[10].mxu1  ;;  %5682 = vmatpush1.bf16.msra.mxu1 %v8455_v58  ;;  %v2628_v58 = vld [vmem:[%s12968_s3 + $0x860] sm:$0xff]  ;;  %v10946_v63 = vpack.c.bf16 %v2346_v49, %v2346_v49  ;;  %v2605_v49 = vld [vmem:[%s12968_s3 + $0x7a8] sm:$0xff] }
 0x18e   :  { %v2219_v8 = vpop.f32.mrb[11].mxu1  ;;  %5536 = vmatpush1.bf16.msra.mxu0 %v8525_v59  ;;  %5683 = vmatprep.subr.bf16.mxu1 %v8464_v60  ;;  %v8503_v59 = vcombine.low %v2545_v43, %v2549_v44  ;;  %v8573_v60 = vcombine.low %v2616_v45, %v2620_v46  ;;  %v8582_v1 = vcombine.high %v2624_v57, %v2628_v58  ;;  %v2632_v6 = vld [vmem:[%s12968_s3 + $0x880] sm:$0xff] }
 0x18f   :  { %5537 = vmatprep.subr.bf16.mxu0 %v8534_v62  ;;  %v8512_v62 = vcombine.high %v2553_v53, %v2557_v54  ;;  %v8511_v8 = vcombine.low %v2553_v53, %v2557_v54  ;;  %v2664_v43 = vld [vmem:[%s12968_s3 + $0x980] sm:$0xff]  ;;  %v8613_v46 = vcombine.low %v2656_v34, %v2660_v35 }
 0x190   :  { %v2668_v44 = vld [vmem:[%s12968_s3 + $0x9a0] sm:$0xff] }
 0x191   :  { %5684 = vmatpush1.bf16.msra.mxu1 %v8463_v7  ;;  %v2636_v7 = vld [vmem:[%s12968_s3 + $0x8a0] sm:$0xff] }
 0x192   :  { %5538 = vmatpush1.bf16.msra.mxu0 %v8533_v9  ;;  %5685 = vmatprep.subr.bf16.mxu1 %v8472_v10  ;;  %v8581_v9 = vcombine.low %v2624_v57, %v2628_v58  ;;  %v8520_v10 = vcombine.high %v2561_v3, %v2565_v33  ;;  %v2676_v53 = vld [vmem:[%s12968_s3 + $0x9e0] sm:$0xff]  ;;  %v8621_v57 = vcombine.low %v2664_v43, %v2668_v44 }
 0x193   :  { %5539 = vmatprep.subr.bf16.mxu0 %v8542_v38  ;;  %v8590_v38 = vcombine.high %v2632_v6, %v2636_v7 }
 0x195   :  { %5686 = vmatpush1.bf16.msra.mxu1 %v8471_v16  ;;  %v8519_v16 = vcombine.low %v2561_v3, %v2565_v33  ;;  %v2684_v3 = vld [vmem:[%s12968_s3 + $0xa20] sm:$0xff] }
 0x196   :  { %5540 = vmatpush1.bf16.msra.mxu0 %v8541_v28  ;;  %5687 = vmatprep.subr.bf16.mxu1 %v8480_v32  ;;  %v8589_v28 = vcombine.low %v2632_v6, %v2636_v7  ;;  %v8528_v32 = vcombine.high %v2569_v11, %v2573_v12 }
 0x197   :  { %5541 = vmatprep.subr.bf16.mxu0 %v8550_v4  ;;  %v8598_v4 = vcombine.high %v2640_v13, %v2644_v14 }
 0x199   :  { %5688 = vmatpush1.bf16.msra.mxu1 %v8479_v23  ;;  %v8527_v23 = vcombine.low %v2569_v11, %v2573_v12  ;;  %v2692_v11 = vld [vmem:[%s12968_s3 + $0xa60] sm:$0xff] }
 0x19a   :  { %5542 = vmatpush1.bf16.msra.mxu0 %v8549_v24  ;;  %5689 = vmatprep.subr.bf16.mxu1 %v8488_v26  ;;  %v8597_v24 = vcombine.low %v2640_v13, %v2644_v14  ;;  %v8536_v26 = vcombine.high %v2577_v19, %v2581_v21  ;;  %v2700_v19 = vld [vmem:[%s12968_s3 + $0xaa0] sm:$0xff] }
 0x19b   :  { %5543 = vmatprep.subr.bf16.mxu0 %v8558_v29  ;;  %v2585_v29 = vld [vmem:[%s12968_s3 + $0x708] sm:$0xff] }
 0x19c   :  { %v8543_v45 = vcombine.low %v2585_v29, %v2589_v30 }
 0x19d   :  { %5690 = vmatpush1.bf16.msra.mxu1 %v8487_v40  ;;  %v8605_v40 = vcombine.low %v2648_v22, %v2652_v25 }
 0x19e   :  { %5544 = vmatpush1.bf16.msra.mxu0 %v8557_v31  ;;  %5691 = vmatprep.subr.bf16.mxu1 %v8496_v36  ;;  %v8544_v31 = vcombine.high %v2585_v29, %v2589_v30  ;;  %v8614_v36 = vcombine.high %v2656_v34, %v2660_v35  ;;  %v2708_v29 = vld [vmem:[%s12968_s3 + $0xae0] sm:$0xff] }
 0x19f   :  { %5545 = vmatprep.subr.bf16.mxu0 %v8566_v42  ;;  %v2597_v42 = vld [vmem:[%s12968_s3 + $0x768] sm:$0xff] }
 0x1a0   :  { %v8551_v54 = vcombine.low %v2593_v41, %v2597_v42 }
 0x1a1   :  { %5692 = vmatpush1.bf16.msra.mxu1 %v8495_v15  ;;  %v8552_v15 = vcombine.high %v2593_v41, %v2597_v42  ;;  %v2716_v41 = vld [vmem:[%s12968_s3 + $0xb20] sm:$0xff] }
 0x1a2   :  { %5546 = vmatpush1.bf16.msra.mxu0 %v8565_v55  ;;  %5693 = vmatprep.subr.bf16.mxu1 %v8504_v47  ;;  %v8622_v55 = vcombine.high %v2664_v43, %v2668_v44  ;;  %v2601_v47 = vld [vmem:[%s12968_s3 + $0x788] sm:$0xff] }
 0x1a3   :  { %5556 = vmatprep.subr.bf16.mxu0 %v8574_v50  ;;  %v2672_v50 = vld [vmem:[%s12968_s3 + $0x9c0] sm:$0xff]  ;;  %v8560_v58 = vcombine.high %v2601_v47, %v2605_v49  ;;  %v8559_v33 = vcombine.low %v2601_v47, %v2605_v49 }
 0x1a4   :  { %v8629_v6 = vcombine.low %v2672_v50, %v2676_v53  ;;  %v2724_v47 = vld [vmem:[%s12968_s3 + $0xb60] sm:$0xff] }
 0x1a5   :  { %5548 = vmatmul.mubr.bf16.vlgmr.msra.gmra.mrb[8].mxu0 %v10946_v63  ;;  %5694 = vmatpush1.bf16.msra.mxu1 %v8503_v59  ;;  %v8630_v59 = vcombine.high %v2672_v50, %v2676_v53 }
 0x1a6   :  { %5557 = vmatpush1.bf16.msra.mxu0 %v8573_v60  ;;  %5695 = vmatprep.subr.bf16.mxu1 %v8512_v62  ;;  %v2609_v60 = vld [vmem:[%s12968_s3 + $0x7c8] sm:$0xff] }
 0x1a7   :  { %5558 = vmatprep.subr.bf16.mxu0 %v8582_v1  ;;  %v2613_v62 = vld [vmem:[%s12968_s3 + $0x7e8] sm:$0xff]  ;;  %v2680_v1 = vld [vmem:[%s12968_s3 + $0xa00] sm:$0xff] }
 0x1a8   :  { %v8568_v7 = vcombine.high %v2609_v60, %v2613_v62  ;;  %v8567_v12 = vcombine.low %v2609_v60, %v2613_v62  ;;  %v8637_v13 = vcombine.low %v2680_v1, %v2684_v3  ;;  %v11104_v60 = vsub.s32 5, %v9638_v18  ;;  %v2728_v62 = vld [vmem:[%s12968_s3 + $0xb80] sm:$0xff] }
 0x1a9   :  { %5696 = vmatpush1.bf16.msra.mxu1 %v8511_v8  ;;  %v8638_v8 = vcombine.high %v2680_v1, %v2684_v3  ;;  %v2732_v1 = vld [vmem:[%s12968_s3 + $0xba0] sm:$0xff] }
 0x1aa   :  { %5559 = vmatpush1.bf16.msra.mxu0 %v8581_v9  ;;  %5697 = vmatprep.subr.bf16.mxu1 %v8520_v10  ;;  %v2617_v9 = vld [vmem:[%s12968_s3 + $0x808] sm:$0xff] }
 0x1ab   :  { %5560 = vmatprep.subr.bf16.mxu0 %v8590_v38  ;;  %v2621_v10 = vld [vmem:[%s12968_s3 + $0x828] sm:$0xff]  ;;  %v2688_v38 = vld [vmem:[%s12968_s3 + $0xa40] sm:$0xff] }
 0x1ac   :  { %v8576_v14 = vcombine.high %v2617_v9, %v2621_v10  ;;  %v8575_v21 = vcombine.low %v2617_v9, %v2621_v10  ;;  %v8645_v22 = vcombine.low %v2688_v38, %v2692_v11  ;;  %v2665_v9 = vld [vmem:[%s12968_s3 + $0x988] sm:$0xff] }
 0x1ad   :  { %5698 = vmatpush1.bf16.msra.mxu1 %v8519_v16  ;;  %v8646_v16 = vcombine.high %v2688_v38, %v2692_v11  ;;  %v2669_v10 = vld [vmem:[%s12968_s3 + $0x9a8] sm:$0xff]  ;;  %v347_v38 = vrot.slane %v10688_v56, %v11104_v60  ;;  %v2736_v11 = vld [vmem:[%s12968_s3 + $0xbc0] sm:$0xff] }
 0x1ae   :  { %5561 = vmatpush1.bf16.msra.mxu0 %v8589_v28  ;;  %5699 = vmatprep.subr.bf16.mxu1 %v8528_v32  ;;  %v2625_v28 = vld [vmem:[%s12968_s3 + $0x848] sm:$0xff] }
 0x1af   :  { %5562 = vmatprep.subr.bf16.mxu0 %v8598_v4  ;;  %v2629_v32 = vld [vmem:[%s12968_s3 + $0x868] sm:$0xff]  ;;  %v2696_v4 = vld [vmem:[%s12968_s3 + $0xa80] sm:$0xff] }
 0x1b0   :  { %v8584_v25 = vcombine.high %v2625_v28, %v2629_v32  ;;  %v8583_v30 = vcombine.low %v2625_v28, %v2629_v32  ;;  %v8653_v34 = vcombine.low %v2696_v4, %v2700_v19  ;;  %v8624_v28 = vcombine.high %v2665_v9, %v2669_v10 }
 0x1b1   :  { %5700 = vmatpush1.bf16.msra.mxu1 %v8527_v23  ;;  %v8654_v23 = vcombine.high %v2696_v4, %v2700_v19 }
 0x1b2   :  { %5563 = vmatpush1.bf16.msra.mxu0 %v8597_v24  ;;  %5701 = vmatprep.subr.bf16.mxu1 %v8536_v26  ;;  %v2633_v24 = vld [vmem:[%s12968_s3 + $0x888] sm:$0xff] }
 0x1b3   :  { %5564 = vmatprep.subr.bf16.mxu0 %v8606_v27  ;;  %v2637_v26 = vld [vmem:[%s12968_s3 + $0x8a8] sm:$0xff]  ;;  %v2704_v27 = vld [vmem:[%s12968_s3 + $0xac0] sm:$0xff] }
 0x1b4   :  { %v8592_v35 = vcombine.high %v2633_v24, %v2637_v26  ;;  %v8591_v42 = vcombine.low %v2633_v24, %v2637_v26  ;;  %v8661_v43 = vcombine.low %v2704_v27, %v2708_v29  ;;  %v2748_v24 = vld [vmem:[%s12968_s3 + $0xc20] sm:$0xff] }
 0x1b5   :  { %5702 = vmatpush1.bf16.msra.mxu1 %v8535_v37  ;;  %v8662_v37 = vcombine.high %v2704_v27, %v2708_v29  ;;  %v8623_v29 = vcombine.low %v2665_v9, %v2669_v10  ;;  %v2705_v10 = vld [vmem:[%s12968_s3 + $0xac8] sm:$0xff] }
 0x1b6   :  { %5565 = vmatpush1.bf16.msra.mxu0 %v8605_v40  ;;  %5703 = vmatprep.subr.bf16.mxu1 %v8544_v31  ;;  %v2641_v40 = vld [vmem:[%s12968_s3 + $0x8c8] sm:$0xff] }
 0x1b7   :  { %5566 = vmatprep.subr.bf16.mxu0 %v8614_v36  ;;  %v2645_v31 = vld [vmem:[%s12968_s3 + $0x8e8] sm:$0xff]  ;;  %v2712_v36 = vld [vmem:[%s12968_s3 + $0xb00] sm:$0xff] }
 0x1b8   :  { %v8600_v44 = vcombine.high %v2641_v40, %v2645_v31  ;;  %v8599_v49 = vcombine.low %v2641_v40, %v2645_v31  ;;  %v8669_v50 = vcombine.low %v2712_v36, %v2716_v41  ;;  %v2681_v31 = vld [vmem:[%s12968_s3 + $0xa08] sm:$0xff] }
 0x1b9   :  { %5704 = vmatpush1.bf16.msra.mxu1 %v8543_v45  ;;  %v8670_v45 = vcombine.high %v2712_v36, %v2716_v41  ;;  %v2756_v41 = vld [vmem:[%s12968_s3 + $0xc60] sm:$0xff] }
 0x1ba   :  { %5567 = vmatpush1.bf16.msra.mxu0 %v8613_v46  ;;  %5705 = vmatprep.subr.bf16.mxu1 %v8552_v15  ;;  %v2649_v46 = vld [vmem:[%s12968_s3 + $0x908] sm:$0xff] }
 0x1bb   :  { %5568 = vmatprep.subr.bf16.mxu0 %v8622_v55  ;;  %v2653_v15 = vld [vmem:[%s12968_s3 + $0x928] sm:$0xff]  ;;  %v2720_v55 = vld [vmem:[%s12968_s3 + $0xb40] sm:$0xff] }
 0x1bc   :  { %v8608_v53 = vcombine.high %v2649_v46, %v2653_v15  ;;  %v8607_v3 = vcombine.low %v2649_v46, %v2653_v15 }
 0x1bd   :  { %5706 = vmatpush1.bf16.msra.mxu1 %v8551_v54  ;;  %v8678_v54 = vcombine.high %v2720_v55, %v2724_v47 }
 0x1be   :  { %5569 = vmatpush1.bf16.msra.mxu0 %v8621_v57  ;;  %5707 = vmatprep.subr.bf16.mxu1 %v8560_v58  ;;  %v11095_v57 = vsub.s32 4, %v9638_v18  ;;  %v2657_v58 = vld [vmem:[%s12968_s3 + $0x948] sm:$0xff] }
 0x1bf   :  { %5570 = vmatprep.subr.bf16.mxu0 %v8630_v59  ;;  %v2661_v59 = vld [vmem:[%s12968_s3 + $0x968] sm:$0xff] }
 0x1c1   :  { %5708 = vmatpush1.bf16.msra.mxu1 %v8559_v33  ;;  %v8677_v33 = vcombine.low %v2720_v55, %v2724_v47  ;;  %v2689_v55 = vld [vmem:[%s12968_s3 + $0xa48] sm:$0xff] }
 0x1c2   :  { %5571 = vmatpush1.bf16.msra.mxu0 %v8629_v6  ;;  %5709 = vmatprep.subr.bf16.mxu1 %v8568_v7  ;;  %v8616_v6 = vcombine.high %v2657_v58, %v2661_v59  ;;  %v343_v7 = vrot.slane %v10688_v56, %v11095_v57  ;;  %v2673_v56 = vld [vmem:[%s12968_s3 + $0x9c8] sm:$0xff] }
 0x1c3   :  { %5572 = vmatprep.subr.bf16.mxu0 %v8638_v8  ;;  %v8686_v8 = vcombine.high %v2728_v62, %v2732_v1  ;;  %v2693_v47 = vld [vmem:[%s12968_s3 + $0xa68] sm:$0xff] }
 0x1c5   :  { %5710 = vmatpush1.bf16.msra.mxu1 %v8567_v12  ;;  %v2740_v12 = vld [vmem:[%s12968_s3 + $0xbe0] sm:$0xff] }
 0x1c6   :  { %5573 = vmatpush1.bf16.msra.mxu0 %v8637_v13  ;;  %5720 = vmatprep.subr.bf16.mxu1 %v8576_v14  ;;  %v8615_v13 = vcombine.low %v2657_v58, %v2661_v59  ;;  %v8694_v19 = vcombine.high %v2736_v11, %v2740_v12  ;;  %v8648_v58 = vcombine.high %v2689_v55, %v2693_v47 }
 0x1c7   :  { %5574 = vmatprep.subr.bf16.mxu0 %v8646_v16  ;;  %v8685_v16 = vcombine.low %v2728_v62, %v2732_v1  ;;  %v2697_v62 = vld [vmem:[%s12968_s3 + $0xa88] sm:$0xff] }
 0x1c8   :  { %5712 = vmatmul.mubr.bf16.vlgmr.msra.gmra.mrb[16].mxu1 %v10946_v63  ;;  %v2701_v1 = vld [vmem:[%s12968_s3 + $0xaa8] sm:$0xff] }
 0x1c9   :  { %5721 = vmatpush1.bf16.msra.mxu1 %v8575_v21  ;;  %v2677_v21 = vld [vmem:[%s12968_s3 + $0x9e8] sm:$0xff] }
 0x1ca   :  { %5575 = vmatpush1.bf16.msra.mxu0 %v8645_v22  ;;  %5722 = vmatprep.subr.bf16.mxu1 %v8584_v25 }
 0x1cb   :  { %5576 = vmatprep.subr.bf16.mxu0 %v8654_v23  ;;  %v2744_v23 = vld [vmem:[%s12968_s3 + $0xc00] sm:$0xff] }
 0x1cc   :  { %v8702_v40 = vcombine.high %v2744_v23, %v2748_v24 }
 0x1cd   :  { %5723 = vmatpush1.bf16.msra.mxu1 %v8583_v30 }
 0x1ce   :  { %5577 = vmatpush1.bf16.msra.mxu0 %v8653_v34  ;;  %5724 = vmatprep.subr.bf16.mxu1 %v8592_v35  ;;  %v8693_v34 = vcombine.low %v2736_v11, %v2740_v12  ;;  %v8632_v35 = vcombine.high %v2673_v56, %v2677_v21  ;;  %v2776_v11 = vld [vmem:[%s12968_s3 + $0xd00] sm:$0xff] }
 0x1cf   :  { %5578 = vmatprep.subr.bf16.mxu0 %v8662_v37  ;;  %v2780_v12 = vld [vmem:[%s12968_s3 + $0xd20] sm:$0xff] }
 0x1d1   :  { %5725 = vmatpush1.bf16.msra.mxu1 %v8591_v42  ;;  %v8631_v42 = vcombine.low %v2673_v56, %v2677_v21  ;;  %v2788_v56 = vld [vmem:[%s12968_s3 + $0xd60] sm:$0xff] }
 0x1d2   :  { %5579 = vmatpush1.bf16.msra.mxu0 %v8661_v43  ;;  %5726 = vmatprep.subr.bf16.mxu1 %v8600_v44  ;;  %v8701_v44 = vcombine.low %v2744_v23, %v2748_v24  ;;  %v2721_v24 = vld [vmem:[%s12968_s3 + $0xb48] sm:$0xff] }
 0x1d3   :  { %5580 = vmatprep.subr.bf16.mxu0 %v8670_v45 }
 0x1d5   :  { %5727 = vmatpush1.bf16.msra.mxu1 %v8599_v49  ;;  %v2760_v49 = vld [vmem:[%s12968_s3 + $0xc80] sm:$0xff] }
 0x1d6   :  { %5581 = vmatpush1.bf16.msra.mxu0 %v8669_v50  ;;  %5728 = vmatprep.subr.bf16.mxu1 %v8608_v53  ;;  %v2764_v50 = vld [vmem:[%s12968_s3 + $0xca0] sm:$0xff] }
 0x1d7   :  { %5582 = vmatprep.subr.bf16.mxu0 %v8678_v54  ;;  %v8718_v59 = vcombine.high %v2760_v49, %v2764_v50 }
 0x1d9   :  { %5729 = vmatpush1.bf16.msra.mxu1 %v8607_v3  ;;  %v2173_v14 = vpop.f32.mrb[4].mxu0  ;;  %v2768_v3 = vld [vmem:[%s12968_s3 + $0xcc0] sm:$0xff] }
 0x1da   :  { %5583 = vmatpush1.bf16.msra.mxu0 %v8677_v33  ;;  %5730 = vmatprep.subr.bf16.mxu1 %v8616_v6  ;;  %v9104_v32 = vadd.f32 %v2173_v14, %v343_v7  ;;  %v2175_v4 = vpop.f32.mrb[5].mxu0  ;;  %v2772_v33 = vld [vmem:[%s12968_s3 + $0xce0] sm:$0xff]  ;;  %v8647_v6 = vcombine.low %v2689_v55, %v2693_v47  ;;  %v8717_v7 = vcombine.low %v2760_v49, %v2764_v50 }
 0x1db   :  { %5584 = vmatprep.subr.bf16.mxu0 %v8686_v8  ;;  %v9106_v22 = vadd.f32 %v2175_v4, %v347_v38  ;;  %v2177_v25 = vpop.f32.mrb[6].mxu0  ;;  %v8656_v8 = vcombine.high %v2697_v62, %v2701_v1  ;;  %v8726_v9 = vcombine.high %v2768_v3, %v2772_v33  ;;  %v2709_v38 = vld [vmem:[%s12968_s3 + $0xae8] sm:$0xff]  ;;  %v8725_v14 = vcombine.low %v2768_v3, %v2772_v33  ;;  %v2808_v55 = vld [vmem:[%s12968_s3 + $0xe00] sm:$0xff] }
 0x1dc   :  { %v9105_v26 = vadd.f32 %v9104_v32, %v10864_v61  ;;  %v2178_v27 = vpop.f32.mrb[7].mxu0  ;;  %v2685_v61 = vld [vmem:[%s12968_s3 + $0xa28] sm:$0xff]  ;;  %v8663_v21 = vcombine.low %v2705_v10, %v2709_v38  ;;  %v2812_v47 = vld [vmem:[%s12968_s3 + $0xe20] sm:$0xff] }
 0x1dd   :  { %5731 = vmatpush1.bf16.msra.mxu1 %v8615_v13  ;;  %v9107_v30 = vadd.f32 %v9106_v22, %v10872_v2  ;;  %v2752_v2 = vld [vmem:[%s12968_s3 + $0xc40] sm:$0xff]  ;;  %v8640_v45 = vcombine.high %v2681_v31, %v2685_v61  ;;  %v8639_v53 = vcombine.low %v2681_v31, %v2685_v61  ;;  %v8655_v13 = vcombine.low %v2697_v62, %v2701_v1  ;;  %v2713_v32 = vld [vmem:[%s12968_s3 + $0xb08] sm:$0xff] }
 0x1de   :  { %5585 = vmatpush1.bf16.msra.mxu0 %v8685_v16  ;;  %5732 = vmatprep.subr.bf16.mxu1 %v8624_v28  ;;  %v2348_v37 = vmax.f32 %v9105_v26, 0.0  ;;  %v8710_v15 = vcombine.high %v2752_v2, %v2756_v41  ;;  %v8709_v54 = vcombine.low %v2752_v2, %v2756_v41  ;;  %v8664_v16 = vcombine.high %v2705_v10, %v2709_v38  ;;  %v2717_v4 = vld [vmem:[%s12968_s3 + $0xb28] sm:$0xff]  ;;  %v2792_v27 = vld [vmem:[%s12968_s3 + $0xd80] sm:$0xff] }
 0x1df   :  { %5586 = vmatprep.subr.bf16.mxu0 %v8694_v19  ;;  %v2349_v36 = vmax.f32 %v9107_v30, 0.0  ;;  %v8734_v28 = vcombine.high %v2776_v11, %v2780_v12  ;;  %v2784_v19 = vld [vmem:[%s12968_s3 + $0xd40] sm:$0xff]  ;;  %v8733_v22 = vcombine.low %v2776_v11, %v2780_v12  ;;  %v8672_v25 = vcombine.high %v2713_v32, %v2717_v4  ;;  %v2725_v26 = vld [vmem:[%s12968_s3 + $0xb68] sm:$0xff] }
 0x1e0   :  { %v11156_v46 = vpack.c.bf16 %v2348_v37, %v2348_v37  ;;  %v8742_v23 = vcombine.high %v2784_v19, %v2788_v56  ;;  %v8671_v30 = vcombine.low %v2713_v32, %v2717_v4  ;;  %v2733_v31 = vld [vmem:[%s12968_s3 + $0xba8] sm:$0xff]  ;;  %v2800_v61 = vld [vmem:[%s12968_s3 + $0xdc0] sm:$0xff]  ;;  %v8679_v2 = vcombine.low %v2721_v24, %v2725_v26 }
 0x1e1   :  { %5733 = vmatpush1.bf16.msra.mxu1 %v8623_v29  ;;  %v11154_v43 = vpack.c.bf16 %v2349_v36, %v2349_v36  ;;  %v2796_v29 = vld [vmem:[%s12968_s3 + $0xda0] sm:$0xff]  ;;  %v8765_v33 = vcombine.low %v2808_v55, %v2812_v47 }
 0x1e2   :  { %5587 = vmatpush1.bf16.msra.mxu0 %v8693_v34  ;;  %5734 = vmatprep.subr.bf16.mxu1 %v8632_v35  ;;  %v8741_v34 = vcombine.low %v2784_v19, %v2788_v56  ;;  %v8680_v35 = vcombine.high %v2721_v24, %v2725_v26  ;;  %v8750_v37 = vcombine.high %v2792_v27, %v2796_v29  ;;  %v2804_v36 = vld [vmem:[%s12968_s3 + $0xde0] sm:$0xff] }
 0x1e3   :  { %5597 = vmatprep.subr.bf16.mxu0 %v8702_v40  ;;  %5588 = vmatprep.mubr.bf16.mxu0 %v11154_v43  ;;  %v2729_v40 = vld [vmem:[%s12968_s3 + $0xb88] sm:$0xff]  ;;  %v8749_v41 = vcombine.low %v2792_v27, %v2796_v29  ;;  %v8757_v50 = vcombine.low %v2800_v61, %v2804_v36  ;;  %v2816_v62 = vld [vmem:[%s12968_s3 + $0xe40] sm:$0xff] }
 0x1e4   :  { %5752 = vmatprep.mubr.bf16.mxu1 %v11154_v43  ;;  %v8687_v49 = vcombine.low %v2729_v40, %v2733_v31  ;;  %v2820_v1 = vld [vmem:[%s12968_s3 + $0xe60] sm:$0xff] }
 0x1e5   :  { %5735 = vmatpush1.bf16.msra.mxu1 %v8631_v42  ;;  %5589 = vmatmul.mubr.bf16.vlgmr.msra.gmra.mrb[8].mxu0 %v11156_v46  ;;  %v8688_v42 = vcombine.high %v2729_v40, %v2733_v31  ;;  %v2824_v10 = vld [vmem:[%s12968_s3 + $0xe80] sm:$0xff]  ;;  %v8773_v12 = vcombine.low %v2816_v62, %v2820_v1 }
 0x1e6   :  { %5598 = vmatpush1.bf16.msra.mxu0 %v8701_v44  ;;  %5736 = vmatprep.subr.bf16.mxu1 %v8640_v45  ;;  %v8758_v44 = vcombine.high %v2800_v61, %v2804_v36  ;;  %v2737_v45 = vld [vmem:[%s12968_s3 + $0xbc8] sm:$0xff]  ;;  %v2828_v38 = vld [vmem:[%s12968_s3 + $0xea0] sm:$0xff] }
 0x1e7   :  { %5599 = vmatprep.subr.bf16.mxu0 %v8710_v15  ;;  %v2741_v15 = vld [vmem:[%s12968_s3 + $0xbe8] sm:$0xff]  ;;  %v2832_v32 = vld [vmem:[%s12968_s3 + $0xec0] sm:$0xff]  ;;  %v8781_v56 = vcombine.low %v2824_v10, %v2828_v38 }
 0x1e8   :  { %v8695_v3 = vcombine.low %v2737_v45, %v2741_v15  ;;  %v2836_v4 = vld [vmem:[%s12968_s3 + $0xee0] sm:$0xff] }
 0x1e9   :  { %5737 = vmatpush1.bf16.msra.mxu1 %v8639_v53  ;;  %v8696_v53 = vcombine.high %v2737_v45, %v2741_v15  ;;  %v2840_v24 = vld [vmem:[%s12968_s3 + $0xf00] sm:$0xff]  ;;  %v8789_v29 = vcombine.low %v2832_v32, %v2836_v4  ;;  %v350_v45 = vsub.s32 6, %v9638_v18 }
 0x1ea   :  { %5600 = vmatpush1.bf16.msra.mxu0 %v8709_v54  ;;  %5738 = vmatprep.subr.bf16.mxu1 %v8648_v58  ;;  %v8766_v54 = vcombine.high %v2808_v55, %v2812_v47  ;;  %v2745_v58 = vld [vmem:[%s12968_s3 + $0xc08] sm:$0xff]  ;;  %v2844_v26 = vld [vmem:[%s12968_s3 + $0xf20] sm:$0xff] }
 0x1eb   :  { %5601 = vmatprep.subr.bf16.mxu0 %v8718_v59  ;;  %v2749_v59 = vld [vmem:[%s12968_s3 + $0xc28] sm:$0xff]  ;;  %v2848_v40 = vld [vmem:[%s12968_s3 + $0xf40] sm:$0xff]  ;;  %v8797_v36 = vcombine.low %v2840_v24, %v2844_v26 }
 0x1ec   :  { %v8703_v11 = vcombine.low %v2745_v58, %v2749_v59  ;;  %v2852_v31 = vld [vmem:[%s12968_s3 + $0xf60] sm:$0xff] }
 0x1ed   :  { %5739 = vmatpush1.bf16.msra.mxu1 %v8647_v6  ;;  %v8704_v6 = vcombine.high %v2745_v58, %v2749_v59  ;;  %v2856_v15 = vld [vmem:[%s12968_s3 + $0xf80] sm:$0xff]  ;;  %v2793_v58 = vld [vmem:[%s12968_s3 + $0xd88] sm:$0xff] }
 0x1ee   :  { %5602 = vmatpush1.bf16.msra.mxu0 %v8717_v7  ;;  %5740 = vmatprep.subr.bf16.mxu1 %v8656_v8  ;;  %v8774_v7 = vcombine.high %v2816_v62, %v2820_v1  ;;  %v2753_v8 = vld [vmem:[%s12968_s3 + $0xc48] sm:$0xff]  ;;  %v2860_v55 = vld [vmem:[%s12968_s3 + $0xfa0] sm:$0xff] }
 0x1ef   :  { %5603 = vmatprep.subr.bf16.mxu0 %v8726_v9  ;;  %v2757_v9 = vld [vmem:[%s12968_s3 + $0xc68] sm:$0xff]  ;;  %v9555_v62 = vld [vmem:[%s12969_s2] sm:$0xff] }
 0x1f0   :  { %v8711_v19 = vcombine.low %v2753_v8, %v2757_v9  ;;  %v2797_v59 = vld [vmem:[%s12968_s3 + $0xda8] sm:$0xff]  ;;  %v351_v1 = vrot.slane %v9555_v62, %v350_v45 }
 0x1f1   :  { %5741 = vmatpush1.bf16.msra.mxu1 %v8655_v13  ;;  %v8712_v13 = vcombine.high %v2753_v8, %v2757_v9  ;;  %v8813_v8 = vcombine.low %v2856_v15, %v2860_v55  ;;  %v8752_v9 = vcombine.high %v2793_v58, %v2797_v59 }
 0x1f2   :  { %5604 = vmatpush1.bf16.msra.mxu0 %v8725_v14  ;;  %5742 = vmatprep.subr.bf16.mxu1 %v8664_v16  ;;  %v8782_v14 = vcombine.high %v2824_v10, %v2828_v38  ;;  %v2761_v16 = vld [vmem:[%s12968_s3 + $0xc88] sm:$0xff] }
 0x1f3   :  { %5605 = vmatprep.subr.bf16.mxu0 %v8734_v28  ;;  %v2765_v28 = vld [vmem:[%s12968_s3 + $0xca8] sm:$0xff] }
 0x1f4   :  { %v8719_v27 = vcombine.low %v2761_v16, %v2765_v28 }
 0x1f5   :  { %5743 = vmatpush1.bf16.msra.mxu1 %v8663_v21  ;;  %v8720_v21 = vcombine.high %v2761_v16, %v2765_v28 }
 0x1f6   :  { %5606 = vmatpush1.bf16.msra.mxu0 %v8733_v22  ;;  %5744 = vmatprep.subr.bf16.mxu1 %v8672_v25  ;;  %v8790_v22 = vcombine.high %v2832_v32, %v2836_v4  ;;  %v2769_v25 = vld [vmem:[%s12968_s3 + $0xcc8] sm:$0xff]  ;;  %v8751_v32 = vcombine.low %v2793_v58, %v2797_v59  ;;  %v2362_v4 = vld [vmem:[%s12968_s3 + $0x10] sm:$0xff] }
 0x1f7   :  { %5607 = vmatprep.subr.bf16.mxu0 %v8742_v23  ;;  %v2773_v23 = vld [vmem:[%s12968_s3 + $0xce8] sm:$0xff]  ;;  %v2390_v58 = vld [vmem:[%s12968_s3 + $0xf0] sm:$0xff] }
 0x1f8   :  { %v8727_v61 = vcombine.low %v2769_v25, %v2773_v23 }
 0x1f9   :  { %5745 = vmatpush1.bf16.msra.mxu1 %v8671_v30  ;;  %v8728_v30 = vcombine.high %v2769_v25, %v2773_v23 }
 0x1fa   :  { %5608 = vmatpush1.bf16.msra.mxu0 %v8741_v34  ;;  %5746 = vmatprep.subr.bf16.mxu1 %v8680_v35  ;;  %v8798_v34 = vcombine.high %v2840_v24, %v2844_v26  ;;  %v2777_v35 = vld [vmem:[%s12968_s3 + $0xd08] sm:$0xff] }
 0x1fb   :  { %5609 = vmatprep.subr.bf16.mxu0 %v8750_v37  ;;  %v2781_v37 = vld [vmem:[%s12968_s3 + $0xd28] sm:$0xff] }
 0x1fc   :  { %v8735_v47 = vcombine.low %v2777_v35, %v2781_v37  ;;  %v2809_v24 = vld [vmem:[%s12968_s3 + $0xe08] sm:$0xff] }
 0x1fd   :  { %5747 = vmatpush1.bf16.msra.mxu1 %v8679_v2  ;;  %v8736_v2 = vcombine.high %v2777_v35, %v2781_v37 }
 0x1fe   :  { %5610 = vmatpush1.bf16.msra.mxu0 %v8749_v41  ;;  %5748 = vmatprep.subr.bf16.mxu1 %v8688_v42  ;;  %v8806_v41 = vcombine.high %v2848_v40, %v2852_v31  ;;  %v2785_v42 = vld [vmem:[%s12968_s3 + $0xd48] sm:$0xff] }
 0x1ff   :  { %5611 = vmatprep.subr.bf16.mxu0 %v8758_v44  ;;  %v2789_v44 = vld [vmem:[%s12968_s3 + $0xd68] sm:$0xff] }
 0x201   :  { %5749 = vmatpush1.bf16.msra.mxu1 %v8687_v49  ;;  %v354_v49 = vsub.s32 7, %v9638_v18 }
 0x202   :  { %5612 = vmatpush1.bf16.msra.mxu0 %v8757_v50  ;;  %5750 = vmatprep.subr.bf16.mxu1 %v8696_v53  ;;  %v8805_v50 = vcombine.low %v2848_v40, %v2852_v31  ;;  %v8744_v53 = vcombine.high %v2785_v42, %v2789_v44 }
 0x203   :  { %5613 = vmatprep.subr.bf16.mxu0 %v8766_v54  ;;  %v8814_v54 = vcombine.high %v2856_v15, %v2860_v55 }
 0x205   :  { %5751 = vmatpush1.bf16.msra.mxu1 %v8695_v3  ;;  %v2864_v3 = vld [vmem:[%s12968_s3 + $0xfc0] sm:$0xff] }
 0x206   :  { %5614 = vmatpush1.bf16.msra.mxu0 %v8765_v33  ;;  %5761 = vmatprep.subr.bf16.mxu1 %v8704_v6  ;;  %v2868_v33 = vld [vmem:[%s12968_s3 + $0xfe0] sm:$0xff]  ;;  %v355_v6 = vrot.slane %v9555_v62, %v354_v49 }
 0x207   :  { %5615 = vmatprep.subr.bf16.mxu0 %v8774_v7  ;;  %v8743_v7 = vcombine.low %v2785_v42, %v2789_v44  ;;  %v8822_v38 = vcombine.high %v2864_v3, %v2868_v33  ;;  %v2382_v42 = vld [vmem:[%s12968_s3 + $0xb0] sm:$0xff] }
 0x208   :  { %5753 = vmatmul.mubr.bf16.vlgmr.msra.gmra.mrb[16].mxu1 %v11156_v46 }
 0x209   :  { %5762 = vmatpush1.bf16.msra.mxu1 %v8703_v11  ;;  %v2801_v11 = vld [vmem:[%s12968_s3 + $0xdc8] sm:$0xff] }
 0x20a   :  { %5616 = vmatpush1.bf16.msra.mxu0 %v8773_v12  ;;  %5763 = vmatprep.subr.bf16.mxu1 %v8712_v13  ;;  %v2805_v12 = vld [vmem:[%s12968_s3 + $0xde8] sm:$0xff] }
 0x20b   :  { %5617 = vmatprep.subr.bf16.mxu0 %v8782_v14  ;;  %v8759_v35 = vcombine.low %v2801_v11, %v2805_v12 }
 0x20d   :  { %5764 = vmatpush1.bf16.msra.mxu1 %v8711_v19  ;;  %v2366_v19 = vld [vmem:[%s12968_s3 + $0x30] sm:$0xff] }
 0x20e   :  { %5618 = vmatpush1.bf16.msra.mxu0 %v8781_v56  ;;  %5765 = vmatprep.subr.bf16.mxu1 %v8720_v21  ;;  %v8821_v21 = vcombine.low %v2864_v3, %v2868_v33  ;;  %v8322_v26 = vcombine.high %v2362_v4, %v2366_v19  ;;  %v8321_v37 = vcombine.low %v2362_v4, %v2366_v19  ;;  %v2833_v33 = vld [vmem:[%s12968_s3 + $0xec8] sm:$0xff] }
 0x20f   :  { %5619 = vmatprep.subr.bf16.mxu0 %v8790_v22  ;;  %v8760_v22 = vcombine.high %v2801_v11, %v2805_v12  ;;  %v2841_v12 = vld [vmem:[%s12968_s3 + $0xf08] sm:$0xff] }
 0x211   :  { %5766 = vmatpush1.bf16.msra.mxu1 %v8719_v27  ;;  %v2813_v27 = vld [vmem:[%s12968_s3 + $0xe28] sm:$0xff] }
 0x212   :  { %5620 = vmatpush1.bf16.msra.mxu0 %v8789_v29  ;;  %5767 = vmatprep.subr.bf16.mxu1 %v8728_v30  ;;  %v2370_v29 = vld [vmem:[%s12968_s3 + $0x50] sm:$0xff]  ;;  %v8768_v31 = vcombine.high %v2809_v24, %v2813_v27  ;;  %v8767_v44 = vcombine.low %v2809_v24, %v2813_v27 }
 0x213   :  { %5621 = vmatprep.subr.bf16.mxu0 %v8798_v34  ;;  %v2374_v30 = vld [vmem:[%s12968_s3 + $0x70] sm:$0xff] }
 0x214   :  { %v8329_v15 = vcombine.low %v2370_v29, %v2374_v30 }
 0x215   :  { %5768 = vmatpush1.bf16.msra.mxu1 %v8727_v61  ;;  %v8330_v61 = vcombine.high %v2370_v29, %v2374_v30  ;;  %v2857_v29 = vld [vmem:[%s12968_s3 + $0xf88] sm:$0xff] }
 0x216   :  { %5622 = vmatpush1.bf16.msra.mxu0 %v8797_v36  ;;  %5769 = vmatprep.subr.bf16.mxu1 %v8736_v2  ;;  %v2817_v36 = vld [vmem:[%s12968_s3 + $0xe48] sm:$0xff] }
 0x217   :  { %5623 = vmatprep.subr.bf16.mxu0 %v8806_v41  ;;  %v2821_v2 = vld [vmem:[%s12968_s3 + $0xe68] sm:$0xff]  ;;  %v2378_v41 = vld [vmem:[%s12968_s3 + $0x90] sm:$0xff] }
 0x218   :  { %v8776_v55 = vcombine.high %v2817_v36, %v2821_v2  ;;  %v8775_v59 = vcombine.low %v2817_v36, %v2821_v2  ;;  %v8337_v62 = vcombine.low %v2378_v41, %v2382_v42  ;;  %v2861_v30 = vld [vmem:[%s12968_s3 + $0xfa8] sm:$0xff] }
 0x219   :  { %5770 = vmatpush1.bf16.msra.mxu1 %v8735_v47  ;;  %v8338_v47 = vcombine.high %v2378_v41, %v2382_v42  ;;  %v8816_v36 = vcombine.high %v2857_v29, %v2861_v30  ;;  %v2865_v41 = vld [vmem:[%s12968_s3 + $0xfc8] sm:$0xff] }
 0x21a   :  { %5624 = vmatpush1.bf16.msra.mxu0 %v8805_v50  ;;  %5771 = vmatprep.subr.bf16.mxu1 %v8744_v53  ;;  %v2825_v50 = vld [vmem:[%s12968_s3 + $0xe88] sm:$0xff] }
 0x21b   :  { %v2337_v10 = vpop.f32.mrb[12].mxu1  ;;  %5625 = vmatprep.subr.bf16.mxu0 %v8814_v54  ;;  %v2829_v53 = vld [vmem:[%s12968_s3 + $0xea8] sm:$0xff]  ;;  %v2386_v54 = vld [vmem:[%s12968_s3 + $0xd0] sm:$0xff] }
 0x21c   :  { %v9108_v13 = vadd.f32 %v2337_v10, %v351_v1  ;;  %v2339_v14 = vpop.f32.mrb[13].mxu1  ;;  %v8784_v1 = vcombine.high %v2825_v50, %v2829_v53  ;;  %v8346_v3 = vcombine.high %v2386_v54, %v2390_v58  ;;  %v8345_v10 = vcombine.low %v2386_v54, %v2390_v58  ;;  %v2869_v42 = vld [vmem:[%s12968_s3 + $0xfe8] sm:$0xff]  ;;  %v2363_v54 = vld [vmem:[%s12968_s3 + $0x18] sm:$0xff] }
 0x21d   :  { %v9109_v16 = vadd.f32 %v2339_v14, %v355_v6  ;;  %v2341_v28 = vpop.f32.mrb[14].mxu1  ;;  %5772 = vmatpush1.bf16.msra.mxu1 %v8743_v7  ;;  %v2837_v6 = vld [vmem:[%s12968_s3 + $0xee8] sm:$0xff]  ;;  %v2394_v7 = vld [vmem:[%s12968_s3 + $0x110] sm:$0xff]  ;;  %v2367_v58 = vld [vmem:[%s12968_s3 + $0x38] sm:$0xff] }
 0x21e   :  { %v2342_v56 = vpop.f32.mrb[15].mxu1  ;;  %5626 = vmatpush1.bf16.msra.mxu0 %v8813_v8  ;;  %5773 = vmatprep.subr.bf16.mxu1 %v8752_v9  ;;  %v2350_v25 = vmax.f32 %v9108_v13, 0.0  ;;  %v2398_v8 = vld [vmem:[%s12968_s3 + $0x130] sm:$0xff]  ;;  %v8783_v9 = vcombine.low %v2825_v50, %v2829_v53  ;;  %v2845_v13 = vld [vmem:[%s12968_s3 + $0xf28] sm:$0xff]  ;;  %v8791_v28 = vcombine.low %v2833_v33, %v2837_v6  ;;  %v8824_v50 = vcombine.high %v2865_v41, %v2869_v42 }
 0x21f   :  { %v2351_v23 = vmax.f32 %v9109_v16, 0.0  ;;  %5627 = vmatprep.subr.bf16.mxu0 %v8822_v38  ;;  %v8792_v38 = vcombine.high %v2833_v33, %v2837_v6  ;;  %v8354_v11 = vcombine.high %v2394_v7, %v2398_v8  ;;  %v2402_v14 = vld [vmem:[%s12968_s3 + $0x150] sm:$0xff]  ;;  %v8800_v4 = vcombine.high %v2841_v12, %v2845_v13  ;;  %v2849_v56 = vld [vmem:[%s12968_s3 + $0xf48] sm:$0xff] }
 0x220   :  { %v11365_v40 = vpack.c.bf16 %v2350_v25, %v2350_v25  ;;  %v2406_v16 = vld [vmem:[%s12968_s3 + $0x170] sm:$0xff]  ;;  %v8324_v33 = vcombine.high %v2363_v54, %v2367_v58 }
 0x221   :  { %v11363_v34 = vpack.c.bf16 %v2351_v23, %v2351_v23  ;;  %5774 = vmatpush1.bf16.msra.mxu1 %v8751_v32  ;;  %v8353_v32 = vcombine.low %v2394_v7, %v2398_v8  ;;  %v8362_v19 = vcombine.high %v2402_v14, %v2406_v16  ;;  %v2414_v25 = vld [vmem:[%s12968_s3 + $0x1b0] sm:$0xff]  ;;  %v8799_v23 = vcombine.low %v2841_v12, %v2845_v13  ;;  %v2371_v7 = vld [vmem:[%s12968_s3 + $0x58] sm:$0xff] }
 0x222   :  { %5628 = vmatpush1.bf16.msra.mxu0 %v8821_v21  ;;  %5775 = vmatprep.subr.bf16.mxu1 %v8760_v22  ;;  %v2853_v21 = vld [vmem:[%s12968_s3 + $0xf68] sm:$0xff]  ;;  %v2410_v22 = vld [vmem:[%s12968_s3 + $0x190] sm:$0xff]  ;;  %v8361_v24 = vcombine.low %v2402_v14, %v2406_v16  ;;  %v2375_v8 = vld [vmem:[%s12968_s3 + $0x78] sm:$0xff] }
 0x223   :  { %5629 = vmatprep.mubr.bf16.mxu0 %v11363_v34  ;;  %5793 = vmatprep.mubr.bf16.mxu1 %v11363_v34  ;;  %v8370_v27 = vcombine.high %v2410_v22, %v2414_v25  ;;  %v8332_v12 = vcombine.high %v2371_v7, %v2375_v8  ;;  %v2379_v14 = vld [vmem:[%s12968_s3 + $0x98] sm:$0xff] }
 0x224   :  { %5802 = vmatprep.subr.bf16.mxu0 %v8322_v26  ;;  %v8808_v26 = vcombine.high %v2849_v56, %v2853_v21  ;;  %v2383_v16 = vld [vmem:[%s12968_s3 + $0xb8] sm:$0xff] }
 0x225   :  { %5630 = vmatmul.mubr.bf16.vlgmr.msra.gmra.mrb[8].mxu0 %v11365_v40  ;;  %5776 = vmatpush1.bf16.msra.mxu1 %v8759_v35  ;;  %v2418_v35 = vld [vmem:[%s12968_s3 + $0x1d0] sm:$0xff] }
 0x226   :  { %5803 = vmatpush1.bf16.msra.mxu0 %v8321_v37  ;;  %5834 = vmatprep.mubr.bf16.mxu0 %v10723_v48  ;;  %v2422_v37 = vld [vmem:[%s12968_s3 + $0x1f0] sm:$0xff] }
 0x227   :  { %5777 = vmatprep.subr.bf16.mxu1 %v8768_v31  ;;  %5804 = vmatprep.subr.bf16.mxu0 %v8330_v61  ;;  %v8807_v31 = vcombine.low %v2849_v56, %v2853_v21  ;;  %v8369_v61 = vcombine.low %v2410_v22, %v2414_v25  ;;  %v8378_v2 = vcombine.high %v2418_v35, %v2422_v37  ;;  %v2387_v22 = vld [vmem:[%s12968_s3 + $0xd8] sm:$0xff] }
 0x228   :  { %v8340_v56 = vcombine.high %v2379_v14, %v2383_v16  ;;  %v2391_v25 = vld [vmem:[%s12968_s3 + $0xf8] sm:$0xff] }
 0x229   :  { %5778 = vmatpush1.bf16.msra.mxu1 %v8767_v44  ;;  %v2426_v44 = vld [vmem:[%s12968_s3 + $0x210] sm:$0xff] }
 0x22a   :  { %5805 = vmatpush1.bf16.msra.mxu0 %v8329_v15  ;;  %5779 = vmatprep.subr.bf16.mxu1 %v8776_v55  ;;  %v2430_v15 = vld [vmem:[%s12968_s3 + $0x230] sm:$0xff]  ;;  %v8815_v55 = vcombine.low %v2857_v29, %v2861_v30  ;;  %v2395_v30 = vld [vmem:[%s12968_s3 + $0x118] sm:$0xff] }
 0x22b   :  { %5806 = vmatprep.subr.bf16.mxu0 %v8338_v47  ;;  %v8377_v47 = vcombine.low %v2418_v35, %v2422_v37  ;;  %v8386_v53 = vcombine.high %v2426_v44, %v2430_v15  ;;  %v2399_v35 = vld [vmem:[%s12968_s3 + $0x138] sm:$0xff]  ;;  %v2466_v37 = vld [vmem:[%s12968_s3 + $0x350] sm:$0xff] }
 0x22d   :  { %5780 = vmatpush1.bf16.msra.mxu1 %v8775_v59  ;;  %v2434_v59 = vld [vmem:[%s12968_s3 + $0x250] sm:$0xff] }
 0x22e   :  { %5807 = vmatpush1.bf16.msra.mxu0 %v8337_v62  ;;  %5781 = vmatprep.subr.bf16.mxu1 %v8784_v1  ;;  %v2438_v62 = vld [vmem:[%s12968_s3 + $0x270] sm:$0xff]  ;;  %v8823_v1 = vcombine.low %v2865_v41, %v2869_v42  ;;  %v2403_v42 = vld [vmem:[%s12968_s3 + $0x158] sm:$0xff] }
 0x22f   :  { %5808 = vmatprep.subr.bf16.mxu0 %v8346_v3  ;;  %v8385_v3 = vcombine.low %v2426_v44, %v2430_v15  ;;  %v8394_v6 = vcombine.high %v2434_v59, %v2438_v62  ;;  %v2407_v44 = vld [vmem:[%s12968_s3 + $0x178] sm:$0xff]  ;;  %v2474_v15 = vld [vmem:[%s12968_s3 + $0x390] sm:$0xff] }
 0x231   :  { %5782 = vmatpush1.bf16.msra.mxu1 %v8783_v9  ;;  %v2442_v9 = vld [vmem:[%s12968_s3 + $0x290] sm:$0xff] }
 0x232   :  { %5809 = vmatpush1.bf16.msra.mxu0 %v8345_v10  ;;  %5783 = vmatprep.subr.bf16.mxu1 %v8792_v38  ;;  %v2446_v10 = vld [vmem:[%s12968_s3 + $0x2b0] sm:$0xff]  ;;  %v8323_v38 = vcombine.low %v2363_v54, %v2367_v58  ;;  %v2411_v58 = vld [vmem:[%s12968_s3 + $0x198] sm:$0xff] }
 0x233   :  { %5810 = vmatprep.subr.bf16.mxu0 %v8354_v11  ;;  %v8393_v11 = vcombine.low %v2434_v59, %v2438_v62  ;;  %v8402_v13 = vcombine.high %v2442_v9, %v2446_v10  ;;  %v2415_v59 = vld [vmem:[%s12968_s3 + $0x1b8] sm:$0xff]  ;;  %v2482_v62 = vld [vmem:[%s12968_s3 + $0x3d0] sm:$0xff] }
 0x235   :  { %5784 = vmatpush1.bf16.msra.mxu1 %v8791_v28  ;;  %v2450_v28 = vld [vmem:[%s12968_s3 + $0x2d0] sm:$0xff] }
 0x236   :  { %5811 = vmatpush1.bf16.msra.mxu0 %v8353_v32  ;;  %5785 = vmatprep.subr.bf16.mxu1 %v8800_v4  ;;  %v2454_v32 = vld [vmem:[%s12968_s3 + $0x2f0] sm:$0xff]  ;;  %v8331_v4 = vcombine.low %v2371_v7, %v2375_v8  ;;  %v2419_v8 = vld [vmem:[%s12968_s3 + $0x1d8] sm:$0xff] }
 0x237   :  { %5812 = vmatprep.subr.bf16.mxu0 %v8362_v19  ;;  %v8401_v19 = vcombine.low %v2442_v9, %v2446_v10  ;;  %v8410_v21 = vcombine.high %v2450_v28, %v2454_v32  ;;  %v2423_v9 = vld [vmem:[%s12968_s3 + $0x1f8] sm:$0xff]  ;;  %v2490_v10 = vld [vmem:[%s12968_s3 + $0x410] sm:$0xff] }
 0x239   :  { %5786 = vmatpush1.bf16.msra.mxu1 %v8799_v23  ;;  %v2458_v23 = vld [vmem:[%s12968_s3 + $0x310] sm:$0xff] }
 0x23a   :  { %5813 = vmatpush1.bf16.msra.mxu0 %v8361_v24  ;;  %5787 = vmatprep.subr.bf16.mxu1 %v8808_v26  ;;  %v8339_v24 = vcombine.low %v2379_v14, %v2383_v16  ;;  %v8409_v26 = vcombine.low %v2450_v28, %v2454_v32  ;;  %v2427_v16 = vld [vmem:[%s12968_s3 + $0x218] sm:$0xff]  ;;  %v2498_v32 = vld [vmem:[%s12968_s3 + $0x450] sm:$0xff] }
 0x23b   :  { %5814 = vmatprep.subr.bf16.mxu0 %v8370_v27  ;;  %v8348_v27 = vcombine.high %v2387_v22, %v2391_v25  ;;  %v2431_v28 = vld [vmem:[%s12968_s3 + $0x238] sm:$0xff] }
 0x23d   :  { %5788 = vmatpush1.bf16.msra.mxu1 %v8807_v31  ;;  %v2470_v31 = vld [vmem:[%s12968_s3 + $0x370] sm:$0xff] }
 0x23e   :  { %5815 = vmatpush1.bf16.msra.mxu0 %v8369_v61  ;;  %5789 = vmatprep.subr.bf16.mxu1 %v8816_v36  ;;  %v8347_v61 = vcombine.low %v2387_v22, %v2391_v25  ;;  %v8426_v41 = vcombine.high %v2466_v37, %v2470_v31  ;;  %v2435_v25 = vld [vmem:[%s12968_s3 + $0x258] sm:$0xff] }
 0x23f   :  { %5816 = vmatprep.subr.bf16.mxu0 %v8378_v2  ;;  %v8356_v2 = vcombine.high %v2395_v30, %v2399_v35 }
 0x241   :  { %5790 = vmatpush1.bf16.msra.mxu1 %v8815_v55  ;;  %v2478_v55 = vld [vmem:[%s12968_s3 + $0x3b0] sm:$0xff] }
 0x242   :  { %5817 = vmatpush1.bf16.msra.mxu0 %v8377_v47  ;;  %5791 = vmatprep.subr.bf16.mxu1 %v8824_v50  ;;  %v8355_v47 = vcombine.low %v2395_v30, %v2399_v35  ;;  %v8425_v50 = vcombine.low %v2466_v37, %v2470_v31  ;;  %v8434_v54 = vcombine.high %v2474_v15, %v2478_v55  ;;  %v2443_v35 = vld [vmem:[%s12968_s3 + $0x298] sm:$0xff]  ;;  %v2514_v31 = vld [vmem:[%s12968_s3 + $0x4d0] sm:$0xff] }
 0x243   :  { %5818 = vmatprep.subr.bf16.mxu0 %v8386_v53  ;;  %v8364_v53 = vcombine.high %v2403_v42, %v2407_v44  ;;  %v2447_v37 = vld [vmem:[%s12968_s3 + $0x2b8] sm:$0xff] }
 0x245   :  { %5792 = vmatpush1.bf16.msra.mxu1 %v8823_v1  ;;  %v2486_v1 = vld [vmem:[%s12968_s3 + $0x3f0] sm:$0xff] }
 0x246   :  { %5819 = vmatpush1.bf16.msra.mxu0 %v8385_v3  ;;  %5966 = vmatprep.subr.bf16.mxu1 %v8324_v33  ;;  %v8363_v3 = vcombine.low %v2403_v42, %v2407_v44  ;;  %v8433_v33 = vcombine.low %v2474_v15, %v2478_v55  ;;  %v8442_v7 = vcombine.high %v2482_v62, %v2486_v1  ;;  %v2451_v44 = vld [vmem:[%s12968_s3 + $0x2d8] sm:$0xff]  ;;  %v2522_v55 = vld [vmem:[%s12968_s3 + $0x510] sm:$0xff] }
 0x247   :  { %5820 = vmatprep.subr.bf16.mxu0 %v8394_v6  ;;  %v8372_v6 = vcombine.high %v2411_v58, %v2415_v59  ;;  %v2455_v15 = vld [vmem:[%s12968_s3 + $0x2f8] sm:$0xff] }
 0x248   :  { %5794 = vmatmul.mubr.bf16.vlgmr.msra.gmra.mrb[16].mxu1 %v11365_v40 }
 0x249   :  { %5967 = vmatpush1.bf16.msra.mxu1 %v8323_v38  ;;  %5998 = vmatprep.mubr.bf16.mxu1 %v10723_v48  ;;  %v2462_v48 = vld [vmem:[%s12968_s3 + $0x330] sm:$0xff] }
 0x24a   :  { %5821 = vmatpush1.bf16.msra.mxu0 %v8393_v11  ;;  %5968 = vmatprep.subr.bf16.mxu1 %v8332_v12  ;;  %v8418_v29 = vcombine.high %v2458_v23, %v2462_v48  ;;  %v8417_v36 = vcombine.low %v2458_v23, %v2462_v48  ;;  %v2494_v38 = vld [vmem:[%s12968_s3 + $0x430] sm:$0xff]  ;;  %v8371_v11 = vcombine.low %v2411_v58, %v2415_v59  ;;  %v2439_v23 = vld [vmem:[%s12968_s3 + $0x278] sm:$0xff] }
 0x24b   :  { %5822 = vmatprep.subr.bf16.mxu0 %v8402_v13  ;;  %v8441_v12 = vcombine.low %v2482_v62, %v2486_v1  ;;  %v8380_v13 = vcombine.high %v2419_v8, %v2423_v9  ;;  %v8450_v14 = vcombine.high %v2490_v10, %v2494_v38  ;;  %v2506_v48 = vld [vmem:[%s12968_s3 + $0x490] sm:$0xff]  ;;  %v2459_v59 = vld [vmem:[%s12968_s3 + $0x318] sm:$0xff] }
 0x24c   :  { %v2463_v62 = vld [vmem:[%s12968_s3 + $0x338] sm:$0xff]  ;;  %v2530_v1 = vld [vmem:[%s12968_s3 + $0x550] sm:$0xff] }
 0x24d   :  { %5969 = vmatpush1.bf16.msra.mxu1 %v8331_v4  ;;  %v2502_v4 = vld [vmem:[%s12968_s3 + $0x470] sm:$0xff] }
 0x24e   :  { %5823 = vmatpush1.bf16.msra.mxu0 %v8401_v19  ;;  %5970 = vmatprep.subr.bf16.mxu1 %v8340_v56  ;;  %v8379_v19 = vcombine.low %v2419_v8, %v2423_v9  ;;  %v8449_v56 = vcombine.low %v2490_v10, %v2494_v38  ;;  %v8458_v22 = vcombine.high %v2498_v32, %v2502_v4  ;;  %v2467_v9 = vld [vmem:[%s12968_s3 + $0x358] sm:$0xff]  ;;  %v2538_v38 = vld [vmem:[%s12968_s3 + $0x590] sm:$0xff] }
 0x24f   :  { %5824 = vmatprep.subr.bf16.mxu0 %v8410_v21  ;;  %v8388_v21 = vcombine.high %v2427_v16, %v2431_v28  ;;  %v2471_v10 = vld [vmem:[%s12968_s3 + $0x378] sm:$0xff] }
 0x251   :  { %5971 = vmatpush1.bf16.msra.mxu1 %v8339_v24  ;;  %v2510_v24 = vld [vmem:[%s12968_s3 + $0x4b0] sm:$0xff] }
 0x252   :  { %5825 = vmatpush1.bf16.msra.mxu0 %v8409_v26  ;;  %5972 = vmatprep.subr.bf16.mxu1 %v8348_v27  ;;  %v8387_v26 = vcombine.low %v2427_v16, %v2431_v28  ;;  %v8457_v27 = vcombine.low %v2498_v32, %v2502_v4  ;;  %v8466_v30 = vcombine.high %v2506_v48, %v2510_v24  ;;  %v2475_v28 = vld [vmem:[%s12968_s3 + $0x398] sm:$0xff]  ;;  %v2546_v4 = vld [vmem:[%s12968_s3 + $0x5d0] sm:$0xff] }
 0x253   :  { %5826 = vmatprep.subr.bf16.mxu0 %v8418_v29  ;;  %v8396_v29 = vcombine.high %v2435_v25, %v2439_v23  ;;  %v2479_v32 = vld [vmem:[%s12968_s3 + $0x3b8] sm:$0xff] }
 0x255   :  { %5973 = vmatpush1.bf16.msra.mxu1 %v8347_v61  ;;  %v2518_v61 = vld [vmem:[%s12968_s3 + $0x4f0] sm:$0xff] }
 0x256   :  { %5827 = vmatpush1.bf16.msra.mxu0 %v8417_v36  ;;  %5974 = vmatprep.subr.bf16.mxu1 %v8356_v2  ;;  %v8395_v36 = vcombine.low %v2435_v25, %v2439_v23  ;;  %v8465_v2 = vcombine.low %v2506_v48, %v2510_v24  ;;  %v8474_v42 = vcombine.high %v2514_v31, %v2518_v61  ;;  %v2483_v23 = vld [vmem:[%s12968_s3 + $0x3d8] sm:$0xff]  ;;  %v2554_v24 = vld [vmem:[%s12968_s3 + $0x610] sm:$0xff] }
 0x257   :  { %5828 = vmatprep.subr.bf16.mxu0 %v8426_v41  ;;  %v8404_v41 = vcombine.high %v2443_v35, %v2447_v37  ;;  %v2487_v48 = vld [vmem:[%s12968_s3 + $0x3f8] sm:$0xff] }
 0x259   :  { %5975 = vmatpush1.bf16.msra.mxu1 %v8355_v47  ;;  %v2526_v47 = vld [vmem:[%s12968_s3 + $0x530] sm:$0xff] }
 0x25a   :  { %5829 = vmatpush1.bf16.msra.mxu0 %v8425_v50  ;;  %5976 = vmatprep.subr.bf16.mxu1 %v8364_v53  ;;  %v8403_v50 = vcombine.low %v2443_v35, %v2447_v37  ;;  %v8473_v53 = vcombine.low %v2514_v31, %v2518_v61  ;;  %v8482_v58 = vcombine.high %v2522_v55, %v2526_v47  ;;  %v2491_v37 = vld [vmem:[%s12968_s3 + $0x418] sm:$0xff]  ;;  %v2562_v61 = vld [vmem:[%s12968_s3 + $0x650] sm:$0xff] }
 0x25b   :  { %5830 = vmatprep.subr.bf16.mxu0 %v8434_v54  ;;  %v8412_v54 = vcombine.high %v2451_v44, %v2455_v15  ;;  %v2495_v31 = vld [vmem:[%s12968_s3 + $0x438] sm:$0xff] }
 0x25d   :  { %5977 = vmatpush1.bf16.msra.mxu1 %v8363_v3  ;;  %v2534_v3 = vld [vmem:[%s12968_s3 + $0x570] sm:$0xff] }
 0x25e   :  { %5831 = vmatpush1.bf16.msra.mxu0 %v8433_v33  ;;  %5978 = vmatprep.subr.bf16.mxu1 %v8372_v6  ;;  %v8411_v33 = vcombine.low %v2451_v44, %v2455_v15  ;;  %v8481_v6 = vcombine.low %v2522_v55, %v2526_v47  ;;  %v8490_v8 = vcombine.high %v2530_v1, %v2534_v3  ;;  %v2499_v15 = vld [vmem:[%s12968_s3 + $0x458] sm:$0xff]  ;;  %v2570_v47 = vld [vmem:[%s12968_s3 + $0x690] sm:$0xff] }
 0x25f   :  { %5832 = vmatprep.subr.bf16.mxu0 %v8442_v7  ;;  %v8420_v7 = vcombine.high %v2459_v59, %v2463_v62  ;;  %v2503_v55 = vld [vmem:[%s12968_s3 + $0x478] sm:$0xff] }
 0x261   :  { %5979 = vmatpush1.bf16.msra.mxu1 %v8371_v11  ;;  %v2542_v11 = vld [vmem:[%s12968_s3 + $0x5b0] sm:$0xff] }
 0x262   :  { %5833 = vmatpush1.bf16.msra.mxu0 %v8441_v12  ;;  %5980 = vmatprep.subr.bf16.mxu1 %v8380_v13  ;;  %v8419_v12 = vcombine.low %v2459_v59, %v2463_v62  ;;  %v8489_v13 = vcombine.low %v2530_v1, %v2534_v3  ;;  %v8498_v16 = vcombine.high %v2538_v38, %v2542_v11  ;;  %v2507_v62 = vld [vmem:[%s12968_s3 + $0x498] sm:$0xff]  ;;  %v2578_v3 = vld [vmem:[%s12968_s3 + $0x6d0] sm:$0xff] }
 0x263   :  { %5843 = vmatprep.subr.bf16.mxu0 %v8450_v14  ;;  %v8428_v14 = vcombine.high %v2467_v9, %v2471_v10  ;;  %v2511_v1 = vld [vmem:[%s12968_s3 + $0x4b8] sm:$0xff] }
 0x265   :  { %5835 = vmatmul.mubr.bf16.vlgmr.msra.gmra.mrb[12].mxu0 %v10727_v20  ;;  %5981 = vmatpush1.bf16.msra.mxu1 %v8379_v19  ;;  %v2550_v19 = vld [vmem:[%s12968_s3 + $0x5f0] sm:$0xff] }
 0x266   :  { %5844 = vmatpush1.bf16.msra.mxu0 %v8449_v56  ;;  %5875 = vmatprep.mubr.bf16.mxu0 %v10835_v39  ;;  %v8427_v56 = vcombine.low %v2467_v9, %v2471_v10  ;;  %v8506_v25 = vcombine.high %v2546_v4, %v2550_v19  ;;  %v2519_v10 = vld [vmem:[%s12968_s3 + $0x4f8] sm:$0xff] }
 0x267   :  { %5982 = vmatprep.subr.bf16.mxu1 %v8388_v21  ;;  %5845 = vmatprep.subr.bf16.mxu0 %v8458_v22  ;;  %v8497_v21 = vcombine.low %v2538_v38, %v2542_v11  ;;  %v8436_v22 = vcombine.high %v2475_v28, %v2479_v32  ;;  %v2586_v38 = vld [vmem:[%s12968_s3 + $0x710] sm:$0xff]  ;;  %v8467_v11 = vcombine.low %v2507_v62, %v2511_v1 }
 0x269   :  { %5983 = vmatpush1.bf16.msra.mxu1 %v8387_v26  ;;  %v2558_v26 = vld [vmem:[%s12968_s3 + $0x630] sm:$0xff] }
 0x26a   :  { %5846 = vmatpush1.bf16.msra.mxu0 %v8457_v27  ;;  %5984 = vmatprep.subr.bf16.mxu1 %v8396_v29  ;;  %v8435_v27 = vcombine.low %v2475_v28, %v2479_v32  ;;  %v8505_v29 = vcombine.low %v2546_v4, %v2550_v19  ;;  %v8514_v35 = vcombine.high %v2554_v24, %v2558_v26  ;;  %v2527_v28 = vld [vmem:[%s12968_s3 + $0x538] sm:$0xff]  ;;  %v2594_v32 = vld [vmem:[%s12968_s3 + $0x750] sm:$0xff] }
 0x26b   :  { %5847 = vmatprep.subr.bf16.mxu0 %v8466_v30  ;;  %v8444_v30 = vcombine.high %v2483_v23, %v2487_v48  ;;  %v2598_v4 = vld [vmem:[%s12968_s3 + $0x770] sm:$0xff] }
 0x26d   :  { %5985 = vmatpush1.bf16.msra.mxu1 %v8395_v36  ;;  %v2566_v36 = vld [vmem:[%s12968_s3 + $0x670] sm:$0xff] }
 0x26e   :  { %5848 = vmatpush1.bf16.msra.mxu0 %v8465_v2  ;;  %5986 = vmatprep.subr.bf16.mxu1 %v8404_v41  ;;  %v8443_v2 = vcombine.low %v2483_v23, %v2487_v48  ;;  %v8513_v41 = vcombine.low %v2554_v24, %v2558_v26  ;;  %v8522_v44 = vcombine.high %v2562_v61, %v2566_v36  ;;  %v2535_v23 = vld [vmem:[%s12968_s3 + $0x578] sm:$0xff]  ;;  %v2602_v48 = vld [vmem:[%s12968_s3 + $0x790] sm:$0xff] }
 0x26f   :  { %5849 = vmatprep.subr.bf16.mxu0 %v8474_v42  ;;  %v8452_v42 = vcombine.high %v2491_v37, %v2495_v31  ;;  %v2606_v24 = vld [vmem:[%s12968_s3 + $0x7b0] sm:$0xff] }
 0x271   :  { %5987 = vmatpush1.bf16.msra.mxu1 %v8403_v50  ;;  %v2574_v50 = vld [vmem:[%s12968_s3 + $0x6b0] sm:$0xff] }
 0x272   :  { %5850 = vmatpush1.bf16.msra.mxu0 %v8473_v53  ;;  %5988 = vmatprep.subr.bf16.mxu1 %v8412_v54  ;;  %v8451_v53 = vcombine.low %v2491_v37, %v2495_v31  ;;  %v8521_v54 = vcombine.low %v2562_v61, %v2566_v36  ;;  %v8530_v59 = vcombine.high %v2570_v47, %v2574_v50  ;;  %v2543_v37 = vld [vmem:[%s12968_s3 + $0x5b8] sm:$0xff]  ;;  %v2610_v31 = vld [vmem:[%s12968_s3 + $0x7d0] sm:$0xff] }
 0x273   :  { %5851 = vmatprep.subr.bf16.mxu0 %v8482_v58  ;;  %v8460_v58 = vcombine.high %v2499_v15, %v2503_v55  ;;  %v2614_v61 = vld [vmem:[%s12968_s3 + $0x7f0] sm:$0xff] }
 0x275   :  { %5989 = vmatpush1.bf16.msra.mxu1 %v8411_v33  ;;  %v2582_v33 = vld [vmem:[%s12968_s3 + $0x6f0] sm:$0xff] }
 0x276   :  { %5852 = vmatpush1.bf16.msra.mxu0 %v8481_v6  ;;  %5990 = vmatprep.subr.bf16.mxu1 %v8420_v7  ;;  %v8459_v6 = vcombine.low %v2499_v15, %v2503_v55  ;;  %v8529_v7 = vcombine.low %v2570_v47, %v2574_v50  ;;  %v8538_v9 = vcombine.high %v2578_v3, %v2582_v33  ;;  %v2551_v15 = vld [vmem:[%s12968_s3 + $0x5f8] sm:$0xff]  ;;  %v2618_v55 = vld [vmem:[%s12968_s3 + $0x810] sm:$0xff] }
 0x277   :  { %5853 = vmatprep.subr.bf16.mxu0 %v8490_v8  ;;  %v8468_v8 = vcombine.high %v2507_v62, %v2511_v1  ;;  %v2622_v47 = vld [vmem:[%s12968_s3 + $0x830] sm:$0xff]  ;;  %v2559_v62 = vld [vmem:[%s12968_s3 + $0x638] sm:$0xff] }
 0x278   :  { %v2626_v1 = vld [vmem:[%s12968_s3 + $0x850] sm:$0xff] }
 0x279   :  { %5991 = vmatpush1.bf16.msra.mxu1 %v8419_v12  ;;  %v8537_v12 = vcombine.low %v2578_v3, %v2582_v33  ;;  %v2630_v3 = vld [vmem:[%s12968_s3 + $0x870] sm:$0xff] }
 0x27a   :  { %5854 = vmatpush1.bf16.msra.mxu0 %v8489_v13  ;;  %5992 = vmatprep.subr.bf16.mxu1 %v8428_v14 }
 0x27b   :  { %5855 = vmatprep.subr.bf16.mxu0 %v8498_v16  ;;  %v2523_v16 = vld [vmem:[%s12968_s3 + $0x518] sm:$0xff] }
 0x27c   :  { %v8483_v26 = vcombine.low %v2523_v16, %v2527_v28 }
 0x27d   :  { %5993 = vmatpush1.bf16.msra.mxu1 %v8427_v56 }
 0x27e   :  { %5856 = vmatpush1.bf16.msra.mxu0 %v8497_v21  ;;  %5994 = vmatprep.subr.bf16.mxu1 %v8436_v22  ;;  %v8484_v21 = vcombine.high %v2523_v16, %v2527_v28  ;;  %v8554_v22 = vcombine.high %v2594_v32, %v2598_v4  ;;  %v2642_v28 = vld [vmem:[%s12968_s3 + $0x8d0] sm:$0xff] }
 0x27f   :  { %5857 = vmatprep.subr.bf16.mxu0 %v8506_v25  ;;  %v2531_v25 = vld [vmem:[%s12968_s3 + $0x558] sm:$0xff] }
 0x280   :  { %v8491_v36 = vcombine.low %v2531_v25, %v2535_v23 }
 0x281   :  { %5995 = vmatpush1.bf16.msra.mxu1 %v8435_v27  ;;  %v8553_v27 = vcombine.low %v2594_v32, %v2598_v4  ;;  %v2646_v32 = vld [vmem:[%s12968_s3 + $0x8f0] sm:$0xff] }
 0x282   :  { %5858 = vmatpush1.bf16.msra.mxu0 %v8505_v29  ;;  %5996 = vmatprep.subr.bf16.mxu1 %v8444_v30  ;;  %v8492_v29 = vcombine.high %v2531_v25, %v2535_v23  ;;  %v8562_v30 = vcombine.high %v2602_v48, %v2606_v24  ;;  %v8602_v25 = vcombine.high %v2642_v28, %v2646_v32  ;;  %v2650_v23 = vld [vmem:[%s12968_s3 + $0x910] sm:$0xff] }
 0x283   :  { %5859 = vmatprep.subr.bf16.mxu0 %v8514_v35  ;;  %v2539_v35 = vld [vmem:[%s12968_s3 + $0x598] sm:$0xff] }
 0x284   :  { %v8499_v50 = vcombine.low %v2539_v35, %v2543_v37 }
 0x285   :  { %5997 = vmatpush1.bf16.msra.mxu1 %v8443_v2  ;;  %v8561_v2 = vcombine.low %v2602_v48, %v2606_v24  ;;  %v2654_v48 = vld [vmem:[%s12968_s3 + $0x930] sm:$0xff] }
 0x286   :  { %5860 = vmatpush1.bf16.msra.mxu0 %v8513_v41  ;;  %6007 = vmatprep.subr.bf16.mxu1 %v8452_v42  ;;  %v8500_v41 = vcombine.high %v2539_v35, %v2543_v37  ;;  %v8570_v42 = vcombine.high %v2610_v31, %v2614_v61  ;;  %v8610_v35 = vcombine.high %v2650_v23, %v2654_v48  ;;  %v2658_v37 = vld [vmem:[%s12968_s3 + $0x950] sm:$0xff] }
 0x287   :  { %5861 = vmatprep.subr.bf16.mxu0 %v8522_v44  ;;  %v2547_v44 = vld [vmem:[%s12968_s3 + $0x5d8] sm:$0xff] }
 0x288   :  { %5999 = vmatmul.mubr.bf16.vlgmr.msra.gmra.mrb[20].mxu1 %v10727_v20  ;;  %v2515_v20 = vld [vmem:[%s12968_s3 + $0x4d8] sm:$0xff]  ;;  %v8507_v33 = vcombine.low %v2547_v44, %v2551_v15 }
 0x289   :  { %6008 = vmatpush1.bf16.msra.mxu1 %v8451_v53  ;;  %6039 = vmatprep.mubr.bf16.mxu1 %v10835_v39  ;;  %v2590_v39 = vld [vmem:[%s12968_s3 + $0x730] sm:$0xff]  ;;  %v8476_v13 = vcombine.high %v2515_v20, %v2519_v10  ;;  %v8475_v19 = vcombine.low %v2515_v20, %v2519_v10  ;;  %v8569_v53 = vcombine.low %v2610_v31, %v2614_v61 }
 0x28a   :  { %5862 = vmatpush1.bf16.msra.mxu0 %v8521_v54  ;;  %6009 = vmatprep.subr.bf16.mxu1 %v8460_v58  ;;  %v8546_v14 = vcombine.high %v2586_v38, %v2590_v39  ;;  %v8545_v56 = vcombine.low %v2586_v38, %v2590_v39  ;;  %v8508_v54 = vcombine.high %v2547_v44, %v2551_v15  ;;  %v2634_v10 = vld [vmem:[%s12968_s3 + $0x890] sm:$0xff] }
 0x28b   :  { %5863 = vmatprep.subr.bf16.mxu0 %v8530_v59  ;;  %v8578_v58 = vcombine.high %v2618_v55, %v2622_v47  ;;  %v2555_v59 = vld [vmem:[%s12968_s3 + $0x618] sm:$0xff]  ;;  %v8586_v20 = vcombine.high %v2626_v1, %v2630_v3  ;;  %v2638_v38 = vld [vmem:[%s12968_s3 + $0x8b0] sm:$0xff] }
 0x28c   :  { %v8515_v39 = vcombine.low %v2555_v59, %v2559_v62  ;;  %v8594_v16 = vcombine.high %v2634_v10, %v2638_v38  ;;  %v2662_v31 = vld [vmem:[%s12968_s3 + $0x970] sm:$0xff] }
 0x28d   :  { %6010 = vmatpush1.bf16.msra.mxu1 %v8459_v6  ;;  %v8577_v6 = vcombine.low %v2618_v55, %v2622_v47  ;;  %v8618_v44 = vcombine.high %v2658_v37, %v2662_v31  ;;  %v2666_v15 = vld [vmem:[%s12968_s3 + $0x990] sm:$0xff] }
 0x28e   :  { %5864 = vmatpush1.bf16.msra.mxu0 %v8529_v7  ;;  %6011 = vmatprep.subr.bf16.mxu1 %v8468_v8  ;;  %v2563_v7 = vld [vmem:[%s12968_s3 + $0x658] sm:$0xff]  ;;  %v2670_v55 = vld [vmem:[%s12968_s3 + $0x9b0] sm:$0xff] }
 0x28f   :  { %5865 = vmatprep.subr.bf16.mxu0 %v8538_v9  ;;  %v2567_v8 = vld [vmem:[%s12968_s3 + $0x678] sm:$0xff]  ;;  %v8516_v9 = vcombine.high %v2555_v59, %v2559_v62  ;;  %v8626_v59 = vcombine.high %v2666_v15, %v2670_v55  ;;  %v2674_v62 = vld [vmem:[%s12968_s3 + $0x9d0] sm:$0xff] }
 0x290   :  { %v8523_v4 = vcombine.low %v2563_v7, %v2567_v8 }
 0x291   :  { %6012 = vmatpush1.bf16.msra.mxu1 %v8467_v11  ;;  %v2571_v11 = vld [vmem:[%s12968_s3 + $0x698] sm:$0xff] }
 0x292   :  { %5866 = vmatpush1.bf16.msra.mxu0 %v8537_v12  ;;  %6013 = vmatprep.subr.bf16.mxu1 %v8476_v13  ;;  %v2575_v12 = vld [vmem:[%s12968_s3 + $0x6b8] sm:$0xff]  ;;  %v8585_v13 = vcombine.low %v2626_v1, %v2630_v3  ;;  %v2678_v1 = vld [vmem:[%s12968_s3 + $0x9f0] sm:$0xff] }
 0x293   :  { %5867 = vmatprep.subr.bf16.mxu0 %v8546_v14  ;;  %v8524_v14 = vcombine.high %v2563_v7, %v2567_v8  ;;  %v8531_v24 = vcombine.low %v2571_v11, %v2575_v12  ;;  %v8625_v7 = vcombine.low %v2666_v15, %v2670_v55 }
 0x295   :  { %6014 = vmatpush1.bf16.msra.mxu1 %v8475_v19  ;;  %v2579_v19 = vld [vmem:[%s12968_s3 + $0x6d8] sm:$0xff] }
 0x296   :  { %5868 = vmatpush1.bf16.msra.mxu0 %v8545_v56  ;;  %6015 = vmatprep.subr.bf16.mxu1 %v8484_v21  ;;  %v2583_v56 = vld [vmem:[%s12968_s3 + $0x6f8] sm:$0xff]  ;;  %v8593_v21 = vcombine.low %v2634_v10, %v2638_v38  ;;  %v2686_v10 = vld [vmem:[%s12968_s3 + $0xa30] sm:$0xff] }
 0x297   :  { %5869 = vmatprep.subr.bf16.mxu0 %v8554_v22  ;;  %v8532_v22 = vcombine.high %v2571_v11, %v2575_v12  ;;  %v8539_v61 = vcombine.low %v2579_v19, %v2583_v56  ;;  %v2623_v11 = vld [vmem:[%s12968_s3 + $0x838] sm:$0xff]  ;;  %v8633_v12 = vcombine.low %v2674_v62, %v2678_v1 }
 0x299   :  { %6016 = vmatpush1.bf16.msra.mxu1 %v8483_v26  ;;  %v2587_v26 = vld [vmem:[%s12968_s3 + $0x718] sm:$0xff] }
 0x29a   :  { %5870 = vmatpush1.bf16.msra.mxu0 %v8553_v27  ;;  %6017 = vmatprep.subr.bf16.mxu1 %v8492_v29  ;;  %v2591_v27 = vld [vmem:[%s12968_s3 + $0x738] sm:$0xff]  ;;  %v8601_v29 = vcombine.low %v2642_v28, %v2646_v32  ;;  %v2694_v28 = vld [vmem:[%s12968_s3 + $0xa70] sm:$0xff] }
 0x29b   :  { %5871 = vmatprep.subr.bf16.mxu0 %v8562_v30  ;;  %v8540_v30 = vcombine.high %v2579_v19, %v2583_v56  ;;  %v8547_v47 = vcombine.low %v2587_v26, %v2591_v27  ;;  %v2631_v19 = vld [vmem:[%s12968_s3 + $0x878] sm:$0xff] }
 0x29d   :  { %6018 = vmatpush1.bf16.msra.mxu1 %v8491_v36  ;;  %v2595_v36 = vld [vmem:[%s12968_s3 + $0x758] sm:$0xff] }
 0x29e   :  { %5872 = vmatpush1.bf16.msra.mxu0 %v8561_v2  ;;  %6019 = vmatprep.subr.bf16.mxu1 %v8500_v41  ;;  %v2599_v2 = vld [vmem:[%s12968_s3 + $0x778] sm:$0xff]  ;;  %v8609_v41 = vcombine.low %v2650_v23, %v2654_v48  ;;  %v2702_v23 = vld [vmem:[%s12968_s3 + $0xab0] sm:$0xff] }
 0x29f   :  { %5873 = vmatprep.subr.bf16.mxu0 %v8570_v42  ;;  %v8548_v42 = vcombine.high %v2587_v26, %v2591_v27  ;;  %v8555_v3 = vcombine.low %v2595_v36, %v2599_v2  ;;  %v2635_v27 = vld [vmem:[%s12968_s3 + $0x898] sm:$0xff] }
 0x2a1   :  { %6020 = vmatpush1.bf16.msra.mxu1 %v8499_v50  ;;  %v2603_v50 = vld [vmem:[%s12968_s3 + $0x798] sm:$0xff] }
 0x2a2   :  { %5874 = vmatpush1.bf16.msra.mxu0 %v8569_v53  ;;  %6021 = vmatprep.subr.bf16.mxu1 %v8508_v54  ;;  %v2607_v53 = vld [vmem:[%s12968_s3 + $0x7b8] sm:$0xff]  ;;  %v8617_v54 = vcombine.low %v2658_v37, %v2662_v31  ;;  %v2710_v37 = vld [vmem:[%s12968_s3 + $0xaf0] sm:$0xff] }
 0x2a3   :  { %5884 = vmatprep.subr.bf16.mxu0 %v8578_v58  ;;  %v8556_v58 = vcombine.high %v2595_v36, %v2599_v2  ;;  %v8564_v8 = vcombine.high %v2603_v50, %v2607_v53  ;;  %v8563_v38 = vcombine.low %v2603_v50, %v2607_v53  ;;  %v2643_v2 = vld [vmem:[%s12968_s3 + $0x8d8] sm:$0xff]  ;;  %v2722_v53 = vld [vmem:[%s12968_s3 + $0xb50] sm:$0xff] }
 0x2a4   :  { %v2655_v50 = vld [vmem:[%s12968_s3 + $0x938] sm:$0xff] }
 0x2a5   :  { %5876 = vmatmul.mubr.bf16.vlgmr.msra.gmra.mrb[12].mxu0 %v10946_v63  ;;  %6022 = vmatpush1.bf16.msra.mxu1 %v8507_v33  ;;  %v2611_v33 = vld [vmem:[%s12968_s3 + $0x7d8] sm:$0xff] }
 0x2a6   :  { %5885 = vmatpush1.bf16.msra.mxu0 %v8577_v6  ;;  %5916 = vmatprep.mubr.bf16.mxu0 %v11154_v43  ;;  %v2615_v6 = vld [vmem:[%s12968_s3 + $0x7f8] sm:$0xff] }
 0x2a7   :  { %6023 = vmatprep.subr.bf16.mxu1 %v8516_v9  ;;  %5886 = vmatprep.subr.bf16.mxu0 %v8586_v20  ;;  %v8634_v9 = vcombine.high %v2674_v62, %v2678_v1  ;;  %v2682_v20 = vld [vmem:[%s12968_s3 + $0xa10] sm:$0xff]  ;;  %v8571_v32 = vcombine.low %v2611_v33, %v2615_v6 }
 0x2a8   :  { %v8641_v56 = vcombine.low %v2682_v20, %v2686_v10 }
 0x2a9   :  { %6024 = vmatpush1.bf16.msra.mxu1 %v8515_v39  ;;  %v2619_v39 = vld [vmem:[%s12968_s3 + $0x818] sm:$0xff] }
 0x2aa   :  { %5887 = vmatpush1.bf16.msra.mxu0 %v8585_v13  ;;  %6025 = vmatprep.subr.bf16.mxu1 %v8524_v14  ;;  %v8572_v13 = vcombine.high %v2611_v33, %v2615_v6  ;;  %v8642_v14 = vcombine.high %v2682_v20, %v2686_v10  ;;  %v8579_v48 = vcombine.low %v2619_v39, %v2623_v11  ;;  %v2663_v33 = vld [vmem:[%s12968_s3 + $0x978] sm:$0xff]  ;;  %v2730_v6 = vld [vmem:[%s12968_s3 + $0xb90] sm:$0xff] }
 0x2ab   :  { %5888 = vmatprep.subr.bf16.mxu0 %v8594_v16  ;;  %v2690_v16 = vld [vmem:[%s12968_s3 + $0xa50] sm:$0xff] }
 0x2ad   :  { %6026 = vmatpush1.bf16.msra.mxu1 %v8523_v4  ;;  %v2627_v4 = vld [vmem:[%s12968_s3 + $0x858] sm:$0xff] }
 0x2ae   :  { %5889 = vmatpush1.bf16.msra.mxu0 %v8593_v21  ;;  %6027 = vmatprep.subr.bf16.mxu1 %v8532_v22  ;;  %v8580_v21 = vcombine.high %v2619_v39, %v2623_v11  ;;  %v8650_v22 = vcombine.high %v2690_v16, %v2694_v28  ;;  %v8588_v26 = vcombine.high %v2627_v4, %v2631_v19  ;;  %v2671_v39 = vld [vmem:[%s12968_s3 + $0x9b8] sm:$0xff]  ;;  %v2738_v11 = vld [vmem:[%s12968_s3 + $0xbd0] sm:$0xff] }
 0x2af   :  { %5890 = vmatprep.subr.bf16.mxu0 %v8602_v25  ;;  %v2698_v25 = vld [vmem:[%s12968_s3 + $0xa90] sm:$0xff]  ;;  %v8587_v31 = vcombine.low %v2627_v4, %v2631_v19  ;;  %v2679_v4 = vld [vmem:[%s12968_s3 + $0x9f8] sm:$0xff] }
 0x2b0   :  { %v2746_v19 = vld [vmem:[%s12968_s3 + $0xc10] sm:$0xff] }
 0x2b1   :  { %6028 = vmatpush1.bf16.msra.mxu1 %v8531_v24  ;;  %v8649_v24 = vcombine.low %v2690_v16, %v2694_v28 }
 0x2b2   :  { %5891 = vmatpush1.bf16.msra.mxu0 %v8601_v29  ;;  %6029 = vmatprep.subr.bf16.mxu1 %v8540_v30  ;;  %v8658_v29 = vcombine.high %v2698_v25, %v2702_v23  ;;  %v2639_v30 = vld [vmem:[%s12968_s3 + $0x8b8] sm:$0xff] }
 0x2b3   :  { %5892 = vmatprep.subr.bf16.mxu0 %v8610_v35  ;;  %v2706_v35 = vld [vmem:[%s12968_s3 + $0xad0] sm:$0xff]  ;;  %v8596_v36 = vcombine.high %v2635_v27, %v2639_v30 }
 0x2b4   :  { %v8665_v15 = vcombine.low %v2706_v35, %v2710_v37 }
 0x2b5   :  { %6030 = vmatpush1.bf16.msra.mxu1 %v8539_v61  ;;  %v8657_v61 = vcombine.low %v2698_v25, %v2702_v23 }
 0x2b6   :  { %5893 = vmatpush1.bf16.msra.mxu0 %v8609_v41  ;;  %6031 = vmatprep.subr.bf16.mxu1 %v8548_v42  ;;  %v2714_v41 = vld [vmem:[%s12968_s3 + $0xb10] sm:$0xff]  ;;  %v8666_v42 = vcombine.high %v2706_v35, %v2710_v37  ;;  %v2691_v37 = vld [vmem:[%s12968_s3 + $0xa58] sm:$0xff] }
 0x2b7   :  { %5894 = vmatprep.subr.bf16.mxu0 %v8618_v44  ;;  %v8595_v44 = vcombine.low %v2635_v27, %v2639_v30 }
 0x2b9   :  { %6032 = vmatpush1.bf16.msra.mxu1 %v8547_v47  ;;  %v2651_v47 = vld [vmem:[%s12968_s3 + $0x918] sm:$0xff] }
 0x2ba   :  { %5895 = vmatpush1.bf16.msra.mxu0 %v8617_v54  ;;  %6033 = vmatprep.subr.bf16.mxu1 %v8556_v58  ;;  %v2726_v58 = vld [vmem:[%s12968_s3 + $0xb70] sm:$0xff]  ;;  %v8612_v1 = vcombine.high %v2651_v47, %v2655_v50 }
 0x2bb   :  { %5896 = vmatprep.subr.bf16.mxu0 %v8626_v59  ;;  %v8681_v20 = vcombine.low %v2722_v53, %v2726_v58 }
 0x2bd   :  { %6034 = vmatpush1.bf16.msra.mxu1 %v8555_v3  ;;  %v2659_v3 = vld [vmem:[%s12968_s3 + $0x958] sm:$0xff] }
 0x2be   :  { %5897 = vmatpush1.bf16.msra.mxu0 %v8625_v7  ;;  %6035 = vmatprep.subr.bf16.mxu1 %v8564_v8  ;;  %v8682_v7 = vcombine.high %v2722_v53, %v2726_v58  ;;  %v2734_v8 = vld [vmem:[%s12968_s3 + $0xbb0] sm:$0xff]  ;;  %v8620_v10 = vcombine.high %v2659_v3, %v2663_v33 }
 0x2bf   :  { %5898 = vmatprep.subr.bf16.mxu0 %v8634_v9  ;;  %v8611_v9 = vcombine.low %v2651_v47, %v2655_v50  ;;  %v8689_v16 = vcombine.low %v2730_v6, %v2734_v8  ;;  %v2770_v47 = vld [vmem:[%s12968_s3 + $0xcd0] sm:$0xff] }
 0x2c0   :  { %v2774_v50 = vld [vmem:[%s12968_s3 + $0xcf0] sm:$0xff] }
 0x2c1   :  { %6036 = vmatpush1.bf16.msra.mxu1 %v8563_v38  ;;  %v2667_v38 = vld [vmem:[%s12968_s3 + $0x998] sm:$0xff] }
 0x2c2   :  { %5899 = vmatpush1.bf16.msra.mxu0 %v8633_v12  ;;  %6037 = vmatprep.subr.bf16.mxu1 %v8572_v13  ;;  %v8690_v12 = vcombine.high %v2730_v6, %v2734_v8  ;;  %v2742_v13 = vld [vmem:[%s12968_s3 + $0xbf0] sm:$0xff]  ;;  %v8628_v28 = vcombine.high %v2667_v38, %v2671_v39 }
 0x2c3   :  { %5900 = vmatprep.subr.bf16.mxu0 %v8642_v14  ;;  %v8619_v14 = vcombine.low %v2659_v3, %v2663_v33  ;;  %v8697_v25 = vcombine.low %v2738_v11, %v2742_v13  ;;  %v8730_v3 = vcombine.high %v2770_v47, %v2774_v50  ;;  %v2782_v33 = vld [vmem:[%s12968_s3 + $0xd30] sm:$0xff] }
 0x2c5   :  { %6038 = vmatpush1.bf16.msra.mxu1 %v8571_v32  ;;  %v2675_v32 = vld [vmem:[%s12968_s3 + $0x9d8] sm:$0xff] }
 0x2c6   :  { %5901 = vmatpush1.bf16.msra.mxu0 %v8641_v56  ;;  %6048 = vmatprep.subr.bf16.mxu1 %v8580_v21  ;;  %v8698_v56 = vcombine.high %v2738_v11, %v2742_v13  ;;  %v2750_v21 = vld [vmem:[%s12968_s3 + $0xc30] sm:$0xff]  ;;  %v8636_v23 = vcombine.high %v2675_v32, %v2679_v4  ;;  %v8635_v30 = vcombine.low %v2675_v32, %v2679_v4 }
 0x2c7   :  { %5902 = vmatprep.subr.bf16.mxu0 %v8650_v22  ;;  %v8627_v22 = vcombine.low %v2667_v38, %v2671_v39  ;;  %v8706_v27 = vcombine.high %v2746_v19, %v2750_v21  ;;  %v8705_v35 = vcombine.low %v2746_v19, %v2750_v21  ;;  %v2790_v39 = vld [vmem:[%s12968_s3 + $0xd70] sm:$0xff] }
 0x2c8   :  { %6040 = vmatmul.mubr.bf16.vlgmr.msra.gmra.mrb[20].mxu1 %v10946_v63  ;;  %v2647_v63 = vld [vmem:[%s12968_s3 + $0x8f8] sm:$0xff]  ;;  %v2798_v4 = vld [vmem:[%s12968_s3 + $0xdb0] sm:$0xff] }
 0x2c9   :  { %6049 = vmatpush1.bf16.msra.mxu1 %v8579_v48  ;;  %6080 = vmatprep.mubr.bf16.mxu1 %v11154_v43  ;;  %v2718_v43 = vld [vmem:[%s12968_s3 + $0xb30] sm:$0xff]  ;;  %v8604_v55 = vcombine.high %v2643_v2, %v2647_v63  ;;  %v8603_v59 = vcombine.low %v2643_v2, %v2647_v63  ;;  %v2683_v48 = vld [vmem:[%s12968_s3 + $0xa18] sm:$0xff] }
 0x2ca   :  { %5903 = vmatpush1.bf16.msra.mxu0 %v8649_v24  ;;  %6050 = vmatprep.subr.bf16.mxu1 %v8588_v26  ;;  %v8674_v54 = vcombine.high %v2714_v41, %v2718_v43  ;;  %v8673_v62 = vcombine.low %v2714_v41, %v2718_v43  ;;  %v2687_v24 = vld [vmem:[%s12968_s3 + $0xa38] sm:$0xff]  ;;  %v2754_v26 = vld [vmem:[%s12968_s3 + $0xc50] sm:$0xff] }
 0x2cb   :  { %5904 = vmatprep.subr.bf16.mxu0 %v8658_v29  ;;  %v2758_v29 = vld [vmem:[%s12968_s3 + $0xc70] sm:$0xff]  ;;  %v8643_v41 = vcombine.low %v2683_v48, %v2687_v24 }
 0x2cc   :  { %v2762_v2 = vld [vmem:[%s12968_s3 + $0xc90] sm:$0xff] }
 0x2cd   :  { %6051 = vmatpush1.bf16.msra.mxu1 %v8587_v31  ;;  %v2695_v31 = vld [vmem:[%s12968_s3 + $0xa78] sm:$0xff]  ;;  %v2766_v63 = vld [vmem:[%s12968_s3 + $0xcb0] sm:$0xff] }
 0x2ce   :  { %5905 = vmatpush1.bf16.msra.mxu0 %v8657_v61  ;;  %6052 = vmatprep.subr.bf16.mxu1 %v8596_v36  ;;  %v8644_v61 = vcombine.high %v2683_v48, %v2687_v24  ;;  %v8714_v36 = vcombine.high %v2754_v26, %v2758_v29  ;;  %v8652_v43 = vcombine.high %v2691_v37, %v2695_v31  ;;  %v2806_v24 = vld [vmem:[%s12968_s3 + $0xdf0] sm:$0xff] }
 0x2cf   :  { %5906 = vmatprep.subr.bf16.mxu0 %v8666_v42  ;;  %v8713_v42 = vcombine.low %v2754_v26, %v2758_v29  ;;  %v8651_v53 = vcombine.low %v2691_v37, %v2695_v31  ;;  %v2739_v31 = vld [vmem:[%s12968_s3 + $0xbd8] sm:$0xff] }
 0x2d1   :  { %6053 = vmatpush1.bf16.msra.mxu1 %v8595_v44  ;;  %v2699_v44 = vld [vmem:[%s12968_s3 + $0xa98] sm:$0xff] }
 0x2d2   :  { %5907 = vmatpush1.bf16.msra.mxu0 %v8665_v15  ;;  %6054 = vmatprep.subr.bf16.mxu1 %v8604_v55  ;;  %v2703_v15 = vld [vmem:[%s12968_s3 + $0xab8] sm:$0xff]  ;;  %v8722_v55 = vcombine.high %v2762_v2, %v2766_v63 }
 0x2d3   :  { %5908 = vmatprep.subr.bf16.mxu0 %v8674_v54  ;;  %v8721_v54 = vcombine.low %v2762_v2, %v2766_v63  ;;  %v8660_v58 = vcombine.high %v2699_v44, %v2703_v15  ;;  %v8659_v6 = vcombine.low %v2699_v44, %v2703_v15  ;;  %v2743_v2 = vld [vmem:[%s12968_s3 + $0xbf8] sm:$0xff]  ;;  %v2810_v63 = vld [vmem:[%s12968_s3 + $0xe10] sm:$0xff] }
 0x2d4   :  { %v8700_v44 = vcombine.high %v2739_v31, %v2743_v2  ;;  %v2747_v15 = vld [vmem:[%s12968_s3 + $0xc18] sm:$0xff] }
 0x2d5   :  { %6055 = vmatpush1.bf16.msra.mxu1 %v8603_v59  ;;  %v2707_v59 = vld [vmem:[%s12968_s3 + $0xad8] sm:$0xff] }
 0x2d6   :  { %5909 = vmatpush1.bf16.msra.mxu0 %v8673_v62  ;;  %6056 = vmatprep.subr.bf16.mxu1 %v8612_v1  ;;  %v2711_v62 = vld [vmem:[%s12968_s3 + $0xaf8] sm:$0xff]  ;;  %v2778_v1 = vld [vmem:[%s12968_s3 + $0xd10] sm:$0xff] }
 0x2d7   :  { %5910 = vmatprep.subr.bf16.mxu0 %v8682_v7  ;;  %v8729_v7 = vcombine.low %v2770_v47, %v2774_v50  ;;  %v8668_v8 = vcombine.high %v2707_v59, %v2711_v62  ;;  %v8738_v38 = vcombine.high %v2778_v1, %v2782_v33  ;;  %v8667_v11 = vcombine.low %v2707_v59, %v2711_v62  ;;  %v2818_v47 = vld [vmem:[%s12968_s3 + $0xe50] sm:$0xff]  ;;  %v2755_v62 = vld [vmem:[%s12968_s3 + $0xc58] sm:$0xff] }
 0x2d9   :  { %6057 = vmatpush1.bf16.msra.mxu1 %v8611_v9  ;;  %v2715_v9 = vld [vmem:[%s12968_s3 + $0xb18] sm:$0xff] }
 0x2da   :  { %5911 = vmatpush1.bf16.msra.mxu0 %v8681_v20  ;;  %6058 = vmatprep.subr.bf16.mxu1 %v8620_v10  ;;  %v2719_v20 = vld [vmem:[%s12968_s3 + $0xb38] sm:$0xff]  ;;  %v2786_v10 = vld [vmem:[%s12968_s3 + $0xd50] sm:$0xff] }
 0x2db   :  { %5912 = vmatprep.subr.bf16.mxu0 %v8690_v12  ;;  %v8737_v12 = vcombine.low %v2778_v1, %v2782_v33  ;;  %v8676_v13 = vcombine.high %v2715_v9, %v2719_v20  ;;  %v8746_v32 = vcombine.high %v2786_v10, %v2790_v39  ;;  %v8675_v19 = vcombine.low %v2715_v9, %v2719_v20  ;;  %v2826_v33 = vld [vmem:[%s12968_s3 + $0xe90] sm:$0xff] }
 0x2dd   :  { %6059 = vmatpush1.bf16.msra.mxu1 %v8619_v14  ;;  %v2723_v14 = vld [vmem:[%s12968_s3 + $0xb58] sm:$0xff] }
 0x2de   :  { %5913 = vmatpush1.bf16.msra.mxu0 %v8689_v16  ;;  %6060 = vmatprep.subr.bf16.mxu1 %v8628_v28  ;;  %v2727_v16 = vld [vmem:[%s12968_s3 + $0xb78] sm:$0xff]  ;;  %v2794_v28 = vld [vmem:[%s12968_s3 + $0xd90] sm:$0xff] }
 0x2df   :  { %5914 = vmatprep.subr.bf16.mxu0 %v8698_v56  ;;  %v8745_v56 = vcombine.low %v2786_v10, %v2790_v39  ;;  %v8684_v21 = vcombine.high %v2723_v14, %v2727_v16  ;;  %v8754_v48 = vcombine.high %v2794_v28, %v2798_v4  ;;  %v8683_v29 = vcombine.low %v2723_v14, %v2727_v16  ;;  %v2763_v10 = vld [vmem:[%s12968_s3 + $0xc98] sm:$0xff]  ;;  %v2834_v39 = vld [vmem:[%s12968_s3 + $0xed0] sm:$0xff] }
 0x2e1   :  { %6061 = vmatpush1.bf16.msra.mxu1 %v8627_v22  ;;  %v2731_v22 = vld [vmem:[%s12968_s3 + $0xb98] sm:$0xff] }
 0x2e2   :  { %5915 = vmatpush1.bf16.msra.mxu0 %v8697_v25  ;;  %6062 = vmatprep.subr.bf16.mxu1 %v8636_v23  ;;  %v2735_v25 = vld [vmem:[%s12968_s3 + $0xbb8] sm:$0xff]  ;;  %v2802_v23 = vld [vmem:[%s12968_s3 + $0xdd0] sm:$0xff] }
 0x2e3   :  { %5925 = vmatprep.subr.bf16.mxu0 %v8706_v27  ;;  %v8692_v37 = vcombine.high %v2731_v22, %v2735_v25 }
 0x2e5   :  { %5917 = vmatmul.mubr.bf16.vlgmr.msra.gmra.mrb[12].mxu0 %v11156_v46  ;;  %6063 = vmatpush1.bf16.msra.mxu1 %v8635_v30 }
 0x2e6   :  { %5926 = vmatpush1.bf16.msra.mxu0 %v8705_v35  ;;  %5957 = vmatprep.mubr.bf16.mxu0 %v11363_v34  ;;  %v8753_v35 = vcombine.low %v2794_v28, %v2798_v4  ;;  %v2775_v28 = vld [vmem:[%s12968_s3 + $0xcf8] sm:$0xff] }
 0x2e7   :  { %6064 = vmatprep.subr.bf16.mxu1 %v8644_v61  ;;  %5927 = vmatprep.subr.bf16.mxu0 %v8714_v36  ;;  %v8762_v36 = vcombine.high %v2802_v23, %v2806_v24 }
 0x2e9   :  { %6065 = vmatpush1.bf16.msra.mxu1 %v8643_v41  ;;  %v2814_v41 = vld [vmem:[%s12968_s3 + $0xe30] sm:$0xff] }
 0x2ea   :  { %5928 = vmatpush1.bf16.msra.mxu0 %v8713_v42  ;;  %6066 = vmatprep.subr.bf16.mxu1 %v8652_v43  ;;  %v8691_v42 = vcombine.low %v2731_v22, %v2735_v25  ;;  %v8761_v43 = vcombine.low %v2802_v23, %v2806_v24  ;;  %v8770_v50 = vcombine.high %v2810_v63, %v2814_v41  ;;  %v2779_v22 = vld [vmem:[%s12968_s3 + $0xd18] sm:$0xff]  ;;  %v2850_v23 = vld [vmem:[%s12968_s3 + $0xf50] sm:$0xff] }
 0x2eb   :  { %5929 = vmatprep.subr.bf16.mxu0 %v8722_v55  ;;  %v2751_v55 = vld [vmem:[%s12968_s3 + $0xc38] sm:$0xff] }
 0x2ec   :  { %v8708_v59 = vcombine.high %v2747_v15, %v2751_v55  ;;  %v2783_v25 = vld [vmem:[%s12968_s3 + $0xd38] sm:$0xff] }
 0x2ed   :  { %6067 = vmatpush1.bf16.msra.mxu1 %v8651_v53  ;;  %v2822_v53 = vld [vmem:[%s12968_s3 + $0xe70] sm:$0xff] }
 0x2ee   :  { %5930 = vmatpush1.bf16.msra.mxu0 %v8721_v54  ;;  %6068 = vmatprep.subr.bf16.mxu1 %v8660_v58  ;;  %v8699_v54 = vcombine.low %v2739_v31, %v2743_v2  ;;  %v8769_v58 = vcombine.low %v2810_v63, %v2814_v41  ;;  %v8778_v1 = vcombine.high %v2818_v47, %v2822_v53  ;;  %v2791_v31 = vld [vmem:[%s12968_s3 + $0xd78] sm:$0xff]  ;;  %v12124_v2 = vld [vmem:[%s12971_s4] sm:$0xff] }
 0x2ef   :  { %5931 = vmatprep.subr.bf16.mxu0 %v8730_v3  ;;  %v2759_v3 = vld [vmem:[%s12968_s3 + $0xc78] sm:$0xff]  ;;  %v8739_v63 = vcombine.low %v2779_v22, %v2783_v25 }
 0x2f0   :  { %v8716_v9 = vcombine.high %v2755_v62, %v2759_v3 }
 0x2f1   :  { %6069 = vmatpush1.bf16.msra.mxu1 %v8659_v6  ;;  %v2830_v6 = vld [vmem:[%s12968_s3 + $0xeb0] sm:$0xff] }
 0x2f2   :  { %5932 = vmatpush1.bf16.msra.mxu0 %v8729_v7  ;;  %6070 = vmatprep.subr.bf16.mxu1 %v8668_v8  ;;  %v8707_v7 = vcombine.low %v2747_v15, %v2751_v55  ;;  %v8777_v8 = vcombine.low %v2818_v47, %v2822_v53  ;;  %v8786_v20 = vcombine.high %v2826_v33, %v2830_v6  ;;  %v2799_v15 = vld [vmem:[%s12968_s3 + $0xdb8] sm:$0xff]  ;;  %v2866_v47 = vld [vmem:[%s12968_s3 + $0xfd0] sm:$0xff] }
 0x2f3   :  { %5933 = vmatprep.subr.bf16.mxu0 %v8738_v38  ;;  %v2767_v38 = vld [vmem:[%s12968_s3 + $0xcb8] sm:$0xff]  ;;  %v2881_v55 = vrot.slane %v12124_v2, %v10691_v52 }
 0x2f4   :  { %v8724_v14 = vcombine.high %v2763_v10, %v2767_v38  ;;  %v8723_v4 = vcombine.low %v2763_v10, %v2767_v38  ;;  %v9213_v38 = vld [vmem:[%s12970_s5 + $0x4] ss:$24 sps:$4 sm:$0xff]  }
 0x2f5   :  { %6071 = vmatpush1.bf16.msra.mxu1 %v8667_v11  ;;  %v2838_v11 = vld [vmem:[%s12968_s3 + $0xef0] sm:$0xff] }
 0x2f6   :  { %5934 = vmatpush1.bf16.msra.mxu0 %v8737_v12  ;;  %6072 = vmatprep.subr.bf16.mxu1 %v8676_v13  ;;  %v8715_v12 = vcombine.low %v2755_v62, %v2759_v3  ;;  %v8785_v13 = vcombine.low %v2826_v33, %v2830_v6  ;;  %v8794_v16 = vcombine.high %v2834_v39, %v2838_v11  ;;  %v2807_v3 = vld [vmem:[%s12968_s3 + $0xdf8] sm:$0xff] }
 0x2f7   :  { %5935 = vmatprep.subr.bf16.mxu0 %v8746_v32  ;;  %v2842_v32 = vld [vmem:[%s12968_s3 + $0xf10] sm:$0xff] }
 0x2f8   :  { %v12031_v26 = vpop.f32.mrb[8].mxu0 }
 0x2f9   :  { %v12033_v27 = vpop.f32.mrb[9].mxu0  ;;  %6073 = vmatpush1.bf16.msra.mxu1 %v8675_v19  ;;  %v8793_v19 = vcombine.low %v2834_v39, %v2838_v11  ;;  %v2815_v11 = vld [vmem:[%s12968_s3 + $0xe38] sm:$0xff] }
 0x2fa   :  { %v5635_v30 = vpop.f32.mrb[10].mxu0  ;;  %5936 = vmatpush1.bf16.msra.mxu0 %v8745_v56  ;;  %6074 = vmatprep.subr.bf16.mxu1 %v8684_v21  ;;  %v9111_v33 = vadd.f32 %v12033_v27, %v2881_v55  ;;  %v2811_v27 = vld [vmem:[%s12968_s3 + $0xe18] sm:$0xff] }
 0x2fb   :  { %v5636_v61 = vpop.f32.mrb[11].mxu0  ;;  %5937 = vmatprep.subr.bf16.mxu0 %v8754_v48  ;;  %v2854_v48 = vld [vmem:[%s12968_s3 + $0xf70] sm:$0xff]  ;;  %v8740_v30 = vcombine.high %v2779_v22, %v2783_v25  ;;  %v2831_v22 = vld [vmem:[%s12968_s3 + $0xeb8] sm:$0xff] }
 0x2fc   :  { %v2858_v61 = vld [vmem:[%s12968_s3 + $0xf90] sm:$0xff]  ;;  %v8809_v41 = vcombine.low %v2850_v23, %v2854_v48  ;;  %v6131_v39 = vmax.f32 %v9111_v33, 0.0  ;;  %v2855_v55 = vld [vmem:[%s12968_s3 + $0xf78] sm:$0xff] }
 0x2fd   :  { %6075 = vmatpush1.bf16.msra.mxu1 %v8683_v29 }
 0x2fe   :  { %5938 = vmatpush1.bf16.msra.mxu0 %v8753_v35  ;;  %6076 = vmatprep.subr.bf16.mxu1 %v8692_v37  ;;  %v8810_v35 = vcombine.high %v2850_v23, %v2854_v48  ;;  %v2787_v37 = vld [vmem:[%s12968_s3 + $0xd58] sm:$0xff] }
 0x2ff   :  { %5939 = vmatprep.subr.bf16.mxu0 %v8762_v36  ;;  %v2862_v36 = vld [vmem:[%s12968_s3 + $0xfb0] sm:$0xff]  ;;  %v8747_v53 = vcombine.low %v2787_v37, %v2791_v31  ;;  %v9217_v23 = vld [vmem:[%s12970_s5 + $0x60] ss:$24 sps:$4 sm:$0xff]  }
 0x301   :  { %6077 = vmatpush1.bf16.msra.mxu1 %v8691_v42  ;;  %v8748_v42 = vcombine.high %v2787_v37, %v2791_v31  ;;  %v9220_v37 = vld [vmem:[%s12970_s5 + $0x90] ss:$24 sps:$4 sm:$0xff]  }
 0x302   :  { %5940 = vmatpush1.bf16.msra.mxu0 %v8761_v43  ;;  %6078 = vmatprep.subr.bf16.mxu1 %v8700_v44  ;;  %v8818_v43 = vcombine.high %v2858_v61, %v2862_v36  ;;  %v2795_v44 = vld [vmem:[%s12968_s3 + $0xd98] sm:$0xff] }
 0x303   :  { %5941 = vmatprep.subr.bf16.mxu0 %v8770_v50  ;;  %v2870_v50 = vld [vmem:[%s12968_s3 + $0xff0] sm:$0xff] }
 0x304   :  { %v8826_v62 = vcombine.high %v2866_v47, %v2870_v50 }
 0x305   :  { %6079 = vmatpush1.bf16.msra.mxu1 %v8699_v54  ;;  %v8817_v54 = vcombine.low %v2858_v61, %v2862_v36  ;;  %v9225_v61 = vld [vmem:[%s12970_s5 + $0xc4] ss:$24 sps:$4 sm:$0xff]  }
 0x306   :  { %5942 = vmatpush1.bf16.msra.mxu0 %v8769_v58  ;;  %6089 = vmatprep.subr.bf16.mxu1 %v8708_v59  ;;  %v8756_v58 = vcombine.high %v2795_v44, %v2799_v15  ;;  %v2843_v36 = vld [vmem:[%s12968_s3 + $0xf18] sm:$0xff] }
 0x307   :  { %5943 = vmatprep.subr.bf16.mxu0 %v8778_v1  ;;  %v2803_v1 = vld [vmem:[%s12968_s3 + $0xdd8] sm:$0xff] }
 0x308   :  { %6081 = vmatmul.mubr.bf16.vlgmr.msra.gmra.mrb[20].mxu1 %v11156_v46  ;;  %v2771_v46 = vld [vmem:[%s12968_s3 + $0xcd8] sm:$0xff]  ;;  %v8764_v10 = vcombine.high %v2803_v1, %v2807_v3 }
 0x309   :  { %6090 = vmatpush1.bf16.msra.mxu1 %v8707_v7  ;;  %6121 = vmatprep.mubr.bf16.mxu1 %v11363_v34  ;;  %v2846_v34 = vld [vmem:[%s12968_s3 + $0xf30] sm:$0xff]  ;;  %v8732_v56 = vcombine.high %v2771_v46, %v2775_v28  ;;  %v8731_v24 = vcombine.low %v2771_v46, %v2775_v28  ;;  %v2819_v46 = vld [vmem:[%s12968_s3 + $0xe58] sm:$0xff] }
 0x30a   :  { %5944 = vmatpush1.bf16.msra.mxu0 %v8777_v8  ;;  %6091 = vmatprep.subr.bf16.mxu1 %v8716_v9  ;;  %v8802_v21 = vcombine.high %v2842_v32, %v2846_v34  ;;  %v8801_v29 = vcombine.low %v2842_v32, %v2846_v34  ;;  %v8755_v8 = vcombine.low %v2795_v44, %v2799_v15  ;;  %v2823_v28 = vld [vmem:[%s12968_s3 + $0xe78] sm:$0xff]  ;;  %v9228_v44 = vld [vmem:[%s12970_s5 + $0xf4] ss:$24 sps:$4 sm:$0xff]  }
 0x30b   :  { %5945 = vmatprep.subr.bf16.mxu0 %v8786_v20  ;;  %v8825_v20 = vcombine.low %v2866_v47, %v2870_v50  ;;  %v12172_v32 = vpack.c.bf16 %v6131_v39, %v6131_v39  ;;  %v8771_v34 = vcombine.low %v2811_v27, %v2815_v11  ;;  %v8779_v25 = vcombine.low %v2819_v46, %v2823_v28  ;;  %v2851_v15 = vld [vmem:[%s12968_s3 + $0xf58] sm:$0xff]  ;;  %v9226_v50 = vld [vmem:[%s12970_s5 + $0xf0] ss:$24 sps:$4 sm:$0xff]  }
 0x30c   :  { %v9237_v39 = vld [vmem:[%s12970_s5 + $0x184] ss:$24 sps:$4 sm:$0xff]  }
 0x30d   :  { %6092 = vmatpush1.bf16.msra.mxu1 %v8715_v12  ;;  %v8763_v12 = vcombine.low %v2803_v1, %v2807_v3  ;;  %v8811_v1 = vcombine.low %v2851_v15, %v2855_v55  ;;  %v9229_v3 = vld [vmem:[%s12970_s5 + $0x120] ss:$24 sps:$4 sm:$0xff]  }
 0x30e   :  { %5946 = vmatpush1.bf16.msra.mxu0 %v8785_v13  ;;  %6093 = vmatprep.subr.bf16.mxu1 %v8724_v14  ;;  %v9211_v13 = vld [vmem:[%s12970_s5] ss:$24 sps:$4 sm:$0xff]   ;;  %v8772_v14 = vcombine.high %v2811_v27, %v2815_v11 }
 0x30f   :  { %5947 = vmatprep.subr.bf16.mxu0 %v8794_v16  ;;  %v9216_v16 = vld [vmem:[%s12970_s5 + $0x34] ss:$24 sps:$4 sm:$0xff]   ;;  %v9235_v11 = vld [vmem:[%s12970_s5 + $0x180] ss:$24 sps:$4 sm:$0xff]  }
 0x311   :  { %6094 = vmatpush1.bf16.msra.mxu1 %v8723_v4  ;;  %v9214_v4 = vld [vmem:[%s12970_s5 + $0x30] ss:$24 sps:$4 sm:$0xff]  }
 0x312   :  { %5948 = vmatpush1.bf16.msra.mxu0 %v8793_v19  ;;  %6095 = vmatprep.subr.bf16.mxu1 %v8732_v56  ;;  %v8780_v19 = vcombine.high %v2819_v46, %v2823_v28  ;;  %v9219_v56 = vld [vmem:[%s12970_s5 + $0x64] ss:$24 sps:$4 sm:$0xff]  }
 0x313   :  { %5949 = vmatprep.subr.bf16.mxu0 %v8802_v21  ;;  %v2827_v21 = vld [vmem:[%s12968_s3 + $0xe98] sm:$0xff] }
 0x314   :  { %v8788_v48 = vcombine.high %v2827_v21, %v2831_v22  ;;  %v9246_v46 = vld [vmem:[%s12970_s5 + $0x3c] ss:$24 sps:$4 sm:$0xff]  }
 0x315   :  { %6096 = vmatpush1.bf16.msra.mxu1 %v8731_v24  ;;  %v9222_v24 = vld [vmem:[%s12970_s5 + $0x94] ss:$24 sps:$4 sm:$0xff]   ;;  %v9249_v28 = vld [vmem:[%s12970_s5 + $0x1e4] ss:$24 sps:$4 sm:$0xff]  }
 0x316   :  { %5950 = vmatpush1.bf16.msra.mxu0 %v8801_v29  ;;  %6097 = vmatprep.subr.bf16.mxu1 %v8740_v30  ;;  %v2835_v29 = vld [vmem:[%s12968_s3 + $0xed8] sm:$0xff] }
 0x317   :  { %5951 = vmatprep.subr.bf16.mxu0 %v8810_v35  ;;  %v2839_v30 = vld [vmem:[%s12968_s3 + $0xef8] sm:$0xff]  ;;  %v8787_v35 = vcombine.low %v2827_v21, %v2831_v22  ;;  %v9253_v21 = vld [vmem:[%s12970_s5 + $0x210] ss:$24 sps:$4 sm:$0xff]  }
 0x318   :  { %v8796_v31 = vcombine.high %v2835_v29, %v2839_v30  ;;  %v9258_v22 = vld [vmem:[%s12970_s5 + $0x9c] ss:$24 sps:$4 sm:$0xff]  }
 0x319   :  { %6098 = vmatpush1.bf16.msra.mxu1 %v8739_v63  ;;  %v2847_v63 = vld [vmem:[%s12968_s3 + $0xf38] sm:$0xff] }
 0x31a   :  { %5952 = vmatpush1.bf16.msra.mxu0 %v8809_v41  ;;  %6099 = vmatprep.subr.bf16.mxu1 %v8748_v42  ;;  %v8795_v41 = vcombine.low %v2835_v29, %v2839_v30  ;;  %v9223_v42 = vld [vmem:[%s12970_s5 + $0xc0] ss:$24 sps:$4 sm:$0xff]   ;;  %v8803_v47 = vcombine.low %v2843_v36, %v2847_v63  ;;  %v9267_v29 = vld [vmem:[%s12970_s5 + $0x274] ss:$24 sps:$4 sm:$0xff]  }
 0x31b   :  { %v12140_v59 = vpop.f32.mrb[16].mxu1  ;;  %5953 = vmatprep.subr.bf16.mxu0 %v8818_v43  ;;  %v8804_v43 = vcombine.high %v2843_v36, %v2847_v63  ;;  %v9262_v30 = vld [vmem:[%s12970_s5 + $0xc8] ss:$24 sps:$4 sm:$0xff]   ;;  %v2889_v36 = vrot.slane %v12124_v2, %v10793_v5  ;;  %v9268_v63 = vld [vmem:[%s12970_s5 + $0xf8] ss:$24 sps:$4 sm:$0xff]  }
 0x31c   :  { %v12149_v6 = vpop.f32.mrb[17].mxu1 }
 0x31d   :  { %v5799_v7 = vpop.f32.mrb[18].mxu1  ;;  %6100 = vmatpush1.bf16.msra.mxu1 %v8747_v53  ;;  %v8812_v53 = vcombine.high %v2851_v15, %v2855_v55  ;;  %v9113_v15 = vadd.f32 %v12149_v6, %v2889_v36  ;;  %v9274_v55 = vld [vmem:[%s12970_s5 + $0x128] ss:$24 sps:$4 sm:$0xff]  }
 0x31e   :  { %v5800_v9 = vpop.f32.mrb[19].mxu1  ;;  %5954 = vmatpush1.bf16.msra.mxu0 %v8817_v54  ;;  %6101 = vmatprep.subr.bf16.mxu1 %v8756_v58  ;;  %v9231_v54 = vld [vmem:[%s12970_s5 + $0x124] ss:$24 sps:$4 sm:$0xff]   ;;  %v9234_v7 = vld [vmem:[%s12970_s5 + $0x154] ss:$24 sps:$4 sm:$0xff]  }
 0x31f   :  { %5955 = vmatprep.subr.bf16.mxu0 %v8826_v62  ;;  %v2859_v58 = vld [vmem:[%s12968_s3 + $0xf98] sm:$0xff]  ;;  %v9334_v36 = vld [vmem:[%s12970_s5 + $0x308] ss:$24 sps:$4 sm:$0xff]  }
 0x320   :  { %v2863_v62 = vld [vmem:[%s12968_s3 + $0xfb8] sm:$0xff] }
 0x321   :  { %6102 = vmatpush1.bf16.msra.mxu1 %v8755_v8  ;;  %v8820_v33 = vcombine.high %v2859_v58, %v2863_v62  ;;  %v2867_v8 = vld [vmem:[%s12968_s3 + $0xfd8] sm:$0xff] }
 0x322   :  { %5956 = vmatpush1.bf16.msra.mxu0 %v8825_v20  ;;  %6103 = vmatprep.subr.bf16.mxu1 %v8764_v10  ;;  %v2871_v9 = vld [vmem:[%s12968_s3 + $0xff8] sm:$0xff]  ;;  %v8819_v20 = vcombine.low %v2859_v58, %v2863_v62  ;;  %v9232_v10 = vld [vmem:[%s12970_s5 + $0x150] ss:$24 sps:$4 sm:$0xff]  }
 0x323   :  { %7330 = vmatprep.subr.bf16.mxu0 %v9213_v38  ;;  %v8828_v38 = vcombine.high %v2867_v8, %v2871_v9  ;;  %v8827_v27 = vcombine.low %v2867_v8, %v2871_v9  ;;  %v9283_v58 = vld [vmem:[%s12970_s5 + $0x300] ss:$24 sps:$4 sm:$0xff]   ;;  %v9289_v8 = vld [vmem:[%s12970_s5 + $0x330] ss:$24 sps:$4 sm:$0xff]   ;;  %v9294_v9 = vld [vmem:[%s12970_s5 + $0x1bc] ss:$24 sps:$4 sm:$0xff]  }
 0x325   :  { %5958 = vmatmul.mubr.bf16.vlgmr.msra.gmra.mrb[12].mxu0 %v11365_v40  ;;  %6104 = vmatpush1.bf16.msra.mxu1 %v8763_v12  ;;  %v9240_v12 = vld [vmem:[%s12970_s5 + $0xc] ss:$24 sps:$4 sm:$0xff]  }
 0x326   :  { %7331 = vmatpush1.bf16.msra.mxu0 %v9211_v13  ;;  %7362 = vmatprep.mubr.bf16.mxu0 %v12172_v32  ;;  %v9243_v13 = vld [vmem:[%s12970_s5 + $0x1b4] ss:$24 sps:$4 sm:$0xff]  }
 0x327   :  { %6105 = vmatprep.subr.bf16.mxu1 %v8772_v14  ;;  %7332 = vmatprep.subr.bf16.mxu0 %v9216_v16  ;;  %v9238_v14 = vld [vmem:[%s12970_s5 + $0x8] ss:$24 sps:$4 sm:$0xff]  }
 0x328   :  { %v9241_v16 = vld [vmem:[%s12970_s5 + $0x1b0] ss:$24 sps:$4 sm:$0xff]  }
 0x329   :  { %6106 = vmatpush1.bf16.msra.mxu1 %v8771_v34  ;;  %v9244_v34 = vld [vmem:[%s12970_s5 + $0x38] ss:$24 sps:$4 sm:$0xff]  }
 0x32a   :  { %7333 = vmatpush1.bf16.msra.mxu0 %v9214_v4  ;;  %6107 = vmatprep.subr.bf16.mxu1 %v8780_v19  ;;  %v9247_v4 = vld [vmem:[%s12970_s5 + $0x1e0] ss:$24 sps:$4 sm:$0xff]   ;;  %v9252_v19 = vld [vmem:[%s12970_s5 + $0x6c] ss:$24 sps:$4 sm:$0xff]  }
 0x32b   :  { %7334 = vmatprep.subr.bf16.mxu0 %v9219_v56  ;;  %v9250_v56 = vld [vmem:[%s12970_s5 + $0x68] ss:$24 sps:$4 sm:$0xff]  }
 0x32d   :  { %6108 = vmatpush1.bf16.msra.mxu1 %v8779_v25  ;;  %v9261_v25 = vld [vmem:[%s12970_s5 + $0x244] ss:$24 sps:$4 sm:$0xff]  }
 0x32e   :  { %7335 = vmatpush1.bf16.msra.mxu0 %v9217_v23  ;;  %6109 = vmatprep.subr.bf16.mxu1 %v8788_v48  ;;  %v9256_v23 = vld [vmem:[%s12970_s5 + $0x98] ss:$24 sps:$4 sm:$0xff]  }
 0x32f   :  { %7336 = vmatprep.subr.bf16.mxu0 %v9222_v24  ;;  %v9259_v48 = vld [vmem:[%s12970_s5 + $0x240] ss:$24 sps:$4 sm:$0xff]   ;;  %v9264_v24 = vld [vmem:[%s12970_s5 + $0xcc] ss:$24 sps:$4 sm:$0xff]  }
 0x331   :  { %6110 = vmatpush1.bf16.msra.mxu1 %v8787_v35  ;;  %v9265_v35 = vld [vmem:[%s12970_s5 + $0x270] ss:$24 sps:$4 sm:$0xff]  }
 0x332   :  { %7337 = vmatpush1.bf16.msra.mxu0 %v9220_v37  ;;  %6111 = vmatprep.subr.bf16.mxu1 %v8796_v31  ;;  %v9270_v37 = vld [vmem:[%s12970_s5 + $0xfc] ss:$24 sps:$4 sm:$0xff]   ;;  %v2877_v31 = vrot.slane %v12124_v2, %v10677_v51 }
 0x333   :  { %7338 = vmatprep.subr.bf16.mxu0 %v9225_v61  ;;  %v9273_v61 = vld [vmem:[%s12970_s5 + $0x2a4] ss:$24 sps:$4 sm:$0xff]  }
 0x335   :  { %6112 = vmatpush1.bf16.msra.mxu1 %v8795_v41  ;;  %v9271_v41 = vld [vmem:[%s12970_s5 + $0x2a0] ss:$24 sps:$4 sm:$0xff]  }
 0x336   :  { %7339 = vmatpush1.bf16.msra.mxu0 %v9223_v42  ;;  %6113 = vmatprep.subr.bf16.mxu1 %v8804_v43  ;;  %v9276_v42 = vld [vmem:[%s12970_s5 + $0x12c] ss:$24 sps:$4 sm:$0xff]   ;;  %v9110_v43 = vadd.f32 %v12031_v26, %v2877_v31  ;;  %v9282_v26 = vld [vmem:[%s12970_s5 + $0x15c] ss:$24 sps:$4 sm:$0xff]  }
 0x337   :  { %7340 = vmatprep.subr.bf16.mxu0 %v9228_v44  ;;  %v9279_v44 = vld [vmem:[%s12970_s5 + $0x2d4] ss:$24 sps:$4 sm:$0xff]  }
 0x338   :  { %v6130_v6 = vmax.f32 %v9110_v43, 0.0  ;;  %v9336_v31 = vld [vmem:[%s12970_s5 + $0x30c] ss:$24 sps:$4 sm:$0xff]   ;;  %v9340_v43 = vld [vmem:[%s12970_s5 + $0x338] ss:$24 sps:$4 sm:$0xff]  }
 0x339   :  { %6114 = vmatpush1.bf16.msra.mxu1 %v8803_v47  ;;  %v9277_v47 = vld [vmem:[%s12970_s5 + $0x2d0] ss:$24 sps:$4 sm:$0xff]  }
 0x33a   :  { %7341 = vmatpush1.bf16.msra.mxu0 %v9226_v50  ;;  %6115 = vmatprep.subr.bf16.mxu1 %v8812_v53  ;;  %v9285_v50 = vld [vmem:[%s12970_s5 + $0x304] ss:$24 sps:$4 sm:$0xff]   ;;  %v9280_v53 = vld [vmem:[%s12970_s5 + $0x158] ss:$24 sps:$4 sm:$0xff]   ;;  %v12361_v62 = vpack.c.bf16 %v6130_v6, %v6130_v6 }
 0x33b   :  { %7342 = vmatprep.subr.bf16.mxu0 %v9231_v54  ;;  %v6133_v54 = vmax.f32 %v9113_v15, 0.0  ;;  %v9348_v15 = vld [vmem:[%s12970_s5 + $0x36c] ss:$24 sps:$4 sm:$0xff]  }
 0x33c   :  { %v9357_v6 = vld [vmem:[%s12970_s5 + $0x544] ss:$24 sps:$4 sm:$0xff]  }
 0x33d   :  { %6116 = vmatpush1.bf16.msra.mxu1 %v8811_v1  ;;  %v9288_v1 = vld [vmem:[%s12970_s5 + $0x18c] ss:$24 sps:$4 sm:$0xff]  }
 0x33e   :  { %7343 = vmatpush1.bf16.msra.mxu0 %v9229_v3  ;;  %6117 = vmatprep.subr.bf16.mxu1 %v8820_v33  ;;  %v9291_v3 = vld [vmem:[%s12970_s5 + $0x334] ss:$24 sps:$4 sm:$0xff]   ;;  %v12369_v33 = vpack.c.bf16 %v6133_v54, %v6133_v54  ;;  %v9355_v54 = vld [vmem:[%s12970_s5 + $0x540] ss:$24 sps:$4 sm:$0xff]  }
 0x33f   :  { %7344 = vmatprep.subr.bf16.mxu0 %v9234_v7  ;;  %v9286_v7 = vld [vmem:[%s12970_s5 + $0x188] ss:$24 sps:$4 sm:$0xff]  }
 0x341   :  { %6118 = vmatpush1.bf16.msra.mxu1 %v8819_v20  ;;  %v9297_v20 = vld [vmem:[%s12970_s5 + $0x364] ss:$24 sps:$4 sm:$0xff]  }
 0x342   :  { %7345 = vmatpush1.bf16.msra.mxu0 %v9232_v10  ;;  %6119 = vmatprep.subr.bf16.mxu1 %v8828_v38  ;;  %v9292_v10 = vld [vmem:[%s12970_s5 + $0x1b8] ss:$24 sps:$4 sm:$0xff]  }
 0x343   :  { %7346 = vmatprep.subr.bf16.mxu0 %v9237_v39  ;;  %v9295_v38 = vld [vmem:[%s12970_s5 + $0x360] ss:$24 sps:$4 sm:$0xff]   ;;  %v9300_v39 = vld [vmem:[%s12970_s5 + $0x1ec] ss:$24 sps:$4 sm:$0xff]  }
 0x345   :  { %6120 = vmatpush1.bf16.msra.mxu1 %v8827_v27  ;;  %v9303_v27 = vld [vmem:[%s12970_s5 + $0x394] ss:$24 sps:$4 sm:$0xff]  }
 0x346   :  { %7347 = vmatpush1.bf16.msra.mxu0 %v9235_v11  ;;  %7412 = vmatprep.subr.bf16.mxu1 %v9240_v12  ;;  %v9298_v11 = vld [vmem:[%s12970_s5 + $0x1e8] ss:$24 sps:$4 sm:$0xff]  }
 0x347   :  { %7348 = vmatprep.subr.bf16.mxu0 %v9243_v13  ;;  %v9301_v12 = vld [vmem:[%s12970_s5 + $0x390] ss:$24 sps:$4 sm:$0xff]   ;;  %v9306_v13 = vld [vmem:[%s12970_s5 + $0x21c] ss:$24 sps:$4 sm:$0xff]  }
 0x348   :  { %6122 = vmatmul.mubr.bf16.vlgmr.msra.gmra.mrb[20].mxu1 %v11365_v40  ;;  %v9255_v40 = vld [vmem:[%s12970_s5 + $0x214] ss:$24 sps:$4 sm:$0xff]  }
 0x349   :  { %7413 = vmatpush1.bf16.msra.mxu1 %v9238_v14  ;;  %7444 = vmatprep.mubr.bf16.mxu1 %v12172_v32  ;;  %v9309_v14 = vld [vmem:[%s12970_s5 + $0x3c4] ss:$24 sps:$4 sm:$0xff]  }
 0x34a   :  { %7349 = vmatpush1.bf16.msra.mxu0 %v9241_v16  ;;  %7414 = vmatprep.subr.bf16.mxu1 %v9246_v46  ;;  %v9304_v16 = vld [vmem:[%s12970_s5 + $0x218] ss:$24 sps:$4 sm:$0xff]  }
 0x34b   :  { %7350 = vmatprep.subr.bf16.mxu0 %v9249_v28  ;;  %v9307_v46 = vld [vmem:[%s12970_s5 + $0x3c0] ss:$24 sps:$4 sm:$0xff]   ;;  %v9312_v28 = vld [vmem:[%s12970_s5 + $0x24c] ss:$24 sps:$4 sm:$0xff]  }
 0x34d   :  { %7415 = vmatpush1.bf16.msra.mxu1 %v9244_v34  ;;  %v9310_v34 = vld [vmem:[%s12970_s5 + $0x248] ss:$24 sps:$4 sm:$0xff]  }
 0x34e   :  { %7351 = vmatpush1.bf16.msra.mxu0 %v9247_v4  ;;  %7416 = vmatprep.subr.bf16.mxu1 %v9252_v19  ;;  %v9315_v4 = vld [vmem:[%s12970_s5 + $0x3f4] ss:$24 sps:$4 sm:$0xff]   ;;  %v9313_v19 = vld [vmem:[%s12970_s5 + $0x3f0] ss:$24 sps:$4 sm:$0xff]  }
 0x34f   :  { %7352 = vmatprep.subr.bf16.mxu0 %v9255_v40  ;;  %v9318_v40 = vld [vmem:[%s12970_s5 + $0x27c] ss:$24 sps:$4 sm:$0xff]  }
 0x351   :  { %7417 = vmatpush1.bf16.msra.mxu1 %v9250_v56  ;;  %v9316_v56 = vld [vmem:[%s12970_s5 + $0x278] ss:$24 sps:$4 sm:$0xff]  }
 0x352   :  { %7353 = vmatpush1.bf16.msra.mxu0 %v9253_v21  ;;  %7418 = vmatprep.subr.bf16.mxu1 %v9258_v22  ;;  %v9321_v21 = vld [vmem:[%s12970_s5 + $0x424] ss:$24 sps:$4 sm:$0xff]   ;;  %v9319_v22 = vld [vmem:[%s12970_s5 + $0x420] ss:$24 sps:$4 sm:$0xff]  }
 0x353   :  { %7354 = vmatprep.subr.bf16.mxu0 %v9261_v25  ;;  %v9324_v25 = vld [vmem:[%s12970_s5 + $0x2ac] ss:$24 sps:$4 sm:$0xff]  }
 0x355   :  { %7419 = vmatpush1.bf16.msra.mxu1 %v9256_v23  ;;  %v9327_v23 = vld [vmem:[%s12970_s5 + $0x454] ss:$24 sps:$4 sm:$0xff]  }
 0x356   :  { %7355 = vmatpush1.bf16.msra.mxu0 %v9259_v48  ;;  %7420 = vmatprep.subr.bf16.mxu1 %v9264_v24  ;;  %v9322_v48 = vld [vmem:[%s12970_s5 + $0x2a8] ss:$24 sps:$4 sm:$0xff]  }
 0x357   :  { %7356 = vmatprep.subr.bf16.mxu0 %v9267_v29  ;;  %v9325_v24 = vld [vmem:[%s12970_s5 + $0x450] ss:$24 sps:$4 sm:$0xff]   ;;  %v9330_v29 = vld [vmem:[%s12970_s5 + $0x2dc] ss:$24 sps:$4 sm:$0xff]  }
 0x359   :  { %7421 = vmatpush1.bf16.msra.mxu1 %v9262_v30  ;;  %v9333_v30 = vld [vmem:[%s12970_s5 + $0x484] ss:$24 sps:$4 sm:$0xff]  }
 0x35a   :  { %7357 = vmatpush1.bf16.msra.mxu0 %v9265_v35  ;;  %7422 = vmatprep.subr.bf16.mxu1 %v9270_v37  ;;  %v9328_v35 = vld [vmem:[%s12970_s5 + $0x2d8] ss:$24 sps:$4 sm:$0xff]  }
 0x35b   :  { %7358 = vmatprep.subr.bf16.mxu0 %v9273_v61  ;;  %v9331_v37 = vld [vmem:[%s12970_s5 + $0x480] ss:$24 sps:$4 sm:$0xff]   ;;  %v9339_v61 = vld [vmem:[%s12970_s5 + $0x4b4] ss:$24 sps:$4 sm:$0xff]  }
 0x35d   :  { %7423 = vmatpush1.bf16.msra.mxu1 %v9268_v63  ;;  %v9337_v63 = vld [vmem:[%s12970_s5 + $0x4b0] ss:$24 sps:$4 sm:$0xff]  }
 0x35e   :  { %7359 = vmatpush1.bf16.msra.mxu0 %v9271_v41  ;;  %7424 = vmatprep.subr.bf16.mxu1 %v9276_v42  ;;  %v9342_v41 = vld [vmem:[%s12970_s5 + $0x33c] ss:$24 sps:$4 sm:$0xff]  }
 0x35f   :  { %7360 = vmatprep.subr.bf16.mxu0 %v9279_v44  ;;  %v9345_v42 = vld [vmem:[%s12970_s5 + $0x4e4] ss:$24 sps:$4 sm:$0xff]   ;;  %v9343_v44 = vld [vmem:[%s12970_s5 + $0x4e0] ss:$24 sps:$4 sm:$0xff]  }
 0x361   :  { %7425 = vmatpush1.bf16.msra.mxu1 %v9274_v55  ;;  %v9351_v55 = vld [vmem:[%s12970_s5 + $0x514] ss:$24 sps:$4 sm:$0xff]  }
 0x362   :  { %7361 = vmatpush1.bf16.msra.mxu0 %v9277_v47  ;;  %7426 = vmatprep.subr.bf16.mxu1 %v9282_v26  ;;  %v9346_v47 = vld [vmem:[%s12970_s5 + $0x368] ss:$24 sps:$4 sm:$0xff]  }
 0x363   :  { %7371 = vmatprep.subr.bf16.mxu0 %v9285_v50  ;;  %v9349_v26 = vld [vmem:[%s12970_s5 + $0x510] ss:$24 sps:$4 sm:$0xff]   ;;  %v9354_v50 = vld [vmem:[%s12970_s5 + $0x39c] ss:$24 sps:$4 sm:$0xff]  }
 0x365   :  { %7363 = vmatmul.mubr.bf16.vlgmr.msra.gmra.mrb[16].mxu0 %v12361_v62  ;;  %7427 = vmatpush1.bf16.msra.mxu1 %v9280_v53  ;;  %v9352_v53 = vld [vmem:[%s12970_s5 + $0x398] ss:$24 sps:$4 sm:$0xff]  }
 0x366   :  { %7372 = vmatpush1.bf16.msra.mxu0 %v9283_v58  ;;  %7403 = vmatprep.mubr.bf16.mxu0 %v12369_v33  ;;  %v9360_v58 = vld [vmem:[%s12970_s5 + $0x3cc] ss:$24 sps:$4 sm:$0xff]  }
 0x367   :  { %7428 = vmatprep.subr.bf16.mxu1 %v9288_v1  ;;  %7373 = vmatprep.subr.bf16.mxu0 %v9291_v3  ;;  %v9363_v1 = vld [vmem:[%s12970_s5 + $0x574] ss:$24 sps:$4 sm:$0xff]   ;;  %v9358_v3 = vld [vmem:[%s12970_s5 + $0x3c8] ss:$24 sps:$4 sm:$0xff]  }
 0x369   :  { %7429 = vmatpush1.bf16.msra.mxu1 %v9286_v7  ;;  %v9361_v7 = vld [vmem:[%s12970_s5 + $0x570] ss:$24 sps:$4 sm:$0xff]  }
 0x36a   :  { %7374 = vmatpush1.bf16.msra.mxu0 %v9289_v8  ;;  %7430 = vmatprep.subr.bf16.mxu1 %v9294_v9  ;;  %v9366_v8 = vld [vmem:[%s12970_s5 + $0x3fc] ss:$24 sps:$4 sm:$0xff]   ;;  %v2885_v9 = vrot.slane %v12124_v2, %v10893_v17  ;;  %v9372_v2 = vld [vmem:[%s12970_s5 + $0x42c] ss:$24 sps:$4 sm:$0xff]  }
 0x36b   :  { %7375 = vmatprep.subr.bf16.mxu0 %v9297_v20  ;;  %v9369_v20 = vld [vmem:[%s12970_s5 + $0x5a4] ss:$24 sps:$4 sm:$0xff]  }
 0x36d   :  { %7431 = vmatpush1.bf16.msra.mxu1 %v9292_v10  ;;  %v9364_v10 = vld [vmem:[%s12970_s5 + $0x3f8] ss:$24 sps:$4 sm:$0xff]  }
 0x36e   :  { %7376 = vmatpush1.bf16.msra.mxu0 %v9295_v38  ;;  %7432 = vmatprep.subr.bf16.mxu1 %v9300_v39  ;;  %v9367_v38 = vld [vmem:[%s12970_s5 + $0x5a0] ss:$24 sps:$4 sm:$0xff]   ;;  %v9112_v39 = vadd.f32 %v12140_v59, %v2885_v9  ;;  %v9378_v59 = vld [vmem:[%s12970_s5 + $0x45c] ss:$24 sps:$4 sm:$0xff]  }
 0x36f   :  { %7377 = vmatprep.subr.bf16.mxu0 %v9303_v27  ;;  %v9375_v27 = vld [vmem:[%s12970_s5 + $0x5d4] ss:$24 sps:$4 sm:$0xff]  }
 0x370   :  { %v9435_v9 = vld [vmem:[%s12970_s5 + $0x1f4] ss:$24 sps:$4 sm:$0xff]  }
 0x371   :  { %7433 = vmatpush1.bf16.msra.mxu1 %v9298_v11  ;;  %v9370_v11 = vld [vmem:[%s12970_s5 + $0x428] ss:$24 sps:$4 sm:$0xff]  }
 0x372   :  { %7378 = vmatpush1.bf16.msra.mxu0 %v9301_v12  ;;  %7434 = vmatprep.subr.bf16.mxu1 %v9306_v13  ;;  %v9373_v12 = vld [vmem:[%s12970_s5 + $0x5d0] ss:$24 sps:$4 sm:$0xff]   ;;  %v6132_v13 = vmax.f32 %v9112_v39, 0.0 }
 0x373   :  { %7379 = vmatprep.subr.bf16.mxu0 %v9309_v14  ;;  %v9381_v14 = vld [vmem:[%s12970_s5 + $0x14] ss:$24 sps:$4 sm:$0xff]  }
 0x374   :  { %v9462_v39 = vld [vmem:[%s12972_s7 + $0x10] sm:$0xff]  }
 0x375   :  { %7435 = vmatpush1.bf16.msra.mxu1 %v9304_v16  ;;  %v9376_v16 = vld [vmem:[%s12970_s5 + $0x458] ss:$24 sps:$4 sm:$0xff]  }
 0x376   :  { %7380 = vmatpush1.bf16.msra.mxu0 %v9307_v46  ;;  %7436 = vmatprep.subr.bf16.mxu1 %v9312_v28  ;;  %v9379_v46 = vld [vmem:[%s12970_s5 + $0x10] ss:$24 sps:$4 sm:$0xff]   ;;  %v12564_v28 = vpack.c.bf16 %v6132_v13, %v6132_v13 }
 0x377   :  { %7381 = vmatprep.subr.bf16.mxu0 %v9315_v4  ;;  %v9387_v4 = vld [vmem:[%s12970_s5 + $0x44] ss:$24 sps:$4 sm:$0xff]   ;;  %v9439_v13 = vld [vmem:[%s12970_s5 + $0x250] ss:$24 sps:$4 sm:$0xff]  }
 0x379   :  { %7437 = vmatpush1.bf16.msra.mxu1 %v9310_v34  ;;  %v9384_v34 = vld [vmem:[%s12970_s5 + $0x48c] ss:$24 sps:$4 sm:$0xff]  }
 0x37a   :  { %7382 = vmatpush1.bf16.msra.mxu0 %v9313_v19  ;;  %7438 = vmatprep.subr.bf16.mxu1 %v9318_v40  ;;  %v9382_v19 = vld [vmem:[%s12970_s5 + $0x488] ss:$24 sps:$4 sm:$0xff]  }
 0x37b   :  { %7383 = vmatprep.subr.bf16.mxu0 %v9321_v21  ;;  %v9385_v40 = vld [vmem:[%s12970_s5 + $0x40] ss:$24 sps:$4 sm:$0xff]   ;;  %v9393_v21 = vld [vmem:[%s12970_s5 + $0x74] ss:$24 sps:$4 sm:$0xff]  }
 0x37d   :  { %7439 = vmatpush1.bf16.msra.mxu1 %v9316_v56  ;;  %v9390_v56 = vld [vmem:[%s12970_s5 + $0x4bc] ss:$24 sps:$4 sm:$0xff]  }
 0x37e   :  { %7384 = vmatpush1.bf16.msra.mxu0 %v9319_v22  ;;  %7440 = vmatprep.subr.bf16.mxu1 %v9324_v25  ;;  %v9388_v22 = vld [vmem:[%s12970_s5 + $0x4b8] ss:$24 sps:$4 sm:$0xff]   ;;  %v9396_v25 = vld [vmem:[%s12970_s5 + $0x4ec] ss:$24 sps:$4 sm:$0xff]  }
 0x37f   :  { %7385 = vmatprep.subr.bf16.mxu0 %v9327_v23  ;;  %v9399_v23 = vld [vmem:[%s12970_s5 + $0xa4] ss:$24 sps:$4 sm:$0xff]  }
 0x381   :  { %7441 = vmatpush1.bf16.msra.mxu1 %v9322_v48  ;;  %v9394_v48 = vld [vmem:[%s12970_s5 + $0x4e8] ss:$24 sps:$4 sm:$0xff]  }
 0x382   :  { %7386 = vmatpush1.bf16.msra.mxu0 %v9325_v24  ;;  %7442 = vmatprep.subr.bf16.mxu1 %v9330_v29  ;;  %v9397_v24 = vld [vmem:[%s12970_s5 + $0xa0] ss:$24 sps:$4 sm:$0xff]   ;;  %v9402_v29 = vld [vmem:[%s12970_s5 + $0x51c] ss:$24 sps:$4 sm:$0xff]  }
 0x383   :  { %7387 = vmatprep.subr.bf16.mxu0 %v9333_v30  ;;  %v9405_v30 = vld [vmem:[%s12970_s5 + $0xd4] ss:$24 sps:$4 sm:$0xff]  }
 0x385   :  { %7443 = vmatpush1.bf16.msra.mxu1 %v9328_v35  ;;  %v9400_v35 = vld [vmem:[%s12970_s5 + $0x518] ss:$24 sps:$4 sm:$0xff]  }
 0x386   :  { %7388 = vmatpush1.bf16.msra.mxu0 %v9331_v37  ;;  %7453 = vmatprep.subr.bf16.mxu1 %v9336_v31  ;;  %v9403_v37 = vld [vmem:[%s12970_s5 + $0xd0] ss:$24 sps:$4 sm:$0xff]   ;;  %v9408_v31 = vld [vmem:[%s12970_s5 + $0x54c] ss:$24 sps:$4 sm:$0xff]  }
 0x387   :  { %7389 = vmatprep.subr.bf16.mxu0 %v9339_v61  ;;  %v9411_v61 = vld [vmem:[%s12970_s5 + $0x104] ss:$24 sps:$4 sm:$0xff]  }
 0x388   :  { %7445 = vmatmul.mubr.bf16.vlgmr.msra.gmra.mrb[24].mxu1 %v12361_v62 }
 0x389   :  { %7454 = vmatpush1.bf16.msra.mxu1 %v9334_v36  ;;  %7485 = vmatprep.mubr.bf16.mxu1 %v12369_v33  ;;  %v9406_v36 = vld [vmem:[%s12970_s5 + $0x548] ss:$24 sps:$4 sm:$0xff]  }
 0x38a   :  { %7390 = vmatpush1.bf16.msra.mxu0 %v9337_v63  ;;  %7455 = vmatprep.subr.bf16.mxu1 %v9342_v41  ;;  %v9409_v63 = vld [vmem:[%s12970_s5 + $0x100] ss:$24 sps:$4 sm:$0xff]   ;;  %v9414_v41 = vld [vmem:[%s12970_s5 + $0x57c] ss:$24 sps:$4 sm:$0xff]  }
 0x38b   :  { %7391 = vmatprep.subr.bf16.mxu0 %v9345_v42  ;;  %v9417_v42 = vld [vmem:[%s12970_s5 + $0x134] ss:$24 sps:$4 sm:$0xff]  }
 0x38d   :  { %7456 = vmatpush1.bf16.msra.mxu1 %v9340_v43  ;;  %v9412_v43 = vld [vmem:[%s12970_s5 + $0x578] ss:$24 sps:$4 sm:$0xff]  }
 0x38e   :  { %7392 = vmatpush1.bf16.msra.mxu0 %v9343_v44  ;;  %7457 = vmatprep.subr.bf16.mxu1 %v9348_v15  ;;  %v9415_v44 = vld [vmem:[%s12970_s5 + $0x130] ss:$24 sps:$4 sm:$0xff]   ;;  %v9420_v15 = vld [vmem:[%s12970_s5 + $0x5ac] ss:$24 sps:$4 sm:$0xff]  }
 0x38f   :  { %7393 = vmatprep.subr.bf16.mxu0 %v9351_v55  ;;  %v9423_v55 = vld [vmem:[%s12970_s5 + $0x164] ss:$24 sps:$4 sm:$0xff]  }
 0x391   :  { %7458 = vmatpush1.bf16.msra.mxu1 %v9346_v47  ;;  %v9418_v47 = vld [vmem:[%s12970_s5 + $0x5a8] ss:$24 sps:$4 sm:$0xff]  }
 0x392   :  { %7394 = vmatpush1.bf16.msra.mxu0 %v9349_v26  ;;  %7459 = vmatprep.subr.bf16.mxu1 %v9354_v50  ;;  %v9421_v26 = vld [vmem:[%s12970_s5 + $0x160] ss:$24 sps:$4 sm:$0xff]   ;;  %v9426_v50 = vld [vmem:[%s12970_s5 + $0x5dc] ss:$24 sps:$4 sm:$0xff]  }
 0x393   :  { %7395 = vmatprep.subr.bf16.mxu0 %v9357_v6  ;;  %v9429_v6 = vld [vmem:[%s12970_s5 + $0x194] ss:$24 sps:$4 sm:$0xff]  }
 0x395   :  { %7460 = vmatpush1.bf16.msra.mxu1 %v9352_v53  ;;  %v9424_v53 = vld [vmem:[%s12970_s5 + $0x5d8] ss:$24 sps:$4 sm:$0xff]  }
 0x396   :  { %7396 = vmatpush1.bf16.msra.mxu0 %v9355_v54  ;;  %7461 = vmatprep.subr.bf16.mxu1 %v9360_v58  ;;  %v9427_v54 = vld [vmem:[%s12970_s5 + $0x190] ss:$24 sps:$4 sm:$0xff]   ;;  %v9451_v58 = vld [vmem:[%s12972_s7 + $0x40] sm:$0xff]  }
 0x397   :  { %7397 = vmatprep.subr.bf16.mxu0 %v9363_v1  ;;  %v9432_v1 = vld [vmem:[%s12970_s5 + $0x1c4] ss:$24 sps:$4 sm:$0xff]  }
 0x399   :  { %7462 = vmatpush1.bf16.msra.mxu1 %v9358_v3  ;;  %v9452_v3 = vld [vmem:[%s12972_s7] sm:$0xff]  }
 0x39a   :  { %7398 = vmatpush1.bf16.msra.mxu0 %v9361_v7  ;;  %7463 = vmatprep.subr.bf16.mxu1 %v9366_v8  ;;  %v9430_v7 = vld [vmem:[%s12970_s5 + $0x1c0] ss:$24 sps:$4 sm:$0xff]   ;;  %v9456_v8 = vld [vmem:[%s12972_s7 + $0x48] sm:$0xff]  }
 0x39b   :  { %7399 = vmatprep.subr.bf16.mxu0 %v9369_v20  ;;  %v9457_v20 = vld [vmem:[%s12972_s7 + $0x8] sm:$0xff]  }
 0x39d   :  { %7464 = vmatpush1.bf16.msra.mxu1 %v9364_v10  ;;  %v9433_v10 = vld [vmem:[%s12970_s5 + $0x1f0] ss:$24 sps:$4 sm:$0xff]  }
 0x39e   :  { %7400 = vmatpush1.bf16.msra.mxu0 %v9367_v38  ;;  %7465 = vmatprep.subr.bf16.mxu1 %v9372_v2  ;;  %v9461_v38 = vld [vmem:[%s12972_s7 + $0x50] sm:$0xff]   ;;  %v9438_v2 = vld [vmem:[%s12970_s5 + $0x224] ss:$24 sps:$4 sm:$0xff]  }
 0x39f   :  { %7401 = vmatprep.subr.bf16.mxu0 %v9375_v27  ;;  %v9436_v27 = vld [vmem:[%s12970_s5 + $0x220] ss:$24 sps:$4 sm:$0xff]  }
 0x3a1   :  { %7466 = vmatpush1.bf16.msra.mxu1 %v9370_v11  ;;  %v9466_v11 = vld [vmem:[%s12972_s7 + $0x58] sm:$0xff]  }
 0x3a2   :  { %7402 = vmatpush1.bf16.msra.mxu0 %v9373_v12  ;;  %7467 = vmatprep.subr.bf16.mxu1 %v9378_v59  ;;  %v9441_v12 = vld [vmem:[%s12970_s5 + $0x254] ss:$24 sps:$4 sm:$0xff]   ;;  %v9467_v59 = vld [vmem:[%s12972_s7 + $0x18] sm:$0xff]  }
 0x3a3   :  { %7494 = vmatprep.subr.bf16.mxu0 %v9381_v14  ;;  %v9471_v14 = vld [vmem:[%s12972_s7 + $0x60] sm:$0xff]  }
 0x3a5   :  { %7404 = vmatmul.mubr.bf16.vlgmr.msra.gmra.mrb[16].mxu0 %v12564_v28  ;;  %7468 = vmatpush1.bf16.msra.mxu1 %v9376_v16  ;;  %v9444_v16 = vld [vmem:[%s12970_s5 + $0x284] ss:$24 sps:$4 sm:$0xff]  }
 0x3a6   :  { %7495 = vmatpush1.bf16.msra.mxu0 %v9379_v46  ;;  %7526 = vmatprep.mubr.bf16.mxu0 %v12172_v32  ;;  %v9391_v32 = vld [vmem:[%s12970_s5 + $0x70] ss:$24 sps:$4 sm:$0xff]   ;;  %v9472_v46 = vld [vmem:[%s12972_s7 + $0x20] sm:$0xff]  }
 0x3a7   :  { %7469 = vmatprep.subr.bf16.mxu1 %v9384_v34  ;;  %7496 = vmatprep.subr.bf16.mxu0 %v9387_v4  ;;  %v9442_v34 = vld [vmem:[%s12970_s5 + $0x280] ss:$24 sps:$4 sm:$0xff]   ;;  %v9476_v4 = vld [vmem:[%s12972_s7 + $0x68] sm:$0xff]  }
 0x3a9   :  { %7470 = vmatpush1.bf16.msra.mxu1 %v9382_v19  ;;  %v9447_v19 = vld [vmem:[%s12970_s5 + $0x2b4] ss:$24 sps:$4 sm:$0xff]  }
 0x3aa   :  { %7497 = vmatpush1.bf16.msra.mxu0 %v9385_v40  ;;  %7471 = vmatprep.subr.bf16.mxu1 %v9390_v56  ;;  %v9477_v40 = vld [vmem:[%s12972_s7 + $0x28] sm:$0xff]  }
 0x3ab   :  { %7498 = vmatprep.subr.bf16.mxu0 %v9393_v21  ;;  %v9445_v56 = vld [vmem:[%s12970_s5 + $0x2b0] ss:$24 sps:$4 sm:$0xff]  }
 0x3ac   :  { %v9481_v21 = vld [vmem:[%s12972_s7 + $0x70] sm:$0xff]  }
 0x3ad   :  { %7472 = vmatpush1.bf16.msra.mxu1 %v9388_v22  ;;  %v9450_v22 = vld [vmem:[%s12970_s5 + $0x2e4] ss:$24 sps:$4 sm:$0xff]  }
 0x3ae   :  { %7499 = vmatpush1.bf16.msra.mxu0 %v9391_v32  ;;  %7473 = vmatprep.subr.bf16.mxu1 %v9396_v25  ;;  %v9482_v32 = vld [vmem:[%s12972_s7 + $0x30] sm:$0xff]   ;;  %v9448_v25 = vld [vmem:[%s12970_s5 + $0x2e0] ss:$24 sps:$4 sm:$0xff]  }
 0x3af   :  { %7500 = vmatprep.subr.bf16.mxu0 %v9399_v23  ;;  %v9486_v23 = vld [vmem:[%s12972_s7 + $0x78] sm:$0xff]  }
 0x3b1   :  { %7474 = vmatpush1.bf16.msra.mxu1 %v9394_v48  ;;  %v9455_v48 = vld [vmem:[%s12970_s5 + $0x314] ss:$24 sps:$4 sm:$0xff]  }
 0x3b2   :  { %7501 = vmatpush1.bf16.msra.mxu0 %v9397_v24  ;;  %7475 = vmatprep.subr.bf16.mxu1 %v9402_v29  ;;  %v9487_v24 = vld [vmem:[%s12972_s7 + $0x38] sm:$0xff]   ;;  %v9453_v29 = vld [vmem:[%s12970_s5 + $0x310] ss:$24 sps:$4 sm:$0xff]  }
 0x3b3   :  { %7502 = vmatprep.subr.bf16.mxu0 %v9405_v30  ;;  %v9460_v30 = vld [vmem:[%s12970_s5 + $0x344] ss:$24 sps:$4 sm:$0xff]  }
 0x3b5   :  { %7476 = vmatpush1.bf16.msra.mxu1 %v9400_v35  ;;  %v9491_v35 = vld [vmem:[%s12972_s7 + $0xc0] sm:$0xff]  }
 0x3b6   :  { %7503 = vmatpush1.bf16.msra.mxu0 %v9403_v37  ;;  %7477 = vmatprep.subr.bf16.mxu1 %v9408_v31  ;;  %v9458_v37 = vld [vmem:[%s12970_s5 + $0x340] ss:$24 sps:$4 sm:$0xff]   ;;  %v9465_v31 = vld [vmem:[%s12970_s5 + $0x374] ss:$24 sps:$4 sm:$0xff]  }
 0x3b7   :  { %7504 = vmatprep.subr.bf16.mxu0 %v9411_v61  ;;  %v9463_v61 = vld [vmem:[%s12970_s5 + $0x370] ss:$24 sps:$4 sm:$0xff]  }
 0x3b9   :  { %7478 = vmatpush1.bf16.msra.mxu1 %v9406_v36  ;;  %v9475_v36 = vld [vmem:[%s12970_s5 + $0x3d4] ss:$24 sps:$4 sm:$0xff]  }
 0x3ba   :  { %7505 = vmatpush1.bf16.msra.mxu0 %v9409_v63  ;;  %7479 = vmatprep.subr.bf16.mxu1 %v9414_v41  ;;  %v9473_v63 = vld [vmem:[%s12970_s5 + $0x3d0] ss:$24 sps:$4 sm:$0xff]   ;;  %v9480_v41 = vld [vmem:[%s12970_s5 + $0x404] ss:$24 sps:$4 sm:$0xff]  }
 0x3bb   :  { %7506 = vmatprep.subr.bf16.mxu0 %v9417_v42  ;;  %v12796_v42 = vld [vmem:[%s12971_s4] sm:$0xff] }
 0x3bd   :  { %7480 = vmatpush1.bf16.msra.mxu1 %v9412_v43  ;;  %v2893_v43 = vrot.slane %v12796_v42, %v11095_v57 }
 0x3be   :  { %7507 = vmatpush1.bf16.msra.mxu0 %v9415_v44  ;;  %7481 = vmatprep.subr.bf16.mxu1 %v9420_v15  ;;  %v2897_v44 = vrot.slane %v12796_v42, %v11104_v60  ;;  %v9478_v15 = vld [vmem:[%s12970_s5 + $0x400] ss:$24 sps:$4 sm:$0xff]  }
 0x3bf   :  { %7508 = vmatprep.subr.bf16.mxu0 %v9423_v55  ;;  %v9485_v55 = vld [vmem:[%s12970_s5 + $0x434] ss:$24 sps:$4 sm:$0xff]  }
 0x3c1   :  { %7482 = vmatpush1.bf16.msra.mxu1 %v9418_v47 }
 0x3c2   :  { %7509 = vmatpush1.bf16.msra.mxu0 %v9421_v26  ;;  %7483 = vmatprep.subr.bf16.mxu1 %v9426_v50 }
 0x3c3   :  { %7510 = vmatprep.subr.bf16.mxu0 %v9429_v6 }
 0x3c5   :  { %7484 = vmatpush1.bf16.msra.mxu1 %v9424_v53 }
 0x3c6   :  { %7511 = vmatpush1.bf16.msra.mxu0 %v9427_v54  ;;  %9054 = vmatprep.subr.bf16.mxu1 %v9451_v58  ;;  %v9483_v54 = vld [vmem:[%s12970_s5 + $0x430] ss:$24 sps:$4 sm:$0xff]  }
 0x3c7   :  { %7512 = vmatprep.subr.bf16.mxu0 %v9432_v1 }
 0x3c8   :  { %7486 = vmatmul.mubr.bf16.vlgmr.msra.gmra.mrb[24].mxu1 %v12564_v28 }
 0x3c9   :  { %9055 = vmatpush3.bf16.msra.mxu1 %v9452_v3  ;;  %v9490_v3 = vld [vmem:[%s12970_s5 + $0x464] ss:$24 sps:$4 sm:$0xff]  }
 0x3ca   :  { %7513 = vmatpush1.bf16.msra.mxu0 %v9430_v7  ;;  %9056 = vmatprep.subr.bf16.mxu1 %v9456_v8 }
 0x3cb   :  { %7514 = vmatprep.subr.bf16.mxu0 %v9435_v9  ;;  %v9488_v9 = vld [vmem:[%s12970_s5 + $0x460] ss:$24 sps:$4 sm:$0xff]  }
 0x3cd   :  { %9057 = vmatpush3.bf16.msra.mxu1 %v9457_v20  ;;  %v9495_v20 = vld [vmem:[%s12972_s7 + $0x80] sm:$0xff]  }
 0x3ce   :  { %7515 = vmatpush1.bf16.msra.mxu0 %v9433_v10  ;;  %9058 = vmatprep.subr.bf16.mxu1 %v9461_v38  ;;  %v9494_v38 = vld [vmem:[%s12970_s5 + $0x494] ss:$24 sps:$4 sm:$0xff]  }
 0x3cf   :  { %7516 = vmatprep.subr.bf16.mxu0 %v9438_v2  ;;  %v9496_v2 = vld [vmem:[%s12972_s7 + $0xc8] sm:$0xff]  }
 0x3d1   :  { %9059 = vmatpush3.bf16.msra.mxu1 %v9462_v39  ;;  %v9492_v39 = vld [vmem:[%s12970_s5 + $0x490] ss:$24 sps:$4 sm:$0xff]  }
 0x3d2   :  { %7517 = vmatpush1.bf16.msra.mxu0 %v9436_v27  ;;  %9060 = vmatprep.subr.bf16.mxu1 %v9466_v11  ;;  %v9500_v27 = vld [vmem:[%s12972_s7 + $0x88] sm:$0xff]   ;;  %v9499_v11 = vld [vmem:[%s12970_s5 + $0x4c4] ss:$24 sps:$4 sm:$0xff]  }
 0x3d3   :  { %7518 = vmatprep.subr.bf16.mxu0 %v9441_v12  ;;  %v9501_v12 = vld [vmem:[%s12972_s7 + $0xd0] sm:$0xff]  }
 0x3d5   :  { %9061 = vmatpush3.bf16.msra.mxu1 %v9467_v59  ;;  %v9497_v59 = vld [vmem:[%s12970_s5 + $0x4c0] ss:$24 sps:$4 sm:$0xff]  }
 0x3d6   :  { %7519 = vmatpush1.bf16.msra.mxu0 %v9439_v13  ;;  %9062 = vmatprep.subr.bf16.mxu1 %v9471_v14  ;;  %v9505_v13 = vld [vmem:[%s12972_s7 + $0x90] sm:$0xff]  }
 0x3d7   :  { %7520 = vmatprep.subr.bf16.mxu0 %v9444_v16  ;;  %v9504_v14 = vld [vmem:[%s12970_s5 + $0x4f4] ss:$24 sps:$4 sm:$0xff]   ;;  %v9506_v16 = vld [vmem:[%s12972_s7 + $0xd8] sm:$0xff]  }
 0x3d9   :  { %9063 = vmatpush3.bf16.msra.mxu1 %v9472_v46  ;;  %v9502_v46 = vld [vmem:[%s12970_s5 + $0x4f0] ss:$24 sps:$4 sm:$0xff]  }
 0x3da   :  { %7521 = vmatpush1.bf16.msra.mxu0 %v9442_v34  ;;  %9064 = vmatprep.subr.bf16.mxu1 %v9476_v4  ;;  %v9510_v34 = vld [vmem:[%s12972_s7 + $0x98] sm:$0xff]  }
 0x3db   :  { %7522 = vmatprep.subr.bf16.mxu0 %v9447_v19  ;;  %v9509_v4 = vld [vmem:[%s12970_s5 + $0x524] ss:$24 sps:$4 sm:$0xff]  }
 0x3dc   :  { %v9511_v19 = vld [vmem:[%s12972_s7 + $0xe0] sm:$0xff]  }
 0x3dd   :  { %9065 = vmatpush3.bf16.msra.mxu1 %v9477_v40  ;;  %v9507_v40 = vld [vmem:[%s12970_s5 + $0x520] ss:$24 sps:$4 sm:$0xff]  }
 0x3de   :  { %7523 = vmatpush1.bf16.msra.mxu0 %v9445_v56  ;;  %9066 = vmatprep.subr.bf16.mxu1 %v9481_v21  ;;  %v9515_v56 = vld [vmem:[%s12972_s7 + $0xa0] sm:$0xff]   ;;  %v9514_v21 = vld [vmem:[%s12970_s5 + $0x554] ss:$24 sps:$4 sm:$0xff]  }
 0x3df   :  { %7524 = vmatprep.subr.bf16.mxu0 %v9450_v22  ;;  %v9516_v22 = vld [vmem:[%s12972_s7 + $0xe8] sm:$0xff]  }
 0x3e1   :  { %9067 = vmatpush3.bf16.msra.mxu1 %v9482_v32  ;;  %v9512_v32 = vld [vmem:[%s12970_s5 + $0x550] ss:$24 sps:$4 sm:$0xff]  }
 0x3e2   :  { %7525 = vmatpush1.bf16.msra.mxu0 %v9448_v25  ;;  %9068 = vmatprep.subr.bf16.mxu1 %v9486_v23  ;;  %v9520_v25 = vld [vmem:[%s12972_s7 + $0xa8] sm:$0xff]   ;;  %v9519_v23 = vld [vmem:[%s12970_s5 + $0x584] ss:$24 sps:$4 sm:$0xff]  }
 0x3e3   :  { %7535 = vmatprep.subr.bf16.mxu0 %v9455_v48  ;;  %v9521_v48 = vld [vmem:[%s12972_s7 + $0xf0] sm:$0xff]  }
 0x3e5   :  { %7527 = vmatmul.mubr.bf16.vlgmr.msra.gmra.mrb[20].mxu0 %v12361_v62  ;;  %9069 = vmatpush3.bf16.msra.mxu1 %v9487_v24  ;;  %v9470_v62 = vld [vmem:[%s12970_s5 + $0x3a4] ss:$24 sps:$4 sm:$0xff]   ;;  %v9517_v24 = vld [vmem:[%s12970_s5 + $0x580] ss:$24 sps:$4 sm:$0xff]  }
 0x3e6   :  { %7536 = vmatpush1.bf16.msra.mxu0 %v9453_v29  ;;  %7567 = vmatprep.mubr.bf16.mxu0 %v12369_v33  ;;  %v9468_v33 = vld [vmem:[%s12970_s5 + $0x3a0] ss:$24 sps:$4 sm:$0xff]   ;;  %v9525_v29 = vld [vmem:[%s12972_s7 + $0xb0] sm:$0xff]  }
 0x3e7   :  { %7537 = vmatprep.subr.bf16.mxu0 %v9460_v30  ;;  %9076 = vmatprep.subr.bf16.mxu1 %v9491_v35  ;;  %v9524_v30 = vld [vmem:[%s12970_s5 + $0x5b4] ss:$24 sps:$4 sm:$0xff]   ;;  %v9526_v35 = vld [vmem:[%s12972_s7 + $0xf8] sm:$0xff]  }
 0x3ea   :  { %7538 = vmatpush1.bf16.msra.mxu0 %v9458_v37  ;;  %v2901_v37 = vrot.slane %v12796_v42, %v350_v45  ;;  %v9529_v45 = vld [vmem:[%s12970_s5 + $0x5e4] ss:$24 sps:$4 sm:$0xff]  }
 0x3eb   :  { %7539 = vmatprep.subr.bf16.mxu0 %v9465_v31  ;;  %v2905_v31 = vrot.slane %v12796_v42, %v354_v49 }
 0x3ee   :  { %7540 = vmatpush1.bf16.msra.mxu0 %v9463_v61  ;;  %v9522_v61 = vld [vmem:[%s12970_s5 + $0x5b0] ss:$24 sps:$4 sm:$0xff]  }
 0x3ef   :  { %7541 = vmatprep.subr.bf16.mxu0 %v9470_v62  ;;  %v9530_v62 = vld [vmem:[%s12972_s7 + $0xb8] sm:$0xff]  }
 0x3f2   :  { %7542 = vmatpush1.bf16.msra.mxu0 %v9468_v33 }
 0x3f3   :  { %7543 = vmatprep.subr.bf16.mxu0 %v9475_v36 }
 0x3f6   :  { %7544 = vmatpush1.bf16.msra.mxu0 %v9473_v63 }
 0x3f7   :  { %7545 = vmatprep.subr.bf16.mxu0 %v9480_v41 }
 0x3f8   :  { %v5959_v47 = vpop.f32.mrb[12].mxu0 }
 0x3f9   :  { %v9114_v26 = vadd.f32 %v5959_v47, %v2893_v43  ;;  %v5961_v50 = vpop.f32.mrb[13].mxu0  ;;  %v9527_v43 = vld [vmem:[%s12970_s5 + $0x5e0] ss:$24 sps:$4 sm:$0xff]  }
 0x3fa   :  { %v9115_v6 = vadd.f32 %v5961_v50, %v2897_v44  ;;  %v5963_v53 = vpop.f32.mrb[14].mxu0  ;;  %7546 = vmatpush1.bf16.msra.mxu0 %v9478_v15  ;;  %v6338_v47 = vld [vmem:[%s12973_s6] sm:$0x3f] }
 0x3fb   :  { %v6134_v58 = vmax.f32 %v9114_v26, 0.0  ;;  %v5964_v1 = vpop.f32.mrb[15].mxu0  ;;  %7547 = vmatprep.subr.bf16.mxu0 %v9485_v55  ;;  %v6343_v26 = vrot.slane %v6338_v47, %v10677_v51  ;;  %v6347_v50 = vrot.slane %v6338_v47, %v10691_v52 }
 0x3fc   :  { %v6135_v7 = vmax.f32 %v9115_v6, 0.0 }
 0x3fd   :  { %v6142_v10 = vpack.c.bf16 %v6134_v58, %v6134_v58 }
 0x3fe   :  { %v6143_v8 = vpack.c.bf16 %v6135_v7, %v6135_v7  ;;  %7548 = vmatpush1.bf16.msra.mxu0 %v9483_v54 }
 0x3ff   :  { %7549 = vmatprep.subr.bf16.mxu0 %v9490_v3 }
 0x400   :  { %7871 = vmatprep.mubr.bf16.mxu1 %v6143_v8  ;;  %v6351_v8 = vrot.slane %v6338_v47, %v10893_v17  ;;  %v9021_v17 = vld [vmem:[%s12974_s8] ss:$0 sm:$0xff] }
 0x401   :  { %7872 = vmatmul.mubr.bf16.vlgmr.msra.gmra.mrb[28].mxu1 %v6142_v10 }
 0x402   :  { %7550 = vmatpush1.bf16.msra.mxu0 %v9488_v9  ;;  %9077 = vmatpush3.bf16.msra.mxu1 %v9495_v20  ;;  %v6355_v9 = vrot.slane %v6338_v47, %v10793_v5  ;;  %v6363_v5 = vrot.slane %v6338_v47, %v11104_v60 }
 0x403   :  { %7551 = vmatprep.subr.bf16.mxu0 %v9494_v38  ;;  %9078 = vmatprep.subr.bf16.mxu1 %v9496_v2 }
 0x406   :  { %7552 = vmatpush1.bf16.msra.mxu0 %v9492_v39  ;;  %9079 = vmatpush3.bf16.msra.mxu1 %v9500_v27 }
 0x407   :  { %7553 = vmatprep.subr.bf16.mxu0 %v9499_v11  ;;  %9080 = vmatprep.subr.bf16.mxu1 %v9501_v12 }
 0x40a   :  { %7554 = vmatpush1.bf16.msra.mxu0 %v9497_v59  ;;  %9081 = vmatpush3.bf16.msra.mxu1 %v9505_v13 }
 0x40b   :  { %7555 = vmatprep.subr.bf16.mxu0 %v9504_v14  ;;  %9082 = vmatprep.subr.bf16.mxu1 %v9506_v16  ;;  %v6359_v14 = vrot.slane %v6338_v47, %v11095_v57 }
 0x40e   :  { %7556 = vmatpush1.bf16.msra.mxu0 %v9502_v46  ;;  %9083 = vmatpush3.bf16.msra.mxu1 %v9510_v34 }
 0x40f   :  { %7557 = vmatprep.subr.bf16.mxu0 %v9509_v4  ;;  %9084 = vmatprep.subr.bf16.mxu1 %v9511_v19 }
 0x412   :  { %7558 = vmatpush1.bf16.msra.mxu0 %v9507_v40  ;;  %9085 = vmatpush3.bf16.msra.mxu1 %v9515_v56 }
 0x413   :  { %7559 = vmatprep.subr.bf16.mxu0 %v9514_v21  ;;  %9086 = vmatprep.subr.bf16.mxu1 %v9516_v22 }
 0x416   :  { %7560 = vmatpush1.bf16.msra.mxu0 %v9512_v32  ;;  %9087 = vmatpush3.bf16.msra.mxu1 %v9520_v25 }
 0x417   :  { %7561 = vmatprep.subr.bf16.mxu0 %v9519_v23  ;;  %9088 = vmatprep.subr.bf16.mxu1 %v9521_v48 }
 0x41a   :  { %7562 = vmatpush1.bf16.msra.mxu0 %v9517_v24  ;;  %9089 = vmatpush3.bf16.msra.mxu1 %v9525_v29  ;;  %v7920_v24 = vand.u32 127, %v324_v0 }
 0x41b   :  { %v6123_v33 = vpop.f32.mrb[20].mxu1  ;;  %7563 = vmatprep.subr.bf16.mxu0 %v9524_v30  ;;  %9090 = vmatprep.subr.bf16.mxu1 %v9526_v35 }
 0x41c   :  { %v9116_v18 = vadd.f32 %v6123_v33, %v2901_v37  ;;  %v6125_v36 = vpop.f32.mrb[21].mxu1  ;;  %vm7921_vm1 = vcmp.lt.s32.totalorder %v7920_v24, 51 }
 0x41d   :  { %v9117_v49 = vadd.f32 %v6125_v36, %v2905_v31  ;;  %v6127_v63 = vpop.f32.mrb[22].mxu1 }
 0x41e   :  { %v6136_v41 = vmax.f32 %v9116_v18, 0.0  ;;  %v6128_v42 = vpop.f32.mrb[23].mxu1  ;;  %7564 = vmatpush1.bf16.msra.mxu0 %v9522_v61  ;;  %9091 = vmatpush3.bf16.msra.mxu1 %v9530_v62 }
 0x41f   :  { %v6137_v44 = vmax.f32 %v9117_v49, 0.0  ;;  %7565 = vmatprep.subr.bf16.mxu0 %v9529_v45 }
 0x420   :  { %v6144_v55 = vpack.c.bf16 %v6136_v41, %v6136_v41 }
 0x421   :  { %v6145_v15 = vpack.c.bf16 %v6137_v44, %v6137_v44 }
 0x422   :  { %7566 = vmatpush1.bf16.msra.mxu0 %v9527_v43 }
 0x423   :  { %7911 = vmatprep.mubr.bf16.mxu1 %v6145_v15 }
 0x424   :  { %7912 = vmatmul.mubr.bf16.vlgmr.msra.gmra.mrb[32].mxu1 %v6144_v55 }
 0x425   :  { %7568 = vmatmul.mubr.bf16.vlgmr.msra.gmra.mrb[20].mxu0 %v12564_v28 }
 0x478   :  { %v7405_v6 = vpop.f32.mrb[16].mxu0 }
 0x479   :  { %v9118_v53 = vadd.f32 %v7405_v6, %v6343_v26  ;;  %v7407_v54 = vpop.f32.mrb[17].mxu0 }
 0x47a   :  { %v9119_v58 = vadd.f32 %v7407_v54, %v6347_v50  ;;  %v7409_v1 = vpop.f32.mrb[18].mxu0 }
 0x47b   :  { %v7410_v3 = vpop.f32.mrb[19].mxu0 }
 0x47c   :  { %v7922_v7 = vadd.f32 %v9119_v58, %v9118_v53 }
 0x49b   :  { %v7487_v28 = vpop.f32.mrb[24].mxu1 }
 0x49c   :  { %v9120_v20 = vadd.f32 %v7487_v28, %v6351_v8  ;;  %v7489_v10 = vpop.f32.mrb[25].mxu1 }
 0x49d   :  { %v9121_v38 = vadd.f32 %v7489_v10, %v6355_v9  ;;  %v7491_v2 = vpop.f32.mrb[26].mxu1 }
 0x49e   :  { %v7923_v39 = vadd.f32 %v9120_v20, %v7922_v7  ;;  %v7492_v51 = vpop.f32.mrb[27].mxu1 }
 0x4a0   :  { %v7924_v27 = vadd.f32 %v9121_v38, %v7923_v39 }
 0x4d4   :  { %v9070_v52 = vpop.f32.mrb[28].mxu1 }
 0x4d5   :  { %v9071_v11 = vpop.f32.mrb[29].mxu1 }
 0x4d6   :  { %v9072_v12 = vadd.f32 %v9071_v11, %v9070_v52  ;;  %v9073_v59 = vpop.f32.mrb[30].mxu1 }
 0x4d7   :  { %v9074_v13 = vpop.f32.mrb[31].mxu1 }
 0x4d8   :  { %v7874_v4 = vadd.f32 %v9072_v12, %v9021_v17 }
 0x4f7   :  { %v9092_v16 = vpop.f32.mrb[32].mxu1 }
 0x4f8   :  { %v7569_v46 = vpop.f32.mrb[20].mxu0  ;;  %v9093_v34 = vpop.f32.mrb[33].mxu1 }
 0x4f9   :  { %v9122_v19 = vadd.f32 %v7569_v46, %v6359_v14  ;;  %v9094_v40 = vadd.f32 %v9093_v34, %v9092_v16  ;;  %v7571_v56 = vpop.f32.mrb[21].mxu0  ;;  %v9095_v21 = vpop.f32.mrb[34].mxu1 }
 0x4fa   :  { %v9123_v22 = vadd.f32 %v7571_v56, %v6363_v5  ;;  %v7573_v32 = vpop.f32.mrb[22].mxu0  ;;  %v9096_v25 = vpop.f32.mrb[35].mxu1 }
 0x4fb   :  { %v7925_v23 = vadd.f32 %v9122_v19, %v7924_v27  ;;  %v7914_v48 = vadd.f32 %v9094_v40, %v7874_v4  ;;  %v7574_v57 = vpop.f32.mrb[23].mxu0 }
 0x4fd   :  { %v7926_v29 = vadd.f32 %v9123_v22, %v7925_v23  ;;  %v8006_v30 = vadd.f32 %v9123_v22, %v7914_v48  ;;  %v7961_v35 = vadd.f32 %v9120_v20, %v7914_v48  ;;  %v7928_v60 = vadd.f32 %v9118_v53, %v7914_v48 }
 0x4fe   :  { %v7976_v37 = vadd.f32 %v9121_v38, %v7914_v48  ;;  %v7946_v31 = vadd.f32 %v9119_v58, %v7914_v48  ;;  %v7991_v61 = vadd.f32 %v9122_v19, %v7914_v48 }
 0x4ff   :  { %v7927_v62 = vmul.f32 0.16666667, %v7926_v29 }
 0x501   :  { %v7962_v33 = vsub.f32 %v7961_v35, %v7927_v62  ;;  %v7929_v45 = vsub.f32 %v7928_v60, %v7927_v62  ;;  %v7977_v18 = vsub.f32 %v7976_v37, %v7927_v62  ;;  %v7947_v36 = vsub.f32 %v7946_v31, %v7927_v62 }
 0x502   :  { %v8007_v49 = vsub.f32 %v8006_v30, %v7927_v62  ;;  %v7992_v63 = vsub.f32 %v7991_v61, %v7927_v62 }
 0x503   :  { %v7963_v41 = vsel %vm7921_vm1, %v7962_v33, -inf  ;;  %v7932_v0 = vsel %vm7921_vm1, %v7929_v45, -inf  ;;  %v7978_v44 = vsel %vm7921_vm1, %v7977_v18, -inf  ;;  %v7948_v15 = vsel %vm7921_vm1, %v7947_v36, -inf }
 0x504   :  { %v7964_v42 = vsel %vm7933_vm2, %v7963_v41, -inf  ;;  %v7934_v43 = vsel %vm7933_vm2, %v7932_v0, -inf  ;;  %v7979_v55 = vsel %vm7933_vm2, %v7978_v44, -inf  ;;  %v7949_v47 = vsel %vm7933_vm2, %v7948_v15, -inf }
 0x505   :  { %7965 = vmax.xlane.f32.xlu1 %v7964_v42  ;;  %7935 = vmax.xlane.f32.xlu0 %v7934_v43  ;;  %v8008_v26 = vsel %vm7921_vm1, %v8007_v49, -inf  ;;  %v7993_v50 = vsel %vm7921_vm1, %v7992_v63, -inf }
 0x506   :  { %v8009_v6 = vsel %vm7933_vm2, %v8008_v26, -inf  ;;  %v7994_v53 = vsel %vm7933_vm2, %v7993_v50, -inf }
 0x509   :  { %7980 = vmax.xlane.f32.xlu1 %v7979_v55  ;;  %7950 = vmax.xlane.f32.xlu0 %v7949_v47 }
 0x50d   :  { %8010 = vmax.xlane.f32.xlu1 %v8009_v6  ;;  %7995 = vmax.xlane.f32.xlu0 %v7994_v53 }
 0x592   :  { %v7966_v54 = vpop.xlane.xlu1 %7965  ;;  %v7936_v58 = vpop.xlane.xlu0 %7935 }
 0x593   :  { %v7967_v1 = vsub.f32 %v7963_v41, %v7966_v54  ;;  %v7937_v3 = vsub.f32 %v7932_v0, %v7936_v58 }
 0x595   :  { %v7938_v7 = vmul.f32 1.442695, %v7937_v3  ;;  %v7968_v8 = vmul.f32 1.442695, %v7967_v1 }
 0x596   :  { %v7981_v9 = vpop.xlane.xlu1 %7980  ;;  %v7951_v28 = vpop.xlane.xlu0 %7950 }
 0x597   :  { %v7982_v20 = vsub.f32 %v7978_v44, %v7981_v9  ;;  %v7952_v10 = vsub.f32 %v7948_v15, %v7951_v28  ;;  %9531 = vpow2.f32 %v7938_v7 }
 0x598   :  { %9533 = vpow2.f32 %v7968_v8 }
 0x599   :  { %v7953_v38 = vmul.f32 1.442695, %v7952_v10  ;;  %v7983_v2 = vmul.f32 1.442695, %v7982_v20 }
 0x59a   :  { %v8011_v39 = vpop.xlane.xlu1 %8010  ;;  %v7996_v51 = vpop.xlane.xlu0 %7995 }
 0x59b   :  { %v8012_v27 = vsub.f32 %v8008_v26, %v8011_v39  ;;  %v7997_v52 = vsub.f32 %v7993_v50, %v7996_v51  ;;  %9535 = vpow2.f32 %v7953_v38 }
 0x59c   :  { %9537 = vpow2.f32 %v7983_v2 }
 0x59d   :  { %v7998_v11 = vmul.f32 1.442695, %v7997_v52  ;;  %v8013_v12 = vmul.f32 1.442695, %v8012_v27 }
 0x59f   :  { %9539 = vpow2.f32 %v7998_v11 }
 0x5a0   :  { %9541 = vpow2.f32 %v8013_v12 }
 0x5a1   :  { %v9532_v59 = vpop.eup %9531 }
 0x5a2   :  { %v7940_v13 = vsel %vm7933_vm2, %v9532_v59, 0.0  ;;  %v9534_v14 = vpop.eup %9533 }
 0x5a3   :  { %7941 = vadd.xlane.f32.xlu0 %v7940_v13  ;;  %v7970_v5 = vsel %vm7933_vm2, %v9534_v14, 0.0 }
 0x5a5   :  { %v9536_v17 = vpop.eup %9535 }
 0x5a6   :  { %v7955_v16 = vsel %vm7933_vm2, %v9536_v17, 0.0  ;;  %v9538_v46 = vpop.eup %9537 }
 0x5a7   :  { %7971 = vadd.xlane.f32.xlu0 %v7970_v5  ;;  %7956 = vadd.xlane.f32.xlu1 %v7955_v16  ;;  %v7985_v4 = vsel %vm7933_vm2, %v9538_v46, 0.0 }
 0x5a9   :  { %v9540_v34 = vpop.eup %9539 }
 0x5aa   :  { %v8000_v19 = vsel %vm7933_vm2, %v9540_v34, 0.0  ;;  %v9542_v40 = vpop.eup %9541 }
 0x5ab   :  { %7986 = vadd.xlane.f32.xlu1 %v7985_v4  ;;  %8001 = vadd.xlane.f32.xlu0 %v8000_v19  ;;  %v8015_v56 = vsel %vm7933_vm2, %v9542_v40, 0.0 }
 0x5af   :  { %8016 = vadd.xlane.f32.xlu1 %v8015_v56 }
 0x630   :  { %v7942_v21 = vpop.xlane.xlu0 %7941 }
 0x631   :  { %9543 = vrcp.f32 %v7942_v21 }
 0x634   :  { %v7957_v22 = vpop.xlane.xlu1 %7956  ;;  %v7972_v32 = vpop.xlane.xlu0 %7971 }
 0x635   :  { %9545 = vrcp.f32 %v7957_v22 }
 0x636   :  { %9547 = vrcp.f32 %v7972_v32 }
 0x638   :  { %v7987_v25 = vpop.xlane.xlu1 %7986  ;;  %v8002_v23 = vpop.xlane.xlu0 %8001 }
 0x639   :  { %9549 = vrcp.f32 %v7987_v25 }
 0x63a   :  { %9551 = vrcp.f32 %v8002_v23 }
 0x63b   :  { %v9544_v48 = vpop.eup %9543 }
 0x63c   :  { %v7944_v57 = vmul.f32 %v9544_v48, %v9532_v59  ;;  %v8017_v24 = vpop.xlane.xlu1 %8016 }
 0x63d   :  { %9553 = vrcp.f32 %v8017_v24 }
 0x63e   :  { %7945 = vst [vmem:[%s12975_s9] sm:$0x3] %v7944_v57 }
 0x63f   :  { %v9546_v29 = vpop.eup %9545 }
 0x640   :  { %v9548_v30 = vpop.eup %9547  ;;  %v7959_v35 = vmul.f32 %v9546_v29, %v9536_v17 }
 0x641   :  { %v7974_v60 = vmul.f32 %v9548_v30, %v9534_v14 }
 0x642   :  { %7960 = vst [vmem:[%s12975_s9 + $0x2] sm:$0x3] %v7959_v35 }
 0x643   :  { %v9550_v37 = vpop.eup %9549  ;;  %7975 = vst [vmem:[%s12975_s9 + $0x4] sm:$0x3] %v7974_v60 }
 0x644   :  { %v9552_v31 = vpop.eup %9551  ;;  %v7989_v61 = vmul.f32 %v9550_v37, %v9538_v46 }
 0x645   :  { %v8004_v62 = vmul.f32 %v9552_v31, %v9540_v34 }
 0x646   :  { %7990 = vst [vmem:[%s12975_s9 + $0x6] sm:$0x3] %v7989_v61 }
 0x647   :  { %v9554_v33 = vpop.eup %9553  ;;  %8005 = vst [vmem:[%s12975_s9 + $0x8] sm:$0x3] %v8004_v62 }
 0x648   :  { %v8019_v45 = vmul.f32 %v9554_v33, %v9542_v40 }
 0x64a   :  { %8020 = vst [vmem:[%s12975_s9 + $0xa] sm:$0x3] %v8019_v45 }

</bundles_post_ra>
